<compile_context>
chip_gen: v6e
topology: v6e:2x2x1
jax: 0.10.0
libtpu: 0.0.40
codegen_flags: <defaults>
</compile_context>

<pallas_src>
import jax
import jax.numpy as jnp
from jax import lax
from jax.experimental import pallas as pl
from jax.experimental.pallas import tpu as pltpu


# ---------------------------------------------------------------------------
# In-kernel helpers.
# ---------------------------------------------------------------------------
def _zero_halo(pad_ref):
    """Zero only the 1-pixel halo border of a (Hp, Wp2, C) pad scratch.

    The interior is fully overwritten every grid step, so the full-slab zero
    fill of the previous version is unnecessary; the border is re-zeroed each
    step so correctness does not depend on which TensorCore ran step 0."""
    Hp, Wp2, C = pad_ref.shape
    pad_ref[0:1, :, :] = jnp.zeros((1, Wp2, C), pad_ref.dtype)
    pad_ref[Hp - 1:Hp, :, :] = jnp.zeros((1, Wp2, C), pad_ref.dtype)
    pad_ref[:, 0:1, :] = jnp.zeros((Hp, 1, C), pad_ref.dtype)
    pad_ref[:, Wp2 - 1:Wp2, :] = jnp.zeros((Hp, 1, C), pad_ref.dtype)


def _conv3x3_pair(pad, wmat, scale, bias, Ho, Wp, Cin, Cout):
    """3x3 "SAME" conv + BN(scale, bias) + ReLU on a zero-padded slab held in
    the column-pair layout.

    pad   : (Ho+2, Wp+2, 2*Cin) bf16, zero halo.  Lane block [0:Cin] holds the
            even high-res column of a pair (2m), [Cin:2*Cin] the odd (2m+1);
            the pair index m is on the sublane axis.
    wmat  : (9*Cin, Cout) bf16, taps flattened (dy, dx, cin) row-major.
    scale : (1, Cout) f32  (gamma / sqrt(var+eps))
    bias  : (1, Cout) f32  (beta - mean*scale)
    Returns (y_even, y_odd), each (Ho*Wp, Cout) f32, ReLU(conv*scale + bias)."""
    lo = slice(0, Cin)            # even high-res column of a pair
    hi = slice(Cin, 2 * Cin)      # odd  high-res column of a pair
    cols_e, cols_o = [], []
    for dy in range(3):
        r = slice(dy, dy + Ho)
        # even output column 2m   <- high-res input columns {2m-1, 2m, 2m+1}
        cols_e += [pad[r, 0:Wp, hi], pad[r, 1:Wp + 1, lo], pad[r, 1:Wp + 1, hi]]
        # odd  output column 2m+1 <- high-res input columns {2m, 2m+1, 2m+2}
        cols_o += [pad[r, 1:Wp + 1, lo], pad[r, 1:Wp + 1, hi], pad[r, 2:Wp + 2, lo]]
    a_e = jnp.concatenate(cols_e, axis=-1).reshape(Ho * Wp, 9 * Cin)
    a_o = jnp.concatenate(cols_o, axis=-1).reshape(Ho * Wp, 9 * Cin)
    # Single merged contraction, M = 2*Ho*Wp (= 256 here) — one weight push,
    # one result drain, one epilogue.
    a = jnp.concatenate([a_e, a_o], axis=0)                      # (2*Ho*Wp, 9*Cin)
    acc = jnp.dot(a, wmat, preferred_element_type=jnp.float32)   # K = 9*Cin
    y = jnp.maximum(acc * scale + bias, 0.0)                     # f32 BN + ReLU
    return y[:Ho * Wp], y[Ho * Wp:]


# ---------------------------------------------------------------------------
# Fused DecoderBlock kernel: one grid step = one batch element.
# ---------------------------------------------------------------------------
def decoder_block_kernel(x_ref, skip_ref, w1_ref, s1_ref, b1_ref,
                         w2_ref, s2_ref, b2_ref, o_ref,
                         pad1_ref, pad2_ref):
    _, H, W, Cx = x_ref.shape              # low-res input
    _, Ho, Wp, C2s = skip_ref.shape        # Ho = 2H, Wp = W, C2s = 2*Cs (pair view)
    Cs = C2s // 2
    Cin1 = Cx + Cs
    Cout = s1_ref.shape[-1]

    # --- nearest-upsample x2 + skip concat, directly in the pair layout -----
    x = x_ref[0]                                              # (H, W, Cx) bf16
    # H duplication: leading-dim stack + merge (pure index remap).
    xh = jnp.concatenate([x[:, None], x[:, None]], axis=1).reshape(Ho, W, Cx)
    skip = skip_ref[0]                                        # (Ho, Wp, 2*Cs)
    # W duplication is just writing xh into both lane halves; per-column
    # channel order matches torch.cat([x_up, skip], dim=1).
    core1 = jnp.concatenate(
        [xh, skip[:, :, 0:Cs], xh, skip[:, :, Cs:C2s]], axis=-1)  # (Ho, Wp, 2*Cin1)

    # --- conv1: 1-pixel halo handled in a VMEM scratch (no HBM pad) ---------
    _zero_halo(pad1_ref)
    pad1_ref[1:Ho + 1, 1:Wp + 1, :] = core1
    y1e, y1o = _conv3x3_pair(pad1_ref[...], w1_ref[...], s1_ref[...], b1_ref[...],
                             Ho, Wp, Cin1, Cout)              # f32, (Ho*Wp, Cout) x2

    # --- conv2 on the VMEM-resident intermediate (never written to HBM) -----
    core2 = jnp.concatenate([y1e, y1o], axis=-1).reshape(Ho, Wp, 2 * Cout)
    _zero_halo(pad2_ref)
    pad2_ref[1:Ho + 1, 1:Wp + 1, :] = core2.astype(pad2_ref.dtype)
    y2e, y2o = _conv3x3_pair(pad2_ref[...], w2_ref[...], s2_ref[...], b2_ref[...],
                             Ho, Wp, Cout, Cout)

    # --- lane-dense bf16 store: interleave even/odd columns -> (Hs, Ws*Cout) --
    y2e3 = y2e.astype(o_ref.dtype).reshape(Ho, Wp, Cout)
    y2o3 = y2o.astype(o_ref.dtype).reshape(Ho, Wp, Cout)
    parts = []
    for m in range(Wp):                    # lane index = (2m+parity)*Cout + co
        parts.append(y2e3[:, m:m + 1, :])
        parts.append(y2o3[:, m:m + 1, :])
    dense = jnp.concatenate(parts, axis=-1)          # (Ho, 1, Wp*2*Cout)
    o_ref[...] = dense.reshape(1, Ho, Wp * 2 * Cout)  # unmasked 128-lane store


# ---------------------------------------------------------------------------
# Wrapper: NCHW interface, fused NHWC (pair-view) kernel inside.
# ---------------------------------------------------------------------------
def decoder_block_forward(x_nchw, skip_nchw, params):
    w1, s1, b1, w2, s2, b2 = params
    if skip_nchw is None:
        # TODO(synk): skip=None (skip_channels == 0) config is not wired to the
        # fused kernel; the DecoderBlock under test always receives a skip.
        raise NotImplementedError("skip=None not supported by the fused kernel")

    N, Cx, H, W = x_nchw.shape
    _, Cs, Hs, Ws = skip_nchw.shape          # Hs = 2H, Ws = 2W
    assert Hs == 2 * H and Ws == 2 * W, "skip spatial must be exactly 2x input"
    Wp = Ws // 2
    Cout = s1.shape[-1]

    # NCHW -> NHWC; bf16 cast fused into the transpose (halves input HBM bytes).
    # In an NHWC end-to-end model these transposes disappear.
    x = jnp.transpose(x_nchw, (0, 2, 3, 1)).astype(jnp.bfloat16)
    skip = jnp.transpose(skip_nchw, (0, 2, 3, 1)).astype(jnp.bfloat16)
    skip_pairs = skip.reshape(N, Hs, Wp, 2 * Cs)   # free column-pair view

    out_flat = pl.pallas_call(
        decoder_block_kernel,
        out_shape=jax.ShapeDtypeStruct((N, Hs, Ws * Cout), jnp.bfloat16),
        grid=(N,),
        in_specs=[
            pl.BlockSpec((1, H, W, Cx), lambda n: (n, 0, 0, 0)),
            pl.BlockSpec((1, Hs, Wp, 2 * Cs), lambda n: (n, 0, 0, 0)),
            pl.BlockSpec((9 * (Cx + Cs), Cout), lambda n: (0, 0)),
            pl.BlockSpec((1, Cout), lambda n: (0, 0)),
            pl.BlockSpec((1, Cout), lambda n: (0, 0)),
            pl.BlockSpec((9 * Cout, Cout), lambda n: (0, 0)),
            pl.BlockSpec((1, Cout), lambda n: (0, 0)),
            pl.BlockSpec((1, Cout), lambda n: (0, 0)),
        ],
        out_specs=pl.BlockSpec((1, Hs, Ws * Cout), lambda n: (n, 0, 0)),
        scratch_shapes=[
            pltpu.VMEM((Hs + 2, Wp + 2, 2 * (Cx + Cs)), jnp.bfloat16),
            pltpu.VMEM((Hs + 2, Wp + 2, 2 * Cout), jnp.bfloat16),
        ],
        compiler_params=pltpu.CompilerParams(
            dimension_semantics=("parallel",)),
    )(x, skip_pairs, w1, s1, b1, w2, s2, b2)

    out = out_flat.reshape(N, Hs, Ws, Cout)        # undo the pair flatten (free)
    # NCHW f32 only to match the torch module interface.
    return jnp.transpose(out, (0, 3, 1, 2)).astype(jnp.float32)


# ---------------------------------------------------------------------------
# Parameter construction (nn.Conv2d / nn.BatchNorm2d, eval mode).
# ---------------------------------------------------------------------------
def make_raw_conv_bn_params(key, cin, cout):
    kw, kg, kb, km, kv = jax.random.split(key, 5)
    return dict(
        w=jax.random.normal(kw, (cout, cin, 3, 3), jnp.float32) * 0.1,  # OIHW
        gamma=1.0 + 0.1 * jax.random.normal(kg, (cout,), jnp.float32),
        beta=0.1 * jax.random.normal(kb, (cout,), jnp.float32),
        mean=0.1 * jax.random.normal(km, (cout,), jnp.float32),
        var=jnp.abs(jax.random.normal(kv, (cout,), jnp.float32)) + 0.5,
    )


def prepare_decoder_params(p1, p2, eps=1e-5):
    """Conv weights as (9*Cin, Cout) bf16 matrices (taps flattened (dy,dx,cin));
    BatchNorm kept as f32 per-channel scale/bias epilogue (not folded into the
    bf16 weights — numerically safer)."""
    def prep(p):
        cout, cin = p["w"].shape[0], p["w"].shape[1]
        wmat = jnp.transpose(p["w"], (2, 3, 1, 0)).reshape(9 * cin, cout)
        scale = p["gamma"] * lax.rsqrt(p["var"] + eps)
        bias = p["beta"] - p["mean"] * scale
        return (wmat.astype(jnp.bfloat16),
                scale.reshape(1, cout).astype(jnp.float32),
                bias.reshape(1, cout).astype(jnp.float32))
    return prep(p1) + prep(p2)


# ---------------------------------------------------------------------------
# Pure-JAX reference (same mixed-precision policy: bf16 conv operands,
# f32 accumulation, f32 BN/ReLU) for validation.
# ---------------------------------------------------------------------------
def _ref_conv_bn_relu(x_nhwc, p, eps=1e-5):
    w_hwio = jnp.transpose(p["w"], (2, 3, 1, 0))
    y = lax.conv_general_dilated(
        x_nhwc.astype(jnp.bfloat16), w_hwio.astype(jnp.bfloat16),
        window_strides=(1, 1), padding="SAME",
        dimension_numbers=("NHWC", "HWIO", "NHWC"),
        preferred_element_type=jnp.float32)
    y = (y - p["mean"]) * (p["gamma"] * lax.rsqrt(p["var"] + eps)) + p["beta"]
    return jnp.maximum(y, 0.0)


def ref_decoder_block(x_nchw, skip_nchw, p1, p2):
    x = jnp.transpose(x_nchw, (0, 2, 3, 1))
    x = jnp.repeat(jnp.repeat(x, 2, axis=1), 2, axis=2)       # nearest x2
    if skip_nchw is not None:
        x = jnp.concatenate([x, jnp.transpose(skip_nchw, (0, 2, 3, 1))], axis=-1)
    x = _ref_conv_bn_relu(x, p1)
    x = _ref_conv_bn_relu(x, p2)
    return jnp.transpose(x, (0, 3, 1, 2))


if __name__ == "__main__":
    # batch=2, in_channels=4, skip_channels=4, out_channels=8; x is 8x8,
    # skip/output are 16x16 (skip spatial = 2x, as the module implies).
    N, CIN, CSKIP, COUT = 2, 4, 4, 8
    H, W = 8, 8

    key = jax.random.PRNGKey(0)
    kx, ks, k1, k2 = jax.random.split(key, 4)
    x = jax.random.normal(kx, (N, CIN, H, W), jnp.float32)
    skip = jax.random.normal(ks, (N, CSKIP, 2 * H, 2 * W), jnp.float32)

    p1 = make_raw_conv_bn_params(k1, CIN + CSKIP, COUT)
    p2 = make_raw_conv_bn_params(k2, COUT, COUT)
    params = prepare_decoder_params(p1, p2)

    out = jax.jit(decoder_block_forward)(x, skip, params)
    out = jax.block_until_ready(out)

    ref = ref_decoder_block(x, skip, p1, p2)
    assert out.shape == (N, COUT, 2 * H, 2 * W), out.shape
    max_diff = float(jnp.max(jnp.abs(out - ref)))
    # Tolerance covers bf16 operands + bf16 output rounding (f32 accumulation).
    assert jnp.allclose(out, ref, atol=5e-2, rtol=5e-2), (
        "mismatch vs reference, max|diff|=%e" % max_diff)

    print("KERNEL_OK")
</pallas_src>

<mosaic_0001>
module attributes {stable_mosaic.version = 11 : i64} {
  func.func @decoder_block_kernel(%arg0: i32, %arg1: memref<1x8x8x4xbf16, #tpu.memory_space<vmem>>, %arg2: memref<1x16x8x8xbf16, #tpu.memory_space<vmem>>, %arg3: memref<72x8xbf16, #tpu.memory_space<vmem>>, %arg4: memref<1x8xf32, #tpu.memory_space<vmem>>, %arg5: memref<1x8xf32, #tpu.memory_space<vmem>>, %arg6: memref<72x8xbf16, #tpu.memory_space<vmem>>, %arg7: memref<1x8xf32, #tpu.memory_space<vmem>>, %arg8: memref<1x8xf32, #tpu.memory_space<vmem>>, %arg9: memref<1x16x128xbf16, #tpu.memory_space<vmem>>, %arg10: memref<18x10x16xbf16, #tpu.memory_space<vmem>>, %arg11: memref<18x10x16xbf16, #tpu.memory_space<vmem>>) attributes {dimension_semantics = [#tpu.dimension_semantics<parallel>], iteration_bounds = array<i64: 2>, scalar_prefetch = 0 : i64, scratch_operands = 2 : i64, tpu.core_type = #tpu.core_type<tc>, window_params = [{transform_indices = @transform_0, window_bounds = array<i64: 1, 8, 8, 4>}, {transform_indices = @transform_1, window_bounds = array<i64: 1, 16, 8, 8>}, {pipeline_mode = #tpu.pipeline_mode<synchronous>, transform_indices = @transform_2, window_bounds = array<i64: 72, 8>}, {pipeline_mode = #tpu.pipeline_mode<synchronous>, transform_indices = @transform_3, window_bounds = array<i64: 1, 8>}, {pipeline_mode = #tpu.pipeline_mode<synchronous>, transform_indices = @transform_4, window_bounds = array<i64: 1, 8>}, {pipeline_mode = #tpu.pipeline_mode<synchronous>, transform_indices = @transform_5, window_bounds = array<i64: 72, 8>}, {pipeline_mode = #tpu.pipeline_mode<synchronous>, transform_indices = @transform_6, window_bounds = array<i64: 1, 8>}, {pipeline_mode = #tpu.pipeline_mode<synchronous>, transform_indices = @transform_7, window_bounds = array<i64: 1, 8>}, {transform_indices = @transform_8, window_bounds = array<i64: 1, 16, 128>}]} {
    %c0 = arith.constant 0 : index
    %c0_0 = arith.constant 0 : index
    %c0_1 = arith.constant 0 : index
    %c0_2 = arith.constant 0 : index
    %0 = vector.load %arg1[%c0, %c0_0, %c0_1, %c0_2] : memref<1x8x8x4xbf16, #tpu.memory_space<vmem>>, vector<1x8x8x4xbf16>
    %1 = vector.shape_cast %0 : vector<1x8x8x4xbf16> to vector<8x8x4xbf16>
    %2 = vector.shape_cast %1 : vector<8x8x4xbf16> to vector<8x1x8x4xbf16>
    %3 = vector.shape_cast %1 : vector<8x8x4xbf16> to vector<8x1x8x4xbf16>
    %4 = tpu.concatenate %2, %3 in 1 : vector<8x1x8x4xbf16>, vector<8x1x8x4xbf16> -> vector<8x2x8x4xbf16>
    %5 = vector.shape_cast %4 : vector<8x2x8x4xbf16> to vector<16x8x4xbf16>
    %c0_3 = arith.constant 0 : index
    %c0_4 = arith.constant 0 : index
    %c0_5 = arith.constant 0 : index
    %c0_6 = arith.constant 0 : index
    %6 = vector.load %arg2[%c0_3, %c0_4, %c0_5, %c0_6] : memref<1x16x8x8xbf16, #tpu.memory_space<vmem>>, vector<1x16x8x8xbf16>
    %7 = vector.shape_cast %6 : vector<1x16x8x8xbf16> to vector<16x8x8xbf16>
    %8 = vector.extract_strided_slice %7 {offsets = [0, 0, 0], sizes = [16, 8, 4], strides = [1, 1, 1]} : vector<16x8x8xbf16> to vector<16x8x4xbf16>
    %9 = vector.extract_strided_slice %7 {offsets = [0, 0, 4], sizes = [16, 8, 4], strides = [1, 1, 1]} : vector<16x8x8xbf16> to vector<16x8x4xbf16>
    %10 = tpu.concatenate %5, %8, %5, %9 in 2 : vector<16x8x4xbf16>, vector<16x8x4xbf16>, vector<16x8x4xbf16>, vector<16x8x4xbf16> -> vector<16x8x16xbf16>
    %cst = arith.constant 0.000000e+00 : bf16
    %11 = vector.broadcast %cst : bf16 to vector<1x10x16xbf16>
    %c0_7 = arith.constant 0 : index
    %c0_8 = arith.constant 0 : index
    %c0_9 = arith.constant 0 : index
    %12 = vector.load %arg10[%c0_7, %c0_8, %c0_9] : memref<18x10x16xbf16, #tpu.memory_space<vmem>>, vector<1x10x16xbf16>
    tpu.vector_store %arg10[%c0_7, %c0_8, %c0_9], %11 {strides = array<i32>} : memref<18x10x16xbf16, #tpu.memory_space<vmem>>, vector<1x10x16xbf16>,
    %cst_10 = arith.constant 0.000000e+00 : bf16
    %13 = vector.broadcast %cst_10 : bf16 to vector<1x10x16xbf16>
    %c17 = arith.constant 17 : index
    %c0_11 = arith.constant 0 : index
    %c0_12 = arith.constant 0 : index
    %14 = vector.load %arg10[%c17, %c0_11, %c0_12] : memref<18x10x16xbf16, #tpu.memory_space<vmem>>, vector<1x10x16xbf16>
    tpu.vector_store %arg10[%c17, %c0_11, %c0_12], %13 {strides = array<i32>} : memref<18x10x16xbf16, #tpu.memory_space<vmem>>, vector<1x10x16xbf16>,
    %cst_13 = arith.constant 0.000000e+00 : bf16
    %15 = vector.broadcast %cst_13 : bf16 to vector<18x1x16xbf16>
    %c0_14 = arith.constant 0 : index
    %c0_15 = arith.constant 0 : index
    %c0_16 = arith.constant 0 : index
    %16 = vector.load %arg10[%c0_14, %c0_15, %c0_16] : memref<18x10x16xbf16, #tpu.memory_space<vmem>>, vector<18x1x16xbf16>
    tpu.vector_store %arg10[%c0_14, %c0_15, %c0_16], %15 {strides = array<i32>} : memref<18x10x16xbf16, #tpu.memory_space<vmem>>, vector<18x1x16xbf16>,
    %cst_17 = arith.constant 0.000000e+00 : bf16
    %17 = vector.broadcast %cst_17 : bf16 to vector<18x1x16xbf16>
    %c0_18 = arith.constant 0 : index
    %c9 = arith.constant 9 : index
    %c0_19 = arith.constant 0 : index
    %18 = vector.load %arg10[%c0_18, %c9, %c0_19] : memref<18x10x16xbf16, #tpu.memory_space<vmem>>, vector<18x1x16xbf16>
    tpu.vector_store %arg10[%c0_18, %c9, %c0_19], %17 {strides = array<i32>} : memref<18x10x16xbf16, #tpu.memory_space<vmem>>, vector<18x1x16xbf16>,
    %c1 = arith.constant 1 : index
    %c1_20 = arith.constant 1 : index
    %c0_21 = arith.constant 0 : index
    %19 = vector.load %arg10[%c1, %c1_20, %c0_21] : memref<18x10x16xbf16, #tpu.memory_space<vmem>>, vector<16x8x16xbf16>
    tpu.vector_store %arg10[%c1, %c1_20, %c0_21], %10 {strides = array<i32>} : memref<18x10x16xbf16, #tpu.memory_space<vmem>>, vector<16x8x16xbf16>,
    %c0_22 = arith.constant 0 : index
    %c0_23 = arith.constant 0 : index
    %c0_24 = arith.constant 0 : index
    %20 = vector.load %arg10[%c0_22, %c0_23, %c0_24] : memref<18x10x16xbf16, #tpu.memory_space<vmem>>, vector<18x10x16xbf16>
    %c0_25 = arith.constant 0 : index
    %c0_26 = arith.constant 0 : index
    %21 = vector.load %arg3[%c0_25, %c0_26] : memref<72x8xbf16, #tpu.memory_space<vmem>>, vector<72x8xbf16>
    %c0_27 = arith.constant 0 : index
    %c0_28 = arith.constant 0 : index
    %22 = vector.load %arg4[%c0_27, %c0_28] : memref<1x8xf32, #tpu.memory_space<vmem>>, vector<1x8xf32>
    %c0_29 = arith.constant 0 : index
    %c0_30 = arith.constant 0 : index
    %23 = vector.load %arg5[%c0_29, %c0_30] : memref<1x8xf32, #tpu.memory_space<vmem>>, vector<1x8xf32>
    %24 = vector.extract_strided_slice %20 {offsets = [0, 0, 8], sizes = [16, 8, 8], strides = [1, 1, 1]} : vector<18x10x16xbf16> to vector<16x8x8xbf16>
    %25 = vector.extract_strided_slice %20 {offsets = [0, 1, 0], sizes = [16, 8, 8], strides = [1, 1, 1]} : vector<18x10x16xbf16> to vector<16x8x8xbf16>
    %26 = vector.extract_strided_slice %20 {offsets = [0, 1, 8], sizes = [16, 8, 8], strides = [1, 1, 1]} : vector<18x10x16xbf16> to vector<16x8x8xbf16>
    %27 = vector.extract_strided_slice %20 {offsets = [0, 1, 0], sizes = [16, 8, 8], strides = [1, 1, 1]} : vector<18x10x16xbf16> to vector<16x8x8xbf16>
    %28 = vector.extract_strided_slice %20 {offsets = [0, 1, 8], sizes = [16, 8, 8], strides = [1, 1, 1]} : vector<18x10x16xbf16> to vector<16x8x8xbf16>
    %29 = vector.extract_strided_slice %20 {offsets = [0, 2, 0], sizes = [16, 8, 8], strides = [1, 1, 1]} : vector<18x10x16xbf16> to vector<16x8x8xbf16>
    %30 = vector.extract_strided_slice %20 {offsets = [1, 0, 8], sizes = [16, 8, 8], strides = [1, 1, 1]} : vector<18x10x16xbf16> to vector<16x8x8xbf16>
    %31 = vector.extract_strided_slice %20 {offsets = [1, 1, 0], sizes = [16, 8, 8], strides = [1, 1, 1]} : vector<18x10x16xbf16> to vector<16x8x8xbf16>
    %32 = vector.extract_strided_slice %20 {offsets = [1, 1, 8], sizes = [16, 8, 8], strides = [1, 1, 1]} : vector<18x10x16xbf16> to vector<16x8x8xbf16>
    %33 = vector.extract_strided_slice %20 {offsets = [1, 1, 0], sizes = [16, 8, 8], strides = [1, 1, 1]} : vector<18x10x16xbf16> to vector<16x8x8xbf16>
    %34 = vector.extract_strided_slice %20 {offsets = [1, 1, 8], sizes = [16, 8, 8], strides = [1, 1, 1]} : vector<18x10x16xbf16> to vector<16x8x8xbf16>
    %35 = vector.extract_strided_slice %20 {offsets = [1, 2, 0], sizes = [16, 8, 8], strides = [1, 1, 1]} : vector<18x10x16xbf16> to vector<16x8x8xbf16>
    %36 = vector.extract_strided_slice %20 {offsets = [2, 0, 8], sizes = [16, 8, 8], strides = [1, 1, 1]} : vector<18x10x16xbf16> to vector<16x8x8xbf16>
    %37 = vector.extract_strided_slice %20 {offsets = [2, 1, 0], sizes = [16, 8, 8], strides = [1, 1, 1]} : vector<18x10x16xbf16> to vector<16x8x8xbf16>
    %38 = vector.extract_strided_slice %20 {offsets = [2, 1, 8], sizes = [16, 8, 8], strides = [1, 1, 1]} : vector<18x10x16xbf16> to vector<16x8x8xbf16>
    %39 = vector.extract_strided_slice %20 {offsets = [2, 1, 0], sizes = [16, 8, 8], strides = [1, 1, 1]} : vector<18x10x16xbf16> to vector<16x8x8xbf16>
    %40 = vector.extract_strided_slice %20 {offsets = [2, 1, 8], sizes = [16, 8, 8], strides = [1, 1, 1]} : vector<18x10x16xbf16> to vector<16x8x8xbf16>
    %41 = vector.extract_strided_slice %20 {offsets = [2, 2, 0], sizes = [16, 8, 8], strides = [1, 1, 1]} : vector<18x10x16xbf16> to vector<16x8x8xbf16>
    %42 = tpu.concatenate %24, %25, %26, %30, %31, %32, %36, %37, %38 in 2 : vector<16x8x8xbf16>, vector<16x8x8xbf16>, vector<16x8x8xbf16>, vector<16x8x8xbf16>, vector<16x8x8xbf16>, vector<16x8x8xbf16>, vector<16x8x8xbf16>, vector<16x8x8xbf16>, vector<16x8x8xbf16> -> vector<16x8x72xbf16>
    %43 = vector.shape_cast %42 : vector<16x8x72xbf16> to vector<128x72xbf16>
    %44 = tpu.concatenate %27, %28, %29, %33, %34, %35, %39, %40, %41 in 2 : vector<16x8x8xbf16>, vector<16x8x8xbf16>, vector<16x8x8xbf16>, vector<16x8x8xbf16>, vector<16x8x8xbf16>, vector<16x8x8xbf16>, vector<16x8x8xbf16>, vector<16x8x8xbf16>, vector<16x8x8xbf16> -> vector<16x8x72xbf16>
    %45 = vector.shape_cast %44 : vector<16x8x72xbf16> to vector<128x72xbf16>
    %46 = tpu.concatenate %43, %45 in 0 : vector<128x72xbf16>, vector<128x72xbf16> -> vector<256x72xbf16>
    %cst_31 = arith.constant dense<0.000000e+00> : vector<256x8xf32>
    %47 = tpu.matmul %46, %21, %cst_31 {dimension_numbers = #tpu.dot_dimension_numbers<[1], [0], [0], [1], [0, 0, 1, 1], [], []>} : vector<256x72xbf16>, vector<72x8xbf16>, vector<256x8xf32> -> vector<256x8xf32>
    %48 = vector.broadcast %22 : vector<1x8xf32> to vector<256x8xf32>
    %49 = arith.mulf %47, %48 : vector<256x8xf32>
    %50 = vector.broadcast %23 : vector<1x8xf32> to vector<256x8xf32>
    %51 = arith.addf %49, %50 : vector<256x8xf32>
    %cst_32 = arith.constant 0.000000e+00 : f32
    %52 = vector.broadcast %cst_32 : f32 to vector<256x8xf32>
    %53 = arith.maximumf %51, %52 : vector<256x8xf32>
    %54 = vector.extract_strided_slice %53 {offsets = [0, 0], sizes = [128, 8], strides = [1, 1]} : vector<256x8xf32> to vector<128x8xf32>
    %55 = vector.extract_strided_slice %53 {offsets = [128, 0], sizes = [128, 8], strides = [1, 1]} : vector<256x8xf32> to vector<128x8xf32>
    %56 = tpu.concatenate %54, %55 in 1 : vector<128x8xf32>, vector<128x8xf32> -> vector<128x16xf32>
    %57 = vector.shape_cast %56 : vector<128x16xf32> to vector<16x8x16xf32>
    %cst_33 = arith.constant 0.000000e+00 : bf16
    %58 = vector.broadcast %cst_33 : bf16 to vector<1x10x16xbf16>
    %c0_34 = arith.constant 0 : index
    %c0_35 = arith.constant 0 : index
    %c0_36 = arith.constant 0 : index
    %59 = vector.load %arg11[%c0_34, %c0_35, %c0_36] : memref<18x10x16xbf16, #tpu.memory_space<vmem>>, vector<1x10x16xbf16>
    tpu.vector_store %arg11[%c0_34, %c0_35, %c0_36], %58 {strides = array<i32>} : memref<18x10x16xbf16, #tpu.memory_space<vmem>>, vector<1x10x16xbf16>,
    %cst_37 = arith.constant 0.000000e+00 : bf16
    %60 = vector.broadcast %cst_37 : bf16 to vector<1x10x16xbf16>
    %c17_38 = arith.constant 17 : index
    %c0_39 = arith.constant 0 : index
    %c0_40 = arith.constant 0 : index
    %61 = vector.load %arg11[%c17_38, %c0_39, %c0_40] : memref<18x10x16xbf16, #tpu.memory_space<vmem>>, vector<1x10x16xbf16>
    tpu.vector_store %arg11[%c17_38, %c0_39, %c0_40], %60 {strides = array<i32>} : memref<18x10x16xbf16, #tpu.memory_space<vmem>>, vector<1x10x16xbf16>,
    %cst_41 = arith.constant 0.000000e+00 : bf16
    %62 = vector.broadcast %cst_41 : bf16 to vector<18x1x16xbf16>
    %c0_42 = arith.constant 0 : index
    %c0_43 = arith.constant 0 : index
    %c0_44 = arith.constant 0 : index
    %63 = vector.load %arg11[%c0_42, %c0_43, %c0_44] : memref<18x10x16xbf16, #tpu.memory_space<vmem>>, vector<18x1x16xbf16>
    tpu.vector_store %arg11[%c0_42, %c0_43, %c0_44], %62 {strides = array<i32>} : memref<18x10x16xbf16, #tpu.memory_space<vmem>>, vector<18x1x16xbf16>,
    %cst_45 = arith.constant 0.000000e+00 : bf16
    %64 = vector.broadcast %cst_45 : bf16 to vector<18x1x16xbf16>
    %c0_46 = arith.constant 0 : index
    %c9_47 = arith.constant 9 : index
    %c0_48 = arith.constant 0 : index
    %65 = vector.load %arg11[%c0_46, %c9_47, %c0_48] : memref<18x10x16xbf16, #tpu.memory_space<vmem>>, vector<18x1x16xbf16>
    tpu.vector_store %arg11[%c0_46, %c9_47, %c0_48], %64 {strides = array<i32>} : memref<18x10x16xbf16, #tpu.memory_space<vmem>>, vector<18x1x16xbf16>,
    %66 = arith.truncf %57 : vector<16x8x16xf32> to vector<16x8x16xbf16>
    %c1_49 = arith.constant 1 : index
    %c1_50 = arith.constant 1 : index
    %c0_51 = arith.constant 0 : index
    %67 = vector.load %arg11[%c1_49, %c1_50, %c0_51] : memref<18x10x16xbf16, #tpu.memory_space<vmem>>, vector<16x8x16xbf16>
    tpu.vector_store %arg11[%c1_49, %c1_50, %c0_51], %66 {strides = array<i32>} : memref<18x10x16xbf16, #tpu.memory_space<vmem>>, vector<16x8x16xbf16>,
    %c0_52 = arith.constant 0 : index
    %c0_53 = arith.constant 0 : index
    %c0_54 = arith.constant 0 : index
    %68 = vector.load %arg11[%c0_52, %c0_53, %c0_54] : memref<18x10x16xbf16, #tpu.memory_space<vmem>>, vector<18x10x16xbf16>
    %c0_55 = arith.constant 0 : index
    %c0_56 = arith.constant 0 : index
    %69 = vector.load %arg6[%c0_55, %c0_56] : memref<72x8xbf16, #tpu.memory_space<vmem>>, vector<72x8xbf16>
    %c0_57 = arith.constant 0 : index
    %c0_58 = arith.constant 0 : index
    %70 = vector.load %arg7[%c0_57, %c0_58] : memref<1x8xf32, #tpu.memory_space<vmem>>, vector<1x8xf32>
    %c0_59 = arith.constant 0 : index
    %c0_60 = arith.constant 0 : index
    %71 = vector.load %arg8[%c0_59, %c0_60] : memref<1x8xf32, #tpu.memory_space<vmem>>, vector<1x8xf32>
    %72 = vector.extract_strided_slice %68 {offsets = [0, 0, 8], sizes = [16, 8, 8], strides = [1, 1, 1]} : vector<18x10x16xbf16> to vector<16x8x8xbf16>
    %73 = vector.extract_strided_slice %68 {offsets = [0, 1, 0], sizes = [16, 8, 8], strides = [1, 1, 1]} : vector<18x10x16xbf16> to vector<16x8x8xbf16>
    %74 = vector.extract_strided_slice %68 {offsets = [0, 1, 8], sizes = [16, 8, 8], strides = [1, 1, 1]} : vector<18x10x16xbf16> to vector<16x8x8xbf16>
    %75 = vector.extract_strided_slice %68 {offsets = [0, 1, 0], sizes = [16, 8, 8], strides = [1, 1, 1]} : vector<18x10x16xbf16> to vector<16x8x8xbf16>
    %76 = vector.extract_strided_slice %68 {offsets = [0, 1, 8], sizes = [16, 8, 8], strides = [1, 1, 1]} : vector<18x10x16xbf16> to vector<16x8x8xbf16>
    %77 = vector.extract_strided_slice %68 {offsets = [0, 2, 0], sizes = [16, 8, 8], strides = [1, 1, 1]} : vector<18x10x16xbf16> to vector<16x8x8xbf16>
    %78 = vector.extract_strided_slice %68 {offsets = [1, 0, 8], sizes = [16, 8, 8], strides = [1, 1, 1]} : vector<18x10x16xbf16> to vector<16x8x8xbf16>
    %79 = vector.extract_strided_slice %68 {offsets = [1, 1, 0], sizes = [16, 8, 8], strides = [1, 1, 1]} : vector<18x10x16xbf16> to vector<16x8x8xbf16>
    %80 = vector.extract_strided_slice %68 {offsets = [1, 1, 8], sizes = [16, 8, 8], strides = [1, 1, 1]} : vector<18x10x16xbf16> to vector<16x8x8xbf16>
    %81 = vector.extract_strided_slice %68 {offsets = [1, 1, 0], sizes = [16, 8, 8], strides = [1, 1, 1]} : vector<18x10x16xbf16> to vector<16x8x8xbf16>
    %82 = vector.extract_strided_slice %68 {offsets = [1, 1, 8], sizes = [16, 8, 8], strides = [1, 1, 1]} : vector<18x10x16xbf16> to vector<16x8x8xbf16>
    %83 = vector.extract_strided_slice %68 {offsets = [1, 2, 0], sizes = [16, 8, 8], strides = [1, 1, 1]} : vector<18x10x16xbf16> to vector<16x8x8xbf16>
    %84 = vector.extract_strided_slice %68 {offsets = [2, 0, 8], sizes = [16, 8, 8], strides = [1, 1, 1]} : vector<18x10x16xbf16> to vector<16x8x8xbf16>
    %85 = vector.extract_strided_slice %68 {offsets = [2, 1, 0], sizes = [16, 8, 8], strides = [1, 1, 1]} : vector<18x10x16xbf16> to vector<16x8x8xbf16>
    %86 = vector.extract_strided_slice %68 {offsets = [2, 1, 8], sizes = [16, 8, 8], strides = [1, 1, 1]} : vector<18x10x16xbf16> to vector<16x8x8xbf16>
    %87 = vector.extract_strided_slice %68 {offsets = [2, 1, 0], sizes = [16, 8, 8], strides = [1, 1, 1]} : vector<18x10x16xbf16> to vector<16x8x8xbf16>
    %88 = vector.extract_strided_slice %68 {offsets = [2, 1, 8], sizes = [16, 8, 8], strides = [1, 1, 1]} : vector<18x10x16xbf16> to vector<16x8x8xbf16>
    %89 = vector.extract_strided_slice %68 {offsets = [2, 2, 0], sizes = [16, 8, 8], strides = [1, 1, 1]} : vector<18x10x16xbf16> to vector<16x8x8xbf16>
    %90 = tpu.concatenate %72, %73, %74, %78, %79, %80, %84, %85, %86 in 2 : vector<16x8x8xbf16>, vector<16x8x8xbf16>, vector<16x8x8xbf16>, vector<16x8x8xbf16>, vector<16x8x8xbf16>, vector<16x8x8xbf16>, vector<16x8x8xbf16>, vector<16x8x8xbf16>, vector<16x8x8xbf16> -> vector<16x8x72xbf16>
    %91 = vector.shape_cast %90 : vector<16x8x72xbf16> to vector<128x72xbf16>
    %92 = tpu.concatenate %75, %76, %77, %81, %82, %83, %87, %88, %89 in 2 : vector<16x8x8xbf16>, vector<16x8x8xbf16>, vector<16x8x8xbf16>, vector<16x8x8xbf16>, vector<16x8x8xbf16>, vector<16x8x8xbf16>, vector<16x8x8xbf16>, vector<16x8x8xbf16>, vector<16x8x8xbf16> -> vector<16x8x72xbf16>
    %93 = vector.shape_cast %92 : vector<16x8x72xbf16> to vector<128x72xbf16>
    %94 = tpu.concatenate %91, %93 in 0 : vector<128x72xbf16>, vector<128x72xbf16> -> vector<256x72xbf16>
    %cst_61 = arith.constant dense<0.000000e+00> : vector<256x8xf32>
    %95 = tpu.matmul %94, %69, %cst_61 {dimension_numbers = #tpu.dot_dimension_numbers<[1], [0], [0], [1], [0, 0, 1, 1], [], []>} : vector<256x72xbf16>, vector<72x8xbf16>, vector<256x8xf32> -> vector<256x8xf32>
    %96 = vector.broadcast %70 : vector<1x8xf32> to vector<256x8xf32>
    %97 = arith.mulf %95, %96 : vector<256x8xf32>
    %98 = vector.broadcast %71 : vector<1x8xf32> to vector<256x8xf32>
    %99 = arith.addf %97, %98 : vector<256x8xf32>
    %cst_62 = arith.constant 0.000000e+00 : f32
    %100 = vector.broadcast %cst_62 : f32 to vector<256x8xf32>
    %101 = arith.maximumf %99, %100 : vector<256x8xf32>
    %102 = vector.extract_strided_slice %101 {offsets = [0, 0], sizes = [128, 8], strides = [1, 1]} : vector<256x8xf32> to vector<128x8xf32>
    %103 = vector.extract_strided_slice %101 {offsets = [128, 0], sizes = [128, 8], strides = [1, 1]} : vector<256x8xf32> to vector<128x8xf32>
    %104 = arith.truncf %102 : vector<128x8xf32> to vector<128x8xbf16>
    %105 = vector.shape_cast %104 : vector<128x8xbf16> to vector<16x8x8xbf16>
    %106 = arith.truncf %103 : vector<128x8xf32> to vector<128x8xbf16>
    %107 = vector.shape_cast %106 : vector<128x8xbf16> to vector<16x8x8xbf16>
    %108 = vector.extract_strided_slice %105 {offsets = [0, 0, 0], sizes = [16, 1, 8], strides = [1, 1, 1]} : vector<16x8x8xbf16> to vector<16x1x8xbf16>
    %109 = vector.extract_strided_slice %107 {offsets = [0, 0, 0], sizes = [16, 1, 8], strides = [1, 1, 1]} : vector<16x8x8xbf16> to vector<16x1x8xbf16>
    %110 = vector.extract_strided_slice %105 {offsets = [0, 1, 0], sizes = [16, 1, 8], strides = [1, 1, 1]} : vector<16x8x8xbf16> to vector<16x1x8xbf16>
    %111 = vector.extract_strided_slice %107 {offsets = [0, 1, 0], sizes = [16, 1, 8], strides = [1, 1, 1]} : vector<16x8x8xbf16> to vector<16x1x8xbf16>
    %112 = vector.extract_strided_slice %105 {offsets = [0, 2, 0], sizes = [16, 1, 8], strides = [1, 1, 1]} : vector<16x8x8xbf16> to vector<16x1x8xbf16>
    %113 = vector.extract_strided_slice %107 {offsets = [0, 2, 0], sizes = [16, 1, 8], strides = [1, 1, 1]} : vector<16x8x8xbf16> to vector<16x1x8xbf16>
    %114 = vector.extract_strided_slice %105 {offsets = [0, 3, 0], sizes = [16, 1, 8], strides = [1, 1, 1]} : vector<16x8x8xbf16> to vector<16x1x8xbf16>
    %115 = vector.extract_strided_slice %107 {offsets = [0, 3, 0], sizes = [16, 1, 8], strides = [1, 1, 1]} : vector<16x8x8xbf16> to vector<16x1x8xbf16>
    %116 = vector.extract_strided_slice %105 {offsets = [0, 4, 0], sizes = [16, 1, 8], strides = [1, 1, 1]} : vector<16x8x8xbf16> to vector<16x1x8xbf16>
    %117 = vector.extract_strided_slice %107 {offsets = [0, 4, 0], sizes = [16, 1, 8], strides = [1, 1, 1]} : vector<16x8x8xbf16> to vector<16x1x8xbf16>
    %118 = vector.extract_strided_slice %105 {offsets = [0, 5, 0], sizes = [16, 1, 8], strides = [1, 1, 1]} : vector<16x8x8xbf16> to vector<16x1x8xbf16>
    %119 = vector.extract_strided_slice %107 {offsets = [0, 5, 0], sizes = [16, 1, 8], strides = [1, 1, 1]} : vector<16x8x8xbf16> to vector<16x1x8xbf16>
    %120 = vector.extract_strided_slice %105 {offsets = [0, 6, 0], sizes = [16, 1, 8], strides = [1, 1, 1]} : vector<16x8x8xbf16> to vector<16x1x8xbf16>
    %121 = vector.extract_strided_slice %107 {offsets = [0, 6, 0], sizes = [16, 1, 8], strides = [1, 1, 1]} : vector<16x8x8xbf16> to vector<16x1x8xbf16>
    %122 = vector.extract_strided_slice %105 {offsets = [0, 7, 0], sizes = [16, 1, 8], strides = [1, 1, 1]} : vector<16x8x8xbf16> to vector<16x1x8xbf16>
    %123 = vector.extract_strided_slice %107 {offsets = [0, 7, 0], sizes = [16, 1, 8], strides = [1, 1, 1]} : vector<16x8x8xbf16> to vector<16x1x8xbf16>
    %124 = tpu.concatenate %108, %109, %110, %111, %112, %113, %114, %115, %116, %117, %118, %119, %120, %121, %122, %123 in 2 : vector<16x1x8xbf16>, vector<16x1x8xbf16>, vector<16x1x8xbf16>, vector<16x1x8xbf16>, vector<16x1x8xbf16>, vector<16x1x8xbf16>, vector<16x1x8xbf16>, vector<16x1x8xbf16>, vector<16x1x8xbf16>, vector<16x1x8xbf16>, vector<16x1x8xbf16>, vector<16x1x8xbf16>, vector<16x1x8xbf16>, vector<16x1x8xbf16>, vector<16x1x8xbf16>, vector<16x1x8xbf16> -> vector<16x1x128xbf16>
    %125 = vector.shape_cast %124 : vector<16x1x128xbf16> to vector<1x16x128xbf16>
    %c0_63 = arith.constant 0 : index
    %c0_64 = arith.constant 0 : index
    %c0_65 = arith.constant 0 : index
    %126 = vector.load %arg9[%c0_63, %c0_64, %c0_65] : memref<1x16x128xbf16, #tpu.memory_space<vmem>>, vector<1x16x128xbf16>
    tpu.vector_store %arg9[%c0_63, %c0_64, %c0_65], %125 {strides = array<i32>} : memref<1x16x128xbf16, #tpu.memory_space<vmem>>, vector<1x16x128xbf16>,
    return
  }
  func.func @transform_0(%arg0: i32) -> (i32, i32, i32, i32) {
    %c0_i32 = arith.constant 0 : i32
    %c0_i32_0 = arith.constant 0 : i32
    %c0_i32_1 = arith.constant 0 : i32
    %c0_i32_2 = arith.constant 0 : i32
    return %arg0, %c0_i32, %c0_i32_0, %c0_i32_1 : i32, i32, i32, i32
  }
  func.func @transform_1(%arg0: i32) -> (i32, i32, i32, i32) {
    %c0_i32 = arith.constant 0 : i32
    %c0_i32_0 = arith.constant 0 : i32
    %c0_i32_1 = arith.constant 0 : i32
    %c0_i32_2 = arith.constant 0 : i32
    return %arg0, %c0_i32, %c0_i32_0, %c0_i32_1 : i32, i32, i32, i32
  }
  func.func @transform_2(%arg0: i32) -> (i32, i32) {
    %c0_i32 = arith.constant 0 : i32
    %c0_i32_0 = arith.constant 0 : i32
    %c0_i32_1 = arith.constant 0 : i32
    return %c0_i32, %c0_i32_0 : i32, i32
  }
  func.func @transform_3(%arg0: i32) -> (i32, i32) {
    %c0_i32 = arith.constant 0 : i32
    %c0_i32_0 = arith.constant 0 : i32
    %c0_i32_1 = arith.constant 0 : i32
    return %c0_i32, %c0_i32_0 : i32, i32
  }
  func.func @transform_4(%arg0: i32) -> (i32, i32) {
    %c0_i32 = arith.constant 0 : i32
    %c0_i32_0 = arith.constant 0 : i32
    %c0_i32_1 = arith.constant 0 : i32
    return %c0_i32, %c0_i32_0 : i32, i32
  }
  func.func @transform_5(%arg0: i32) -> (i32, i32) {
    %c0_i32 = arith.constant 0 : i32
    %c0_i32_0 = arith.constant 0 : i32
    %c0_i32_1 = arith.constant 0 : i32
    return %c0_i32, %c0_i32_0 : i32, i32
  }
  func.func @transform_6(%arg0: i32) -> (i32, i32) {
    %c0_i32 = arith.constant 0 : i32
    %c0_i32_0 = arith.constant 0 : i32
    %c0_i32_1 = arith.constant 0 : i32
    return %c0_i32, %c0_i32_0 : i32, i32
  }
  func.func @transform_7(%arg0: i32) -> (i32, i32) {
    %c0_i32 = arith.constant 0 : i32
    %c0_i32_0 = arith.constant 0 : i32
    %c0_i32_1 = arith.constant 0 : i32
    return %c0_i32, %c0_i32_0 : i32, i32
  }
  func.func @transform_8(%arg0: i32) -> (i32, i32, i32) {
    %c0_i32 = arith.constant 0 : i32
    %c0_i32_0 = arith.constant 0 : i32
    %c0_i32_1 = arith.constant 0 : i32
    return %arg0, %c0_i32, %c0_i32_0 : i32, i32, i32
  }
}

</mosaic_0001>

<bundles_post_ra>
// kernel: decoder_block_forward.1
= control target key start
LH: loop header
LB: loop body
LE: loop exit
PB: predicated region body
PF: predicated region fallthrough
CT: control target
= control target key end

     0   :  { %s7358_s27 = smov 0   ;;  %s12340_s0 = inlined_call_operand.vmem [shape: bf16[2,8,8,4], index: 0, kind: input, shape index: {}]   ;;  %s12341_s1 = inlined_call_operand.vmem [shape: bf16[2,16,8,8], index: 1, kind: input, shape index: {}]   ;;  %s12342_s2 = inlined_call_operand.vmem [shape: bf16[72,8], index: 2, kind: input, shape index: {}]   ;;  %s12343_s3 = inlined_call_operand.vmem [shape: f32[1,8], index: 3, kind: input, shape index: {}]   ;;  %s12344_s4 = inlined_call_operand.vmem [shape: f32[1,8], index: 4, kind: input, shape index: {}]   ;;  %s12345_s5 = inlined_call_operand.vmem [shape: bf16[72,8], index: 5, kind: input, shape index: {}]   ;;  %s12346_s6 = inlined_call_operand.vmem [shape: f32[1,8], index: 6, kind: input, shape index: {}]   ;;  %s12347_s7 = inlined_call_operand.vmem [shape: f32[1,8], index: 7, kind: input, shape index: {}]   ;;  %s12348_s8 = inlined_call_operand.vmem [shape: bf16[2,16,128], index: 8, kind: output, shape index: {}]  }
   0x1 LB: > { %s6605_s28 = sadd.s32 4294967295, %s7294_s27   ;;  %p6609_p0 = scmp.ge.s32.totalorder %s7294_s27, 1  ;;  %s7294_s27 = sphi %s7358_s27, %s18_s27  }
   0x2   : > { %p272_p1 = scmp.lt.s32.totalorder %s7294_s27, 3 }
   0x4   : > { %p273_p2 = pnand %p6609_p0, %p272_p1 }
   0x6   : > { %276 = sbr.rel (%p273_p2) target bundleno = 2173 (0x87d), region = 52 }
   0xb   : > { %p311_p3 = scmp.lt.s32.totalorder %s6605_s28, 1  ;;  %s7296_s11 = smov 4   ;;  %vm602_vm0 = vcmask 125952   ;;  %vm604_vm1 = vcmask 122880   ;;  %v7297_v22 = vmov 0   ;;  %v12461_v27 = vmov 0 }
   0xc   : > { %603 = vst.msk [vmem:[#allocation2] sm:$0xf] %vm602_vm0, %v7297_v22  ;;  %607 = vst.msk [vmem:[#allocation2 + $0x88] sm:$0xf] %vm602_vm0, %v7297_v22  ;;  %s7298_s16 = smov 8   ;;  %v12464_v31 = vmov 0 }
   0xd   : > { %s12987_s28 = smov (!%p311_p3, %s6605_s28), 1  ;;  %605 = vst.msk [vmem:[#allocation2 + $0x4] sm:$0x1] %vm604_vm1, %v7297_v22  ;;  %608 = vst.msk [vmem:[#allocation2 + $0x8c] sm:$0x1] %vm604_vm1, %v7297_v22  ;;  %v12467_v33 = vmov 0 }
   0xe   : > { %s6937_s29 = sshll.u32 %s12987_s28, 6  ;;  %s6936_s12 = sshll.u32 %s12987_s28, 5  ;;  %2885 = vst.msk [vmem:[#allocation3] sm:$0xf] %vm602_vm0, %v7297_v22  ;;  %2888 = vst.msk [vmem:[#allocation3 + $0x88] sm:$0xf] %vm602_vm0, %v7297_v22 }
   0xf   : > { %s7372_s10 = scalar_lea.vmem %s12341_s1, %s6937_s29  ;;  %s7444_s15 = scalar_lea.vmem %s12340_s0, %s6936_s12  ;;  %2886 = vst.msk [vmem:[#allocation3 + $0x4] sm:$0x1] %vm604_vm1, %v7297_v22  ;;  %2889 = vst.msk [vmem:[#allocation3 + $0x8c] sm:$0x1] %vm604_vm1, %v7297_v22  ;;  %vm610_vm2 = vsmask.f32 256 }
  0x10   : > { %v7375_v0 = vld [vmem:[%s7372_s10 + $0x8] ss:$0 sps:$4 sm:$0xff]   ;;  %v7378_v1 = vld [vmem:[%s7372_s10] ss:$0 sps:$4 sm:$0xff]   ;;  %v7383_v2 = vld [vmem:[%s7372_s10 + $0xc] ss:$0 sps:$4 sm:$0xff]  }
  0x11   : > { %403 = vrot.lane.b32.xlu1 %v7375_v0, %s7296_s11  ;;  %399 = vrot.lane.b32.xlu0 %v7378_v1, %s7296_s11  ;;  %v7388_v3 = vld [vmem:[%s7372_s10 + $0x4] ss:$0 sps:$4 sm:$0xff]   ;;  %v7393_v4 = vld [vmem:[%s7372_s10 + $0x14] ss:$0 sps:$4 sm:$0xff]   ;;  %v618_v24 = vld [vmem:[#allocation2 + $0x10] sm:$0x1] }
  0x12   : > { %v7398_v5 = vld [vmem:[%s7372_s10 + $0x10] ss:$0 sps:$4 sm:$0xff]   ;;  %v7403_v6 = vld [vmem:[%s7372_s10 + $0x1c] ss:$0 sps:$4 sm:$0xff]   ;;  %v7408_v7 = vld [vmem:[%s7372_s10 + $0x18] ss:$0 sps:$4 sm:$0xff]  }
  0x13   : > { %v7411_v8 = vld [vmem:[%s7372_s10 + $0x24] ss:$0 sps:$4 sm:$0xff]   ;;  %v7418_v9 = vld [vmem:[%s7372_s10 + $0x20] ss:$0 sps:$4 sm:$0xff]   ;;  %v7423_v10 = vld [vmem:[%s7372_s10 + $0x2c] ss:$0 sps:$4 sm:$0xff]  }
  0x14   : > { %v7428_v11 = vld [vmem:[%s7372_s10 + $0x28] ss:$0 sps:$4 sm:$0xff]   ;;  %v7434_v12 = vld [vmem:[%s7372_s10 + $0x34] ss:$0 sps:$4 sm:$0xff]   ;;  %v7439_v13 = vld [vmem:[%s7372_s10 + $0x30] ss:$0 sps:$4 sm:$0xff]  }
  0x15   : > { %405 = vrot.lane.b32.xlu1 %v7383_v2, %s7296_s11  ;;  %401 = vrot.lane.b32.xlu0 %v7388_v3, %s7296_s11  ;;  %v7449_v14 = vld [vmem:[%s7372_s10 + $0x3c] ss:$0 sps:$4 sm:$0xff]   ;;  %v7454_v15 = vld [vmem:[%s7372_s10 + $0x38] ss:$0 sps:$4 sm:$0xff]   ;;  %vm7494_vm3 = vmand %vm604_vm1, %vm610_vm2  ;;  %vm666_vm4 = vsmask.f32 7938 }
  0x16   : > { %v7457_v16 = vld [vmem:[%s7444_s15 + $0x4] sm:$0xf]  ;;  %v7460_v17 = vld [vmem:[%s7444_s15] sm:$0xf]  ;;  %v7471_v20 = vld [vmem:[%s7444_s15 + $0xc] sm:$0xf] }
  0x17   : > { %v6633_v18 = vcombine.low %v7457_v16, %v7457_v16  ;;  %v6632_v19 = vcombine.low %v7460_v17, %v7460_v17  ;;  %v7474_v21 = vld [vmem:[%s7444_s15 + $0x8] sm:$0xf]  ;;  %v6635_v23 = vcombine.low %v7471_v20, %v7471_v20  ;;  %v7491_v26 = vld [vmem:[%s7444_s15 + $0x14] sm:$0xf]  ;;  %v12462_v27 = vsel %vm7494_vm3, 4294967295, %v12461_v27  ;;  %vm7504_vm5 = vmand %vm604_vm1, %vm666_vm4  ;;  %s7299_s17 = smov 120  }
  0x18   : > { %v6634_v25 = vcombine.low %v7474_v21, %v7474_v21  ;;  %12463 = vst [vmem:[#allocation4_spill] sm:$0xff] %v12462_v27  ;;  %v674_v28 = vld [vmem:[#allocation2 + $0x14] sm:$0x1]  ;;  %v7499_v29 = vld [vmem:[%s7444_s15 + $0x10] sm:$0xf]  ;;  %v619_v30 = vsel %vm7494_vm3, 0, %v618_v24  ;;  %vm7511_vm6 = vmand %vm602_vm0, %vm666_vm4  ;;  %v6637_v36 = vcombine.low %v7491_v26, %v7491_v26 }
  0x19   : > { %409 = vrot.lane.b32.xlu1 %v7393_v4, %s7296_s11  ;;  %407 = vrot.lane.b32.xlu0 %v7398_v5, %s7296_s11  ;;  %v12465_v31 = vsel %vm7504_vm5, 4294967295, %v12464_v31  ;;  %620 = vst [vmem:[#allocation2 + $0x10] sm:$0x1] %v619_v30  ;;  %v675_v32 = vsel %vm7504_vm5, 0, %v674_v28  ;;  %v12468_v33 = vsel %vm7511_vm6, 4294967295, %v12467_v33  ;;  %v6636_v39 = vcombine.low %v7499_v29, %v7499_v29  ;;  %s7300_s18 = smov 16  }
  0x1a   : > { %12466 = vst [vmem:[#allocation5_spill] sm:$0xff] %v12465_v31  ;;  %12469 = vst [vmem:[#allocation6_spill] sm:$0xff] %v12468_v33  ;;  %v615_v34 = vld [vmem:[#allocation2 + $0x8] sm:$0x1]  ;;  %v671_v35 = vld [vmem:[#allocation2 + $0xc] sm:$0x1] }
  0x1b   : > { %676 = vst [vmem:[#allocation2 + $0x14] sm:$0x1] %v675_v32  ;;  %v616_v37 = vsel %vm7494_vm3, 0, %v615_v34  ;;  %v672_v38 = vsel %vm7504_vm5, 0, %v671_v35  ;;  %v7526_v40 = vld [vmem:[%s7444_s15 + $0x1c] sm:$0xf] }
  0x1c   : > { %617 = vst [vmem:[#allocation2 + $0x8] sm:$0x1] %v616_v37  ;;  %673 = vst [vmem:[#allocation2 + $0xc] sm:$0x1] %v672_v38  ;;  %v612_v41 = vld [vmem:[#allocation2] sm:$0x1]  ;;  %v6639_v49 = vcombine.low %v7526_v40, %v7526_v40 }
  0x1d   : > { %413 = vrot.lane.b32.xlu1 %v7403_v6, %s7296_s11  ;;  %411 = vrot.lane.b32.xlu0 %v7408_v7, %s7296_s11  ;;  %v668_v42 = vld [vmem:[#allocation2 + $0x4] sm:$0x1]  ;;  %v7529_v43 = vld [vmem:[%s7444_s15 + $0x18] sm:$0xf]  ;;  %v613_v44 = vsel %vm7494_vm3, 0, %v612_v41  ;;  %vm503_vm7 = vcmask 31744  }
  0x1e   : > { %v669_v45 = vsel %vm7504_vm5, 0, %v668_v42  ;;  %v624_v46 = vld [vmem:[#allocation2 + $0x20] sm:$0x1]  ;;  %v680_v47 = vld [vmem:[#allocation2 + $0x24] sm:$0x1]  ;;  %v6638_v54 = vcombine.low %v7529_v43, %v7529_v43  ;;  %vm544_vm8 = vcmask 64512  }
  0x1f   : > { %v621_v48 = vld [vmem:[#allocation2 + $0x18] sm:$0x1]  ;;  %614 = vst [vmem:[#allocation2] sm:$0x1] %v613_v44  ;;  %670 = vst [vmem:[#allocation2 + $0x4] sm:$0x1] %v669_v45 }
  0x20   : > { %v625_v50 = vsel %vm7494_vm3, 0, %v624_v46  ;;  %v681_v51 = vsel %vm7504_vm5, 0, %v680_v47  ;;  %v622_v52 = vsel %vm7494_vm3, 0, %v621_v48  ;;  %v677_v53 = vld [vmem:[#allocation2 + $0x1c] sm:$0x1]  ;;  %vm569_vm9 = vcmask 97280  }
  0x21   : > { %417 = vrot.lane.b32.xlu1 %v7411_v8, %s7296_s11  ;;  %415 = vrot.lane.b32.xlu0 %v7418_v9, %s7296_s11  ;;  %626 = vst [vmem:[#allocation2 + $0x20] sm:$0x1] %v625_v50  ;;  %682 = vst [vmem:[#allocation2 + $0x24] sm:$0x1] %v681_v51  ;;  %v678_v55 = vsel %vm7504_vm5, 0, %v677_v53  ;;  %s7301_s19 = smov 32  }
  0x22   : > { %623 = vst [vmem:[#allocation2 + $0x18] sm:$0x1] %v622_v52  ;;  %679 = vst [vmem:[#allocation2 + $0x1c] sm:$0x1] %v678_v55  ;;  %v630_v56 = vld [vmem:[#allocation2 + $0x30] sm:$0x1] }
  0x23   : > { %v686_v57 = vld [vmem:[#allocation2 + $0x34] sm:$0x1]  ;;  %v631_v58 = vsel %vm7494_vm3, 0, %v630_v56  ;;  %v627_v60 = vld [vmem:[#allocation2 + $0x28] sm:$0x1]  ;;  %s7302_s20 = smov 40  }
  0x24   : > { %v687_v59 = vsel %vm7504_vm5, 0, %v686_v57  ;;  %632 = vst [vmem:[#allocation2 + $0x30] sm:$0x1] %v631_v58  ;;  %v683_v61 = vld [vmem:[#allocation2 + $0x2c] sm:$0x1]  ;;  %v628_v62 = vsel %vm7494_vm3, 0, %v627_v60 }
  0x25   : > { %421 = vrot.lane.b32.xlu1 %v7423_v10, %s7296_s11  ;;  %419 = vrot.lane.b32.xlu0 %v7428_v11, %s7296_s11  ;;  %688 = vst [vmem:[#allocation2 + $0x34] sm:$0x1] %v687_v59  ;;  %v684_v63 = vsel %vm7504_vm5, 0, %v683_v61  ;;  %629 = vst [vmem:[#allocation2 + $0x28] sm:$0x1] %v628_v62  ;;  %vm2532_vm10 = vcmask 1043456  }
  0x26   : > { %685 = vst [vmem:[#allocation2 + $0x2c] sm:$0x1] %v684_v63  ;;  %v633_v22 = vld [vmem:[#allocation2 + $0x38] sm:$0x1]  ;;  %v689_v28 = vld [vmem:[#allocation2 + $0x3c] sm:$0x1] }
  0x27   : > { %v698_v32 = vld [vmem:[#allocation2 + $0x54] sm:$0x1]  ;;  %v639_v34 = vld [vmem:[#allocation2 + $0x48] sm:$0x1]  ;;  %v648_v37 = vld [vmem:[#allocation2 + $0x60] sm:$0x1] }
  0x28   : > { %v640_v35 = vsel %vm7494_vm3, 0, %v639_v34  ;;  %v704_v38 = vld [vmem:[#allocation2 + $0x64] sm:$0x1]  ;;  %v701_v42 = vld [vmem:[#allocation2 + $0x5c] sm:$0x1]  ;;  %s7303_s9 = smov 56  }
  0x29   : > { %425 = vrot.lane.b32.xlu1 %v7434_v12, %s7296_s11  ;;  %423 = vrot.lane.b32.xlu0 %v7439_v13, %s7296_s11  ;;  %641 = vst [vmem:[#allocation2 + $0x48] sm:$0x1] %v640_v35  ;;  %v705_v41 = vsel %vm7504_vm5, 0, %v704_v38  ;;  %v702_v44 = vsel %vm7504_vm5, 0, %v701_v42  ;;  %v1030_v45 = vld [vmem:[#allocation2 + $0x4] sm:$0x1] }
  0x2a   : > { %706 = vst [vmem:[#allocation2 + $0x64] sm:$0x1] %v705_v41  ;;  %703 = vst [vmem:[#allocation2 + $0x5c] sm:$0x1] %v702_v44  ;;  %v654_v46 = vld [vmem:[#allocation2 + $0x70] sm:$0x1] }
  0x2b   : > { %v710_v47 = vld [vmem:[#allocation2 + $0x74] sm:$0x1]  ;;  %v651_v48 = vld [vmem:[#allocation2 + $0x68] sm:$0x1]  ;;  %v660_v51 = vld [vmem:[#allocation2 + $0x80] sm:$0x1] }
  0x2c   : > { %v716_v52 = vld [vmem:[#allocation2 + $0x84] sm:$0x1]  ;;  %v657_v53 = vld [vmem:[#allocation2 + $0x78] sm:$0x1]  ;;  %v713_v56 = vld [vmem:[#allocation2 + $0x7c] sm:$0x1] }
  0x2d   : > { %429 = vrot.lane.b32.xlu1 %v7449_v14, %s7296_s11  ;;  %427 = vrot.lane.b32.xlu0 %v7454_v15, %s7296_s11  ;;  %v658_v55 = vsel %vm7494_vm3, 0, %v657_v53  ;;  %s7304_s12 = smov 24   ;;  %vm1550_vm11 = vcmask 130048   ;;  %vm1567_vm12 = vcmask 195584   ;;  %vm1600_vm13 = vcmask 261120   ;;  %s7305_s13 = smov 48  }
  0x2e   : > { %659 = vst [vmem:[#allocation2 + $0x78] sm:$0x1] %v658_v55  ;;  %vm1633_vm14 = vcmask 326656   ;;  %vm1650_vm15 = vcmask 392192   ;;  %vm1683_vm0 = vcmask 457728   ;;  %vm1716_vm1 = vcmask 523264  }
  0x2f   : > { %vm2483_vm2 = vcmask 588800   ;;  %s7306_s14 = smov 64   ;;  %vm2165_vm4 = vsmask.f32 3328  ;;  %s7312_s30 = smov 112  }
  0x31   : > { %457 = vrot.lane.b32.xlu1 %v6633_v18, %s7298_s16  ;;  %455 = vrot.lane.b32.xlu0 %v6632_v19, %s7298_s16  ;;  %v636_v18 = vld [vmem:[#allocation2 + $0x40] sm:$0x1]  ;;  %v692_v19 = vld [vmem:[#allocation2 + $0x44] sm:$0x1] }
  0x32   : > { %v693_v24 = vsel %vm7504_vm5, 0, %v692_v19 }
  0x33   : > { %694 = vst [vmem:[#allocation2 + $0x44] sm:$0x1] %v693_v24 }
  0x35   : > { %461 = vrot.lane.b32.xlu1 %v6635_v23, %s7298_s16  ;;  %459 = vrot.lane.b32.xlu0 %v6634_v25, %s7298_s16  ;;  %v637_v23 = vsel %vm7494_vm3, 0, %v636_v18  ;;  %v634_v25 = vsel %vm7494_vm3, 0, %v633_v22 }
  0x36   : > { %638 = vst [vmem:[#allocation2 + $0x40] sm:$0x1] %v637_v23  ;;  %635 = vst [vmem:[#allocation2 + $0x38] sm:$0x1] %v634_v25 }
  0x39   : > { %465 = vrot.lane.b32.xlu1 %v6637_v36, %s7298_s16  ;;  %463 = vrot.lane.b32.xlu0 %v6636_v39, %s7298_s16  ;;  %v695_v36 = vld [vmem:[#allocation2 + $0x4c] sm:$0x1]  ;;  %v649_v39 = vsel %vm7494_vm3, 0, %v648_v37 }
  0x3a   : > { %650 = vst [vmem:[#allocation2 + $0x60] sm:$0x1] %v649_v39 }
  0x3d   : > { %469 = vrot.lane.b32.xlu1 %v6639_v49, %s7298_s16  ;;  %467 = vrot.lane.b32.xlu0 %v6638_v54, %s7298_s16  ;;  %v655_v49 = vsel %vm7494_vm3, 0, %v654_v46  ;;  %v661_v54 = vsel %vm7494_vm3, 0, %v660_v51 }
  0x3e   : > { %656 = vst [vmem:[#allocation2 + $0x70] sm:$0x1] %v655_v49  ;;  %662 = vst [vmem:[#allocation2 + $0x80] sm:$0x1] %v661_v54 }
  0x41   : > { %473 = vrot.lane.b32.xlu1 %v7388_v3, %s7298_s16  ;;  %471 = vrot.lane.b32.xlu0 %v7378_v1, %s7298_s16  ;;  %v690_v1 = vsel %vm7504_vm5, 0, %v689_v28  ;;  %v642_v3 = vld [vmem:[#allocation2 + $0x50] sm:$0x1] }
  0x42   : > { %691 = vst [vmem:[#allocation2 + $0x3c] sm:$0x1] %v690_v1  ;;  %v643_v30 = vsel %vm7494_vm3, 0, %v642_v3 }
  0x43   : > { %644 = vst [vmem:[#allocation2 + $0x50] sm:$0x1] %v643_v30 }
  0x45   : > { %477 = vrot.lane.b32.xlu1 %v7383_v2, %s7298_s16  ;;  %475 = vrot.lane.b32.xlu0 %v7375_v0, %s7298_s16  ;;  %v699_v2 = vsel %vm7504_vm5, 0, %v698_v32  ;;  %v696_v0 = vsel %vm7504_vm5, 0, %v695_v36 }
  0x46   : > { %700 = vst [vmem:[#allocation2 + $0x54] sm:$0x1] %v699_v2  ;;  %697 = vst [vmem:[#allocation2 + $0x4c] sm:$0x1] %v696_v0 }
  0x49   : > { %481 = vrot.lane.b32.xlu1 %v7393_v4, %s7298_s16  ;;  %479 = vrot.lane.b32.xlu0 %v7398_v5, %s7298_s16  ;;  %v645_v4 = vld [vmem:[#allocation2 + $0x58] sm:$0x1] }
  0x4a   : > { %v646_v5 = vsel %vm7494_vm3, 0, %v645_v4 }
  0x4b   : > { %647 = vst [vmem:[#allocation2 + $0x58] sm:$0x1] %v646_v5 }
  0x4d   : > { %485 = vrot.lane.b32.xlu1 %v7403_v6, %s7298_s16  ;;  %483 = vrot.lane.b32.xlu0 %v7408_v7, %s7298_s16  ;;  %v1029_v6 = vld [vmem:[#allocation2] sm:$0xf] }
  0x4e   : > { %v7607_v7 = vcombine.low %v1029_v6, %v1030_v45 }
  0x50   : > { %12470 = vst [vmem:[#allocation7_spill] sm:$0xff] %v7607_v7  ;;  %v1207_v50 = vshll.u32 %v7607_v7, 16  ;;  %v1205_v57 = vshrl.u32 %v7607_v7, 16 }
  0x51   : > { %489 = vrot.lane.b32.xlu1 %v7411_v8, %s7298_s16  ;;  %487 = vrot.lane.b32.xlu0 %v7418_v9, %s7298_s16  ;;  %v711_v8 = vsel %vm7504_vm5, 0, %v710_v47  ;;  %v652_v9 = vsel %vm7494_vm3, 0, %v651_v48 }
  0x52   : > { %712 = vst [vmem:[#allocation2 + $0x74] sm:$0x1] %v711_v8  ;;  %653 = vst [vmem:[#allocation2 + $0x68] sm:$0x1] %v652_v9  ;;  %v1209_v58 = vrot.slane %v1207_v50, 1 }
  0x54   : > { %v7636_v59 = vor.u32 %v1209_v58, %v1205_v57 }
  0x55   : > { %493 = vrot.lane.b32.xlu1 %v7423_v10, %s7298_s16  ;;  %491 = vrot.lane.b32.xlu0 %v7428_v11, %s7298_s16  ;;  %v707_v10 = vld [vmem:[#allocation2 + $0x6c] sm:$0x1] }
  0x56   : > { %v708_v11 = vsel %vm7504_vm5, 0, %v707_v10 }
  0x57   : > { %709 = vst [vmem:[#allocation2 + $0x6c] sm:$0x1] %v708_v11 }
  0x59   : > { %497 = vrot.lane.b32.xlu1 %v7434_v12, %s7298_s16  ;;  %495 = vrot.lane.b32.xlu0 %v7439_v13, %s7298_s16  ;;  %v717_v12 = vsel %vm7504_vm5, 0, %v716_v52  ;;  %v6656_v13 = vcombine.low %v1029_v6, %v1029_v6 }
  0x5a   : > { %718 = vst [vmem:[#allocation2 + $0x84] sm:$0x1] %v717_v12 }
  0x5d   : > { %501 = vrot.lane.b32.xlu1 %v7449_v14, %s7298_s16  ;;  %499 = vrot.lane.b32.xlu0 %v7454_v15, %s7298_s16  ;;  %v714_v14 = vsel %vm7504_vm5, 0, %v713_v56 }
  0x5e   : > { %715 = vst [vmem:[#allocation2 + $0x7c] sm:$0x1] %v714_v14  ;;  %v939_v14 = vld [vmem:[#allocation2 + $0x10] sm:$0xf] }
  0x61   : > { %1124 = vrot.lane.b32.xlu0 %v6656_v13, %s7299_s17 }
  0x65   : > { %1316 = vrot.lane.b32.xlu0 %v7636_v59, %s7298_s16 }
  0x83   : > { %v404_v15 = vpop.permute.xlu1 %403  ;;  %v400_v60 = vpop.permute.xlu0 %399 }
  0x84   : > { %v511_v39 = vsel %vm503_vm7, %v7457_v16, %v404_v15  ;;  %v506_v41 = vsel %vm503_vm7, %v7460_v17, %v400_v60 }
  0x87   : > { %v406_v61 = vpop.permute.xlu1 %405  ;;  %v402_v62 = vpop.permute.xlu0 %401 }
  0x88   : > { %v513_v5 = vsel %vm503_vm7, %v7457_v16, %v406_v61  ;;  %v508_v42 = vsel %vm503_vm7, %v7460_v17, %v402_v62 }
  0x8b   : > { %v410_v63 = vpop.permute.xlu1 %409  ;;  %v408_v18 = vpop.permute.xlu0 %407 }
  0x8c   : > { %v518_v44 = vsel %vm503_vm7, %v7474_v21, %v410_v63  ;;  %v516_v6 = vsel %vm503_vm7, %v7474_v21, %v408_v18  ;;  %v942_v18 = vld [vmem:[#allocation2 + $0x14] sm:$0x1] }
  0x8f   : > { %v414_v19 = vpop.permute.xlu1 %413  ;;  %v412_v22 = vpop.permute.xlu0 %411 }
  0x90   : > { %v523_v45 = vsel %vm503_vm7, %v7471_v20, %v414_v19  ;;  %v521_v48 = vsel %vm503_vm7, %v7471_v20, %v412_v22  ;;  %v933_v19 = vld [vmem:[#allocation2 + $0x8] sm:$0xf] }
  0x93   : > { %v418_v23 = vpop.permute.xlu1 %417  ;;  %v416_v24 = vpop.permute.xlu0 %415 }
  0x94   : > { %v7673_v16 = vsel %vm503_vm7, %v7499_v29, %v418_v23  ;;  %v526_v21 = vsel %vm503_vm7, %v7499_v29, %v416_v24 }
  0x97   : > { %v422_v25 = vpop.permute.xlu1 %421  ;;  %v420_v28 = vpop.permute.xlu0 %419 }
  0x98   : > { %v533_v9 = vsel %vm503_vm7, %v7491_v26, %v422_v25  ;;  %v531_v20 = vsel %vm503_vm7, %v7491_v26, %v420_v28 }
  0x9b   : > { %v7640_v1 = vpop.permute.xlu1 %425  ;;  %v7642_v3 = vpop.permute.xlu0 %423 }
  0x9f   : > { %v7644_v30 = vpop.permute.xlu1 %429  ;;  %v7646_v32 = vpop.permute.xlu0 %427 }
  0xa3   : > { %v458_v34 = vpop.permute.xlu1 %457  ;;  %v456_v2 = vpop.permute.xlu0 %455 }
  0xa4   : > { %v547_v46 = vsel %vm544_vm8, %v508_v42, %v456_v2  ;;  %v546_v17 = vsel %vm544_vm8, %v506_v41, %v456_v2  ;;  %v549_v50 = vsel %vm544_vm8, %v511_v39, %v458_v34  ;;  %v550_v51 = vsel %vm544_vm8, %v513_v5, %v458_v34  ;;  %v936_v34 = vld [vmem:[#allocation2 + $0xc] sm:$0x1] }
  0xa7   : > { %v462_v35 = vpop.permute.xlu1 %461  ;;  %v460_v36 = vpop.permute.xlu0 %459 }
  0xa8   : > { %v7687_v53 = vsel %vm544_vm8, %v521_v48, %v462_v35  ;;  %v556_v54 = vsel %vm544_vm8, %v523_v45, %v462_v35  ;;  %v552_v29 = vsel %vm544_vm8, %v516_v6, %v460_v36  ;;  %v553_v56 = vsel %vm544_vm8, %v518_v44, %v460_v36 }
  0xab   : > { %v466_v0 = vpop.permute.xlu1 %465  ;;  %v7648_v37 = vpop.permute.xlu0 %463 }
  0xac   : > { %v7693_v13 = vsel %vm544_vm8, %v531_v20, %v466_v0  ;;  %v7698_v63 = vsel %vm544_vm8, %v533_v9, %v466_v0 }
  0xaf   : > { %v7650_v38 = vpop.permute.xlu1 %469  ;;  %v7652_v4 = vpop.permute.xlu0 %467 }
  0xb3   : > { %v474_v47 = vpop.permute.xlu1 %473  ;;  %v472_v8 = vpop.permute.xlu0 %471 }
  0xb4   : > { %v573_v49 = vsel %vm569_vm9, %v547_v46, %v474_v47  ;;  %v571_v11 = vsel %vm569_vm9, %v546_v17, %v472_v8  ;;  %v951_v17 = vld [vmem:[#allocation2 + $0x20] sm:$0xf] }
  0xb5   : > { %v6641_v10 = vcombine.low %v573_v49, %v573_v49  ;;  %v6640_v52 = vcombine.low %v571_v11, %v571_v11  ;;  %v954_v49 = vld [vmem:[#allocation2 + $0x24] sm:$0x1] }
  0xb7   : > { %v779_v12 = vshrl.u32 %v6641_v10, 16  ;;  %v478_v55 = vpop.permute.xlu1 %477  ;;  %v771_v26 = vshrl.u32 %v6640_v52, 16  ;;  %v476_v58 = vpop.permute.xlu0 %475  ;;  %v782_v60 = vshll.u32 %v6641_v10, 16  ;;  %v774_v23 = vshll.u32 %v6640_v52, 16 }
  0xb8   : > { %v577_v57 = vsel %vm569_vm9, %v550_v51, %v478_v55  ;;  %v575_v62 = vsel %vm569_vm9, %v549_v50, %v476_v58  ;;  %v558_v10 = vsel %vm544_vm8, %v526_v21, %v7648_v37  ;;  %v945_v50 = vld [vmem:[#allocation2 + $0x18] sm:$0xf]  ;;  %v948_v51 = vld [vmem:[#allocation2 + $0x1c] sm:$0x1] }
  0xb9   : > { %v781_v15 = vrot.slane %v779_v12, 7  ;;  %v6643_v61 = vcombine.low %v577_v57, %v577_v57  ;;  %v773_v22 = vrot.slane %v771_v26, 7  ;;  %v6642_v24 = vcombine.low %v575_v62, %v575_v62 }
  0xbb   : > { %v784_v25 = vor.u32 %v782_v60, %v781_v15  ;;  %v785_v28 = vrot.slane %v781_v15, 4  ;;  %v795_v2 = vshrl.u32 %v6643_v61, 16  ;;  %v798_v35 = vshll.u32 %v6643_v61, 16  ;;  %v482_v36 = vpop.permute.xlu1 %481  ;;  %v480_v44 = vpop.permute.xlu0 %479 }
  0xbc   : > { %v776_v39 = vor.u32 %v774_v23, %v773_v22  ;;  %v777_v41 = vrot.slane %v773_v22, 4  ;;  %v787_v5 = vshrl.u32 %v6642_v24, 16  ;;  %v790_v42 = vshll.u32 %v6642_v24, 16  ;;  %v963_v22 = vld [vmem:[#allocation2 + $0x30] sm:$0xf] }
  0xbd   : > { %v940_v0 = vsel %vm7511_vm6, %v784_v25, %v939_v14  ;;  %v943_v6 = vsel %vm7494_vm3, %v785_v28, %v942_v18  ;;  %v797_v45 = vrot.slane %v795_v2, 7  ;;  %v581_v46 = vsel %vm569_vm9, %v553_v56, %v482_v36  ;;  %v966_v23 = vld [vmem:[#allocation2 + $0x34] sm:$0x1] }
  0xbe   : > { %941 = vst [vmem:[#allocation2 + $0x10] sm:$0xf] %v940_v0  ;;  %944 = vst [vmem:[#allocation2 + $0x14] sm:$0x1] %v943_v6  ;;  %v934_v47 = vsel %vm7511_vm6, %v776_v39, %v933_v19  ;;  %v937_v48 = vsel %vm7494_vm3, %v777_v41, %v936_v34  ;;  %v789_v8 = vrot.slane %v787_v5, 7  ;;  %v6645_v9 = vcombine.low %v581_v46, %v581_v46 }
  0xbf   : > { %935 = vst [vmem:[#allocation2 + $0x8] sm:$0xf] %v934_v47  ;;  %938 = vst [vmem:[#allocation2 + $0xc] sm:$0x1] %v937_v48  ;;  %v800_v11 = vor.u32 %v798_v35, %v797_v45  ;;  %v801_v20 = vrot.slane %v797_v45, 4  ;;  %v579_v52 = vsel %vm569_vm9, %v552_v29, %v480_v44  ;;  %v486_v12 = vpop.permute.xlu1 %485  ;;  %v484_v58 = vpop.permute.xlu0 %483  ;;  %v559_v19 = vsel %vm544_vm8, %v7673_v16, %v7648_v37 }
  0xc0   : > { %v792_v55 = vor.u32 %v790_v42, %v789_v8  ;;  %v793_v56 = vrot.slane %v789_v8, 4  ;;  %v811_v26 = vshrl.u32 %v6645_v9, 16  ;;  %v814_v57 = vshll.u32 %v6645_v9, 16  ;;  %v957_v41 = vld [vmem:[#allocation2 + $0x28] sm:$0xf] }
  0xc1   : > { %v952_v14 = vsel %vm7511_vm6, %v800_v11, %v951_v17  ;;  %v955_v21 = vsel %vm7494_vm3, %v801_v20, %v954_v49  ;;  %v6644_v15 = vcombine.low %v579_v52, %v579_v52  ;;  %v585_v60 = vsel %vm569_vm9, %v556_v54, %v486_v12  ;;  %v975_v6 = vld [vmem:[#allocation2 + $0x40] sm:$0xf]  ;;  %v978_v17 = vld [vmem:[#allocation2 + $0x44] sm:$0x1]  ;;  %v969_v12 = vld [vmem:[#allocation2 + $0x38] sm:$0xf] }
  0xc2   : > { %953 = vst [vmem:[#allocation2 + $0x20] sm:$0xf] %v952_v14  ;;  %956 = vst [vmem:[#allocation2 + $0x24] sm:$0x1] %v955_v21  ;;  %v946_v29 = vsel %vm7511_vm6, %v792_v55, %v945_v50  ;;  %v949_v61 = vsel %vm7494_vm3, %v793_v56, %v948_v51  ;;  %v813_v62 = vrot.slane %v811_v26, 7  ;;  %v6647_v18 = vcombine.low %v585_v60, %v585_v60 }
  0xc3   : > { %947 = vst [vmem:[#allocation2 + $0x18] sm:$0xf] %v946_v29  ;;  %950 = vst [vmem:[#allocation2 + $0x1c] sm:$0x1] %v949_v61  ;;  %v803_v24 = vshrl.u32 %v6644_v15, 16  ;;  %v806_v54 = vshll.u32 %v6644_v15, 16  ;;  %v583_v25 = vsel %vm569_vm9, %v7687_v53, %v484_v58  ;;  %v490_v28 = vpop.permute.xlu1 %489  ;;  %v488_v39 = vpop.permute.xlu0 %487 }
  0xc4   : > { %v816_v34 = vor.u32 %v814_v57, %v813_v62  ;;  %v817_v2 = vrot.slane %v813_v62, 4  ;;  %v827_v35 = vshrl.u32 %v6647_v18, 16  ;;  %v830_v36 = vshll.u32 %v6647_v18, 16  ;;  %v960_v53 = vld [vmem:[#allocation2 + $0x2c] sm:$0x1] }
  0xc5   : > { %v805_v5 = vrot.slane %v803_v24, 7  ;;  %v6646_v42 = vcombine.low %v583_v25, %v583_v25  ;;  %v589_v37 = vsel %vm569_vm9, %v559_v19, %v490_v28  ;;  %v587_v16 = vsel %vm569_vm9, %v558_v10, %v488_v39  ;;  %v972_v14 = vld [vmem:[#allocation2 + $0x3c] sm:$0x1]  ;;  %v987_v21 = vld [vmem:[#allocation2 + $0x50] sm:$0xf] }
  0xc6   : > { %v964_v44 = vsel %vm7511_vm6, %v816_v34, %v963_v22  ;;  %v967_v0 = vsel %vm7494_vm3, %v817_v2, %v966_v23  ;;  %v829_v45 = vrot.slane %v827_v35, 7  ;;  %v6649_v46 = vcombine.low %v589_v37, %v589_v37  ;;  %v990_v62 = vld [vmem:[#allocation2 + $0x54] sm:$0x1]  ;;  %v7748_v2 = vld [vmem:[#allocation2 + $0x10] sm:$0xf] }
  0xc7   : > { %965 = vst [vmem:[#allocation2 + $0x30] sm:$0xf] %v964_v44  ;;  %968 = vst [vmem:[#allocation2 + $0x34] sm:$0x1] %v967_v0  ;;  %v808_v47 = vor.u32 %v806_v54, %v805_v5  ;;  %v809_v48 = vrot.slane %v805_v5, 4  ;;  %v819_v49 = vshrl.u32 %v6646_v42, 16  ;;  %v494_v9 = vpop.permute.xlu1 %493  ;;  %v6648_v56 = vcombine.low %v587_v16, %v587_v16  ;;  %v492_v26 = vpop.permute.xlu0 %491 }
  0xc8   : > { %v822_v8 = vshll.u32 %v6646_v42, 16  ;;  %v832_v11 = vor.u32 %v830_v36, %v829_v45  ;;  %v833_v10 = vrot.slane %v829_v45, 4  ;;  %v843_v20 = vshrl.u32 %v6649_v46, 16  ;;  %v7750_v35 = vld [vmem:[#allocation2 + $0x8] sm:$0xf] }
  0xc9   : > { %v846_v50 = vshll.u32 %v6649_v46, 16  ;;  %v958_v51 = vsel %vm7511_vm6, %v808_v47, %v957_v41  ;;  %v961_v52 = vsel %vm7494_vm3, %v809_v48, %v960_v53  ;;  %v821_v55 = vrot.slane %v819_v49, 7  ;;  %v981_v41 = vld [vmem:[#allocation2 + $0x48] sm:$0xf]  ;;  %v984_v5 = vld [vmem:[#allocation2 + $0x4c] sm:$0x1] }
  0xca   : > { %959 = vst [vmem:[#allocation2 + $0x28] sm:$0xf] %v958_v51  ;;  %962 = vst [vmem:[#allocation2 + $0x2c] sm:$0x1] %v961_v52  ;;  %v976_v57 = vsel %vm7511_vm6, %v832_v11, %v975_v6  ;;  %v979_v58 = vsel %vm7494_vm3, %v833_v10, %v978_v17  ;;  %v845_v15 = vrot.slane %v843_v20, 7  ;;  %v593_v60 = vsel %vm569_vm9, %v7698_v63, %v494_v9 }
  0xcb   : > { %977 = vst [vmem:[#allocation2 + $0x40] sm:$0xf] %v976_v57  ;;  %980 = vst [vmem:[#allocation2 + $0x44] sm:$0x1] %v979_v58  ;;  %v824_v29 = vor.u32 %v822_v8, %v821_v55  ;;  %v825_v61 = vrot.slane %v821_v55, 4  ;;  %v835_v18 = vshrl.u32 %v6648_v56, 16  ;;  %v6651_v24 = vcombine.low %v593_v60, %v593_v60  ;;  %v498_v37 = vpop.permute.xlu1 %497  ;;  %v496_v48 = vpop.permute.xlu0 %495 }
  0xcc   : > { %v838_v19 = vshll.u32 %v6648_v56, 16  ;;  %v848_v22 = vor.u32 %v846_v50, %v845_v15  ;;  %v849_v23 = vrot.slane %v845_v15, 4  ;;  %v591_v54 = vsel %vm569_vm9, %v7693_v13, %v492_v26  ;;  %v999_v53 = vld [vmem:[#allocation2 + $0x60] sm:$0xf]  ;;  %v1002_v17 = vld [vmem:[#allocation2 + $0x64] sm:$0x1] }
  0xcd   : > { %v970_v25 = vsel %vm7511_vm6, %v824_v29, %v969_v12  ;;  %v973_v28 = vsel %vm7494_vm3, %v825_v61, %v972_v14  ;;  %v837_v63 = vrot.slane %v835_v18, 7  ;;  %v6650_v34 = vcombine.low %v591_v54, %v591_v54  ;;  %v993_v49 = vld [vmem:[#allocation2 + $0x58] sm:$0xf]  ;;  %v996_v51 = vld [vmem:[#allocation2 + $0x5c] sm:$0x1] }
  0xce   : > { %v538_v36 = vsel %vm503_vm7, %v7529_v43, %v7640_v1  ;;  %971 = vst [vmem:[#allocation2 + $0x38] sm:$0xf] %v970_v25  ;;  %974 = vst [vmem:[#allocation2 + $0x3c] sm:$0x1] %v973_v28  ;;  %v988_v13 = vsel %vm7511_vm6, %v848_v22, %v987_v21  ;;  %v991_v39 = vsel %vm7494_vm3, %v849_v23, %v990_v62  ;;  %v859_v42 = vshrl.u32 %v6651_v24, 16 }
  0xcf   : > { %v536_v16 = vsel %vm503_vm7, %v7529_v43, %v7642_v3  ;;  %989 = vst [vmem:[#allocation2 + $0x50] sm:$0xf] %v988_v13  ;;  %992 = vst [vmem:[#allocation2 + $0x54] sm:$0x1] %v991_v39  ;;  %v840_v44 = vor.u32 %v838_v19, %v837_v63  ;;  %v841_v1 = vrot.slane %v837_v63, 4  ;;  %v851_v0 = vshrl.u32 %v6650_v34, 16  ;;  %v502_v15 = vpop.permute.xlu1 %501  ;;  %v500_v22 = vpop.permute.xlu0 %499 }
  0xd0   : > { %v861_v6 = vrot.slane %v859_v42, 7  ;;  %v862_v45 = vshll.u32 %v6651_v24, 16  ;;  %v7764_v46 = vcombine.low %v7748_v2, %v7748_v2  ;;  %v7768_v47 = vcombine.low %v7750_v35, %v7750_v35  ;;  %v7782_v52 = vld [vmem:[#allocation2 + $0x20] sm:$0xf]  ;;  %v1011_v28 = vld [vmem:[#allocation2 + $0x70] sm:$0xf] }
  0xd1   : > { %v982_v43 = vsel %vm7511_vm6, %v840_v44, %v981_v41  ;;  %v985_v3 = vsel %vm7494_vm3, %v841_v1, %v984_v5  ;;  %v853_v8 = vrot.slane %v851_v0, 7  ;;  %v854_v9 = vshll.u32 %v6650_v34, 16  ;;  %v1014_v13 = vld [vmem:[#allocation2 + $0x74] sm:$0x1]  ;;  %v1005_v39 = vld [vmem:[#allocation2 + $0x68] sm:$0xf] }
  0xd2   : > { %v564_v11 = vsel %vm544_vm8, %v536_v16, %v7652_v4  ;;  %v565_v10 = vsel %vm544_vm8, %v538_v36, %v7652_v4  ;;  %983 = vst [vmem:[#allocation2 + $0x48] sm:$0xf] %v982_v43  ;;  %986 = vst [vmem:[#allocation2 + $0x4c] sm:$0x1] %v985_v3  ;;  %v864_v20 = vor.u32 %v862_v45, %v861_v6  ;;  %v865_v50 = vrot.slane %v861_v6, 4 }
  0xd3   : > { %1128 = vrot.lane.b32.xlu0 %v7764_v46, %s7299_s17  ;;  %1126 = vrot.lane.b32.xlu1 %v7768_v47, %s7299_s17  ;;  %v856_v12 = vor.u32 %v854_v9, %v853_v8  ;;  %v857_v55 = vrot.slane %v853_v8, 4  ;;  %v597_v56 = vsel %vm569_vm9, %v565_v10, %v498_v37  ;;  %v595_v26 = vsel %vm569_vm9, %v564_v11, %v496_v48  ;;  %v7786_v4 = vld [vmem:[#allocation2 + $0x18] sm:$0xf]  ;;  %v1008_v37 = vld [vmem:[#allocation2 + $0x6c] sm:$0x1] }
  0xd4   : > { %v543_v57 = vsel %vm503_vm7, %v7526_v40, %v7644_v30  ;;  %v1000_v58 = vsel %vm7511_vm6, %v864_v20, %v999_v53  ;;  %v1003_v14 = vsel %vm7494_vm3, %v865_v50, %v1002_v17  ;;  %v6653_v21 = vcombine.low %v597_v56, %v597_v56  ;;  %v7820_v44 = vld [vmem:[#allocation2 + $0x30] sm:$0xf]  ;;  %v7826_v43 = vld [vmem:[#allocation2 + $0x28] sm:$0xf]  ;;  %v1026_v8 = vld [vmem:[#allocation2 + $0x84] sm:$0x1] }
  0xd5   : > { %1001 = vst [vmem:[#allocation2 + $0x60] sm:$0xf] %v1000_v58  ;;  %1004 = vst [vmem:[#allocation2 + $0x64] sm:$0x1] %v1003_v14  ;;  %v994_v60 = vsel %vm7511_vm6, %v856_v12, %v993_v49  ;;  %v997_v29 = vsel %vm7494_vm3, %v857_v55, %v996_v51  ;;  %v6652_v61 = vcombine.low %v595_v26, %v595_v26  ;;  %v1023_v49 = vld [vmem:[#allocation2 + $0x80] sm:$0xf] }
  0xd6   : > { %v7801_v30 = vcombine.low %v7782_v52, %v7782_v52  ;;  %v568_v62 = vsel %vm544_vm8, %v543_v57, %v7650_v38  ;;  %995 = vst [vmem:[#allocation2 + $0x58] sm:$0xf] %v994_v60  ;;  %998 = vst [vmem:[#allocation2 + $0x5c] sm:$0x1] %v997_v29  ;;  %v875_v18 = vshrl.u32 %v6653_v21, 16  ;;  %v7807_v19 = vcombine.low %v7786_v4, %v7786_v4 }
  0xd7   : > { %v541_v23 = vsel %vm503_vm7, %v7526_v40, %v7646_v32  ;;  %v867_v24 = vshrl.u32 %v6652_v61, 16  ;;  %v601_v54 = vsel %vm569_vm9, %v568_v62, %v502_v15  ;;  %v878_v34 = vshll.u32 %v6653_v21, 16  ;;  %v7836_v11 = vld [vmem:[#allocation2 + $0x40] sm:$0xf]  ;;  %v7844_v55 = vld [vmem:[#allocation2 + $0x38] sm:$0xf] }
  0xd8   : > { %1132 = vrot.lane.b32.xlu0 %v7801_v30, %s7299_s17  ;;  %v567_v25 = vsel %vm544_vm8, %v541_v23, %v7650_v38  ;;  %v877_v63 = vrot.slane %v875_v18, 7  ;;  %1130 = vrot.lane.b32.xlu1 %v7807_v19, %s7299_s17  ;;  %v6655_v36 = vcombine.low %v601_v54, %v601_v54  ;;  %v870_v40 = vshll.u32 %v6652_v61, 16  ;;  %v7854_v14 = vld [vmem:[#allocation2 + $0x50] sm:$0xf]  ;;  %v1017_v21 = vld [vmem:[#allocation2 + $0x78] sm:$0xf] }
  0xd9   : > { %v869_v41 = vrot.slane %v867_v24, 7  ;;  %v599_v32 = vsel %vm569_vm9, %v567_v25, %v500_v22  ;;  %v7834_v9 = vcombine.low %v7820_v44, %v7820_v44  ;;  %v7842_v12 = vcombine.low %v7826_v43, %v7826_v43  ;;  %v1020_v15 = vld [vmem:[#allocation2 + $0x7c] sm:$0x1]  ;;  %v7862_v62 = vld [vmem:[#allocation2 + $0x48] sm:$0xf] }
  0xda   : > { %v880_v5 = vor.u32 %v878_v34, %v877_v63  ;;  %v881_v42 = vrot.slane %v877_v63, 4  ;;  %v891_v16 = vshrl.u32 %v6655_v36, 16  ;;  %v894_v0 = vshll.u32 %v6655_v36, 16 }
  0xdb   : > { %v872_v38 = vor.u32 %v870_v40, %v869_v41  ;;  %v873_v1 = vrot.slane %v869_v41, 4  ;;  %v6654_v48 = vcombine.low %v599_v32, %v599_v32  ;;  %v7852_v58 = vcombine.low %v7836_v11, %v7836_v11  ;;  %v1034_v41 = vld [vmem:[#allocation2 + $0x14] sm:$0x1] }
  0xdc   : > { %v1012_v53 = vsel %vm7511_vm6, %v880_v5, %v1011_v28  ;;  %v1015_v6 = vsel %vm7494_vm3, %v881_v42, %v1014_v13  ;;  %v893_v45 = vrot.slane %v891_v16, 7  ;;  %1136 = vrot.lane.b32.xlu0 %v7834_v9, %s7299_s17  ;;  %1134 = vrot.lane.b32.xlu1 %v7842_v12, %s7299_s17  ;;  %v7860_v61 = vcombine.low %v7844_v55, %v7844_v55  ;;  %v7874_v24 = vld [vmem:[#allocation2 + $0x60] sm:$0xf]  ;;  %v1038_v42 = vld [vmem:[#allocation2 + $0x24] sm:$0x1] }
  0xdd   : > { %1013 = vst [vmem:[#allocation2 + $0x70] sm:$0xf] %v1012_v53  ;;  %1016 = vst [vmem:[#allocation2 + $0x74] sm:$0x1] %v1015_v6  ;;  %v1006_v3 = vsel %vm7511_vm6, %v872_v38, %v1005_v39  ;;  %v1009_v17 = vsel %vm7494_vm3, %v873_v1, %v1008_v37  ;;  %v883_v50 = vshrl.u32 %v6654_v48, 16  ;;  %v886_v51 = vshll.u32 %v6654_v48, 16 }
  0xde   : > { %1007 = vst [vmem:[#allocation2 + $0x68] sm:$0xf] %v1006_v3  ;;  %1010 = vst [vmem:[#allocation2 + $0x6c] sm:$0x1] %v1009_v17  ;;  %v896_v10 = vor.u32 %v894_v0, %v893_v45  ;;  %v897_v20 = vrot.slane %v893_v45, 4  ;;  %v7868_v18 = vcombine.low %v7854_v14, %v7854_v14  ;;  %v7880_v54 = vcombine.low %v7862_v62, %v7862_v62 }
  0xdf   : > { %v885_v57 = vrot.slane %v883_v50, 7  ;;  %v7882_v25 = vld [vmem:[#allocation2 + $0x58] sm:$0xf]  ;;  %v7888_v28 = vcombine.low %v7874_v24, %v7874_v24  ;;  %v7917_v32 = vcombine.low %v7748_v2, %v1034_v41  ;;  %v663_v37 = vld [vmem:[#allocation2 + $0x88] sm:$0x1]  ;;  %v7929_v2 = vcombine.low %v7782_v52, %v1038_v42 }
  0xe0   : > { %v1024_v56 = vsel %vm7511_vm6, %v896_v10, %v1023_v49  ;;  %v1027_v26 = vsel %vm7494_vm3, %v897_v20, %v1026_v8  ;;  %1140 = vrot.lane.b32.xlu0 %v7852_v58, %s7299_s17  ;;  %1138 = vrot.lane.b32.xlu1 %v7860_v61, %s7299_s17  ;;  %v7896_v34 = vcombine.low %v7882_v25, %v7882_v25  ;;  %v719_v16 = vld [vmem:[#allocation2 + $0x8c] sm:$0x1]  ;;  %v1042_v0 = vld [vmem:[#allocation2 + $0x34] sm:$0x1]  ;;  %v664_v53 = vsel %vm7494_vm3, 0, %v663_v37 }
  0xe1   : > { %1025 = vst [vmem:[#allocation2 + $0x80] sm:$0xf] %v1024_v56  ;;  %1028 = vst [vmem:[#allocation2 + $0x84] sm:$0x1] %v1027_v26  ;;  %v888_v60 = vor.u32 %v886_v51, %v885_v57  ;;  %v889_v29 = vrot.slane %v885_v57, 4  ;;  %v1221_v1 = vshll.u32 %v7917_v32, 16  ;;  %v7943_v45 = vcombine.low %v7820_v44, %v1042_v0 }
  0xe2   : > { %v1032_v38 = vld [vmem:[#allocation2 + $0xc] sm:$0x1]  ;;  %v720_v6 = vsel %vm7504_vm5, 0, %v719_v16  ;;  %665 = vst [vmem:[#allocation2 + $0x88] sm:$0x1] %v664_v53  ;;  %v1235_v3 = vshll.u32 %v7929_v2, 16 }
  0xe3   : > { %v1018_v22 = vsel %vm7511_vm6, %v888_v60, %v1017_v21  ;;  %v1021_v23 = vsel %vm7494_vm3, %v889_v29, %v1020_v15  ;;  %721 = vst [vmem:[#allocation2 + $0x8c] sm:$0x1] %v720_v6  ;;  %v1036_v52 = vld [vmem:[#allocation2 + $0x1c] sm:$0x1]  ;;  %v1223_v48 = vrot.slane %v1221_v1, 1  ;;  %v1219_v49 = vshrl.u32 %v7917_v32, 16 }
  0xe4   : > { %1019 = vst [vmem:[#allocation2 + $0x78] sm:$0xf] %v1018_v22  ;;  %1022 = vst [vmem:[#allocation2 + $0x7c] sm:$0x1] %v1021_v23  ;;  %1144 = vrot.lane.b32.xlu0 %v7868_v18, %s7299_s17  ;;  %v7890_v63 = vld [vmem:[#allocation2 + $0x70] sm:$0xf]  ;;  %1142 = vrot.lane.b32.xlu1 %v7880_v54, %s7299_s17  ;;  %v7950_v8 = vcombine.low %v7786_v4, %v1036_v52 }
  0xe5   : > { %v7898_v36 = vld [vmem:[#allocation2 + $0x68] sm:$0xf]  ;;  %v7904_v13 = vcombine.low %v7890_v63, %v7890_v63  ;;  %v1046_v17 = vld [vmem:[#allocation2 + $0x44] sm:$0x1]  ;;  %v1249_v44 = vshll.u32 %v7943_v45, 16  ;;  %v1237_v20 = vrot.slane %v1235_v3, 1  ;;  %v7961_v51 = vor.u32 %v1223_v48, %v1219_v49 }
  0xe6   : > { %v7910_v39 = vcombine.low %v7898_v36, %v7898_v36  ;;  %12472 = vst [vmem:[#allocation9_spill] sm:$0xff] %v7950_v8  ;;  %v1040_v10 = vld [vmem:[#allocation2 + $0x2c] sm:$0x1]  ;;  %v7957_v50 = vcombine.low %v7836_v11, %v1046_v17  ;;  %v1050_v56 = vld [vmem:[#allocation2 + $0x54] sm:$0x1]  ;;  %v1233_v4 = vshrl.u32 %v7929_v2, 16 }
  0xe7   : > { %12473 = vst [vmem:[#allocation10_spill] sm:$0xff] %v7961_v51  ;;  %v1228_v26 = vshll.u32 %v7950_v8, 16  ;;  %v7966_v57 = vcombine.low %v7826_v43, %v1040_v10  ;;  %v1044_v21 = vld [vmem:[#allocation2 + $0x3c] sm:$0x1]  ;;  %v1251_v11 = vrot.slane %v1249_v44, 1  ;;  %v7972_v29 = vcombine.low %v7854_v14, %v1050_v56 }
  0xe8   : > { %1148 = vrot.lane.b32.xlu0 %v7888_v28, %s7299_s17  ;;  %1146 = vrot.lane.b32.xlu1 %v7896_v34, %s7299_s17  ;;  %v1263_v60 = vshll.u32 %v7957_v50, 16  ;;  %v7976_v22 = vor.u32 %v1237_v20, %v1233_v4  ;;  %v7980_v43 = vcombine.low %v7844_v55, %v1044_v21  ;;  %v1054_v41 = vld [vmem:[#allocation2 + $0x64] sm:$0x1]  ;;  %v1247_v37 = vshrl.u32 %v7943_v45, 16  ;;  %v1048_v1 = vld [vmem:[#allocation2 + $0x4c] sm:$0x1] }
  0xe9   : > { %12474 = vst [vmem:[#allocation11_spill] sm:$0xff] %v7966_v57  ;;  %v1230_v42 = vrot.slane %v1228_v26, 1  ;;  %v1242_v16 = vshll.u32 %v7966_v57, 16  ;;  %v1277_v53 = vshll.u32 %v7972_v29, 16  ;;  %v7991_v55 = vcombine.low %v7874_v24, %v1054_v41  ;;  %v1058_v48 = vld [vmem:[#allocation2 + $0x74] sm:$0x1] }
  0xea   : > { %12475 = vst [vmem:[#allocation12_spill] sm:$0xff] %v7976_v22  ;;  %12476 = vst [vmem:[#allocation13_spill] sm:$0xff] %v7980_v43  ;;  %v1265_v0 = vrot.slane %v1263_v60, 1  ;;  %v7995_v6 = vor.u32 %v1251_v11, %v1247_v37  ;;  %v1256_v52 = vshll.u32 %v7980_v43, 16  ;;  %v1261_v17 = vshrl.u32 %v7957_v50, 16 }
  0xeb   : > { %v7912_v40 = vld [vmem:[#allocation2 + $0x78] sm:$0xf]  ;;  %12477 = vst [vmem:[#allocation14_spill] sm:$0xff] %v7991_v55  ;;  %v1244_v3 = vrot.slane %v1242_v16, 1  ;;  %v8000_v49 = vcombine.low %v7862_v62, %v1048_v1  ;;  %v1240_v24 = vshrl.u32 %v7966_v57, 16  ;;  %v1279_v10 = vrot.slane %v1277_v53, 1 }
  0xec   : > { %1152 = vrot.lane.b32.xlu0 %v7904_v13, %s7299_s17  ;;  %1150 = vrot.lane.b32.xlu1 %v7910_v39, %s7299_s17  ;;  %v7923_v5 = vcombine.low %v7912_v40, %v7912_v40  ;;  %12478 = vst [vmem:[#allocation15_spill] sm:$0xff] %v7995_v6  ;;  %v1052_v44 = vld [vmem:[#allocation2 + $0x5c] sm:$0x1]  ;;  %v1291_v20 = vshll.u32 %v7991_v55, 16  ;;  %v8009_v56 = vcombine.low %v7890_v63, %v1058_v48  ;;  %v1258_v62 = vrot.slane %v1256_v52, 1 }
  0xed   : > { %12479 = vst [vmem:[#allocation16_spill] sm:$0xff] %v8000_v49  ;;  %v8013_v4 = vor.u32 %v1265_v0, %v1261_v17  ;;  %v1275_v26 = vshrl.u32 %v7972_v29, 16  ;;  %v1270_v21 = vshll.u32 %v8000_v49, 16  ;;  %v8022_v11 = vor.u32 %v1244_v3, %v1240_v24  ;;  %v1056_v63 = vld [vmem:[#allocation2 + $0x6c] sm:$0x1] }
  0xee   : > { %12481 = vst [vmem:[#allocation18_spill] sm:$0xff] %v8009_v56  ;;  %v1254_v60 = vshrl.u32 %v7980_v43, 16  ;;  %v1305_v41 = vshll.u32 %v8009_v56, 16  ;;  %v1289_v37 = vshrl.u32 %v7991_v55, 16  ;;  %v1060_v0 = vld [vmem:[#allocation2 + $0x7c] sm:$0x1] }
  0xef   : > { %12483 = vst [vmem:[#allocation20_spill] sm:$0xff] %v8022_v11  ;;  %v1268_v53 = vshrl.u32 %v8000_v49, 16  ;;  %v1303_v3 = vshrl.u32 %v8009_v56, 16  ;;  %v8047_v24 = vcombine.low %v7912_v40, %v1060_v0  ;;  %vm2166_vm7 = vsmask.f32 7440 }
  0xf0   : > { %1351 = vrot.lane.b32.xlu0 %v7768_v47, %s7300_s18  ;;  %1154 = vrot.lane.b32.xlu1 %v7923_v5, %s7299_s17  ;;  %v7938_v47 = vcombine.low %v7750_v35, %v1032_v38  ;;  %v1226_v38 = vshrl.u32 %v7950_v8, 16  ;;  %v8037_v1 = vor.u32 %v1258_v62, %v1254_v60  ;;  %v1307_v52 = vrot.slane %v1305_v41, 1  ;;  %vm9148_vm9 = vmor %vm2165_vm4, %vm2166_vm7 }
  0xf1   : > { %12486 = vst [vmem:[#allocation23_spill] sm:$0xff] %v8047_v24 }
  0xf2   : > { %12471 = vst [vmem:[#allocation8_spill] sm:$0xff] %v7938_v47  ;;  %v1214_v35 = vshll.u32 %v7938_v47, 16  ;;  %v1212_v23 = vshrl.u32 %v7938_v47, 16  ;;  %12485 = vst [vmem:[#allocation22_spill] sm:$0xff] %v8037_v1 }
  0xf4   : > { %1355 = vrot.lane.b32.xlu0 %v7807_v19, %s7300_s18  ;;  %1353 = vrot.lane.b32.xlu1 %v7764_v46, %s7300_s18  ;;  %v1216_v15 = vrot.slane %v1214_v35, 1  ;;  %v8004_v35 = vor.u32 %v1230_v42, %v1226_v38  ;;  %v8028_v42 = vor.u32 %v1279_v10, %v1275_v26  ;;  %v8033_v38 = vcombine.low %v7898_v36, %v1056_v63 }
  0xf5   : > { %v1312_v26 = vshll.u32 %v8047_v24, 16 }
  0xf6   : > { %v7986_v14 = vor.u32 %v1216_v15, %v1212_v23  ;;  %12480 = vst [vmem:[#allocation17_spill] sm:$0xff] %v8004_v35  ;;  %v8018_v15 = vcombine.low %v7882_v25, %v1052_v44  ;;  %v1293_v23 = vrot.slane %v1291_v20, 1  ;;  %v1272_v25 = vrot.slane %v1270_v21, 1  ;;  %12484 = vst [vmem:[#allocation21_spill] sm:$0xff] %v8033_v38 }
  0xf7   : > { %v1298_v36 = vshll.u32 %v8033_v38, 16  ;;  %v8056_v20 = vor.u32 %v1307_v52, %v1303_v3  ;;  %v1296_v21 = vshrl.u32 %v8033_v38, 16  ;;  %v1314_v63 = vrot.slane %v1312_v26, 1 }
  0xf8   : > { %1359 = vrot.lane.b32.xlu0 %v7842_v12, %s7300_s18  ;;  %1357 = vrot.lane.b32.xlu1 %v7801_v30, %s7300_s18  ;;  %12482 = vst [vmem:[#allocation19_spill] sm:$0xff] %v8018_v15  ;;  %v1284_v16 = vshll.u32 %v8018_v15, 16  ;;  %v8042_v48 = vor.u32 %v1293_v23, %v1289_v37  ;;  %v8051_v44 = vor.u32 %v1272_v25, %v1268_v53  ;;  %v1282_v10 = vshrl.u32 %v8018_v15, 16  ;;  %v1061_v37 = vld [vmem:[#allocation2 + $0x80] sm:$0xf] }
  0xf9   : > { %12488 = vst [vmem:[#allocation25_spill] sm:$0xff] %v8056_v20  ;;  %v1300_v62 = vrot.slane %v1298_v36, 1  ;;  %v1310_v23 = vshrl.u32 %v8047_v24, 16  ;;  %v8097_v25 = vcombine.low %v1061_v37, %v1061_v37  ;;  %v1062_v53 = vld [vmem:[#allocation2 + $0x84] sm:$0x1] }
  0xfa   : > { %v1286_v17 = vrot.slane %v1284_v16, 1  ;;  %12487 = vst [vmem:[#allocation24_spill] sm:$0xff] %v8051_v44  ;;  %v8105_v16 = vpop.permute.xlu0 %1124  ;;  %v8123_v3 = vcombine.low %v1061_v37, %v1062_v53 }
  0xfb   : > { %v8068_v60 = vor.u32 %v1300_v62, %v1296_v21  ;;  %v8075_v41 = vor.u32 %v1314_v63, %v1310_v23 }
  0xfc   : > { %1320 = vrot.lane.b32.xlu0 %v7961_v51, %s7298_s16  ;;  %1361 = vrot.lane.b32.xlu1 %v7834_v9, %s7300_s18  ;;  %v8061_v40 = vor.u32 %v1286_v17, %v1282_v10  ;;  %12489 = vst [vmem:[#allocation26_spill] sm:$0xff] %v8123_v3  ;;  %v1389_v10 = vshll.u32 %v8123_v3, 16  ;;  %v1387_v63 = vshrl.u32 %v8123_v3, 16 }
  0xfe   : > { %v8113_v0 = vpop.permute.xlu0 %1316  ;;  %v1391_v26 = vrot.slane %v1389_v10, 1 }
 0x100   : > { %1324 = vrot.lane.b32.xlu0 %v7976_v22, %s7298_s16  ;;  %1318 = vrot.lane.b32.xlu1 %v7986_v14, %s7298_s16  ;;  %v8151_v37 = vor.u32 %v1391_v26, %v1387_v63 }
 0x102   : > { %12490 = vst [vmem:[#allocation27_spill] sm:$0xff] %v8151_v37 }
 0x104   : > { %1328 = vrot.lane.b32.xlu0 %v7995_v6, %s7298_s16  ;;  %1322 = vrot.lane.b32.xlu1 %v8004_v35, %s7298_s16 }
 0x108   : > { %1332 = vrot.lane.b32.xlu0 %v8013_v4, %s7298_s16  ;;  %1326 = vrot.lane.b32.xlu1 %v8022_v11, %s7298_s16 }
 0x10c   : > { %1336 = vrot.lane.b32.xlu0 %v8028_v42, %s7298_s16  ;;  %1330 = vrot.lane.b32.xlu1 %v8037_v1, %s7298_s16 }
 0x110   : > { %1340 = vrot.lane.b32.xlu0 %v8042_v48, %s7298_s16  ;;  %1334 = vrot.lane.b32.xlu1 %v8051_v44, %s7298_s16 }
 0x114   : > { %1344 = vrot.lane.b32.xlu0 %v8056_v20, %s7298_s16  ;;  %1338 = vrot.lane.b32.xlu1 %v8061_v40, %s7298_s16 }
 0x118   : > { %1363 = vrot.lane.b32.xlu0 %v7860_v61, %s7300_s18  ;;  %1342 = vrot.lane.b32.xlu1 %v8068_v60, %s7298_s16 }
 0x11c   : > { %1367 = vrot.lane.b32.xlu0 %v7880_v54, %s7300_s18  ;;  %1346 = vrot.lane.b32.xlu1 %v8075_v41, %s7298_s16 }
 0x120   : > { %1371 = vrot.lane.b32.xlu0 %v7896_v34, %s7300_s18  ;;  %1365 = vrot.lane.b32.xlu1 %v7852_v58, %s7300_s18 }
 0x124   : > { %1375 = vrot.lane.b32.xlu0 %v7910_v39, %s7300_s18  ;;  %1369 = vrot.lane.b32.xlu1 %v7868_v18, %s7300_s18 }
 0x128   : > { %1379 = vrot.lane.b32.xlu0 %v7923_v5, %s7300_s18  ;;  %1373 = vrot.lane.b32.xlu1 %v7888_v28, %s7300_s18 }
 0x12c   : > { %1393 = vrot.lane.b32.xlu0 %v7986_v14, %s7301_s19  ;;  %1377 = vrot.lane.b32.xlu1 %v7904_v13, %s7300_s18 }
 0x130   : > { %1397 = vrot.lane.b32.xlu0 %v8004_v35, %s7301_s19  ;;  %1381 = vrot.lane.b32.xlu1 %v8097_v25, %s7300_s18 }
 0x134   : > { %1401 = vrot.lane.b32.xlu0 %v8022_v11, %s7301_s19  ;;  %1395 = vrot.lane.b32.xlu1 %v7961_v51, %s7301_s19 }
 0x138   : > { %1405 = vrot.lane.b32.xlu0 %v8037_v1, %s7301_s19  ;;  %1399 = vrot.lane.b32.xlu1 %v7976_v22, %s7301_s19 }
 0x13c   : > { %1409 = vrot.lane.b32.xlu0 %v8051_v44, %s7301_s19  ;;  %1403 = vrot.lane.b32.xlu1 %v7995_v6, %s7301_s19 }
 0x140   : > { %1413 = vrot.lane.b32.xlu0 %v8061_v40, %s7301_s19  ;;  %1407 = vrot.lane.b32.xlu1 %v8013_v4, %s7301_s19 }
 0x144   : > { %1417 = vrot.lane.b32.xlu0 %v8068_v60, %s7301_s19  ;;  %1411 = vrot.lane.b32.xlu1 %v8028_v42, %s7301_s19 }
 0x145   : > { %v8121_v52 = vpop.permute.xlu0 %1128  ;;  %v8127_v17 = vpop.permute.xlu1 %1126 }
 0x148   : > { %1421 = vrot.lane.b32.xlu0 %v8075_v41, %s7301_s19  ;;  %1415 = vrot.lane.b32.xlu1 %v8042_v48, %s7301_s19 }
 0x14a   : > { %v8133_v36 = vpop.permute.xlu0 %1132  ;;  %v8138_v62 = vpop.permute.xlu1 %1130 }
 0x14c   : > { %1428 = vrot.lane.b32.xlu0 %v7764_v46, %s7302_s20  ;;  %1419 = vrot.lane.b32.xlu1 %v8056_v20, %s7301_s19 }
 0x14e   : > { %v8144_v21 = vpop.permute.xlu0 %1136  ;;  %v8147_v23 = vpop.permute.xlu1 %1134 }
 0x150   : > { %1432 = vrot.lane.b32.xlu0 %v7801_v30, %s7302_s20  ;;  %1423 = vrot.lane.b32.xlu1 %v8151_v37, %s7301_s19 }
 0x152   : > { %v8155_v53 = vpop.permute.xlu0 %1140  ;;  %v8157_v46 = vpop.permute.xlu1 %1138 }
 0x154   : > { %1436 = vrot.lane.b32.xlu0 %v7834_v9, %s7302_s20  ;;  %1430 = vrot.lane.b32.xlu1 %v7807_v19, %s7302_s20  ;;  %v7240_v19 = vld [vmem:[%s12342_s2 + $0x20] ss:$0 sps:$4 sm:$0xff]  }
 0x155   : > { %7113 = vmatprep.subr.msk.bf16.mxu0 %vm2532_vm10, %v7240_v19 }
 0x156   : > { %v8163_v10 = vpop.permute.xlu0 %1144  ;;  %v8165_v33 = vpop.permute.xlu1 %1142 }
 0x157   : > { %12491 = vst [vmem:[#allocation28_spill] sm:$0xff] %v8163_v10  ;;  %12492 = vst [vmem:[#allocation29_spill] sm:$0xff] %v8165_v33 }
 0x158   : > { %1440 = vrot.lane.b32.xlu0 %v7852_v58, %s7302_s20  ;;  %1434 = vrot.lane.b32.xlu1 %v7842_v12, %s7302_s20  ;;  %v2534_v12 = vsel %vm2532_vm10, %v7240_v19, 0 }
 0x159   : > { %7030 = vmatpush3.bf16.msra.mxu0 %v2534_v12 }
 0x15a   : > { %v8171_v30 = vpop.permute.xlu0 %1148  ;;  %v8173_v26 = vpop.permute.xlu1 %1146 }
 0x15b   : > { %12493 = vst [vmem:[#allocation30_spill] sm:$0xff] %v8171_v30  ;;  %12494 = vst [vmem:[#allocation31_spill] sm:$0xff] %v8173_v26 }
 0x15c   : > { %1444 = vrot.lane.b32.xlu0 %v7868_v18, %s7302_s20  ;;  %1438 = vrot.lane.b32.xlu1 %v7860_v61, %s7302_s20  ;;  %v7241_v18 = vld [vmem:[%s12342_s2 + $0x18] sm:$0xff]  }
 0x15d   : > { %7031 = vmatprep.subr.bf16.mxu0 %v7241_v18 }
 0x15e   : > { %v8182_v9 = vpop.permute.xlu0 %1152  ;;  %v8186_v58 = vpop.permute.xlu1 %1150  ;;  %7032 = vmatpush3.bf16.msra.mxu0 %v7241_v18  ;;  %v1063_v18 = vld [vmem:[#allocation2 + $0x88] sm:$0xf] }
 0x15f   : > { %12495 = vst [vmem:[#allocation32_spill] sm:$0xff] %v8182_v9  ;;  %12496 = vst [vmem:[#allocation33_spill] sm:$0xff] %v8186_v58  ;;  %v1064_v9 = vld [vmem:[#allocation2 + $0x8c] sm:$0x1] }
 0x160   : > { %1448 = vrot.lane.b32.xlu0 %v7888_v28, %s7302_s20  ;;  %1442 = vrot.lane.b32.xlu1 %v7880_v54, %s7302_s20  ;;  %v7242_v28 = vld [vmem:[%s12342_s2 + $0x10] sm:$0xff]   ;;  %v8265_v26 = vcombine.low %v1063_v18, %v1064_v9 }
 0x161   : > { %7033 = vmatprep.subr.bf16.mxu0 %v7242_v28 }
 0x162   : > { %v8195_v61 = vpop.permute.xlu0 %1351  ;;  %v8197_v63 = vpop.permute.xlu1 %1154  ;;  %7034 = vmatpush3.bf16.msra.mxu0 %v7242_v28  ;;  %v6690_v28 = vcombine.low %v1063_v18, %v1063_v18  ;;  %12500 = vst [vmem:[#allocation37_spill] sm:$0xff] %v8265_v26  ;;  %v1466_v10 = vshll.u32 %v8265_v26, 16  ;;  %v1464_v18 = vshrl.u32 %v8265_v26, 16 }
 0x163   : > { %12497 = vst [vmem:[#allocation34_spill] sm:$0xff] %v8197_v63 }
 0x164   : > { %1452 = vrot.lane.b32.xlu0 %v7904_v13, %s7302_s20  ;;  %1446 = vrot.lane.b32.xlu1 %v7896_v34, %s7302_s20  ;;  %v7243_v13 = vld [vmem:[%s12342_s2 + $0x8] sm:$0xff]  }
 0x165   : > { %7035 = vmatprep.subr.bf16.mxu0 %v7243_v13 }
 0x166   : > { %v8206_v19 = vpop.permute.xlu0 %1355  ;;  %v8208_v54 = vpop.permute.xlu1 %1353  ;;  %7036 = vmatpush3.bf16.msra.mxu0 %v7243_v13 }
 0x168   : > { %1456 = vrot.lane.b32.xlu0 %v8097_v25, %s7302_s20  ;;  %1450 = vrot.lane.b32.xlu1 %v7910_v39, %s7302_s20  ;;  %v7244_v39 = vld [vmem:[%s12342_s2] sm:$0xff]  }
 0x169   : > { %7037 = vmatprep.subr.bf16.mxu0 %v7244_v39 }
 0x16a   : > { %v8217_v12 = vpop.permute.xlu0 %1359  ;;  %v8219_v34 = vpop.permute.xlu1 %1357  ;;  %7038 = vmatpush3.bf16.msra.mxu0 %v7244_v39 }
 0x16c   : > { %1470 = vrot.lane.b32.xlu0 %v7961_v51, %s7303_s9  ;;  %1454 = vrot.lane.b32.xlu1 %v7923_v5, %s7302_s20 }
 0x16e   : > { %v8225_v25 = vpop.permute.xlu0 %1320  ;;  %v8230_v31 = vpop.permute.xlu1 %1361 }
 0x16f   : > { %12498 = vst [vmem:[#allocation35_spill] sm:$0xff] %v8230_v31 }
 0x170   : > { %1474 = vrot.lane.b32.xlu0 %v7976_v22, %s7303_s9  ;;  %1458 = vrot.lane.b32.xlu1 %v6690_v28, %s7302_s20 }
 0x172   : > { %v8235_v27 = vpop.permute.xlu0 %1324  ;;  %v8237_v13 = vpop.permute.xlu1 %1318 }
 0x174   : > { %1478 = vrot.lane.b32.xlu0 %v7995_v6, %s7303_s9  ;;  %1472 = vrot.lane.b32.xlu1 %v8004_v35, %s7303_s9 }
 0x176   : > { %v8243_v5 = vpop.permute.xlu0 %1328  ;;  %v8245_v7 = vpop.permute.xlu1 %1322 }
 0x178   : > { %1482 = vrot.lane.b32.xlu0 %v8013_v4, %s7303_s9  ;;  %1476 = vrot.lane.b32.xlu1 %v8022_v11, %s7303_s9 }
 0x17a   : > { %v8251_v28 = vpop.permute.xlu0 %1332  ;;  %v8253_v39 = vpop.permute.xlu1 %1326 }
 0x17c   : > { %1486 = vrot.lane.b32.xlu0 %v8028_v42, %s7303_s9  ;;  %1480 = vrot.lane.b32.xlu1 %v8037_v1, %s7303_s9 }
 0x17e   : > { %v8259_v63 = vpop.permute.xlu0 %1336  ;;  %v8261_v58 = vpop.permute.xlu1 %1330 }
 0x17f   : > { %12499 = vst [vmem:[#allocation36_spill] sm:$0xff] %v8259_v63 }
 0x180   : > { %1490 = vrot.lane.b32.xlu0 %v8042_v48, %s7303_s9  ;;  %1484 = vrot.lane.b32.xlu1 %v8051_v44, %s7303_s9 }
 0x182   : > { %v8269_v30 = vpop.permute.xlu0 %1340  ;;  %v8271_v33 = vpop.permute.xlu1 %1334 }
 0x183   : > { %12501 = vst [vmem:[#allocation38_spill] sm:$0xff] %v8269_v30  ;;  %12502 = vst [vmem:[#allocation39_spill] sm:$0xff] %v8271_v33  ;;  %v1468_v30 = vrot.slane %v1466_v10, 1 }
 0x184   : > { %1494 = vrot.lane.b32.xlu0 %v8056_v20, %s7303_s9  ;;  %1488 = vrot.lane.b32.xlu1 %v8061_v40, %s7303_s9 }
 0x186   : > { %v8277_v31 = vpop.permute.xlu0 %1344  ;;  %v8280_v63 = vpop.permute.xlu1 %1338 }
 0x187   : > { %12503 = vst [vmem:[#allocation40_spill] sm:$0xff] %v8277_v31  ;;  %12504 = vst [vmem:[#allocation41_spill] sm:$0xff] %v8280_v63  ;;  %v8297_v63 = vor.u32 %v1468_v30, %v1464_v18 }
 0x188   : > { %1498 = vrot.lane.b32.xlu0 %v8151_v37, %s7303_s9  ;;  %1492 = vrot.lane.b32.xlu1 %v8068_v60, %s7303_s9 }
 0x189   : > { %12507 = vst [vmem:[#allocation44_spill] sm:$0xff] %v8297_v63 }
 0x18a   : > { %v8286_v9 = vpop.permute.xlu0 %1363  ;;  %v8289_v33 = vpop.permute.xlu1 %1342 }
 0x18b   : > { %12505 = vst [vmem:[#allocation42_spill] sm:$0xff] %v8289_v33 }
 0x18c   : > { %1733 = vrot.lane.b32.xlu0 %v7636_v59, %s7300_s18  ;;  %1496 = vrot.lane.b32.xlu1 %v8075_v41, %s7303_s9 }
 0x18e   : > { %v8295_v31 = vpop.permute.xlu0 %1367  ;;  %v8299_v37 = vpop.permute.xlu1 %1346 }
 0x18f   : > { %12506 = vst [vmem:[#allocation43_spill] sm:$0xff] %v8295_v31  ;;  %12508 = vst [vmem:[#allocation45_spill] sm:$0xff] %v8299_v37 }
 0x190   : > { %1737 = vrot.lane.b32.xlu0 %v7961_v51, %s7300_s18  ;;  %1500 = vrot.lane.b32.xlu1 %v8297_v63, %s7303_s9 }
 0x192   : > { %v8305_v10 = vpop.permute.xlu0 %1371  ;;  %v8307_v26 = vpop.permute.xlu1 %1365 }
 0x193   : > { %12509 = vst [vmem:[#allocation46_spill] sm:$0xff] %v8305_v10  ;;  %12510 = vst [vmem:[#allocation47_spill] sm:$0xff] %v8307_v26 }
 0x194   : > { %1741 = vrot.lane.b32.xlu0 %v7976_v22, %s7300_s18  ;;  %1735 = vrot.lane.b32.xlu1 %v7986_v14, %s7300_s18 }
 0x196   : > { %v8313_v59 = vpop.permute.xlu0 %1375  ;;  %v8315_v30 = vpop.permute.xlu1 %1369 }
 0x197   : > { %12511 = vst [vmem:[#allocation48_spill] sm:$0xff] %v8313_v59  ;;  %12512 = vst [vmem:[#allocation49_spill] sm:$0xff] %v8315_v30 }
 0x198   : > { %1745 = vrot.lane.b32.xlu0 %v7995_v6, %s7300_s18  ;;  %1739 = vrot.lane.b32.xlu1 %v8004_v35, %s7300_s18 }
 0x19a   : > { %v8321_v18 = vpop.permute.xlu0 %1379  ;;  %v8323_v63 = vpop.permute.xlu1 %1373 }
 0x19b   : > { %12513 = vst [vmem:[#allocation50_spill] sm:$0xff] %v8321_v18  ;;  %12514 = vst [vmem:[#allocation51_spill] sm:$0xff] %v8323_v63 }
 0x19c   : > { %1749 = vrot.lane.b32.xlu0 %v8013_v4, %s7300_s18  ;;  %1743 = vrot.lane.b32.xlu1 %v8022_v11, %s7300_s18 }
 0x19e   : > { %v8329_v37 = vpop.permute.xlu0 %1393  ;;  %v8331_v59 = vpop.permute.xlu1 %1377 }
 0x19f   : > { %12515 = vst [vmem:[#allocation52_spill] sm:$0xff] %v8331_v59 }
 0x1a0   : > { %1753 = vrot.lane.b32.xlu0 %v8028_v42, %s7300_s18  ;;  %1747 = vrot.lane.b32.xlu1 %v8037_v1, %s7300_s18 }
 0x1a2   : > { %v8337_v10 = vpop.permute.xlu0 %1397  ;;  %v8339_v18 = vpop.permute.xlu1 %1381 }
 0x1a3   : > { %12516 = vst [vmem:[#allocation53_spill] sm:$0xff] %v8339_v18 }
 0x1a4   : > { %1757 = vrot.lane.b32.xlu0 %v8042_v48, %s7300_s18  ;;  %1751 = vrot.lane.b32.xlu1 %v8051_v44, %s7300_s18 }
 0x1a6   : > { %v8345_v63 = vpop.permute.xlu0 %1401  ;;  %v8347_v33 = vpop.permute.xlu1 %1395 }
 0x1a8   : > { %1761 = vrot.lane.b32.xlu0 %v8056_v20, %s7300_s18  ;;  %1755 = vrot.lane.b32.xlu1 %v8061_v40, %s7300_s18 }
 0x1aa   : > { %v8353_v59 = vpop.permute.xlu0 %1405  ;;  %v8355_v30 = vpop.permute.xlu1 %1399 }
 0x1ac   : > { %1765 = vrot.lane.b32.xlu0 %v7938_v47, %s7304_s12  ;;  %1759 = vrot.lane.b32.xlu1 %v8068_v60, %s7300_s18 }
 0x1ae   : > { %v8361_v18 = vpop.permute.xlu0 %1409  ;;  %v8363_v31 = vpop.permute.xlu1 %1403 }
 0x1af   : > { %12517 = vst [vmem:[#allocation54_spill] sm:$0xff] %v8361_v18 }
 0x1b0   : > { %1769 = vrot.lane.b32.xlu0 %v7950_v8, %s7304_s12  ;;  %1763 = vrot.lane.b32.xlu1 %v8075_v41, %s7300_s18 }
 0x1b2   : > { %v8369_v26 = vpop.permute.xlu0 %1413  ;;  %v8371_v20 = vpop.permute.xlu1 %1407 }
 0x1b3   : > { %12518 = vst [vmem:[#allocation55_spill] sm:$0xff] %v8369_v26 }
 0x1b4   : > { %1773 = vrot.lane.b32.xlu0 %v7966_v57, %s7304_s12  ;;  %1767 = vrot.lane.b32.xlu1 %v7917_v32, %s7304_s12 }
 0x1b6   : > { %v8377_v47 = vpop.permute.xlu0 %1417  ;;  %v8379_v18 = vpop.permute.xlu1 %1411 }
 0x1b7   : > { %12519 = vst [vmem:[#allocation56_spill] sm:$0xff] %v8377_v47 }
 0x1b8   : > { %1777 = vrot.lane.b32.xlu0 %v7980_v43, %s7304_s12  ;;  %1771 = vrot.lane.b32.xlu1 %v7929_v2, %s7304_s12 }
 0x1ba   : > { %v8385_v8 = vpop.permute.xlu0 %1421  ;;  %v8387_v26 = vpop.permute.xlu1 %1415 }
 0x1bb   : > { %12520 = vst [vmem:[#allocation57_spill] sm:$0xff] %v8385_v8  ;;  %12521 = vst [vmem:[#allocation58_spill] sm:$0xff] %v8387_v26 }
 0x1bc   : > { %1781 = vrot.lane.b32.xlu0 %v8000_v49, %s7304_s12  ;;  %1775 = vrot.lane.b32.xlu1 %v7943_v45, %s7304_s12 }
 0x1be   : > { %v8393_v57 = vpop.permute.xlu0 %1428  ;;  %v8395_v47 = vpop.permute.xlu1 %1419 }
 0x1bf   : > { %12522 = vst [vmem:[#allocation59_spill] sm:$0xff] %v8395_v47 }
 0x1c0   : > { %1785 = vrot.lane.b32.xlu0 %v8018_v15, %s7304_s12  ;;  %1779 = vrot.lane.b32.xlu1 %v7957_v50, %s7304_s12 }
 0x1c2   : > { %v8401_v43 = vpop.permute.xlu0 %1432  ;;  %v8403_v8 = vpop.permute.xlu1 %1423 }
 0x1c3   : > { %12523 = vst [vmem:[#allocation60_spill] sm:$0xff] %v8403_v8 }
 0x1c4   : > { %1789 = vrot.lane.b32.xlu0 %v8033_v38, %s7304_s12  ;;  %1783 = vrot.lane.b32.xlu1 %v7972_v29, %s7304_s12 }
 0x1c6   : > { %v8409_v49 = vpop.permute.xlu0 %1436  ;;  %v8411_v26 = vpop.permute.xlu1 %1430 }
 0x1c8   : > { %1793 = vrot.lane.b32.xlu0 %v8047_v24, %s7304_s12  ;;  %1787 = vrot.lane.b32.xlu1 %v7991_v55, %s7304_s12 }
 0x1ca   : > { %v8417_v15 = vpop.permute.xlu0 %1440  ;;  %v8419_v47 = vpop.permute.xlu1 %1434 }
 0x1cc   : > { %1797 = vrot.lane.b32.xlu0 %v7986_v14, %s7302_s20  ;;  %1791 = vrot.lane.b32.xlu1 %v8009_v56, %s7304_s12 }
 0x1ce   : > { %v8425_v38 = vpop.permute.xlu0 %1444  ;;  %v8427_v8 = vpop.permute.xlu1 %1438 }
 0x1d0   : > { %1801 = vrot.lane.b32.xlu0 %v8004_v35, %s7302_s20  ;;  %1795 = vrot.lane.b32.xlu1 %v8123_v3, %s7304_s12 }
 0x1d2   : > { %v8433_v24 = vpop.permute.xlu0 %1448  ;;  %v8435_v55 = vpop.permute.xlu1 %1442 }
 0x1d4   : > { %1805 = vrot.lane.b32.xlu0 %v8022_v11, %s7302_s20  ;;  %1799 = vrot.lane.b32.xlu1 %v7961_v51, %s7302_s20  ;;  %v1504_v11 = vsel %vm544_vm8, %v8105_v16, %v8113_v0  ;;  %v1507_v51 = vsel %vm544_vm8, %v8127_v17, %v8237_v13  ;;  %v1516_v17 = vsel %vm544_vm8, %v8133_v36, %v8235_v27 }
 0x1d5   : > { %v1552_v16 = vsel %vm1550_vm11, %v1507_v51, %v8237_v13  ;;  %v1555_v36 = vsel %vm1550_vm11, %v1516_v17, %v8235_v27  ;;  %v1519_v27 = vsel %vm544_vm8, %v8147_v23, %v8253_v39 }
 0x1d6   : > { %v8441_v14 = vpop.permute.xlu0 %1452  ;;  %v8443_v56 = vpop.permute.xlu1 %1446  ;;  %v1577_v13 = vsel %vm1567_vm12, %v1555_v36, %v8217_v12  ;;  %v1556_v12 = vsel %vm1550_vm11, %v1519_v27, %v8253_v39 }
 0x1d8   : > { %1809 = vrot.lane.b32.xlu0 %v8037_v1, %s7302_s20  ;;  %1803 = vrot.lane.b32.xlu1 %v7976_v22, %s7302_s20  ;;  %v1510_v22 = vsel %vm544_vm8, %v8121_v52, %v8225_v25  ;;  %v1513_v52 = vsel %vm544_vm8, %v8138_v62, %v8245_v7 }
 0x1d9   : > { %v1554_v62 = vsel %vm1550_vm11, %v1513_v52, %v8245_v7  ;;  %v1528_v7 = vsel %vm544_vm8, %v8155_v53, %v8251_v28 }
 0x1da   : > { %v8449_v35 = vpop.permute.xlu0 %1456  ;;  %v8451_v3 = vpop.permute.xlu1 %1450 }
 0x1db   : > { %12524 = vst [vmem:[#allocation61_spill] sm:$0xff] %v8449_v35 }
 0x1dc   : > { %1813 = vrot.lane.b32.xlu0 %v8051_v44, %s7302_s20  ;;  %1807 = vrot.lane.b32.xlu1 %v7995_v6, %s7302_s20  ;;  %v1551_v44 = vsel %vm1550_vm11, %v1504_v11, %v8113_v0  ;;  %v1553_v11 = vsel %vm1550_vm11, %v1510_v22, %v8225_v25  ;;  %v1522_v22 = vsel %vm544_vm8, %v8144_v21, %v8243_v5 }
 0x1dd   : > { %v1569_v6 = vsel %vm1567_vm12, %v1551_v44, %v8195_v61  ;;  %v1571_v44 = vsel %vm1567_vm12, %v1552_v16, %v8208_v54  ;;  %v1573_v54 = vsel %vm1567_vm12, %v1553_v11, %v8206_v19  ;;  %v1575_v19 = vsel %vm1567_vm12, %v1554_v62, %v8219_v34  ;;  %v12525_v34 = vld [vmem:[#allocation36_spill] sm:$0xff] }
 0x1de   : > { %v1471_v1 = vpop.permute.xlu0 %1470  ;;  %v8473_v35 = vpop.permute.xlu1 %1454  ;;  %v1602_v51 = vsel %vm1600_vm13, %v1569_v6, %v8329_v37  ;;  %v1604_v6 = vsel %vm1600_vm13, %v1571_v44, %v8347_v33  ;;  %v1606_v25 = vsel %vm1600_vm13, %v1573_v54, %v8337_v10  ;;  %v1608_v52 = vsel %vm1600_vm13, %v1575_v19, %v8355_v30 }
 0x1df   : > { %v1634_v21 = vsel %vm1633_vm14, %v1602_v51, %v8329_v37  ;;  %v1557_v37 = vsel %vm1550_vm11, %v1522_v22, %v8243_v5  ;;  %v1635_v53 = vsel %vm1633_vm14, %v1604_v6, %v8347_v33  ;;  %v1525_v33 = vsel %vm544_vm8, %v8157_v46, %v8261_v58  ;;  %v12526_v51 = vld [vmem:[#allocation28_spill] sm:$0xff]  ;;  %v12527_v6 = vld [vmem:[#allocation35_spill] sm:$0xff] }
 0x1e0   : > { %1817 = vrot.lane.b32.xlu0 %v8061_v40, %s7302_s20  ;;  %1811 = vrot.lane.b32.xlu1 %v8013_v4, %s7302_s20  ;;  %v1652_v16 = vsel %vm1650_vm15, %v1634_v21, %v8393_v57  ;;  %v1559_v57 = vsel %vm1550_vm11, %v1528_v7, %v8251_v28  ;;  %v1654_v5 = vsel %vm1650_vm15, %v1635_v53, %v8411_v26 }
 0x1e1   : > { %v1685_v17 = vsel %vm1683_vm0, %v1652_v16, %v1471_v1  ;;  %v1534_v39 = vsel %vm544_vm8, %v12526_v51, %v12525_v34  ;;  %v1636_v28 = vsel %vm1633_vm14, %v1606_v25, %v8337_v10  ;;  %v1610_v26 = vsel %vm1600_vm13, %v1577_v13, %v8345_v63  ;;  %v12529_v16 = vld [vmem:[#allocation29_spill] sm:$0xff] }
 0x1e2   : > { %v1475_v0 = vpop.permute.xlu0 %1474  ;;  %v8499_v61 = vpop.permute.xlu1 %1458  ;;  %v1656_v44 = vsel %vm1650_vm15, %v1636_v28, %v8401_v43  ;;  %v1717_v46 = vsel %vm1716_vm1, %v1685_v17, %v1471_v1  ;;  %v1637_v10 = vsel %vm1633_vm14, %v1608_v52, %v8355_v30  ;;  %v1579_v27 = vsel %vm1567_vm12, %v1556_v12, %v12527_v6  ;;  %v12528_v30 = vld [vmem:[#allocation39_spill] sm:$0xff] }
 0x1e3   : > { %v1689_v7 = vsel %vm1683_vm0, %v1656_v44, %v1475_v0  ;;  %v1558_v43 = vsel %vm1550_vm11, %v1525_v33, %v8261_v58  ;;  %v1561_v54 = vsel %vm1550_vm11, %v1534_v39, %v12525_v34  ;;  %v1612_v1 = vsel %vm1600_vm13, %v1579_v27, %v8363_v31  ;;  %v12532_v39 = vld [vmem:[#allocation38_spill] sm:$0xff] }
 0x1e4   : > { %1821 = vrot.lane.b32.xlu0 %v8068_v60, %s7302_s20  ;;  %1815 = vrot.lane.b32.xlu1 %v8028_v42, %s7302_s20  ;;  %v1658_v25 = vsel %vm1650_vm15, %v1637_v10, %v8419_v47  ;;  %v1531_v53 = vsel %vm544_vm8, %v12529_v16, %v12528_v30  ;;  %v1581_v58 = vsel %vm1567_vm12, %v1557_v37, %v8286_v9  ;;  %v12531_v37 = vld [vmem:[#allocation47_spill] sm:$0xff] }
 0x1e5   : > { %v1638_v19 = vsel %vm1633_vm14, %v1610_v26, %v8345_v63  ;;  %v1614_v47 = vsel %vm1600_vm13, %v1581_v58, %v8353_v59  ;;  %v1719_v52 = vsel %vm1716_vm1, %v1689_v7, %v1475_v0  ;;  %v1583_v63 = vsel %vm1567_vm12, %v1558_v43, %v12531_v37  ;;  %v12533_v0 = vld [vmem:[#allocation30_spill] sm:$0xff]  ;;  %v12536_v10 = vld [vmem:[#allocation43_spill] sm:$0xff] }
 0x1e6   : > { %v1479_v23 = vpop.permute.xlu0 %1478  ;;  %v1473_v11 = vpop.permute.xlu1 %1472  ;;  %v1660_v12 = vsel %vm1650_vm15, %v1638_v19, %v8409_v49  ;;  %v1639_v33 = vsel %vm1633_vm14, %v1612_v1, %v8363_v31  ;;  %v1560_v49 = vsel %vm1550_vm11, %v1531_v53, %v12528_v30  ;;  %v1540_v28 = vsel %vm544_vm8, %v12533_v0, %v12532_v39  ;;  %v12534_v31 = vld [vmem:[#allocation41_spill] sm:$0xff] }
 0x1e7   : > { %v1687_v36 = vsel %vm1683_vm0, %v1654_v5, %v1473_v11  ;;  %v1693_v34 = vsel %vm1683_vm0, %v1660_v12, %v1479_v23  ;;  %v1662_v26 = vsel %vm1650_vm15, %v1639_v33, %v8427_v8  ;;  %v1585_v6 = vsel %vm1567_vm12, %v1559_v57, %v12536_v10  ;;  %v12539_v30 = vld [vmem:[#allocation49_spill] sm:$0xff]  ;;  %v12548_v10 = vld [vmem:[#allocation58_spill] sm:$0xff] }
 0x1e8   : > { %1825 = vrot.lane.b32.xlu0 %v8075_v41, %s7302_s20  ;;  %1819 = vrot.lane.b32.xlu1 %v8042_v48, %s7302_s20  ;;  %v1718_v22 = vsel %vm1716_vm1, %v1687_v36, %v1473_v11  ;;  %v12530_v11 = vld [vmem:[#allocation25_spill] sm:$0xff]  ;;  %v1616_v36 = vsel %vm1600_vm13, %v1583_v63, %v8371_v20  ;;  %v1640_v27 = vsel %vm1633_vm14, %v1614_v47, %v8353_v59 }
 0x1e9   : > { %v6724_v21 = vcombine.low %v1717_v46, %v1718_v22  ;;  %v12535_v46 = vld [vmem:[#allocation31_spill] sm:$0xff]  ;;  %v1664_v43 = vsel %vm1650_vm15, %v1640_v27, %v8417_v15  ;;  %v1721_v1 = vsel %vm1716_vm1, %v1693_v34, %v1479_v23  ;;  %v1587_v59 = vsel %vm1567_vm12, %v1560_v49, %v12539_v30  ;;  %v12541_v12 = vld [vmem:[#allocation33_spill] sm:$0xff] }
 0x1ea   : > { %v8553_v62 = vpop.permute.xlu0 %1482  ;;  %v1477_v13 = vpop.permute.xlu1 %1476  ;;  %v1537_v22 = vsel %vm544_vm8, %v12535_v46, %v12534_v31  ;;  %v1641_v16 = vsel %vm1633_vm14, %v1616_v36, %v8371_v20  ;;  %v1563_v15 = vsel %vm1550_vm11, %v1540_v28, %v12532_v39  ;;  %v1620_v19 = vsel %vm1600_vm13, %v1587_v59, %v8379_v18  ;;  %v12540_v20 = vld [vmem:[#allocation42_spill] sm:$0xff]  ;;  %v12543_v34 = vld [vmem:[#allocation55_spill] sm:$0xff]  ;;  %v12546_v46 = vld [vmem:[#allocation40_spill] sm:$0xff] }
 0x1eb   : > { %v1691_v17 = vsel %vm1683_vm0, %v1658_v25, %v1477_v13  ;;  %7039 = vmatprep.mubr.msk.bf16.mxu0 %vm2483_vm2, %v6724_v21  ;;  %v12537_v21 = vld [vmem:[#allocation54_spill] sm:$0xff]  ;;  %v1697_v53 = vsel %vm1683_vm0, %v1664_v43, %v8553_v62  ;;  %v1562_v23 = vsel %vm1550_vm11, %v1537_v22, %v12534_v31  ;;  %v12545_v28 = vld [vmem:[#allocation51_spill] sm:$0xff]  ;;  %v12551_v43 = vld [vmem:[#allocation48_spill] sm:$0xff] }
 0x1ec   : > { %1829 = vrot.lane.b32.xlu0 %v7917_v32, %s7305_s13  ;;  %v1720_v5 = vsel %vm1716_vm1, %v1691_v17, %v1477_v13  ;;  %1823 = vrot.lane.b32.xlu1 %v12530_v11, %s7302_s20  ;;  %v1618_v8 = vsel %vm1600_vm13, %v1585_v6, %v12537_v21  ;;  %v12538_v13 = vld [vmem:[#allocation27_spill] sm:$0xff]  ;;  %v1666_v17 = vsel %vm1650_vm15, %v1641_v16, %v8435_v55  ;;  %v12552_v59 = vld [vmem:[#allocation56_spill] sm:$0xff] }
 0x1ed   : > { %v6725_v51 = vcombine.low %v1719_v52, %v1720_v5  ;;  %v1543_v52 = vsel %vm544_vm8, %v12541_v12, %v12540_v20  ;;  %v12542_v5 = vld [vmem:[#allocation46_spill] sm:$0xff]  ;;  %v1642_v63 = vsel %vm1633_vm14, %v1618_v8, %v12537_v21  ;;  %v1723_v49 = vsel %vm1716_vm1, %v1697_v53, %v8553_v62 }
 0x1ee   : > { %v1487_v9 = vpop.permute.xlu0 %1486  ;;  %v1481_v44 = vpop.permute.xlu1 %1480  ;;  %v1589_v37 = vsel %vm1567_vm12, %v1561_v54, %v12542_v5  ;;  %v12544_v54 = vld [vmem:[#allocation9_spill] sm:$0xff]  ;;  %v1591_v36 = vsel %vm1567_vm12, %v1562_v23, %v12545_v28  ;;  %v1564_v62 = vsel %vm1550_vm11, %v1543_v52, %v12540_v20  ;;  %v12550_v21 = vld [vmem:[#allocation34_spill] sm:$0xff]  ;;  %v12553_v23 = vld [vmem:[#allocation11_spill] sm:$0xff] }
 0x1ef   : > { %v1695_v7 = vsel %vm1683_vm0, %v1662_v26, %v1481_v44  ;;  %7040 = vmatmul.mubr.msk.bf16.vlgmr.msra.gmra.mxu0 %vm2483_vm2, %v6725_v51  ;;  %v1622_v55 = vsel %vm1600_vm13, %v1589_v37, %v12543_v34  ;;  %v1668_v51 = vsel %vm1650_vm15, %v1642_v63, %v8425_v38  ;;  %v1643_v26 = vsel %vm1633_vm14, %v1620_v19, %v8379_v18  ;;  %v12547_v38 = vld [vmem:[#allocation32_spill] sm:$0xff]  ;;  %v12549_v18 = vld [vmem:[#allocation45_spill] sm:$0xff]  ;;  %v12555_v52 = vld [vmem:[#allocation59_spill] sm:$0xff] }
 0x1f0   : > { %1833 = vrot.lane.b32.xlu0 %v7929_v2, %s7305_s13  ;;  %v1722_v25 = vsel %vm1716_vm1, %v1695_v7, %v1481_v44  ;;  %1827 = vrot.lane.b32.xlu1 %v12538_v13, %s7302_s20  ;;  %v1701_v44 = vsel %vm1683_vm0, %v1668_v51, %v1487_v9  ;;  %v1546_v22 = vsel %vm544_vm8, %v12547_v38, %v12546_v46  ;;  %v12554_v19 = vld [vmem:[#allocation52_spill] sm:$0xff] }
 0x1f1   : > { %v6726_v58 = vcombine.low %v1721_v1, %v1722_v25  ;;  %v1624_v6 = vsel %vm1600_vm13, %v1591_v36, %v12548_v10  ;;  %v1670_v27 = vsel %vm1650_vm15, %v1643_v26, %v8443_v56  ;;  %v1549_v8 = vsel %vm544_vm8, %v12550_v21, %v12549_v18  ;;  %v12558_v26 = vld [vmem:[#allocation13_spill] sm:$0xff] }
 0x1f2   : > { %v1491_v57 = vpop.permute.xlu0 %1490  ;;  %v1485_v47 = vpop.permute.xlu1 %1484  ;;  %v1593_v1 = vsel %vm1567_vm12, %v1563_v15, %v12551_v43  ;;  %v1644_v25 = vsel %vm1633_vm14, %v1622_v55, %v12543_v34  ;;  %v1725_v53 = vsel %vm1716_vm1, %v1701_v44, %v1487_v9  ;;  %v1566_v63 = vsel %vm1550_vm11, %v1549_v8, %v12549_v18  ;;  %v12562_v21 = vld [vmem:[#allocation61_spill] sm:$0xff] }
 0x1f3   : > { %v1699_v33 = vsel %vm1683_vm0, %v1666_v17, %v1485_v47  ;;  %7043 = vmatprep.mubr.msk.bf16.mxu0 %vm2483_vm2, %v6726_v58  ;;  %v1626_v56 = vsel %vm1600_vm13, %v1593_v1, %v12552_v59  ;;  %v1672_v16 = vsel %vm1650_vm15, %v1644_v25, %v8433_v24  ;;  %v1595_v17 = vsel %vm1567_vm12, %v1564_v62, %v12554_v19 }
 0x1f4   : > { %1837 = vrot.lane.b32.xlu0 %v7943_v45, %s7305_s13  ;;  %v1724_v39 = vsel %vm1716_vm1, %v1699_v33, %v1485_v47  ;;  %1831 = vrot.lane.b32.xlu1 %v12544_v54, %s7305_s13  ;;  %v1645_v47 = vsel %vm1633_vm14, %v1624_v6, %v12548_v10  ;;  %v1705_v20 = vsel %vm1683_vm0, %v1672_v16, %v1491_v57  ;;  %v12556_v33 = vld [vmem:[#allocation50_spill] sm:$0xff]  ;;  %v12560_v10 = vld [vmem:[#allocation60_spill] sm:$0xff] }
 0x1f5   : > { %v6727_v31 = vcombine.low %v1723_v49, %v1724_v39  ;;  %v1565_v24 = vsel %vm1550_vm11, %v1546_v22, %v12546_v46  ;;  %v1628_v9 = vsel %vm1600_vm13, %v1595_v17, %v12555_v52  ;;  %v1674_v5 = vsel %vm1650_vm15, %v1645_v47, %v8451_v3  ;;  %v12557_v49 = vld [vmem:[#allocation57_spill] sm:$0xff]  ;;  %v12565_v47 = vld [vmem:[#allocation19_spill] sm:$0xff] }
 0x1f6   : > { %v1495_v0 = vpop.permute.xlu0 %1494  ;;  %v1489_v7 = vpop.permute.xlu1 %1488  ;;  %v1597_v34 = vsel %vm1567_vm12, %v1565_v24, %v12556_v33  ;;  %v1646_v55 = vsel %vm1633_vm14, %v1626_v56, %v12552_v59  ;;  %v1727_v28 = vsel %vm1716_vm1, %v1705_v20, %v1491_v57  ;;  %v1647_v38 = vsel %vm1633_vm14, %v1628_v9, %v12555_v52  ;;  %v12567_v52 = vld [vmem:[#allocation21_spill] sm:$0xff] }
 0x1f7   : > { %v1703_v30 = vsel %vm1683_vm0, %v1670_v27, %v1489_v7  ;;  %7044 = vmatmul.mubr.msk.bf16.gmra.mxu0 %vm2483_vm2, %v6727_v31  ;;  %v1630_v3 = vsel %vm1600_vm13, %v1597_v34, %v12557_v49  ;;  %v1676_v39 = vsel %vm1650_vm15, %v1646_v55, %v8441_v14  ;;  %v12559_v31 = vld [vmem:[#allocation53_spill] sm:$0xff]  ;;  %v1678_v57 = vsel %vm1650_vm15, %v1647_v38, %v8473_v35  ;;  %v12561_v27 = vld [vmem:[#allocation14_spill] sm:$0xff]  ;;  %v12563_v35 = vld [vmem:[#allocation16_spill] sm:$0xff] }
 0x1f8   : > { %1841 = vrot.lane.b32.xlu0 %v7957_v50, %s7305_s13  ;;  %v1726_v58 = vsel %vm1716_vm1, %v1703_v30, %v1489_v7  ;;  %1835 = vrot.lane.b32.xlu1 %v12553_v23, %s7305_s13  ;;  %v1599_v46 = vsel %vm1567_vm12, %v1566_v63, %v12559_v31  ;;  %v1709_v22 = vsel %vm1683_vm0, %v1676_v39, %v1495_v0  ;;  %v12570_v34 = vld [vmem:[#allocation12_spill] sm:$0xff]  ;;  %v12571_v55 = vld [vmem:[#allocation37_spill] sm:$0xff] }
 0x1f9   : > { %v6728_v12 = vcombine.low %v1725_v53, %v1726_v58  ;;  %v1632_v14 = vsel %vm1600_vm13, %v1599_v46, %v12560_v10  ;;  %v1648_v7 = vsel %vm1633_vm14, %v1630_v3, %v12557_v49  ;;  %v1729_v43 = vsel %vm1716_vm1, %v1709_v22, %v1495_v0  ;;  %v12564_v58 = vld [vmem:[#allocation18_spill] sm:$0xff]  ;;  %v12572_v3 = vld [vmem:[#allocation15_spill] sm:$0xff]  ;;  %v12573_v39 = vld [vmem:[#allocation17_spill] sm:$0xff] }
 0x1fa   : > { %v1499_v15 = vpop.permute.xlu0 %1498  ;;  %v1493_v37 = vpop.permute.xlu1 %1492  ;;  %v1680_v8 = vsel %vm1650_vm15, %v1648_v7, %v12562_v21  ;;  %v1649_v30 = vsel %vm1633_vm14, %v1632_v14, %v12560_v10  ;;  %v12574_v31 = vld [vmem:[#allocation20_spill] sm:$0xff]  ;;  %v12575_v22 = vld [vmem:[#allocation22_spill] sm:$0xff] }
 0x1fb   : > { %v1707_v51 = vsel %vm1683_vm0, %v1674_v5, %v1493_v37  ;;  %7047 = vmatprep.mubr.msk.bf16.mxu0 %vm2483_vm2, %v6728_v12  ;;  %v1713_v59 = vsel %vm1683_vm0, %v1680_v8, %v1499_v15  ;;  %v1682_v16 = vsel %vm1650_vm15, %v1649_v30, %v8499_v61  ;;  %v12566_v61 = vld [vmem:[#allocation26_spill] sm:$0xff] }
 0x1fc   : > { %1845 = vrot.lane.b32.xlu0 %v7972_v29, %s7305_s13  ;;  %v1728_v36 = vsel %vm1716_vm1, %v1707_v51, %v1493_v37  ;;  %1839 = vrot.lane.b32.xlu1 %v12558_v26, %s7305_s13  ;;  %v1731_v19 = vsel %vm1716_vm1, %v1713_v59, %v1499_v15  ;;  %v12568_v5 = vld [vmem:[#allocation10_spill] sm:$0xff]  ;;  %v12569_v37 = vld [vmem:[#allocation23_spill] sm:$0xff] }
 0x1fd   : > { %v6729_v62 = vcombine.low %v1727_v28, %v1728_v36 }
 0x1fe   : > { %v8718_v44 = vpop.permute.xlu0 %1733  ;;  %v1497_v6 = vpop.permute.xlu1 %1496 }
 0x1ff   : > { %v1711_v18 = vsel %vm1683_vm0, %v1678_v57, %v1497_v6  ;;  %7048 = vmatmul.mubr.msk.bf16.gmra.mxu0 %vm2483_vm2, %v6729_v62 }
 0x200   : > { %1849 = vrot.lane.b32.xlu0 %v12561_v27, %s7305_s13  ;;  %v1730_v1 = vsel %vm1716_vm1, %v1711_v18, %v1497_v6  ;;  %1843 = vrot.lane.b32.xlu1 %v12563_v35, %s7305_s13  ;;  %v12577_v18 = vld [vmem:[#allocation44_spill] sm:$0xff] }
 0x201   : > { %v6730_v56 = vcombine.low %v1729_v43, %v1730_v1 }
 0x202   : > { %v8741_v25 = vpop.permute.xlu0 %1737  ;;  %v1501_v53 = vpop.permute.xlu1 %1500 }
 0x203   : > { %v1715_v0 = vsel %vm1683_vm0, %v1682_v16, %v1501_v53  ;;  %7051 = vmatprep.mubr.msk.bf16.mxu0 %vm2483_vm2, %v6730_v56 }
 0x204   : > { %1853 = vrot.lane.b32.xlu0 %v12564_v58, %s7305_s13  ;;  %v1732_v17 = vsel %vm1716_vm1, %v1715_v0, %v1501_v53  ;;  %1847 = vrot.lane.b32.xlu1 %v12565_v47, %s7305_s13 }
 0x205   : > { %v6731_v12 = vcombine.low %v1731_v19, %v1732_v17 }
 0x206   : > { %v8756_v20 = vpop.permute.xlu0 %1741  ;;  %v8758_v24 = vpop.permute.xlu1 %1735 }
 0x207   : > { %7052 = vmatmul.mubr.msk.bf16.gmra.mxu0 %vm2483_vm2, %v6731_v12 }
 0x208   : > { %1857 = vrot.lane.b32.xlu0 %v12566_v61, %s7305_s13  ;;  %1851 = vrot.lane.b32.xlu1 %v12567_v52, %s7305_s13 }
 0x20a   : > { %v8765_v9 = vpop.permute.xlu0 %1745  ;;  %v8767_v15 = vpop.permute.xlu1 %1739 }
 0x20c   : > { %1861 = vrot.lane.b32.xlu0 %v12568_v5, %s7306_s14  ;;  %1855 = vrot.lane.b32.xlu1 %v12569_v37, %s7305_s13 }
 0x20e   : > { %v8773_v63 = vpop.permute.xlu0 %1749  ;;  %v8775_v33 = vpop.permute.xlu1 %1743 }
 0x210   : > { %1865 = vrot.lane.b32.xlu0 %v12570_v34, %s7306_s14  ;;  %1859 = vrot.lane.b32.xlu1 %v12571_v55, %s7305_s13 }
 0x212   : > { %v8781_v51 = vpop.permute.xlu0 %1753  ;;  %v8783_v49 = vpop.permute.xlu1 %1747 }
 0x214   : > { %1869 = vrot.lane.b32.xlu0 %v12572_v3, %s7306_s14  ;;  %1863 = vrot.lane.b32.xlu1 %v12573_v39, %s7306_s14 }
 0x216   : > { %v8789_v28 = vpop.permute.xlu0 %1757  ;;  %v8791_v36 = vpop.permute.xlu1 %1751 }
 0x218   : > { %1873 = vrot.lane.b32.xlu0 %v8013_v4, %s7306_s14  ;;  %1867 = vrot.lane.b32.xlu1 %v12574_v31, %s7306_s14  ;;  %v12576_v4 = vld [vmem:[#allocation24_spill] sm:$0xff] }
 0x21a   : > { %v8797_v46 = vpop.permute.xlu0 %1761  ;;  %v8799_v38 = vpop.permute.xlu1 %1755 }
 0x21c   : > { %1877 = vrot.lane.b32.xlu0 %v8028_v42, %s7306_s14  ;;  %1871 = vrot.lane.b32.xlu1 %v12575_v22, %s7306_s14 }
 0x21e   : > { %v8805_v62 = vpop.permute.xlu0 %1765  ;;  %v8807_v10 = vpop.permute.xlu1 %1759 }
 0x220   : > { %1881 = vrot.lane.b32.xlu0 %v8042_v48, %s7306_s14  ;;  %1875 = vrot.lane.b32.xlu1 %v12576_v4, %s7306_s14 }
 0x222   : > { %v8813_v14 = vpop.permute.xlu0 %1769  ;;  %v8815_v57 = vpop.permute.xlu1 %1763 }
 0x224   : > { %1885 = vrot.lane.b32.xlu0 %v12530_v11, %s7306_s14  ;;  %1879 = vrot.lane.b32.xlu1 %v8061_v40, %s7306_s14 }
 0x226   : > { %v8821_v42 = vpop.permute.xlu0 %1773  ;;  %v8823_v6 = vpop.permute.xlu1 %1767 }
 0x228   : > { %1889 = vrot.lane.b32.xlu0 %v12538_v13, %s7306_s14  ;;  %1883 = vrot.lane.b32.xlu1 %v8068_v60, %s7306_s14 }
 0x22a   : > { %v8829_v48 = vpop.permute.xlu0 %1777  ;;  %v8831_v7 = vpop.permute.xlu1 %1771 }
 0x22c   : > { %1887 = vrot.lane.b32.xlu1 %v8075_v41, %s7306_s14 }
 0x22e   : > { %v8835_v11 = vpop.permute.xlu0 %1781  ;;  %v8837_v40 = vpop.permute.xlu1 %1775 }
 0x230   : > { %1891 = vrot.lane.b32.xlu1 %v12577_v18, %s7306_s14 }
 0x232   : > { %v8841_v21 = vpop.permute.xlu0 %1785  ;;  %v8843_v13 = vpop.permute.xlu1 %1779 }
 0x236   : > { %v8845_v8 = vpop.permute.xlu0 %1789  ;;  %v8847_v60 = vpop.permute.xlu1 %1783 }
 0x23a   : > { %v8849_v43 = vpop.permute.xlu0 %1793  ;;  %v8851_v1 = vpop.permute.xlu1 %1787 }
 0x23e   : > { %v8853_v41 = vpop.permute.xlu0 %1797  ;;  %v8855_v30 = vpop.permute.xlu1 %1791 }
 0x242   : > { %v8857_v59 = vpop.permute.xlu0 %1801  ;;  %v8859_v56 = vpop.permute.xlu1 %1795 }
 0x246   : > { %v8861_v16 = vpop.permute.xlu0 %1805  ;;  %v8863_v53 = vpop.permute.xlu1 %1799 }
 0x24a   : > { %v8865_v0 = vpop.permute.xlu0 %1809  ;;  %v8867_v19 = vpop.permute.xlu1 %1803 }
 0x24e   : > { %v8869_v17 = vpop.permute.xlu0 %1813  ;;  %v8871_v12 = vpop.permute.xlu1 %1807 }
 0x24f   : > { %12578 = vst [vmem:[#allocation36_spill] sm:$0xff] %v8869_v17 }
 0x252   : > { %v8873_v61 = vpop.permute.xlu0 %1817  ;;  %v8875_v5 = vpop.permute.xlu1 %1811 }
 0x253   : > { %12579 = vst [vmem:[#allocation28_spill] sm:$0xff] %v8873_v61  ;;  %12580 = vst [vmem:[#allocation35_spill] sm:$0xff] %v8875_v5 }
 0x256   : > { %v8877_v34 = vpop.permute.xlu0 %1821  ;;  %v8879_v55 = vpop.permute.xlu1 %1815 }
 0x257   : > { %12581 = vst [vmem:[#allocation39_spill] sm:$0xff] %v8877_v34  ;;  %12582 = vst [vmem:[#allocation29_spill] sm:$0xff] %v8879_v55 }
 0x25a   : > { %v8881_v3 = vpop.permute.xlu0 %1825  ;;  %v8883_v39 = vpop.permute.xlu1 %1819 }
 0x25b   : > { %12583 = vst [vmem:[#allocation25_spill] sm:$0xff] %v8881_v3  ;;  %12584 = vst [vmem:[#allocation47_spill] sm:$0xff] %v8883_v39  ;;  %v12590_v39 = vld [vmem:[#allocation7_spill] sm:$0xff] }
 0x25c   : > { %v1894_v3 = vsel %vm1550_vm11, %v12590_v39, %v8718_v44  ;;  %v1906_v44 = vsel %vm1550_vm11, %v7943_v45, %v8765_v9 }
 0x25d   : > { %v1926_v39 = vsel %vm1567_vm12, %v1894_v3, %v8805_v62 }
 0x25e   : > { %v8885_v31 = vpop.permute.xlu0 %1829  ;;  %v8887_v22 = vpop.permute.xlu1 %1823 }
 0x25f   : > { %12585 = vst [vmem:[#allocation38_spill] sm:$0xff] %v8887_v22  ;;  %v1898_v22 = vsel %vm1550_vm11, %v7917_v32, %v8741_v25  ;;  %v1910_v25 = vsel %vm1550_vm11, %v7957_v50, %v8773_v63  ;;  %v1920_v63 = vsel %vm1550_vm11, %v12567_v52, %v8807_v10 }
 0x260   : > { %v1930_v45 = vsel %vm1567_vm12, %v1898_v22, %v8813_v14 }
 0x262   : > { %v8889_v4 = vpop.permute.xlu0 %1833  ;;  %v8891_v18 = vpop.permute.xlu1 %1827 }
 0x263   : > { %12586 = vst [vmem:[#allocation30_spill] sm:$0xff] %v8891_v18  ;;  %v1902_v18 = vsel %vm1550_vm11, %v7929_v2, %v8756_v20  ;;  %v1904_v2 = vsel %vm1550_vm11, %v12553_v23, %v8775_v33  ;;  %v1908_v20 = vsel %vm1550_vm11, %v12558_v26, %v8783_v49  ;;  %v1916_v26 = vsel %vm1550_vm11, %v12565_v47, %v8799_v38 }
 0x264   : > { %v1934_v50 = vsel %vm1567_vm12, %v1902_v18, %v8821_v42  ;;  %v1924_v33 = vsel %vm1550_vm11, %v12569_v37, %v8815_v57  ;;  %v1938_v47 = vsel %vm1567_vm12, %v1906_v44, %v8829_v48  ;;  %v1942_v37 = vsel %vm1567_vm12, %v1910_v25, %v8835_v11 }
 0x265   : > { %v1961_v49 = vsel %vm1600_vm13, %v1934_v50, %v8821_v42  ;;  %v1963_v10 = vsel %vm1600_vm13, %v1938_v47, %v8829_v48  ;;  %v1948_v57 = vsel %vm1567_vm12, %v1916_v26, %v8851_v1  ;;  %v1956_v48 = vsel %vm1567_vm12, %v1924_v33, %v8859_v56  ;;  %v12597_v26 = vld [vmem:[#allocation25_spill] sm:$0xff]  ;;  %v12599_v47 = vld [vmem:[#allocation47_spill] sm:$0xff] }
 0x266   : > { %v8893_v17 = vpop.permute.xlu0 %1837  ;;  %v8895_v61 = vpop.permute.xlu1 %1831  ;;  %v1968_v44 = vsel %vm1600_vm13, %v1948_v57, %v8851_v1  ;;  %v1982_v1 = vsel %vm1633_vm14, %v1961_v49, %v8861_v16 }
 0x267   : > { %12587 = vst [vmem:[#allocation41_spill] sm:$0xff] %v8893_v17  ;;  %v12591_v17 = vld [vmem:[#allocation8_spill] sm:$0xff] }
 0x26a   : > { %v8897_v5 = vpop.permute.xlu0 %1841  ;;  %v8899_v34 = vpop.permute.xlu1 %1835 }
 0x26b   : > { %12588 = vst [vmem:[#allocation31_spill] sm:$0xff] %v8897_v5  ;;  %v1896_v5 = vsel %vm1550_vm11, %v12591_v17, %v8758_v24  ;;  %v1918_v24 = vsel %vm1550_vm11, %v12561_v27, %v8789_v28  ;;  %v1922_v27 = vsel %vm1550_vm11, %v12564_v58, %v8797_v46  ;;  %v1936_v28 = vsel %vm1567_vm12, %v1904_v2, %v8837_v40 }
 0x26c   : > { %v1928_v23 = vsel %vm1567_vm12, %v1896_v5, %v8823_v6  ;;  %v1950_v38 = vsel %vm1567_vm12, %v1918_v24, %v8845_v8  ;;  %v1954_v42 = vsel %vm1567_vm12, %v1922_v27, %v8849_v43  ;;  %v1965_v17 = vsel %vm1600_vm13, %v1942_v37, %v8835_v11  ;;  %v12595_v24 = vld [vmem:[#allocation29_spill] sm:$0xff] }
 0x26d   : > { %v1958_v58 = vsel %vm1600_vm13, %v1928_v23, %v8823_v6  ;;  %v1952_v5 = vsel %vm1567_vm12, %v1920_v63, %v8855_v30  ;;  %v1962_v3 = vsel %vm1600_vm13, %v1936_v28, %v8837_v40  ;;  %v1969_v11 = vsel %vm1600_vm13, %v1950_v38, %v8845_v8  ;;  %v12596_v23 = vld [vmem:[#allocation39_spill] sm:$0xff]  ;;  %v12602_v38 = vld [vmem:[#allocation30_spill] sm:$0xff] }
 0x26e   : > { %v8901_v55 = vpop.permute.xlu0 %1845  ;;  %v8923_v32 = vpop.permute.xlu1 %1839  ;;  %v12598_v63 = vld [vmem:[#allocation41_spill] sm:$0xff] }
 0x26f   : > { %12589 = vst [vmem:[#allocation43_spill] sm:$0xff] %v8901_v55  ;;  %v1900_v55 = vsel %vm1550_vm11, %v12544_v54, %v8767_v15  ;;  %v1914_v54 = vsel %vm1550_vm11, %v7972_v29, %v8781_v51  ;;  %v1912_v29 = vsel %vm1550_vm11, %v12563_v35, %v8791_v36  ;;  %v1957_v15 = vsel %vm1600_vm13, %v1926_v39, %v8805_v62 }
 0x270   : > { %v1959_v35 = vsel %vm1600_vm13, %v1930_v45, %v8813_v14  ;;  %v1932_v52 = vsel %vm1567_vm12, %v1900_v55, %v8831_v7  ;;  %v1940_v36 = vsel %vm1567_vm12, %v1908_v20, %v8843_v13  ;;  %v1946_v46 = vsel %vm1567_vm12, %v1914_v54, %v8841_v21  ;;  %v12593_v45 = vld [vmem:[#allocation35_spill] sm:$0xff]  ;;  %v12594_v20 = vld [vmem:[#allocation28_spill] sm:$0xff] }
 0x271   : > { %v1944_v14 = vsel %vm1567_vm12, %v1912_v29, %v8847_v60  ;;  %v1960_v6 = vsel %vm1600_vm13, %v1932_v52, %v8831_v7  ;;  %v1964_v22 = vsel %vm1600_vm13, %v1940_v36, %v8843_v13  ;;  %v1967_v7 = vsel %vm1600_vm13, %v1946_v46, %v8841_v21  ;;  %v12601_v36 = vld [vmem:[#allocation38_spill] sm:$0xff] }
 0x272   : > { %v8946_v9 = vpop.permute.xlu0 %1849  ;;  %v8969_v51 = vpop.permute.xlu1 %1843  ;;  %v1966_v18 = vsel %vm1600_vm13, %v1944_v14, %v8847_v60  ;;  %v1971_v39 = vsel %vm1600_vm13, %v1954_v42, %v8849_v43  ;;  %v1974_v40 = vsel %vm1633_vm14, %v1957_v15, %v8853_v41  ;;  %v1970_v21 = vsel %vm1600_vm13, %v1952_v5, %v8855_v30  ;;  %v12600_v49 = vld [vmem:[#allocation31_spill] sm:$0xff] }
 0x273   : > { %v1972_v13 = vsel %vm1600_vm13, %v1956_v48, %v8859_v56  ;;  %v1978_v8 = vsel %vm1633_vm14, %v1959_v35, %v8857_v59  ;;  %v2006_v60 = vsel %vm1650_vm15, %v1974_v40, %v8885_v31  ;;  %v1976_v43 = vsel %vm1633_vm14, %v1958_v58, %v8863_v53  ;;  %v12592_v56 = vld [vmem:[#allocation36_spill] sm:$0xff] }
 0x274   : > { %v1980_v41 = vsel %vm1633_vm14, %v1960_v6, %v8867_v19  ;;  %v1986_v30 = vsel %vm1633_vm14, %v1963_v10, %v8865_v0  ;;  %v1984_v59 = vsel %vm1633_vm14, %v1962_v3, %v8871_v12  ;;  %v1990_v54 = vsel %vm1633_vm14, %v1965_v17, %v12592_v56 }
 0x275   : > { %v1988_v53 = vsel %vm1633_vm14, %v1964_v22, %v12593_v45  ;;  %v1994_v16 = vsel %vm1633_vm14, %v1967_v7, %v12594_v20  ;;  %v1992_v19 = vsel %vm1633_vm14, %v1966_v18, %v12595_v24  ;;  %v1998_v0 = vsel %vm1633_vm14, %v1969_v11, %v12596_v23 }
 0x276   : > { %v8987_v62 = vpop.permute.xlu0 %1853  ;;  %v9005_v55 = vpop.permute.xlu1 %1847  ;;  %v2037_v50 = vsel %vm1683_vm0, %v2006_v60, %v8885_v31  ;;  %v2010_v12 = vsel %vm1650_vm15, %v1978_v8, %v8889_v4  ;;  %v2002_v27 = vsel %vm1633_vm14, %v1971_v39, %v12597_v26  ;;  %v2008_v15 = vsel %vm1650_vm15, %v1976_v43, %v8895_v61  ;;  %v12603_v57 = vld [vmem:[#allocation43_spill] sm:$0xff] }
 0x277   : > { %v2014_v33 = vsel %vm1650_vm15, %v1982_v1, %v12598_v63  ;;  %v1996_v58 = vsel %vm1633_vm14, %v1968_v44, %v12599_v47  ;;  %v2012_v31 = vsel %vm1650_vm15, %v1980_v41, %v8899_v34  ;;  %v2018_v52 = vsel %vm1650_vm15, %v1986_v30, %v12600_v49 }
 0x278   : > { %v2000_v46 = vsel %vm1633_vm14, %v1970_v21, %v12601_v36  ;;  %v2004_v10 = vsel %vm1633_vm14, %v1972_v13, %v12602_v38  ;;  %v2039_v14 = vsel %vm1683_vm0, %v2010_v12, %v8889_v4  ;;  %v2022_v42 = vsel %vm1650_vm15, %v1990_v54, %v12603_v57 }
 0x279   : > { %v2038_v6 = vsel %vm1683_vm0, %v2008_v15, %v8895_v61  ;;  %v2041_v17 = vsel %vm1683_vm0, %v2014_v33, %v12598_v63  ;;  %v2040_v22 = vsel %vm1683_vm0, %v2012_v31, %v8899_v34  ;;  %v2043_v7 = vsel %vm1683_vm0, %v2018_v52, %v12600_v49 }
 0x27a   : > { %v9023_v2 = vpop.permute.xlu0 %1857  ;;  %v9041_v25 = vpop.permute.xlu1 %1851  ;;  %v2016_v4 = vsel %vm1650_vm15, %v1984_v59, %v8923_v32  ;;  %v9093_v61 = vsel %vm1683_vm0, %v2022_v42, %v12603_v57  ;;  %v2020_v18 = vsel %vm1650_vm15, %v1988_v53, %v8969_v51  ;;  %v2026_v44 = vsel %vm1650_vm15, %v1994_v16, %v8946_v9 }
 0x27b   : > { %v2024_v40 = vsel %vm1650_vm15, %v1992_v19, %v9005_v55  ;;  %v2030_v21 = vsel %vm1650_vm15, %v1998_v0, %v8987_v62  ;;  %v2034_v13 = vsel %vm1650_vm15, %v2002_v27, %v9023_v2  ;;  %v9107_v60 = vsel %vm1683_vm0, %v2016_v4, %v8923_v32 }
 0x27c   : > { %v9111_v59 = vsel %vm1683_vm0, %v2020_v18, %v8969_v51  ;;  %v9115_v56 = vsel %vm1683_vm0, %v2026_v44, %v8946_v9  ;;  %v9120_v32 = vsel %vm1683_vm0, %v2024_v40, %v9005_v55  ;;  %v9124_v53 = vsel %vm1683_vm0, %v2030_v21, %v8987_v62 }
 0x27d   : > { %v9128_v20 = vsel %vm1683_vm0, %v2034_v13, %v9023_v2  ;;  %v2028_v9 = vsel %vm1650_vm15, %v1996_v58, %v9041_v25 }
 0x27e   : > { %v1862_v29 = vpop.permute.xlu0 %1861  ;;  %v1856_v37 = vpop.permute.xlu1 %1855  ;;  %v9137_v58 = vsel %vm1683_vm0, %v2028_v9, %v9041_v25 }
 0x27f   : > { %v2054_v35 = vsel %vm1716_vm1, %v2037_v50, %v1862_v29  ;;  %v2032_v24 = vsel %vm1650_vm15, %v2000_v46, %v1856_v37 }
 0x280   : > { %v6692_v28 = vcombine.low %v2054_v35, %v2054_v35  ;;  %v6693_v8 = vcombine.high %v2054_v35, %v2054_v35  ;;  %v9140_v31 = vsel %vm1683_vm0, %v2032_v24, %v1856_v37 }
 0x282   : > { %v2169_v5 = vshrl.u32 %v6692_v28, 16  ;;  %v2172_v48 = vshll.u32 %v6692_v28, 16  ;;  %v1866_v3 = vpop.permute.xlu0 %1865  ;;  %v1860_v39 = vpop.permute.xlu1 %1859  ;;  %v2178_v19 = vshll.u32 %v6693_v8, 16 }
 0x283   : > { %v2058_v11 = vsel %vm1716_vm1, %v2039_v14, %v1866_v3  ;;  %v2036_v28 = vsel %vm1650_vm15, %v2004_v10, %v1860_v39 }
 0x284   : > { %v6696_v34 = vcombine.low %v2058_v11, %v2058_v11  ;;  %v2171_v43 = vrot.slane %v2169_v5, 4  ;;  %v2174_v1 = vrot.slane %v2172_v48, 5  ;;  %v6697_v0 = vcombine.high %v2058_v11, %v2058_v11 }
 0x285   : > { %v2180_v49 = vrot.slane %v2178_v19, 5  ;;  %v9153_v10 = vsel %vm1683_vm0, %v2036_v28, %v1860_v39 }
 0x286   : > { %v2197_v41 = vshrl.u32 %v6696_v34, 16  ;;  %v1870_v30 = vpop.permute.xlu0 %1869  ;;  %v2200_v54 = vshll.u32 %v6696_v34, 16  ;;  %v1864_v51 = vpop.permute.xlu1 %1863  ;;  %v2175_v55 = vor.u32 %v2174_v1, %v2171_v43  ;;  %v9144_v36 = vshll.u32 %v6697_v0, 16 }
 0x287   : > { %v2062_v45 = vsel %vm1716_vm1, %v2041_v17, %v1870_v30  ;;  %v2056_v23 = vsel %vm1716_vm1, %v2038_v6, %v1864_v51 }
 0x288   : > { %v6700_v16 = vcombine.low %v2062_v45, %v2062_v45  ;;  %v2199_v50 = vrot.slane %v2197_v41, 4  ;;  %v6694_v12 = vcombine.low %v2056_v23, %v2056_v23  ;;  %v2202_v29 = vrot.slane %v2200_v54, 5 }
 0x289   : > { %v6701_v26 = vcombine.high %v2062_v45, %v2062_v45  ;;  %v6695_v15 = vcombine.high %v2056_v23, %v2056_v23  ;;  %v2176_v5 = vrot.slane %v2175_v55, 4  ;;  %v2208_v18 = vrot.slane %v9144_v36, 5 }
 0x28a   : > { %v1874_v62 = vpop.permute.xlu0 %1873  ;;  %v2225_v27 = vshrl.u32 %v6700_v16, 16  ;;  %v2228_v2 = vshll.u32 %v6700_v16, 16  ;;  %v2183_v63 = vshrl.u32 %v6694_v12, 16  ;;  %v2186_v33 = vshll.u32 %v6694_v12, 16  ;;  %v1868_v35 = vpop.permute.xlu1 %1867 }
 0x28b   : > { %v2066_v47 = vsel %vm1716_vm1, %v2043_v7, %v1874_v62  ;;  %v2060_v52 = vsel %vm1716_vm1, %v2040_v22, %v1868_v35  ;;  %v2203_v25 = vor.u32 %v2202_v29, %v2199_v50  ;;  %v2192_v48 = vshll.u32 %v6695_v15, 16 }
 0x28c   : > { %v2185_v46 = vrot.slane %v2183_v63, 4  ;;  %v2188_v38 = vrot.slane %v2186_v33, 5  ;;  %v2227_v14 = vrot.slane %v2225_v27, 4  ;;  %v2230_v57 = vrot.slane %v2228_v2, 5 }
 0x28d   : > { %v6698_v42 = vcombine.low %v2060_v52, %v2060_v52  ;;  %v6704_v6 = vcombine.low %v2066_v47, %v2066_v47  ;;  %v2234_v3 = vshll.u32 %v6701_v26, 16  ;;  %v12604_v22 = vmov 0 }
 0x28e   : > { %v1878_v17 = vpop.permute.xlu0 %1877  ;;  %v1872_v37 = vpop.permute.xlu1 %1871  ;;  %v12605_v22 = vsel %vm9148_vm9, 4294967295, %v12604_v22  ;;  %v2189_v7 = vor.u32 %v2188_v38, %v2185_v46  ;;  %v2231_v21 = vor.u32 %v2230_v57, %v2227_v14  ;;  %v6699_v13 = vcombine.high %v2060_v52, %v2060_v52 }
 0x28f   : > { %12606 = vst [vmem:[#allocation54_spill] sm:$0xff] %v12605_v22  ;;  %v2211_v4 = vshrl.u32 %v6698_v42, 16  ;;  %v2214_v11 = vshll.u32 %v6698_v42, 16  ;;  %v2253_v44 = vshrl.u32 %v6704_v6, 16  ;;  %v2256_v34 = vshll.u32 %v6704_v6, 16 }
 0x290   : > { %v2070_v40 = vsel %vm1716_vm1, %v9093_v61, %v1878_v17  ;;  %v2181_v1 = vsel %vm9148_vm9, %v2176_v5, %v2180_v49  ;;  %v2204_v41 = vrot.slane %v2203_v25, 4  ;;  %v2194_v39 = vrot.slane %v2192_v48, 5 }
 0x291   : > { %v2213_v8 = vrot.slane %v2211_v4, 4  ;;  %v2216_v43 = vrot.slane %v2214_v11, 5  ;;  %v2236_v30 = vrot.slane %v2234_v3, 5  ;;  %v2190_v45 = vrot.slane %v2189_v7, 4 }
 0x292   : > { %v1876_v54 = vpop.permute.xlu1 %1875  ;;  %v6705_v51 = vcombine.high %v2066_v47, %v2066_v47  ;;  %v2064_v16 = vsel %vm1716_vm1, %v9107_v60, %v1872_v37  ;;  %v6708_v9 = vcombine.low %v2070_v40, %v2070_v40  ;;  %v2255_v19 = vrot.slane %v2253_v44, 4  ;;  %v1882_v55 = vpop.permute.xlu0 %1881 }
 0x293   : > { %v2217_v24 = vor.u32 %v2216_v43, %v2213_v8  ;;  %v2258_v61 = vrot.slane %v2256_v34, 5  ;;  %v6702_v23 = vcombine.low %v2064_v16, %v2064_v16  ;;  %v2232_v0 = vrot.slane %v2231_v21, 4 }
 0x294   : > { %v2220_v50 = vshll.u32 %v6699_v13, 16  ;;  %v2281_v12 = vshrl.u32 %v6708_v9, 16  ;;  %v2284_v62 = vshll.u32 %v6708_v9, 16  ;;  %v6709_v27 = vcombine.high %v2070_v40, %v2070_v40 }
 0x295   : > { %v2239_v29 = vshrl.u32 %v6702_v23, 16  ;;  %v2242_v26 = vshll.u32 %v6702_v23, 16  ;;  %v2068_v2 = vsel %vm1716_vm1, %v9111_v59, %v1876_v54  ;;  %v2195_v15 = vsel %vm9148_vm9, %v2190_v45, %v2194_v39 }
 0x296   : > { %v2262_v60 = vshll.u32 %v6705_v51, 16  ;;  %v2283_v63 = vrot.slane %v2281_v12, 4  ;;  %v2286_v33 = vrot.slane %v2284_v62, 5  ;;  %v2218_v35 = vrot.slane %v2217_v24, 4  ;;  %v1880_v28 = vpop.permute.xlu1 %1879  ;;  %v1886_v17 = vpop.permute.xlu0 %1885 }
 0x297   : > { %v2259_v47 = vor.u32 %v2258_v61, %v2255_v19  ;;  %v2241_v49 = vrot.slane %v2239_v29, 4  ;;  %v2244_v52 = vrot.slane %v2242_v26, 5  ;;  %v2222_v36 = vrot.slane %v2220_v50, 5 }
 0x298   : > { %v6703_v46 = vcombine.high %v2064_v16, %v2064_v16  ;;  %v6706_v38 = vcombine.low %v2068_v2, %v2068_v2  ;;  %v2074_v14 = vsel %vm1716_vm1, %v9115_v56, %v1882_v55  ;;  %v2287_v57 = vor.u32 %v2286_v33, %v2283_v63 }
 0x299   : > { %v2290_v42 = vshll.u32 %v6709_v27, 16  ;;  %v6712_v59 = vcombine.low %v2074_v14, %v2074_v14  ;;  %v6732_v6 = vcombine.low %v2181_v1, %v2195_v15  ;;  %v2209_v5 = vsel %vm9148_vm9, %v2204_v41, %v2208_v18 }
 0x29a   : > { %v9172_v25 = vsel %vm9148_vm9, %v2232_v0, %v2236_v30  ;;  %v2267_v48 = vshrl.u32 %v6706_v38, 16  ;;  %v2270_v3 = vshll.u32 %v6706_v38, 16  ;;  %v2223_v37 = vsel %vm9148_vm9, %v2218_v35, %v2222_v36  ;;  %v1884_v43 = vpop.permute.xlu1 %1883  ;;  %v1890_v9 = vpop.permute.xlu0 %1889 }
 0x29b   : > { %v2260_v7 = vrot.slane %v2259_v47, 4  ;;  %v2264_v4 = vrot.slane %v2262_v60, 5  ;;  %v2245_v56 = vor.u32 %v2244_v52, %v2241_v49  ;;  %7055 = vmatprep.mubr.msk.bf16.mxu0 %vm2483_vm2, %v6732_v6  ;;  %v2248_v11 = vshll.u32 %v6703_v46, 16 }
 0x29c   : > { %v6707_v44 = vcombine.high %v2068_v2, %v2068_v2  ;;  %v2269_v34 = vrot.slane %v2267_v48, 4  ;;  %v2272_v40 = vrot.slane %v2270_v3, 5  ;;  %v2288_v21 = vrot.slane %v2287_v57, 4 }
 0x29d   : > { %v2292_v18 = vrot.slane %v2290_v42, 5  ;;  %v6713_v13 = vcombine.high %v2074_v14, %v2074_v14  ;;  %v2309_v8 = vshrl.u32 %v6712_v59, 16  ;;  %v2312_v1 = vshll.u32 %v6712_v59, 16 }
 0x29e   : > { %v2072_v41 = vsel %vm1716_vm1, %v9120_v32, %v1880_v28  ;;  %v9181_v39 = vsel %vm1716_vm1, %v9124_v53, %v1886_v17  ;;  %v6733_v30 = vcombine.low %v2209_v5, %v2223_v37  ;;  %v9185_v54 = vsel %vm9148_vm9, %v2260_v7, %v2264_v4  ;;  %v1888_v60 = vpop.permute.xlu1 %1887 }
 0x29f   : > { %v2246_v45 = vrot.slane %v2245_v56, 4  ;;  %v6710_v51 = vcombine.low %v2072_v41, %v2072_v41  ;;  %v6711_v16 = vcombine.high %v2072_v41, %v2072_v41  ;;  %v2250_v24 = vrot.slane %v2248_v11, 5 }
 0x2a0   : > { %v2273_v19 = vor.u32 %v2272_v40, %v2269_v34  ;;  %v2276_v61 = vshll.u32 %v6707_v44, 16  ;;  %v6716_v23 = vcombine.low %v9181_v39, %v9181_v39  ;;  %7056 = vmatmul.mubr.msk.bf16.gmra.mxu0 %vm2483_vm2, %v6733_v30  ;;  %v9190_v32 = vshll.u32 %v6713_v13, 16 }
 0x2a1   : > { %v2295_v53 = vshrl.u32 %v6710_v51, 16  ;;  %v2298_v55 = vshll.u32 %v6710_v51, 16  ;;  %v2076_v0 = vsel %vm1716_vm1, %v9137_v58, %v1884_v43  ;;  %v2293_v50 = vsel %vm9148_vm9, %v2288_v21, %v2292_v18 }
 0x2a2   : > { %v2311_v12 = vrot.slane %v2309_v8, 4  ;;  %v2314_v62 = vrot.slane %v2312_v1, 5  ;;  %v9198_v29 = vsel %vm1716_vm1, %v9128_v20, %v1890_v9  ;;  %v2251_v26 = vsel %vm9148_vm9, %v2246_v45, %v2250_v24  ;;  %v1892_v4 = vpop.permute.xlu1 %1891 }
 0x2a3   : > { %v2297_v27 = vrot.slane %v2295_v53, 4  ;;  %v2300_v2 = vrot.slane %v2298_v55, 5  ;;  %v2304_v15 = vshll.u32 %v6711_v16, 16  ;;  %v2274_v63 = vrot.slane %v2273_v19, 4 }
 0x2a4   : > { %v2278_v33 = vrot.slane %v2276_v61, 5  ;;  %v2337_v35 = vshrl.u32 %v6716_v23, 16  ;;  %v6714_v58 = vcombine.low %v2076_v0, %v2076_v0  ;;  %v2340_v49 = vshll.u32 %v6716_v23, 16 }
 0x2a5   : > { %v2301_v47 = vor.u32 %v2300_v2, %v2297_v27  ;;  %v6715_v52 = vcombine.high %v2076_v0, %v2076_v0  ;;  %v6720_v28 = vcombine.low %v9198_v29, %v9198_v29  ;;  %v2315_v36 = vor.u32 %v2314_v62, %v2311_v12 }
 0x2a6   : > { %v2323_v20 = vshrl.u32 %v6714_v58, 16  ;;  %v2326_v46 = vshll.u32 %v6714_v58, 16  ;;  %v6734_v38 = vcombine.low %v9172_v25, %v2251_v26  ;;  %v2306_v57 = vrot.slane %v2304_v15, 5 }
 0x2a7   : > { %v2302_v14 = vrot.slane %v2301_v47, 4  ;;  %v2332_v42 = vshll.u32 %v6715_v52, 16  ;;  %v2365_v59 = vshrl.u32 %v6720_v28, 16  ;;  %v2279_v6 = vsel %vm9148_vm9, %v2274_v63, %v2278_v33 }
 0x2a8   : > { %v2325_v17 = vrot.slane %v2323_v20, 4  ;;  %v2328_v5 = vrot.slane %v2326_v46, 5  ;;  %v2368_v48 = vshll.u32 %v6720_v28, 16  ;;  %7059 = vmatprep.mubr.msk.bf16.mxu0 %vm2483_vm2, %v6734_v38  ;;  %v6717_v37 = vcombine.high %v9181_v39, %v9181_v39  ;;  %v2890_v38 = vld [vmem:[#allocation3] sm:$0x1] }
 0x2a9   : > { %v2307_v3 = vsel %vm9148_vm9, %v2302_v14, %v2306_v57  ;;  %v2339_v7 = vrot.slane %v2337_v35, 4  ;;  %v2342_v25 = vrot.slane %v2340_v49, 5  ;;  %v2316_v56 = vrot.slane %v2315_v36, 4  ;;  %v2944_v14 = vld [vmem:[#allocation3 + $0x4] sm:$0x1] }
 0x2aa   : > { %v2329_v11 = vor.u32 %v2328_v5, %v2325_v17  ;;  %v2334_v44 = vrot.slane %v2332_v42, 5  ;;  %v2080_v34 = vsel %vm1716_vm1, %v9140_v31, %v1888_v60  ;;  %v2367_v40 = vrot.slane %v2365_v59, 4  ;;  %v2941_v17 = vld [vmem:[#allocation3 + $0x88] sm:$0x1]  ;;  %v2995_v5 = vld [vmem:[#allocation3 + $0x8c] sm:$0x1] }
 0x2ab   : > { %v6718_v21 = vcombine.low %v2080_v34, %v2080_v34  ;;  %v6719_v18 = vcombine.high %v2080_v34, %v2080_v34  ;;  %v6735_v13 = vcombine.low %v9185_v54, %v2279_v6  ;;  %v2370_v43 = vrot.slane %v2368_v48, 5 }
 0x2ac   : > { %v2330_v8 = vrot.slane %v2329_v11, 4  ;;  %v2084_v1 = vsel %vm1716_vm1, %v9153_v10, %v1892_v4  ;;  %v6736_v41 = vcombine.low %v2293_v50, %v2307_v3  ;;  %v2320_v39 = vrot.slane %v9190_v32, 5 }
 0x2ad   : > { %v2343_v30 = vor.u32 %v2342_v25, %v2339_v7  ;;  %v2351_v45 = vshrl.u32 %v6718_v21, 16  ;;  %v2354_v51 = vshll.u32 %v6718_v21, 16  ;;  %7060 = vmatmul.mubr.msk.bf16.gmra.mxu0 %vm2483_vm2, %v6735_v13  ;;  %v6721_v16 = vcombine.high %v9198_v29, %v9198_v29 }
 0x2ae   : > { %v2335_v31 = vsel %vm9148_vm9, %v2330_v8, %v2334_v44  ;;  %v6722_v54 = vcombine.low %v2084_v1, %v2084_v1  ;;  %v6723_v9 = vcombine.high %v2084_v1, %v2084_v1  ;;  %7063 = vmatprep.mubr.msk.bf16.mxu0 %vm2483_vm2, %v6736_v41  ;;  %v2346_v24 = vshll.u32 %v6717_v37, 16 }
 0x2af   : > { %v2353_v10 = vrot.slane %v2351_v45, 4  ;;  %v2356_v19 = vrot.slane %v2354_v51, 5  ;;  %v2360_v61 = vshll.u32 %v6719_v18, 16  ;;  %v2321_v23 = vsel %vm9148_vm9, %v2316_v56, %v2320_v39  ;;  %v2899_v39 = vld [vmem:[#allocation3 + $0x18] sm:$0x1] }
 0x2b0   : > { %v2371_v32 = vor.u32 %v2370_v43, %v2367_v40  ;;  %v2379_v53 = vshrl.u32 %v6722_v54, 16  ;;  %v2382_v55 = vshll.u32 %v6722_v54, 16  ;;  %v2344_v0 = vrot.slane %v2343_v30, 4  ;;  %v2902_v30 = vld [vmem:[#allocation3 + $0x20] sm:$0x1] }
 0x2b1   : > { %v2357_v50 = vor.u32 %v2356_v19, %v2353_v10  ;;  %v6737_v12 = vcombine.low %v2321_v23, %v2335_v31  ;;  %v2374_v62 = vshll.u32 %v6721_v16, 16  ;;  %v2388_v27 = vshll.u32 %v6723_v9, 16  ;;  %v2953_v45 = vld [vmem:[#allocation3 + $0x1c] sm:$0x1]  ;;  %v2956_v54 = vld [vmem:[#allocation3 + $0x24] sm:$0x1] }
 0x2b2   : > { %v2381_v26 = vrot.slane %v2379_v53, 4  ;;  %v2384_v29 = vrot.slane %v2382_v55, 5  ;;  %v2348_v2 = vrot.slane %v2346_v24, 5  ;;  %v2362_v60 = vrot.slane %v2360_v61, 5  ;;  %v9269_v24 = vpop.f32.mrf.mxu0 }
 0x2b3   : > { %v2358_v15 = vrot.slane %v2357_v50, 4  ;;  %v2372_v63 = vrot.slane %v2371_v32, 4  ;;  %v2376_v47 = vrot.slane %v2374_v62, 5  ;;  %v2390_v52 = vrot.slane %v2388_v27, 5 }
 0x2b4   : > { %v2385_v33 = vor.u32 %v2384_v29, %v2381_v26  ;;  %v2349_v35 = vsel %vm9148_vm9, %v2344_v0, %v2348_v2  ;;  %v2891_v42 = vsel %vm7494_vm3, 0, %v2890_v38  ;;  %v2945_v6 = vsel %vm7504_vm5, 0, %v2944_v14  ;;  %v9271_v10 = vpop.f32.mrf.mxu0 }
 0x2b5   : > { %v2363_v58 = vsel %vm9148_vm9, %v2358_v15, %v2362_v60  ;;  %7064 = vmatmul.mubr.msk.bf16.gmra.mxu0 %vm2483_vm2, %v6737_v12  ;;  %v2377_v36 = vsel %vm9148_vm9, %v2372_v63, %v2376_v47  ;;  %2892 = vst [vmem:[#allocation3] sm:$0x1] %v2891_v42  ;;  %2946 = vst [vmem:[#allocation3 + $0x4] sm:$0x1] %v2945_v6  ;;  %v2942_v48 = vsel %vm7494_vm3, 0, %v2941_v17  ;;  %v2996_v3 = vsel %vm7504_vm5, 0, %v2995_v5 }
 0x2b6   : > { %v2386_v49 = vrot.slane %v2385_v33, 4  ;;  %v6738_v28 = vcombine.low %v2349_v35, %v2363_v58  ;;  %2943 = vst [vmem:[#allocation3 + $0x88] sm:$0x1] %v2942_v48  ;;  %2997 = vst [vmem:[#allocation3 + $0x8c] sm:$0x1] %v2996_v3  ;;  %v2900_v51 = vsel %vm7494_vm3, 0, %v2899_v39  ;;  %v9273_v19 = vpop.f32.mrf.mxu0 }
 0x2b7   : > { %v2903_v31 = vsel %vm7494_vm3, 0, %v2902_v30  ;;  %v2954_v16 = vsel %vm7504_vm5, 0, %v2953_v45  ;;  %2901 = vst [vmem:[#allocation3 + $0x18] sm:$0x1] %v2900_v51  ;;  %v2957_v9 = vsel %vm7504_vm5, 0, %v2956_v54 }
 0x2b8   : > { %v2391_v20 = vsel %vm9148_vm9, %v2386_v49, %v2390_v52  ;;  %7067 = vmatprep.mubr.msk.bf16.mxu0 %vm2483_vm2, %v6738_v28  ;;  %2904 = vst [vmem:[#allocation3 + $0x20] sm:$0x1] %v2903_v31  ;;  %2955 = vst [vmem:[#allocation3 + $0x1c] sm:$0x1] %v2954_v16  ;;  %v9275_v61 = vpop.f32.mrf.mxu0  ;;  %v9304_v15 = vld [vmem:[%s12343_s3] ss:$0 sm:$0xff] }
 0x2b9   : > { %v6739_v46 = vcombine.low %v2377_v36, %v2391_v20  ;;  %2958 = vst [vmem:[#allocation3 + $0x24] sm:$0x1] %v2957_v9  ;;  %v9311_v58 = vld [vmem:[%s12344_s4] ss:$0 sm:$0xff]  ;;  %v2893_v48 = vld [vmem:[#allocation3 + $0x8] sm:$0x1]  ;;  %v2704_v59 = vmul.f32 %v9304_v15, %v9275_v61 }
 0x2ba   : > { %v9277_v23 = vpop.f32.mrf.mxu0  ;;  %v2896_v3 = vld [vmem:[#allocation3 + $0x10] sm:$0x1]  ;;  %v2968_v51 = vld [vmem:[#allocation3 + $0x44] sm:$0x1] }
 0x2bb   : > { %v2969_v54 = vsel %vm7504_vm5, 0, %v2968_v51 }
 0x2bc   : > { %v3319_v37 = vld [vmem:[#allocation3] sm:$0xf]  ;;  %v3320_v7 = vld [vmem:[#allocation3 + $0x4] sm:$0x1]  ;;  %v9279_v32 = vpop.f32.mrf.mxu0  ;;  %2970 = vst [vmem:[#allocation3 + $0x44] sm:$0x1] %v2969_v54 }
 0x2bd   : > { %7068 = vmatmul.mubr.msk.bf16.gmra.mxu0 %vm2483_vm2, %v6739_v46  ;;  %v6779_v25 = vcombine.low %v3319_v37, %v3319_v37  ;;  %v9245_v4 = vcombine.low %v3319_v37, %v3320_v7  ;;  %v3353_v56 = vld [vmem:[#allocation3 + $0x88] sm:$0xf]  ;;  %v3354_v11 = vld [vmem:[#allocation3 + $0x8c] sm:$0x1]  ;;  %v2980_v54 = vld [vmem:[#allocation3 + $0x64] sm:$0x1] }
 0x2be   : > { %v6813_v44 = vcombine.low %v3353_v56, %v3353_v56  ;;  %v9248_v34 = vcombine.low %v3353_v56, %v3354_v11  ;;  %v9281_v53 = vpop.f32.mrf.mxu0  ;;  %v2947_v37 = vld [vmem:[#allocation3 + $0xc] sm:$0x1]  ;;  %v2894_v56 = vsel %vm7494_vm3, 0, %v2893_v48  ;;  %v2897_v11 = vsel %vm7494_vm3, 0, %v2896_v3 }
 0x2bf   : > { %12609 = vst [vmem:[#allocation27_spill] sm:$0xff] %v9245_v4  ;;  %3414 = vrot.lane.b32.xlu0 %v6779_v25, %s7299_s17  ;;  %v3495_v40 = vshrl.u32 %v9245_v4, 16  ;;  %v3497_v21 = vshll.u32 %v9245_v4, 16  ;;  %2895 = vst [vmem:[#allocation3 + $0x8] sm:$0x1] %v2894_v56  ;;  %v2710_v61 = vmul.f32 %v9281_v53, %v9304_v15 }
 0x2c0   : > { %12610 = vst [vmem:[#allocation49_spill] sm:$0xff] %v9248_v34  ;;  %3748 = vrot.lane.b32.xlu1 %v6813_v44, %s7302_s20  ;;  %v3756_v13 = vshll.u32 %v9248_v34, 16  ;;  %v3754_v43 = vshrl.u32 %v9248_v34, 16  ;;  %v9283_v55 = vpop.f32.mrf.mxu0  ;;  %v2948_v44 = vsel %vm7504_vm5, 0, %v2947_v37  ;;  %2898 = vst [vmem:[#allocation3 + $0x10] sm:$0x1] %v2897_v11 }
 0x2c1   : > { %v3499_v18 = vrot.slane %v3497_v21, 1  ;;  %2949 = vst [vmem:[#allocation3 + $0xc] sm:$0x1] %v2948_v44  ;;  %v2959_v3 = vld [vmem:[#allocation3 + $0x2c] sm:$0x1]  ;;  %v9449_v53 = vadd.f32 %v9311_v58, %v2710_v61 }
 0x2c2   : > { %v3758_v1 = vrot.slane %v3756_v13, 1  ;;  %v9285_v0 = vpop.f32.mrf.mxu0  ;;  %v2962_v44 = vld [vmem:[#allocation3 + $0x34] sm:$0x1] }
 0x2c3   : > { %v3500_v8 = vor.u32 %v3499_v18, %v3495_v40  ;;  %v2950_v40 = vld [vmem:[#allocation3 + $0x14] sm:$0x1] }
 0x2c4   : > { %v9256_v41 = vor.u32 %v3758_v1, %v3754_v43  ;;  %v9287_v50 = vpop.f32.mrf.mxu0  ;;  %v2951_v18 = vsel %vm7504_vm5, 0, %v2950_v40  ;;  %v2914_v43 = vld [vmem:[#allocation3 + $0x40] sm:$0x1]  ;;  %v2965_v1 = vld [vmem:[#allocation3 + $0x3c] sm:$0x1] }
 0x2c5   : > { %3606 = vrot.lane.b32.xlu0 %v3500_v8, %s7298_s16  ;;  %2952 = vst [vmem:[#allocation3 + $0x14] sm:$0x1] %v2951_v18  ;;  %v2915_v45 = vsel %vm7494_vm3, 0, %v2914_v43  ;;  %v2966_v16 = vsel %vm7504_vm5, 0, %v2965_v1  ;;  %v2963_v18 = vsel %vm7504_vm5, 0, %v2962_v44 }
 0x2c6   : > { %12611 = vst [vmem:[#allocation42_spill] sm:$0xff] %v9256_v41  ;;  %3790 = vrot.lane.b32.xlu1 %v9256_v41, %s7303_s9  ;;  %v9289_v12 = vpop.f32.mrf.mxu0  ;;  %2916 = vst [vmem:[#allocation3 + $0x40] sm:$0x1] %v2915_v45 }
 0x2c7   : > { %2967 = vst [vmem:[#allocation3 + $0x3c] sm:$0x1] %v2966_v16  ;;  %2964 = vst [vmem:[#allocation3 + $0x34] sm:$0x1] %v2963_v18  ;;  %v2977_v16 = vld [vmem:[#allocation3 + $0x5c] sm:$0x1] }
 0x2c8   : > { %v9291_v62 = vpop.f32.mrf.mxu0 }
 0x2c9   : > { %4016 = vrot.lane.b32.xlu0 %v3500_v8, %s7300_s18  ;;  %v2911_v8 = vld [vmem:[#allocation3 + $0x38] sm:$0x1] }
 0x2ca   : > { %v9293_v26 = vpop.f32.mrf.mxu0  ;;  %v2912_v30 = vsel %vm7494_vm3, 0, %v2911_v8 }
 0x2cb   : > { %2913 = vst [vmem:[#allocation3 + $0x38] sm:$0x1] %v2912_v30  ;;  %v2926_v30 = vld [vmem:[#allocation3 + $0x60] sm:$0x1] }
 0x2cc   : > { %v9295_v29 = vpop.f32.mrf.mxu0 }
 0x2ce   : > { %v9297_v27 = vpop.f32.mrf.mxu0 }
 0x2cf   : > { %v2718_v61 = vmul.f32 %v9297_v27, %v9304_v15 }
 0x2d0   : > { %v9299_v2 = vpop.f32.mrf.mxu0 }
 0x360   : > { %v7057_v60 = vpop.f32.mrf.mxu0 }
 0x361   : > { %v2721_v63 = vmul.f32 %v7057_v60, %v9304_v15 }
 0x362   : > { %v2634_v33 = vpop.f32.mrf.mxu0 }
 0x363   : > { %v2719_v35 = vmul.f32 %v9304_v15, %v2634_v33  ;;  %v2759_v49 = vadd.f32 %v9311_v58, %v2721_v63 }
 0x364   : > { %v7058_v47 = vpop.f32.mrf.mxu0 }
 0x365   : > { %v2722_v52 = vmul.f32 %v7058_v47, %v9304_v15  ;;  %v2757_v36 = vadd.f32 %v9311_v58, %v2719_v35  ;;  %v2791_v38 = vmax.f32 %v2759_v49, 0.0 }
 0x366   : > { %v2637_v28 = vpop.f32.mrf.mxu0 }
 0x367   : > { %v2760_v20 = vadd.f32 %v9311_v58, %v2722_v52  ;;  %v2720_v46 = vmul.f32 %v9304_v15, %v2637_v28  ;;  %v2789_v6 = vmax.f32 %v2757_v36, 0.0 }
 0x369   : > { %v2792_v14 = vmax.f32 %v2760_v20, 0.0  ;;  %v2758_v42 = vadd.f32 %v9311_v58, %v2720_v46 }
 0x36b   : > { %v7140_v17 = vpack.i.bf16 %v2792_v14, %v2791_v38  ;;  %v2790_v5 = vmax.f32 %v2758_v42, 0.0  ;;  %v2905_v14 = vld [vmem:[#allocation3 + $0x28] sm:$0x1]  ;;  %v2908_v42 = vld [vmem:[#allocation3 + $0x30] sm:$0x1] }
 0x36d   : > { %v7145_v7 = vpack.i.bf16 %v2790_v5, %v2789_v6  ;;  %v7061_v25 = vpop.f32.mrf.mxu0  ;;  %7141 = vrot.lane.b32.xlu1 %v7140_v17, %s7298_s16 }
 0x36e   : > { %v2725_v21 = vmul.f32 %v7061_v25, %v9304_v15  ;;  %v2909_v25 = vsel %vm7494_vm3, 0, %v2908_v42 }
 0x36f   : > { %v2650_v13 = vpop.f32.mrf.mxu0  ;;  %7146 = vrot.lane.b32.xlu0 %v7145_v7, %s7298_s16  ;;  %v2906_v7 = vsel %vm7494_vm3, 0, %v2905_v14  ;;  %2910 = vst [vmem:[#allocation3 + $0x30] sm:$0x1] %v2909_v25  ;;  %v2974_v14 = vld [vmem:[#allocation3 + $0x54] sm:$0x1] }
 0x370   : > { %v2723_v39 = vmul.f32 %v9304_v15, %v2650_v13  ;;  %v2763_v9 = vadd.f32 %v9311_v58, %v2725_v21  ;;  %2907 = vst [vmem:[#allocation3 + $0x28] sm:$0x1] %v2906_v7  ;;  %v2960_v21 = vsel %vm7504_vm5, 0, %v2959_v3 }
 0x371   : > { %v7062_v31 = vpop.f32.mrf.mxu0  ;;  %2961 = vst [vmem:[#allocation3 + $0x2c] sm:$0x1] %v2960_v21 }
 0x372   : > { %v2726_v60 = vmul.f32 %v7062_v31, %v9304_v15  ;;  %v2761_v63 = vadd.f32 %v9311_v58, %v2723_v39  ;;  %v2795_v52 = vmax.f32 %v2763_v9, 0.0  ;;  %v2923_v39 = vld [vmem:[#allocation3 + $0x58] sm:$0x1]  ;;  %v2927_v31 = vsel %vm7494_vm3, 0, %v2926_v30  ;;  %v2989_v30 = vld [vmem:[#allocation3 + $0x7c] sm:$0x1] }
 0x373   : > { %v2653_v33 = vpop.f32.mrf.mxu0  ;;  %v2924_v51 = vsel %vm7494_vm3, 0, %v2923_v39  ;;  %2928 = vst [vmem:[#allocation3 + $0x60] sm:$0x1] %v2927_v31  ;;  %v2990_v31 = vsel %vm7504_vm5, 0, %v2989_v30 }
 0x374   : > { %v2764_v35 = vadd.f32 %v9311_v58, %v2726_v60  ;;  %v2724_v47 = vmul.f32 %v9304_v15, %v2653_v33  ;;  %v2793_v46 = vmax.f32 %v2761_v63, 0.0  ;;  %2925 = vst [vmem:[#allocation3 + $0x58] sm:$0x1] %v2924_v51  ;;  %v2978_v33 = vsel %vm7504_vm5, 0, %v2977_v16  ;;  %v2992_v16 = vld [vmem:[#allocation3 + $0x84] sm:$0x1] }
 0x375   : > { %v7065_v49 = vpop.f32.mrf.mxu0  ;;  %2979 = vst [vmem:[#allocation3 + $0x5c] sm:$0x1] %v2978_v33  ;;  %2991 = vst [vmem:[#allocation3 + $0x7c] sm:$0x1] %v2990_v31  ;;  %v2932_v33 = vld [vmem:[#allocation3 + $0x70] sm:$0x1] }
 0x376   : > { %v2796_v28 = vmax.f32 %v2764_v35, 0.0  ;;  %v2762_v36 = vadd.f32 %v9311_v58, %v2724_v47  ;;  %v2729_v20 = vmul.f32 %v7065_v49, %v9304_v15  ;;  %v2981_v47 = vsel %vm7504_vm5, 0, %v2980_v54  ;;  %v2917_v49 = vld [vmem:[#allocation3 + $0x48] sm:$0x1] }
 0x377   : > { %v2666_v38 = vpop.f32.mrf.mxu0  ;;  %2982 = vst [vmem:[#allocation3 + $0x64] sm:$0x1] %v2981_v47  ;;  %v2929_v54 = vld [vmem:[#allocation3 + $0x68] sm:$0x1]  ;;  %v2986_v47 = vld [vmem:[#allocation3 + $0x74] sm:$0x1] }
 0x378   : > { %v7150_v6 = vpack.i.bf16 %v2796_v28, %v2795_v52  ;;  %v2794_v17 = vmax.f32 %v2762_v36, 0.0  ;;  %v2767_v5 = vadd.f32 %v9311_v58, %v2729_v20  ;;  %v2727_v48 = vmul.f32 %v9304_v15, %v2666_v38  ;;  %v2920_v52 = vld [vmem:[#allocation3 + $0x50] sm:$0x1]  ;;  %v2971_v38 = vld [vmem:[#allocation3 + $0x4c] sm:$0x1] }
 0x379   : > { %v7066_v37 = vpop.f32.mrf.mxu0  ;;  %v2972_v25 = vsel %vm7504_vm5, 0, %v2971_v38  ;;  %v2705_v38 = vmul.f32 %v9269_v24, %v9304_v15 }
 0x37a   : > { %v7155_v56 = vpack.i.bf16 %v2794_v17, %v2793_v46  ;;  %v2730_v11 = vmul.f32 %v7066_v37, %v9304_v15  ;;  %7151 = vrot.lane.b32.xlu1 %v7150_v6, %s7298_s16  ;;  %v2799_v13 = vmax.f32 %v2767_v5, 0.0  ;;  %v2765_v8 = vadd.f32 %v9311_v58, %v2727_v48  ;;  %2973 = vst [vmem:[#allocation3 + $0x4c] sm:$0x1] %v2972_v25 }
 0x37b   : > { %v2669_v40 = vpop.f32.mrf.mxu0  ;;  %v2918_v6 = vsel %vm7494_vm3, 0, %v2917_v49  ;;  %v2921_v17 = vsel %vm7494_vm3, 0, %v2920_v52  ;;  %v2933_v49 = vsel %vm7494_vm3, 0, %v2932_v33  ;;  %v2711_v25 = vmul.f32 %v9304_v15, %v9287_v50 }
 0x37c   : > { %v2768_v43 = vadd.f32 %v9311_v58, %v2730_v11  ;;  %v2728_v1 = vmul.f32 %v9304_v15, %v2669_v40  ;;  %7156 = vrot.lane.b32.xlu0 %v7155_v56, %s7298_s16  ;;  %v2797_v28 = vmax.f32 %v2765_v8, 0.0  ;;  %2919 = vst [vmem:[#allocation3 + $0x48] sm:$0x1] %v2918_v6  ;;  %2922 = vst [vmem:[#allocation3 + $0x50] sm:$0x1] %v2921_v17  ;;  %v2975_v56 = vsel %vm7504_vm5, 0, %v2974_v14 }
 0x37d   : > { %v7069_v45 = vpop.f32.mrf.mxu0  ;;  %2976 = vst [vmem:[#allocation3 + $0x54] sm:$0x1] %v2975_v56  ;;  %v2935_v40 = vld [vmem:[#allocation3 + $0x78] sm:$0x1]  ;;  %2934 = vst [vmem:[#allocation3 + $0x70] sm:$0x1] %v2933_v49  ;;  %v2703_v14 = vmul.f32 %v9304_v15, %v9271_v10  ;;  %v2709_v6 = vmul.f32 %v9277_v23, %v9304_v15 }
 0x37e   : > { %v2800_v9 = vmax.f32 %v2768_v43, 0.0  ;;  %v2766_v60 = vadd.f32 %v9311_v58, %v2728_v1  ;;  %v2733_v63 = vmul.f32 %v7069_v45, %v9304_v15  ;;  %v2936_v8 = vsel %vm7494_vm3, 0, %v2935_v40  ;;  %v2938_v43 = vld [vmem:[#allocation3 + $0x80] sm:$0x1] }
 0x37f   : > { %v2682_v35 = vpop.f32.mrf.mxu0  ;;  %2937 = vst [vmem:[#allocation3 + $0x78] sm:$0x1] %v2936_v8  ;;  %v2939_v39 = vsel %vm7494_vm3, 0, %v2938_v43  ;;  %v9430_v10 = vadd.f32 %v9311_v58, %v2709_v6  ;;  %v9458_v8 = vadd.f32 %v9311_v58, %v2711_v25  ;;  %v2714_v43 = vmul.f32 %v9289_v12, %v9304_v15  ;;  %v3238_v6 = vld [vmem:[#allocation3 + $0x1c] sm:$0x1] }
 0x380   : > { %v7160_v36 = vpack.i.bf16 %v2800_v9, %v2799_v13  ;;  %v2798_v20 = vmax.f32 %v2766_v60, 0.0  ;;  %v2731_v46 = vmul.f32 %v9304_v15, %v2682_v35  ;;  %v2771_v48 = vadd.f32 %v9311_v58, %v2733_v63  ;;  %2940 = vst [vmem:[#allocation3 + $0x80] sm:$0x1] %v2939_v39  ;;  %v2983_v35 = vld [vmem:[#allocation3 + $0x6c] sm:$0x1] }
 0x381   : > { %v7070_v42 = vpop.f32.mrf.mxu0  ;;  %v2993_v9 = vsel %vm7504_vm5, 0, %v2992_v16  ;;  %v2930_v60 = vsel %vm7494_vm3, 0, %v2929_v54  ;;  %v2984_v52 = vsel %vm7504_vm5, 0, %v2983_v35  ;;  %v2717_v39 = vmul.f32 %v9293_v26, %v9304_v15 }
 0x382   : > { %v7165_v5 = vpack.i.bf16 %v2798_v20, %v2797_v28  ;;  %v2734_v3 = vmul.f32 %v7070_v42, %v9304_v15  ;;  %7161 = vrot.lane.b32.xlu1 %v7160_v36, %s7298_s16  ;;  %v2769_v37 = vadd.f32 %v9311_v58, %v2731_v46  ;;  %v2803_v21 = vmax.f32 %v2771_v48, 0.0  ;;  %2994 = vst [vmem:[#allocation3 + $0x84] sm:$0x1] %v2993_v9  ;;  %v9407_v36 = vpop.permute.xlu0 %3414  ;;  %v9409_v20 = vpop.permute.xlu1 %3748 }
 0x383   : > { %v2685_v7 = vpop.f32.mrf.mxu0  ;;  %2931 = vst [vmem:[#allocation3 + $0x68] sm:$0x1] %v2930_v60  ;;  %2985 = vst [vmem:[#allocation3 + $0x6c] sm:$0x1] %v2984_v52  ;;  %v2987_v28 = vsel %vm7504_vm5, 0, %v2986_v47  ;;  %v2706_v42 = vmul.f32 %v9273_v19, %v9304_v15  ;;  %v2741_v48 = vadd.f32 %v9311_v58, %v2703_v14  ;;  %v2707_v19 = vmul.f32 %v9304_v15, %v9279_v32 }
 0x384   : > { %v2772_v11 = vadd.f32 %v9311_v58, %v2734_v3  ;;  %v2732_v44 = vmul.f32 %v9304_v15, %v2685_v7  ;;  %7166 = vrot.lane.b32.xlu0 %v7165_v5, %s7298_s16  ;;  %v2801_v1 = vmax.f32 %v2769_v37, 0.0  ;;  %2988 = vst [vmem:[#allocation3 + $0x74] sm:$0x1] %v2987_v28  ;;  %12612 = vst [vmem:[#allocation33_spill] sm:$0xff] %v9409_v20  ;;  %v2779_v32 = vmax.f32 %v9430_v10, 0.0 }
 0x385   : > { %v2743_v5 = vadd.f32 %v9311_v58, %v2705_v38  ;;  %v2744_v24 = vadd.f32 %v9311_v58, %v2706_v42  ;;  %v2742_v3 = vadd.f32 %v9311_v58, %v2704_v59  ;;  %v2708_v37 = vmul.f32 %v9304_v15, %v9283_v55  ;;  %v3235_v14 = vld [vmem:[#allocation3 + $0x18] sm:$0xf] }
 0x386   : > { %v2804_v18 = vmax.f32 %v2772_v11, 0.0  ;;  %v2770_v13 = vadd.f32 %v9311_v58, %v2732_v44  ;;  %v9411_v46 = vpop.permute.xlu0 %3606  ;;  %v9423_v17 = vpop.permute.xlu1 %3790  ;;  %v2713_v7 = vmul.f32 %v9285_v0, %v9304_v15  ;;  %v2773_v11 = vmax.f32 %v2741_v48, 0.0 }
 0x387   : > { %12613 = vst [vmem:[#allocation46_spill] sm:$0xff] %v9423_v17  ;;  %v2775_v56 = vmax.f32 %v2743_v5, 0.0  ;;  %v2776_v44 = vmax.f32 %v2744_v24, 0.0  ;;  %v2774_v40 = vmax.f32 %v2742_v3, 0.0  ;;  %v9452_v55 = vadd.f32 %v9311_v58, %v2708_v37  ;;  %v3241_v37 = vld [vmem:[#allocation3 + $0x20] sm:$0xf] }
 0x388   : > { %v7170_v45 = vpack.i.bf16 %v2804_v18, %v2803_v21  ;;  %v2802_v51 = vmax.f32 %v2770_v13, 0.0  ;;  %v9446_v21 = vadd.f32 %v9311_v58, %v2707_v19  ;;  %v9455_v0 = vadd.f32 %v9311_v58, %v2713_v7  ;;  %v3244_v7 = vld [vmem:[#allocation3 + $0x24] sm:$0x1] }
 0x389   : > { %v2780_v9 = vmax.f32 %v9449_v53, 0.0  ;;  %v2778_v12 = vmax.f32 %v9452_v55, 0.0  ;;  %v2781_v35 = vmax.f32 %v9458_v8, 0.0  ;;  %v9476_v47 = vadd.f32 %v9311_v58, %v2714_v43 }
 0x38a   : > { %v7175_v63 = vpack.i.bf16 %v2802_v51, %v2801_v1  ;;  %7171 = vrot.lane.b32.xlu1 %v7170_v45, %s7298_s16  ;;  %v9436_v23 = vpop.permute.xlu0 %4016  ;;  %v2712_v1 = vmul.f32 %v9304_v15, %v9291_v62  ;;  %v2777_v54 = vmax.f32 %v9446_v21, 0.0  ;;  %v2783_v62 = vmax.f32 %v9455_v0, 0.0 }
 0x38b   : > { %12614 = vst [vmem:[#allocation55_spill] sm:$0xff] %v9436_v23  ;;  %v9482_v38 = vadd.f32 %v9311_v58, %v2717_v39  ;;  %v2715_v19 = vmul.f32 %v9304_v15, %v9295_v29  ;;  %vm6268_vm5 = vcmask 719872  }
 0x38c   : > { %7176 = vrot.lane.b32.xlu0 %v7175_v63, %s7298_s16  ;;  %v9479_v28 = vadd.f32 %v9311_v58, %v2712_v1 }
 0x3df   : > { %v7142_v18 = vpop.permute.xlu1 %7141 }
 0x3e0   : > { %v7144_v50 = vunpack.i.h.bf16 %v7142_v18  ;;  %v7143_v13 = vunpack.i.l.bf16 %v7142_v18 }
 0x3e1   : > { %v7147_v30 = vpop.permute.xlu0 %7146 }
 0x3e2   : > { %v2872_v45 = vsel %vm544_vm8, %v2776_v44, %v7144_v50  ;;  %v2871_v51 = vsel %vm544_vm8, %v2775_v56, %v7143_v13  ;;  %v7149_v31 = vunpack.i.h.bf16 %v7147_v30  ;;  %v7148_v16 = vunpack.i.l.bf16 %v7147_v30  ;;  %v3223_v50 = vld [vmem:[#allocation3 + $0x8] sm:$0xf] }
 0x3e3   : > { %v6942_v60 = vpack.c.bf16 %v2872_v45, %v2872_v45  ;;  %v6941_v63 = vpack.c.bf16 %v2871_v51, %v2871_v51 }
 0x3e4   : > { %v2870_v33 = vsel %vm544_vm8, %v2774_v40, %v7149_v31  ;;  %v2869_v26 = vsel %vm544_vm8, %v2773_v11, %v7148_v16  ;;  %v3226_v31 = vld [vmem:[#allocation3 + $0xc] sm:$0x1]  ;;  %v3229_v16 = vld [vmem:[#allocation3 + $0x10] sm:$0xf] }
 0x3e5   : > { %v3087_v49 = vshrl.u32 %v6942_v60, 16  ;;  %v3079_v52 = vshrl.u32 %v6941_v63, 16  ;;  %v6940_v42 = vpack.c.bf16 %v2870_v33, %v2870_v33  ;;  %v6939_v59 = vpack.c.bf16 %v2869_v26, %v2869_v26 }
 0x3e6   : > { %v3090_v48 = vshll.u32 %v6942_v60, 16  ;;  %v3082_v3 = vshll.u32 %v6941_v63, 16  ;;  %v3232_v60 = vld [vmem:[#allocation3 + $0x14] sm:$0x1] }
 0x3e7   : > { %v3089_v5 = vrot.slane %v3087_v49, 7  ;;  %v3081_v24 = vrot.slane %v3079_v52, 7  ;;  %v3071_v25 = vshrl.u32 %v6940_v42, 16  ;;  %v3063_v56 = vshrl.u32 %v6939_v59, 16 }
 0x3e8   : > { %v3074_v43 = vshll.u32 %v6940_v42, 16  ;;  %v3066_v39 = vshll.u32 %v6939_v59, 16  ;;  %v9497_v42 = vadd.f32 %v9311_v58, %v2718_v61 }
 0x3e9   : > { %v3092_v11 = vor.u32 %v3090_v48, %v3089_v5  ;;  %v3093_v44 = vrot.slane %v3089_v5, 4  ;;  %v3084_v40 = vor.u32 %v3082_v3, %v3081_v24  ;;  %v3085_v18 = vrot.slane %v3081_v24, 4 }
 0x3ea   : > { %v3073_v13 = vrot.slane %v3071_v25, 7  ;;  %v3065_v1 = vrot.slane %v3063_v56, 7  ;;  %v2784_v25 = vmax.f32 %v9476_v47, 0.0  ;;  %v2782_v56 = vmax.f32 %v9479_v28, 0.0 }
 0x3eb   : > { %v3242_v45 = vsel %vm7511_vm6, %v3092_v11, %v3241_v37  ;;  %v3245_v29 = vsel %vm7494_vm3, %v3093_v44, %v3244_v7  ;;  %v3236_v27 = vsel %vm7511_vm6, %v3084_v40, %v3235_v14  ;;  %v3239_v51 = vsel %vm7494_vm3, %v3085_v18, %v3238_v6 }
 0x3ec   : > { %3243 = vst [vmem:[#allocation3 + $0x20] sm:$0xf] %v3242_v45  ;;  %3246 = vst [vmem:[#allocation3 + $0x24] sm:$0x1] %v3245_v29  ;;  %v3076_v63 = vor.u32 %v3074_v43, %v3073_v13  ;;  %v3077_v33 = vrot.slane %v3073_v13, 4  ;;  %v3068_v26 = vor.u32 %v3066_v39, %v3065_v1  ;;  %v3069_v49 = vrot.slane %v3065_v1, 4  ;;  %v7152_v52 = vpop.permute.xlu1 %7151 }
 0x3ed   : > { %3237 = vst [vmem:[#allocation3 + $0x18] sm:$0xf] %v3236_v27  ;;  %3240 = vst [vmem:[#allocation3 + $0x1c] sm:$0x1] %v3239_v51  ;;  %v2716_v14 = vmul.f32 %v9304_v15, %v9299_v2  ;;  %v7154_v59 = vunpack.i.h.bf16 %v7152_v52  ;;  %v7153_v6 = vunpack.i.l.bf16 %v7152_v52  ;;  %v2787_v40 = vmax.f32 %v9482_v38, 0.0 }
 0x3ee   : > { %v3230_v5 = vsel %vm7511_vm6, %v3076_v63, %v3229_v16  ;;  %v3233_v48 = vsel %vm7494_vm3, %v3077_v33, %v3232_v60  ;;  %v3224_v24 = vsel %vm7511_vm6, %v3068_v26, %v3223_v50  ;;  %v3227_v3 = vsel %vm7494_vm3, %v3069_v49, %v3226_v31  ;;  %v7157_v37 = vpop.permute.xlu0 %7156  ;;  %v3259_v13 = vld [vmem:[#allocation3 + $0x38] sm:$0xf]  ;;  %v3262_v29 = vld [vmem:[#allocation3 + $0x3c] sm:$0x1]  ;;  %v3268_v16 = vld [vmem:[#allocation3 + $0x44] sm:$0x1] }
 0x3ef   : > { %3231 = vst [vmem:[#allocation3 + $0x10] sm:$0xf] %v3230_v5  ;;  %3234 = vst [vmem:[#allocation3 + $0x14] sm:$0x1] %v3233_v48  ;;  %v2876_v2 = vsel %vm544_vm8, %v2780_v9, %v7154_v59  ;;  %v2875_v15 = vsel %vm544_vm8, %v2779_v32, %v7153_v6  ;;  %v7159_v61 = vunpack.i.h.bf16 %v7157_v37  ;;  %v7158_v7 = vunpack.i.l.bf16 %v7157_v37  ;;  %v3247_v59 = vld [vmem:[#allocation3 + $0x28] sm:$0xf] }
 0x3f0   : > { %3225 = vst [vmem:[#allocation3 + $0x8] sm:$0xf] %v3224_v24  ;;  %3228 = vst [vmem:[#allocation3 + $0xc] sm:$0x1] %v3227_v3  ;;  %v6946_v11 = vpack.c.bf16 %v2876_v2, %v2876_v2  ;;  %v6945_v44 = vpack.c.bf16 %v2875_v15, %v2875_v15  ;;  %v9519_v18 = vadd.f32 %v9311_v58, %v2715_v19  ;;  %v2788_v32 = vmax.f32 %v9497_v42, 0.0 }
 0x3f1   : > { %v2874_v53 = vsel %vm544_vm8, %v2778_v12, %v7159_v61  ;;  %v2873_v10 = vsel %vm544_vm8, %v2777_v54, %v7158_v7  ;;  %v9529_v9 = vadd.f32 %v9311_v58, %v2716_v14  ;;  %v3265_v12 = vld [vmem:[#allocation3 + $0x40] sm:$0xf]  ;;  %v3250_v7 = vld [vmem:[#allocation3 + $0x2c] sm:$0x1] }
 0x3f2   : > { %v3119_v47 = vshrl.u32 %v6946_v11, 16  ;;  %v3111_v50 = vshrl.u32 %v6945_v44, 16  ;;  %v3122_v43 = vshll.u32 %v6946_v11, 16  ;;  %v3114_v1 = vshll.u32 %v6945_v44, 16  ;;  %v3253_v11 = vld [vmem:[#allocation3 + $0x30] sm:$0xf] }
 0x3f3   : > { %v6944_v19 = vpack.c.bf16 %v2874_v53, %v2874_v53  ;;  %v6943_v39 = vpack.c.bf16 %v2873_v10, %v2873_v10  ;;  %v3256_v44 = vld [vmem:[#allocation3 + $0x34] sm:$0x1] }
 0x3f4   : > { %v3325_v45 = vld [vmem:[#allocation3 + $0x18] sm:$0xf]  ;;  %v3326_v55 = vld [vmem:[#allocation3 + $0x1c] sm:$0x1]  ;;  %v3121_v27 = vrot.slane %v3119_v47, 7  ;;  %v3113_v21 = vrot.slane %v3111_v50, 7  ;;  %v7162_v51 = vpop.permute.xlu1 %7161 }
 0x3f5   : > { %v6782_v54 = vcombine.low %v3325_v45, %v3325_v45  ;;  %v9531_v31 = vcombine.low %v3325_v45, %v3326_v55  ;;  %v3103_v58 = vshrl.u32 %v6944_v19, 16  ;;  %v3106_v60 = vshll.u32 %v6944_v19, 16 }
 0x3f6   : > { %v3095_v63 = vshrl.u32 %v6943_v39, 16  ;;  %v3098_v33 = vshll.u32 %v6943_v39, 16  ;;  %v3124_v26 = vor.u32 %v3122_v43, %v3121_v27  ;;  %v3125_v49 = vrot.slane %v3121_v27, 4  ;;  %v7167_v3 = vpop.permute.xlu0 %7166  ;;  %v3324_v30 = vld [vmem:[#allocation3 + $0x14] sm:$0x1] }
 0x3f7   : > { %v3116_v52 = vor.u32 %v3114_v1, %v3113_v21  ;;  %v3117_v14 = vrot.slane %v3113_v21, 4  ;;  %3420 = vrot.lane.b32.xlu1 %v6782_v54, %s7299_s17  ;;  %3645 = vrot.lane.b32.xlu0 %v6782_v54, %s7300_s18  ;;  %v3105_v6 = vrot.slane %v3103_v58, 7  ;;  %v7164_v48 = vunpack.i.h.bf16 %v7162_v51 }
 0x3f8   : > { %v3097_v5 = vrot.slane %v3095_v63, 7  ;;  %v7163_v24 = vunpack.i.l.bf16 %v7162_v51  ;;  %v3266_v37 = vsel %vm7511_vm6, %v3124_v26, %v3265_v12  ;;  %v3269_v2 = vsel %vm7494_vm3, %v3125_v49, %v3268_v16  ;;  %v3283_v26 = vld [vmem:[#allocation3 + $0x58] sm:$0xf]  ;;  %v3289_v49 = vld [vmem:[#allocation3 + $0x60] sm:$0xf] }
 0x3f9   : > { %v3260_v15 = vsel %vm7511_vm6, %v3116_v52, %v3259_v13  ;;  %v3263_v61 = vsel %vm7494_vm3, %v3117_v14, %v3262_v29  ;;  %3267 = vst [vmem:[#allocation3 + $0x40] sm:$0xf] %v3266_v37  ;;  %3270 = vst [vmem:[#allocation3 + $0x44] sm:$0x1] %v3269_v2  ;;  %v3108_v53 = vor.u32 %v3106_v60, %v3105_v6  ;;  %v3109_v10 = vrot.slane %v3105_v6, 4 }
 0x3fa   : > { %3261 = vst [vmem:[#allocation3 + $0x38] sm:$0xf] %v3260_v15  ;;  %3264 = vst [vmem:[#allocation3 + $0x3c] sm:$0x1] %v3263_v61  ;;  %v3100_v47 = vor.u32 %v3098_v33, %v3097_v5  ;;  %v3101_v50 = vrot.slane %v3097_v5, 4  ;;  %v2880_v43 = vsel %vm544_vm8, %v2784_v25, %v7164_v48  ;;  %v2879_v13 = vsel %vm544_vm8, %v2783_v62, %v7163_v24 }
 0x3fb   : > { %v7169_v1 = vunpack.i.h.bf16 %v7167_v3  ;;  %v7168_v19 = vunpack.i.l.bf16 %v7167_v3  ;;  %3720 = vrot.lane.b32.xlu1 %v6782_v54, %s7302_s20  ;;  %4052 = vrot.lane.b32.xlu0 %v9531_v31, %s7304_s12  ;;  %v3254_v39 = vsel %vm7511_vm6, %v3108_v53, %v3253_v11  ;;  %v3257_v45 = vsel %vm7494_vm3, %v3109_v10, %v3256_v44  ;;  %v3292_v6 = vld [vmem:[#allocation3 + $0x64] sm:$0x1]  ;;  %v3271_v24 = vld [vmem:[#allocation3 + $0x48] sm:$0xf]  ;;  %v3277_v3 = vld [vmem:[#allocation3 + $0x50] sm:$0xf] }
 0x3fc   : > { %v3248_v25 = vsel %vm7511_vm6, %v3100_v47, %v3247_v59  ;;  %v3251_v0 = vsel %vm7494_vm3, %v3101_v50, %v3250_v7  ;;  %3255 = vst [vmem:[#allocation3 + $0x30] sm:$0xf] %v3254_v39  ;;  %3258 = vst [vmem:[#allocation3 + $0x34] sm:$0x1] %v3257_v45  ;;  %v6950_v62 = vpack.c.bf16 %v2880_v43, %v2880_v43  ;;  %v7172_v27 = vpop.permute.xlu1 %7171  ;;  %v3274_v10 = vld [vmem:[#allocation3 + $0x4c] sm:$0x1] }
 0x3fd   : > { %3249 = vst [vmem:[#allocation3 + $0x28] sm:$0xf] %v3248_v25  ;;  %3252 = vst [vmem:[#allocation3 + $0x2c] sm:$0x1] %v3251_v0  ;;  %v6949_v55 = vpack.c.bf16 %v2879_v13, %v2879_v13  ;;  %v2878_v29 = vsel %vm544_vm8, %v2782_v56, %v7169_v1  ;;  %v2877_v12 = vsel %vm544_vm8, %v2781_v35, %v7168_v19  ;;  %v7174_v54 = vunpack.i.h.bf16 %v7172_v27  ;;  %v3286_v56 = vld [vmem:[#allocation3 + $0x5c] sm:$0x1] }
 0x3fe   : > { %v6948_v21 = vpack.c.bf16 %v2878_v29, %v2878_v29  ;;  %v6947_v51 = vpack.c.bf16 %v2877_v12, %v2877_v12  ;;  %v7173_v16 = vunpack.i.l.bf16 %v7172_v27  ;;  %v3151_v58 = vshrl.u32 %v6950_v62, 16  ;;  %v3280_v47 = vld [vmem:[#allocation3 + $0x54] sm:$0x1]  ;;  %v7177_v19 = vpop.permute.xlu0 %7176  ;;  %v3321_v39 = vld [vmem:[#allocation3 + $0x8] sm:$0xf] }
 0x3ff   : > { %v3154_v60 = vshll.u32 %v6950_v62, 16  ;;  %v3143_v63 = vshrl.u32 %v6949_v55, 16  ;;  %v3146_v33 = vshll.u32 %v6949_v55, 16  ;;  %v2884_v35 = vsel %vm544_vm8, %v2788_v32, %v7174_v54 }
 0x400   : > { %v3135_v52 = vshrl.u32 %v6948_v21, 16  ;;  %v3138_v14 = vshll.u32 %v6948_v21, 16  ;;  %v3127_v28 = vshrl.u32 %v6947_v51, 16  ;;  %v3130_v59 = vshll.u32 %v6947_v51, 16  ;;  %v3307_v21 = vld [vmem:[#allocation3 + $0x78] sm:$0xf] }
 0x401   : > { %v3153_v8 = vrot.slane %v3151_v58, 7  ;;  %v3145_v5 = vrot.slane %v3143_v63, 7  ;;  %v2883_v48 = vsel %vm544_vm8, %v2787_v40, %v7173_v16  ;;  %v6954_v15 = vpack.c.bf16 %v2884_v35, %v2884_v35  ;;  %v3313_v51 = vld [vmem:[#allocation3 + $0x80] sm:$0xf] }
 0x402   : > { %v3137_v37 = vrot.slane %v3135_v52, 7  ;;  %v3129_v2 = vrot.slane %v3127_v28, 7  ;;  %v6953_v61 = vpack.c.bf16 %v2883_v48, %v2883_v48  ;;  %v2785_v55 = vmax.f32 %v9519_v18, 0.0  ;;  %v3322_v52 = vld [vmem:[#allocation3 + $0xc] sm:$0x1] }
 0x403   : > { %v3156_v7 = vor.u32 %v3154_v60, %v3153_v8  ;;  %v3157_v11 = vrot.slane %v3153_v8, 4  ;;  %v3148_v44 = vor.u32 %v3146_v33, %v3145_v5  ;;  %v3149_v53 = vrot.slane %v3145_v5, 4  ;;  %v3327_v60 = vld [vmem:[#allocation3 + $0x20] sm:$0xf]  ;;  %v3310_v18 = vld [vmem:[#allocation3 + $0x7c] sm:$0x1] }
 0x404   : > { %v3140_v50 = vor.u32 %v3138_v14, %v3137_v37  ;;  %v3141_v42 = vrot.slane %v3137_v37, 4  ;;  %v3132_v43 = vor.u32 %v3130_v59, %v3129_v2  ;;  %v3133_v32 = vrot.slane %v3129_v2, 4  ;;  %v3316_v14 = vld [vmem:[#allocation3 + $0x84] sm:$0x1] }
 0x405   : > { %v3290_v38 = vsel %vm7511_vm6, %v3156_v7, %v3289_v49  ;;  %v3293_v40 = vsel %vm7494_vm3, %v3157_v11, %v3292_v6  ;;  %v3284_v13 = vsel %vm7511_vm6, %v3148_v44, %v3283_v26  ;;  %v3287_v1 = vsel %vm7494_vm3, %v3149_v53, %v3286_v56  ;;  %v3295_v53 = vld [vmem:[#allocation3 + $0x68] sm:$0xf] }
 0x406   : > { %3291 = vst [vmem:[#allocation3 + $0x60] sm:$0xf] %v3290_v38  ;;  %3294 = vst [vmem:[#allocation3 + $0x64] sm:$0x1] %v3293_v40  ;;  %v3278_v45 = vsel %vm7511_vm6, %v3140_v50, %v3277_v3  ;;  %v3281_v25 = vsel %vm7494_vm3, %v3141_v42, %v3280_v47  ;;  %v3272_v0 = vsel %vm7511_vm6, %v3132_v43, %v3271_v24  ;;  %v2786_v29 = vmax.f32 %v9529_v9, 0.0 }
 0x407   : > { %3285 = vst [vmem:[#allocation3 + $0x58] sm:$0xf] %v3284_v13  ;;  %3288 = vst [vmem:[#allocation3 + $0x5c] sm:$0x1] %v3287_v1  ;;  %v3275_v62 = vsel %vm7494_vm3, %v3133_v32, %v3274_v10  ;;  %v3183_v12 = vshrl.u32 %v6954_v15, 16  ;;  %v3175_v27 = vshrl.u32 %v6953_v61, 16  ;;  %v7179_v54 = vunpack.i.h.bf16 %v7177_v19 }
 0x408   : > { %3279 = vst [vmem:[#allocation3 + $0x50] sm:$0xf] %v3278_v45  ;;  %3282 = vst [vmem:[#allocation3 + $0x54] sm:$0x1] %v3281_v25  ;;  %v7178_v16 = vunpack.i.l.bf16 %v7177_v19  ;;  %v6780_v58 = vcombine.low %v3321_v39, %v3321_v39  ;;  %v3186_v33 = vshll.u32 %v6954_v15, 16  ;;  %v3178_v49 = vshll.u32 %v6953_v61, 16 }
 0x409   : > { %3273 = vst [vmem:[#allocation3 + $0x48] sm:$0xf] %v3272_v0  ;;  %3276 = vst [vmem:[#allocation3 + $0x4c] sm:$0x1] %v3275_v62  ;;  %v3185_v63 = vrot.slane %v3183_v12, 7  ;;  %v3177_v26 = vrot.slane %v3175_v27, 7  ;;  %v2882_v9 = vsel %vm544_vm8, %v2786_v29, %v7179_v54  ;;  %v9593_v24 = vcombine.low %v3321_v39, %v3322_v52 }
 0x40a   : > { %v2881_v28 = vsel %vm544_vm8, %v2785_v55, %v7178_v16  ;;  %3641 = vrot.lane.b32.xlu0 %v6780_v58, %s7300_s18  ;;  %3416 = vrot.lane.b32.xlu1 %v6780_v58, %s7299_s17  ;;  %v3518_v59 = vshll.u32 %v9531_v31, 16  ;;  %v6952_v35 = vpack.c.bf16 %v2882_v9, %v2882_v9  ;;  %v3328_v3 = vld [vmem:[#allocation3 + $0x24] sm:$0x1]  ;;  %v6783_v37 = vcombine.low %v3327_v60, %v3327_v60  ;;  %v3298_v50 = vld [vmem:[#allocation3 + $0x6c] sm:$0x1] }
 0x40b   : > { %v3188_v56 = vor.u32 %v3186_v33, %v3185_v63  ;;  %v3189_v6 = vrot.slane %v3185_v63, 4  ;;  %v3180_v8 = vor.u32 %v3178_v49, %v3177_v26  ;;  %v3181_v5 = vrot.slane %v3177_v26, 4  ;;  %12616 = vst [vmem:[#allocation9_spill] sm:$0xff] %v9593_v24  ;;  %v3301_v40 = vld [vmem:[#allocation3 + $0x70] sm:$0xf] }
 0x40c   : > { %v6951_v48 = vpack.c.bf16 %v2881_v28, %v2881_v28  ;;  %v3167_v11 = vshrl.u32 %v6952_v35, 16  ;;  %v9606_v10 = vcombine.low %v3327_v60, %v3328_v3  ;;  %v3520_v47 = vrot.slane %v3518_v59, 1  ;;  %v3304_v13 = vld [vmem:[#allocation3 + $0x74] sm:$0x1]  ;;  %v3323_v27 = vld [vmem:[#allocation3 + $0x10] sm:$0xf] }
 0x40d   : > { %v3314_v2 = vsel %vm7511_vm6, %v3188_v56, %v3313_v51  ;;  %v3317_v15 = vsel %vm7494_vm3, %v3189_v6, %v3316_v14  ;;  %v3308_v61 = vsel %vm7511_vm6, %v3180_v8, %v3307_v21  ;;  %v3311_v7 = vsel %vm7494_vm3, %v3181_v5, %v3310_v18  ;;  %v3333_v51 = vld [vmem:[#allocation3 + $0x38] sm:$0xf]  ;;  %v3329_v18 = vld [vmem:[#allocation3 + $0x28] sm:$0xf]  ;;  %v3330_v9 = vld [vmem:[#allocation3 + $0x2c] sm:$0x1] }
 0x40e   : > { %3315 = vst [vmem:[#allocation3 + $0x80] sm:$0xf] %v3314_v2  ;;  %3318 = vst [vmem:[#allocation3 + $0x84] sm:$0x1] %v3317_v15  ;;  %v3159_v44 = vshrl.u32 %v6951_v48, 16  ;;  %4048 = vrot.lane.b32.xlu0 %v9593_v24, %s7304_s12  ;;  %3647 = vrot.lane.b32.xlu1 %v6783_v37, %s7300_s18  ;;  %v3169_v42 = vrot.slane %v3167_v11, 7  ;;  %v6781_v21 = vcombine.low %v3323_v27, %v3323_v27 }
 0x40f   : > { %3309 = vst [vmem:[#allocation3 + $0x78] sm:$0xf] %v3308_v61  ;;  %3312 = vst [vmem:[#allocation3 + $0x7c] sm:$0x1] %v3311_v7  ;;  %v3170_v43 = vshll.u32 %v6952_v35, 16  ;;  %v3162_v38 = vshll.u32 %v6951_v48, 16  ;;  %v9635_v54 = vcombine.low %v3323_v27, %v3324_v30  ;;  %v6786_v16 = vcombine.low %v3333_v51, %v3333_v51 }
 0x410   : > { %v3161_v32 = vrot.slane %v3159_v44, 7  ;;  %v3516_v1 = vshrl.u32 %v9531_v31, 16  ;;  %v3173_v39 = vrot.slane %v3169_v42, 4  ;;  %v3504_v57 = vshll.u32 %v9593_v24, 16  ;;  %v3334_v56 = vld [vmem:[#allocation3 + $0x3c] sm:$0x1] }
 0x411   : > { %v3172_v19 = vor.u32 %v3170_v43, %v3169_v42  ;;  %v3525_v60 = vshll.u32 %v9606_v10, 16  ;;  %v3502_v63 = vshrl.u32 %v9593_v24, 16  ;;  %v3523_v49 = vshrl.u32 %v9606_v10, 16  ;;  %v3335_v6 = vld [vmem:[#allocation3 + $0x40] sm:$0xf] }
 0x412   : > { %v3164_v45 = vor.u32 %v3162_v38, %v3161_v32  ;;  %v3165_v25 = vrot.slane %v3161_v32, 4  ;;  %3422 = vrot.lane.b32.xlu0 %v6783_v37, %s7299_s17  ;;  %4054 = vrot.lane.b32.xlu1 %v9606_v10, %s7304_s12  ;;  %v9612_v0 = vor.u32 %v3520_v47, %v3516_v1  ;;  %v3305_v55 = vsel %vm7494_vm3, %v3173_v39, %v3304_v13  ;;  %v3331_v7 = vld [vmem:[#allocation3 + $0x30] sm:$0xf]  ;;  %v7282_v47 = vld [vmem:[%s12345_s5 + $0x18] sm:$0xff]   ;;  %v3332_v42 = vld [vmem:[#allocation3 + $0x34] sm:$0x1] }
 0x413   : > { %v3302_v62 = vsel %vm7511_vm6, %v3172_v19, %v3301_v40  ;;  %3306 = vst [vmem:[#allocation3 + $0x74] sm:$0x1] %v3305_v55  ;;  %v3506_v58 = vrot.slane %v3504_v57, 1  ;;  %v3527_v26 = vrot.slane %v3525_v60, 1  ;;  %v6784_v14 = vcombine.low %v3329_v18, %v3329_v18  ;;  %v7281_v44 = vld [vmem:[%s12345_s5 + $0x20] ss:$0 sps:$4 sm:$0xff]  }
 0x414   : > { %v3296_v29 = vsel %vm7511_vm6, %v3164_v45, %v3295_v53  ;;  %v3299_v12 = vsel %vm7494_vm3, %v3165_v25, %v3298_v50  ;;  %3303 = vst [vmem:[#allocation3 + $0x70] sm:$0xf] %v3302_v62  ;;  %v9663_v28 = vcombine.low %v3329_v18, %v3330_v9  ;;  %v3511_v59 = vshll.u32 %v9635_v54, 16  ;;  %7114 = vmatprep.subr.msk.bf16.mxu1 %vm2532_vm10, %v7281_v44  ;;  %v3336_v50 = vld [vmem:[#allocation3 + $0x44] sm:$0x1]  ;;  %v7284_v1 = vld [vmem:[%s12345_s5 + $0x8] sm:$0xff]  }
 0x415   : > { %3297 = vst [vmem:[#allocation3 + $0x68] sm:$0xf] %v3296_v29  ;;  %3300 = vst [vmem:[#allocation3 + $0x6c] sm:$0x1] %v3299_v12  ;;  %v9642_v33 = vor.u32 %v3506_v58, %v3502_v63  ;;  %v9648_v52 = vor.u32 %v3527_v26, %v3523_v49  ;;  %v9670_v8 = vcombine.low %v3333_v51, %v3334_v56  ;;  %v3509_v48 = vshrl.u32 %v9635_v54, 16  ;;  %v7283_v43 = vld [vmem:[%s12345_s5 + $0x10] sm:$0xff]  }
 0x416   : > { %3722 = vrot.lane.b32.xlu0 %v6783_v37, %s7302_s20  ;;  %3612 = vrot.lane.b32.xlu1 %v9612_v0, %s7298_s16  ;;  %12617 = vst [vmem:[#allocation51_spill] sm:$0xff] %v9663_v28  ;;  %v6787_v5 = vcombine.low %v3335_v6, %v3335_v6  ;;  %v3513_v35 = vrot.slane %v3511_v59, 1  ;;  %v6785_v11 = vcombine.low %v3331_v7, %v3331_v7  ;;  %v4812_v53 = vsel %vm2532_vm10, %v7281_v44, 0  ;;  %v3341_v13 = vld [vmem:[#allocation3 + $0x58] sm:$0xf]  ;;  %v7285_v62 = vld [vmem:[%s12345_s5] sm:$0xff]  }
 0x417   : > { %v3546_v37 = vshll.u32 %v9670_v8, 16  ;;  %v3544_v15 = vshrl.u32 %v9670_v8, 16  ;;  %7072 = vmatpush3.bf16.msra.mxu1 %v4812_v53  ;;  %v9712_v32 = vcombine.low %v3335_v6, %v3336_v50  ;;  %v9714_v38 = vcombine.low %v3331_v7, %v3332_v42  ;;  %v3343_v58 = vld [vmem:[#allocation3 + $0x60] sm:$0xf]  ;;  %v3342_v18 = vld [vmem:[#allocation3 + $0x5c] sm:$0x1] }
 0x418   : > { %v9675_v3 = vor.u32 %v3513_v35, %v3509_v48  ;;  %7073 = vmatprep.subr.bf16.mxu1 %v7282_v47  ;;  %v3532_v40 = vshll.u32 %v9663_v28, 16  ;;  %v6790_v19 = vcombine.low %v3341_v13, %v3341_v13  ;;  %v3530_v25 = vshrl.u32 %v9663_v28, 16  ;;  %v3350_v24 = vld [vmem:[#allocation3 + $0x7c] sm:$0x1] }
 0x419   : > { %v3548_v2 = vrot.slane %v3546_v37, 1  ;;  %v3553_v45 = vshll.u32 %v9712_v32, 16  ;;  %v3551_v12 = vshrl.u32 %v9712_v32, 16  ;;  %v6791_v26 = vcombine.low %v3343_v58, %v3343_v58 }
 0x41a   : > { %3418 = vrot.lane.b32.xlu0 %v6781_v21, %s7299_s17  ;;  %3643 = vrot.lane.b32.xlu1 %v6781_v21, %s7300_s18  ;;  %v3534_v39 = vrot.slane %v3532_v40, 1  ;;  %v9765_v9 = vcombine.low %v3341_v13, %v3342_v18  ;;  %v3338_v40 = vld [vmem:[#allocation3 + $0x4c] sm:$0x1]  ;;  %vm6235_vm3 = vcmask 654336   ;;  %vm6301_vm6 = vcmask 785408  }
 0x41b   : > { %v9685_v61 = vor.u32 %v3548_v2, %v3544_v15  ;;  %7074 = vmatpush3.bf16.msra.mxu1 %v7282_v47  ;;  %v3555_v29 = vrot.slane %v3553_v45, 1  ;;  %v3339_v47 = vld [vmem:[#allocation3 + $0x50] sm:$0xf]  ;;  %vm6367_vm10 = vcmask 916480  }
 0x41c   : > { %7075 = vmatprep.subr.bf16.mxu1 %v7283_v43  ;;  %v9730_v55 = vor.u32 %v3534_v39, %v3530_v25  ;;  %v3574_v48 = vshll.u32 %v9765_v9, 16  ;;  %v3572_v7 = vshrl.u32 %v9765_v9, 16  ;;  %v3344_v39 = vld [vmem:[#allocation3 + $0x64] sm:$0x1]  ;;  %v3345_v22 = vld [vmem:[#allocation3 + $0x68] sm:$0xf] }
 0x41d   : > { %v9737_v27 = vor.u32 %v3555_v29, %v3551_v12  ;;  %v9818_v45 = vcombine.low %v3343_v58, %v3344_v39  ;;  %v3349_v12 = vld [vmem:[#allocation3 + $0x78] sm:$0xf] }
 0x41e   : > { %3687 = vrot.lane.b32.xlu0 %v9612_v0, %s7301_s19  ;;  %3762 = vrot.lane.b32.xlu1 %v9612_v0, %s7303_s9  ;;  %v3576_v15 = vrot.slane %v3574_v48, 1 }
 0x41f   : > { %7076 = vmatpush3.bf16.msra.mxu1 %v7283_v43  ;;  %v6789_v43 = vcombine.low %v3339_v47, %v3339_v47  ;;  %v3581_v58 = vshll.u32 %v9818_v45, 16 }
 0x420   : > { %7077 = vmatprep.subr.bf16.mxu1 %v7284_v1  ;;  %v9796_v53 = vor.u32 %v3576_v15, %v3572_v7  ;;  %v3579_v7 = vshrl.u32 %v9818_v45, 16 }
 0x421   : > { %v3583_v15 = vrot.slane %v3581_v58, 1 }
 0x422   : > { %3718 = vrot.lane.b32.xlu0 %v6781_v21, %s7302_s20  ;;  %4022 = vrot.lane.b32.xlu1 %v9612_v0, %s7300_s18  ;;  %v3337_v21 = vld [vmem:[#allocation3 + $0x48] sm:$0xf] }
 0x423   : > { %7078 = vmatpush3.bf16.msra.mxu1 %v7284_v1  ;;  %v6788_v57 = vcombine.low %v3337_v21, %v3337_v21  ;;  %v9808_v13 = vcombine.low %v3337_v21, %v3338_v40  ;;  %v9847_v39 = vor.u32 %v3583_v15, %v3579_v7 }
 0x424   : > { %7079 = vmatprep.subr.bf16.mxu1 %v7285_v62 }
 0x425   : > { %12621 = vst [vmem:[#allocation45_spill] sm:$0xff] %v9808_v13  ;;  %v3560_v29 = vshll.u32 %v9808_v13, 16 }
 0x426   : > { %3653 = vrot.lane.b32.xlu0 %v6786_v16, %s7300_s18  ;;  %4050 = vrot.lane.b32.xlu1 %v9635_v54, %s7304_s12 }
 0x427   : > { %7080 = vmatpush3.bf16.msra.mxu1 %v7285_v62 }
 0x42a   : > { %3683 = vrot.lane.b32.xlu0 %v9642_v33, %s7301_s19  ;;  %3428 = vrot.lane.b32.xlu1 %v6786_v16, %s7299_s17 }
 0x42e   : > { %3614 = vrot.lane.b32.xlu0 %v9648_v52, %s7298_s16  ;;  %3608 = vrot.lane.b32.xlu1 %v9642_v33, %s7298_s16 }
 0x432   : > { %3649 = vrot.lane.b32.xlu0 %v6784_v14, %s7300_s18  ;;  %3728 = vrot.lane.b32.xlu1 %v6786_v16, %s7302_s20  ;;  %v3539_v16 = vshll.u32 %v9714_v38, 16 }
 0x434   : > { %v3541_v49 = vrot.slane %v3539_v16, 1  ;;  %v6794_v16 = vcombine.low %v3349_v12, %v3349_v12 }
 0x436   : > { %3764 = vrot.lane.b32.xlu0 %v9648_v52, %s7303_s9  ;;  %4018 = vrot.lane.b32.xlu1 %v9642_v33, %s7300_s18 }
 0x43a   : > { %4024 = vrot.lane.b32.xlu0 %v9648_v52, %s7300_s18  ;;  %3424 = vrot.lane.b32.xlu1 %v6784_v14, %s7299_s17 }
 0x43e   : > { %4056 = vrot.lane.b32.xlu0 %v9663_v28, %s7304_s12  ;;  %3689 = vrot.lane.b32.xlu1 %v9648_v52, %s7301_s19 }
 0x442   : > { %3430 = vrot.lane.b32.xlu0 %v6787_v5, %s7299_s17  ;;  %3724 = vrot.lane.b32.xlu1 %v6784_v14, %s7302_s20  ;;  %v3537_v14 = vshrl.u32 %v9714_v38, 16 }
 0x444   : > { %v9771_v6 = vor.u32 %v3541_v49, %v3537_v14  ;;  %v3558_v49 = vshrl.u32 %v9808_v13, 16 }
 0x446   : > { %3610 = vrot.lane.b32.xlu0 %v9675_v3, %s7298_s16  ;;  %3655 = vrot.lane.b32.xlu1 %v6787_v5, %s7300_s18 }
 0x44a   : > { %3730 = vrot.lane.b32.xlu0 %v6787_v5, %s7302_s20  ;;  %3685 = vrot.lane.b32.xlu1 %v9675_v3, %s7301_s19 }
 0x44e   : > { %3760 = vrot.lane.b32.xlu0 %v9675_v3, %s7303_s9  ;;  %3620 = vrot.lane.b32.xlu1 %v9685_v61, %s7298_s16 }
 0x452   : > { %4020 = vrot.lane.b32.xlu0 %v9675_v3, %s7300_s18  ;;  %3651 = vrot.lane.b32.xlu1 %v6785_v11, %s7300_s18 }
 0x456   : > { %3426 = vrot.lane.b32.xlu0 %v6785_v11, %s7299_s17  ;;  %3770 = vrot.lane.b32.xlu1 %v9685_v61, %s7303_s9 }
 0x45a   : > { %3695 = vrot.lane.b32.xlu0 %v9685_v61, %s7301_s19  ;;  %4030 = vrot.lane.b32.xlu1 %v9685_v61, %s7300_s18 }
 0x45e   : > { %3726 = vrot.lane.b32.xlu0 %v6785_v11, %s7302_s20  ;;  %4058 = vrot.lane.b32.xlu1 %v9714_v38, %s7304_s12 }
 0x462   : > { %3661 = vrot.lane.b32.xlu0 %v6790_v19, %s7300_s18  ;;  %3436 = vrot.lane.b32.xlu1 %v6790_v19, %s7299_s17 }
 0x466   : > { %3691 = vrot.lane.b32.xlu0 %v9730_v55, %s7301_s19  ;;  %3616 = vrot.lane.b32.xlu1 %v9730_v55, %s7298_s16 }
 0x469   : > { %v9745_v30 = vpop.permute.xlu1 %3420  ;;  %v9747_v51 = vpop.permute.xlu0 %3645 }
 0x46a   : > { %3622 = vrot.lane.b32.xlu0 %v9737_v27, %s7298_s16  ;;  %3736 = vrot.lane.b32.xlu1 %v6790_v19, %s7302_s20 }
 0x46d   : > { %v9757_v60 = vpop.permute.xlu1 %3720  ;;  %v9759_v63 = vpop.permute.xlu0 %4052 }
 0x46e   : > { %3657 = vrot.lane.b32.xlu0 %v6788_v57, %s7300_s18  ;;  %3766 = vrot.lane.b32.xlu1 %v9730_v55, %s7303_s9  ;;  %12618 = vst [vmem:[#allocation40_spill] sm:$0xff] %v9759_v63  ;;  %v6792_v63 = vcombine.low %v3345_v22, %v3345_v22 }
 0x472   : > { %3772 = vrot.lane.b32.xlu0 %v9737_v27, %s7303_s9  ;;  %4026 = vrot.lane.b32.xlu1 %v9730_v55, %s7300_s18 }
 0x476   : > { %4032 = vrot.lane.b32.xlu0 %v9737_v27, %s7300_s18  ;;  %3432 = vrot.lane.b32.xlu1 %v6788_v57, %s7299_s17 }
 0x47a   : > { %3438 = vrot.lane.b32.xlu0 %v6791_v26, %s7299_s17  ;;  %3697 = vrot.lane.b32.xlu1 %v9737_v27, %s7301_s19 }
 0x47c   : > { %v9767_v59 = vpop.permute.xlu0 %3641  ;;  %v9769_v56 = vpop.permute.xlu1 %3416 }
 0x47e   : > { %3618 = vrot.lane.b32.xlu0 %v9771_v6, %s7298_s16  ;;  %3732 = vrot.lane.b32.xlu1 %v6788_v57, %s7302_s20 }
 0x480   : > { %v9776_v5 = vpop.permute.xlu0 %4048  ;;  %v9778_v35 = vpop.permute.xlu1 %3647 }
 0x481   : > { %12619 = vst [vmem:[#allocation32_spill] sm:$0xff] %v9776_v5 }
 0x482   : > { %3738 = vrot.lane.b32.xlu0 %v6791_v26, %s7302_s20  ;;  %3663 = vrot.lane.b32.xlu1 %v6791_v26, %s7300_s18  ;;  %v3562_v26 = vrot.slane %v3560_v29, 1  ;;  %v3340_v29 = vld [vmem:[#allocation3 + $0x54] sm:$0x1] }
 0x484   : > { %v9783_v37 = vpop.permute.xlu0 %3422  ;;  %v9785_v2 = vpop.permute.xlu1 %4054  ;;  %v9838_v48 = vor.u32 %v3562_v26, %v3558_v49  ;;  %v9852_v26 = vcombine.low %v3339_v47, %v3340_v29 }
 0x485   : > { %12620 = vst [vmem:[#allocation58_spill] sm:$0xff] %v9785_v2 }
 0x486   : > { %3768 = vrot.lane.b32.xlu0 %v9771_v6, %s7303_s9  ;;  %3693 = vrot.lane.b32.xlu1 %v9771_v6, %s7301_s19  ;;  %12624 = vst [vmem:[#allocation56_spill] sm:$0xff] %v9852_v26  ;;  %v3565_v2 = vshrl.u32 %v9852_v26, 16 }
 0x488   : > { %v9792_v11 = vpop.permute.xlu0 %3722  ;;  %v9794_v44 = vpop.permute.xlu1 %3612 }
 0x48a   : > { %4028 = vrot.lane.b32.xlu0 %v9771_v6, %s7300_s18  ;;  %3628 = vrot.lane.b32.xlu1 %v9796_v53, %s7298_s16 }
 0x48c   : > { %v9802_v50 = vpop.permute.xlu0 %3418  ;;  %v9804_v42 = vpop.permute.xlu1 %3643 }
 0x48e   : > { %3434 = vrot.lane.b32.xlu0 %v6789_v43, %s7299_s17  ;;  %3659 = vrot.lane.b32.xlu1 %v6789_v43, %s7300_s18 }
 0x490   : > { %v9810_v1 = vpop.permute.xlu0 %3687  ;;  %v9812_v19 = vpop.permute.xlu1 %3762 }
 0x492   : > { %3703 = vrot.lane.b32.xlu0 %v9796_v53, %s7301_s19  ;;  %3778 = vrot.lane.b32.xlu1 %v9796_v53, %s7303_s9 }
 0x494   : > { %v9820_v25 = vpop.permute.xlu0 %3718  ;;  %v9822_v62 = vpop.permute.xlu1 %4022 }
 0x495   : > { %12622 = vst [vmem:[#allocation34_spill] sm:$0xff] %v9822_v62 }
 0x496   : > { %3734 = vrot.lane.b32.xlu0 %v6789_v43, %s7302_s20  ;;  %4038 = vrot.lane.b32.xlu1 %v9796_v53, %s7300_s18 }
 0x498   : > { %v9828_v21 = vpop.permute.xlu0 %3653  ;;  %v9830_v57 = vpop.permute.xlu1 %4050 }
 0x499   : > { %12623 = vst [vmem:[#allocation48_spill] sm:$0xff] %v9830_v57  ;;  %v3567_v57 = vshll.u32 %v9852_v26, 16 }
 0x49a   : > { %3669 = vrot.lane.b32.xlu0 %v6794_v16, %s7300_s18  ;;  %3444 = vrot.lane.b32.xlu1 %v6794_v16, %s7299_s17 }
 0x49b   : > { %v3569_v29 = vrot.slane %v3567_v57, 1  ;;  %v9888_v57 = vcombine.low %v3349_v12, %v3350_v24 }
 0x49c   : > { %v3684_v18 = vpop.permute.xlu0 %3683  ;;  %v9836_v14 = vpop.permute.xlu1 %3428 }
 0x49d   : > { %v9882_v23 = vor.u32 %v3569_v29, %v3565_v2  ;;  %v3794_v2 = vsel %vm544_vm8, %v9407_v36, %v9411_v46  ;;  %v3602_v17 = vshll.u32 %v9888_v57, 16 }
 0x49e   : > { %3699 = vrot.lane.b32.xlu0 %v9838_v48, %s7301_s19  ;;  %3624 = vrot.lane.b32.xlu1 %v9838_v48, %s7298_s16  ;;  %v3840_v24 = vsel %vm1550_vm11, %v3794_v2, %v9411_v46 }
 0x49f   : > { %v3857_v20 = vsel %vm1567_vm12, %v3840_v24, %v9767_v59 }
 0x4a0   : > { %v9845_v43 = vpop.permute.xlu0 %3614  ;;  %v3609_v40 = vpop.permute.xlu1 %3608  ;;  %v3889_v34 = vsel %vm1600_vm13, %v3857_v20, %v3684_v18 }
 0x4a1   : > { %v3797_v29 = vsel %vm544_vm8, %v9769_v56, %v3609_v40  ;;  %v3920_v28 = vsel %vm1633_vm14, %v3889_v34, %v3684_v18 }
 0x4a2   : > { %3630 = vrot.lane.b32.xlu0 %v9847_v39, %s7298_s16  ;;  %3744 = vrot.lane.b32.xlu1 %v6794_v16, %s7302_s20  ;;  %v3841_v36 = vsel %vm1550_vm11, %v3797_v29, %v3609_v40  ;;  %v3347_v40 = vld [vmem:[#allocation3 + $0x70] sm:$0xf]  ;;  %v3937_v34 = vsel %vm1650_vm15, %v3920_v28, %v9820_v25 }
 0x4a3   : > { %v3859_v46 = vsel %vm1567_vm12, %v3841_v36, %v9804_v42  ;;  %v6793_v24 = vcombine.low %v3347_v40, %v3347_v40 }
 0x4a4   : > { %v9854_v58 = vpop.permute.xlu0 %3649  ;;  %v9856_v49 = vpop.permute.xlu1 %3728 }
 0x4a6   : > { %3665 = vrot.lane.b32.xlu0 %v6792_v63, %s7300_s18  ;;  %3774 = vrot.lane.b32.xlu1 %v9838_v48, %s7303_s9 }
 0x4a8   : > { %v9861_v15 = vpop.permute.xlu0 %3764  ;;  %v9863_v7 = vpop.permute.xlu1 %4018 }
 0x4a9   : > { %12625 = vst [vmem:[#allocation11_spill] sm:$0xff] %v9863_v7  ;;  %v3351_v7 = vld [vmem:[#allocation3 + $0x80] sm:$0xf] }
 0x4aa   : > { %3780 = vrot.lane.b32.xlu0 %v9847_v39, %s7303_s9  ;;  %4034 = vrot.lane.b32.xlu1 %v9838_v48, %s7300_s18  ;;  %v6811_v41 = vcombine.low %v3351_v7, %v3351_v7 }
 0x4ac   : > { %v9870_v47 = vpop.permute.xlu0 %4024  ;;  %v9872_v16 = vpop.permute.xlu1 %3424 }
 0x4ad   : > { %12626 = vst [vmem:[#allocation52_spill] sm:$0xff] %v9870_v47 }
 0x4ae   : > { %4040 = vrot.lane.b32.xlu0 %v9847_v39, %s7300_s18  ;;  %3440 = vrot.lane.b32.xlu1 %v6792_v63, %s7299_s17 }
 0x4b0   : > { %v9878_v5 = vpop.permute.xlu0 %4056  ;;  %v9880_v4 = vpop.permute.xlu1 %3689 }
 0x4b1   : > { %12627 = vst [vmem:[#allocation59_spill] sm:$0xff] %v9878_v5 }
 0x4b2   : > { %3626 = vrot.lane.b32.xlu0 %v9882_v23, %s7298_s16  ;;  %3705 = vrot.lane.b32.xlu1 %v9847_v39, %s7301_s19 }
 0x4b4   : > { %v9890_v47 = vpop.permute.xlu0 %3430  ;;  %v9892_v62 = vpop.permute.xlu1 %3724 }
 0x4b5   : > { %12628 = vst [vmem:[#allocation50_spill] sm:$0xff] %v9890_v47  ;;  %v3604_v47 = vrot.slane %v3602_v17, 1 }
 0x4b6   : > { %3746 = vrot.lane.b32.xlu0 %v6811_v41, %s7302_s20  ;;  %3740 = vrot.lane.b32.xlu1 %v6792_v63, %s7302_s20  ;;  %v3346_v63 = vld [vmem:[#allocation3 + $0x6c] sm:$0x1] }
 0x4b7   : > { %v9925_v29 = vcombine.low %v3345_v22, %v3346_v63 }
 0x4b8   : > { %v3611_v12 = vpop.permute.xlu0 %3610  ;;  %v9903_v5 = vpop.permute.xlu1 %3655 }
 0x4ba   : > { %3776 = vrot.lane.b32.xlu0 %v9882_v23, %s7303_s9  ;;  %3671 = vrot.lane.b32.xlu1 %v6811_v41, %s7300_s18  ;;  %v3600_v41 = vshrl.u32 %v9888_v57, 16 }
 0x4bc   : > { %v9913_v56 = vpop.permute.xlu0 %3730  ;;  %v3686_v2 = vpop.permute.xlu1 %3685  ;;  %v9933_v36 = vor.u32 %v3604_v47, %v3600_v41  ;;  %v3348_v41 = vld [vmem:[#allocation3 + $0x74] sm:$0x1] }
 0x4bd   : > { %v3891_v59 = vsel %vm1600_vm13, %v3859_v46, %v3686_v2 }
 0x4be   : > { %v3921_v20 = vsel %vm1633_vm14, %v3891_v59, %v3686_v2  ;;  %4036 = vrot.lane.b32.xlu0 %v9882_v23, %s7300_s18  ;;  %3701 = vrot.lane.b32.xlu1 %v9882_v23, %s7301_s19  ;;  %v3352_v2 = vld [vmem:[#allocation3 + $0x84] sm:$0x1] }
 0x4bf   : > { %v3939_v17 = vsel %vm1650_vm15, %v3921_v20, %v9757_v60  ;;  %v9944_v25 = vcombine.low %v3351_v7, %v3352_v2  ;;  %v3588_v20 = vshll.u32 %v9925_v29, 16 }
 0x4c0   : > { %v3761_v42 = vpop.permute.xlu0 %3760  ;;  %v9931_v18 = vpop.permute.xlu1 %3620  ;;  %v3971_v46 = vsel %vm1683_vm0, %v3939_v17, %v9812_v19 }
 0x4c1   : > { %v3969_v59 = vsel %vm1683_vm0, %v3937_v34, %v3761_v42  ;;  %v4001_v22 = vsel %vm1716_vm1, %v3971_v46, %v9812_v19  ;;  %v9955_v19 = vcombine.low %v3347_v40, %v3348_v41  ;;  %v3590_v34 = vrot.slane %v3588_v20, 1 }
 0x4c2   : > { %3442 = vrot.lane.b32.xlu0 %v6793_v24, %s7299_s17  ;;  %3636 = vrot.lane.b32.xlu1 %v9933_v36, %s7298_s16  ;;  %v4000_v28 = vsel %vm1716_vm1, %v3969_v59, %v3761_v42  ;;  %v3679_v42 = vshll.u32 %v9944_v25, 16  ;;  %v3586_v46 = vshrl.u32 %v9925_v29, 16 }
 0x4c3   : > { %v6847_v60 = vcombine.low %v4000_v28, %v4001_v22  ;;  %v3595_v28 = vshll.u32 %v9955_v19, 16 }
 0x4c4   : > { %v9946_v47 = vpop.permute.xlu0 %4020  ;;  %v9948_v63 = vpop.permute.xlu1 %3651  ;;  %v9970_v40 = vor.u32 %v3590_v34, %v3586_v46  ;;  %v3681_v22 = vrot.slane %v3679_v42, 1 }
 0x4c5   : > { %12629 = vst [vmem:[#allocation57_spill] sm:$0xff] %v9946_v47  ;;  %7081 = vmatprep.mubr.msk.bf16.mxu1 %vm2483_vm2, %v6847_v60  ;;  %v3800_v60 = vsel %vm544_vm8, %v9802_v50, %v3611_v12  ;;  %v3597_v46 = vrot.slane %v3595_v28, 1  ;;  %v3593_v50 = vshrl.u32 %v9955_v19, 16 }
 0x4c6   : > { %3711 = vrot.lane.b32.xlu0 %v9933_v36, %s7301_s19  ;;  %3667 = vrot.lane.b32.xlu1 %v6793_v24, %s7300_s18  ;;  %v3842_v20 = vsel %vm1550_vm11, %v3800_v60, %v3611_v12 }
 0x4c7   : > { %v9998_v60 = vor.u32 %v3597_v46, %v3593_v50 }
 0x4c8   : > { %v9957_v17 = vpop.permute.xlu0 %3426  ;;  %v9959_v7 = vpop.permute.xlu1 %3770 }
 0x4ca   : > { %3742 = vrot.lane.b32.xlu0 %v6793_v24, %s7302_s20  ;;  %3786 = vrot.lane.b32.xlu1 %v9933_v36, %s7303_s9  ;;  %v3677_v24 = vshrl.u32 %v9944_v25, 16 }
 0x4cc   : > { %v9966_v2 = vpop.permute.xlu0 %3695  ;;  %v9968_v59 = vpop.permute.xlu1 %4030  ;;  %v9985_v42 = vor.u32 %v3681_v22, %v3677_v24  ;;  %v3803_v22 = vsel %vm544_vm8, %v9745_v30, %v9794_v44 }
 0x4cd   : > { %12630 = vst [vmem:[#allocation13_spill] sm:$0xff] %v9968_v59  ;;  %v3861_v59 = vsel %vm1567_vm12, %v3842_v20, %v9747_v51  ;;  %v3843_v51 = vsel %vm1550_vm11, %v3803_v22, %v9794_v44 }
 0x4ce   : > { %3707 = vrot.lane.b32.xlu0 %v9970_v40, %s7301_s19  ;;  %4046 = vrot.lane.b32.xlu1 %v9933_v36, %s7300_s18  ;;  %v3893_v28 = vsel %vm1600_vm13, %v3861_v59, %v9810_v1  ;;  %v3863_v30 = vsel %vm1567_vm12, %v3843_v51, %v9778_v35 }
 0x4cf   : > { %v3922_v46 = vsel %vm1633_vm14, %v3893_v28, %v9810_v1  ;;  %v3895_v59 = vsel %vm1600_vm13, %v3863_v30, %v9880_v4 }
 0x4d0   : > { %v9981_v41 = vpop.permute.xlu0 %3726  ;;  %v9983_v34 = vpop.permute.xlu1 %4058  ;;  %v3941_v22 = vsel %vm1650_vm15, %v3922_v46, %v9792_v11  ;;  %v3923_v1 = vsel %vm1633_vm14, %v3895_v59, %v9880_v4 }
 0x4d1   : > { %12631 = vst [vmem:[#allocation53_spill] sm:$0xff] %v9983_v34  ;;  %v3973_v35 = vsel %vm1683_vm0, %v3941_v22, %v9861_v15  ;;  %v3943_v28 = vsel %vm1650_vm15, %v3923_v1, %v9892_v62 }
 0x4d2   : > { %3788 = vrot.lane.b32.xlu0 %v9985_v42, %s7303_s9  ;;  %3632 = vrot.lane.b32.xlu1 %v9970_v40, %s7298_s16  ;;  %v4002_v46 = vsel %vm1716_vm1, %v3973_v35, %v9861_v15  ;;  %v3806_v35 = vsel %vm544_vm8, %v9783_v37, %v9845_v43 }
 0x4d4   : > { %v9994_v47 = vpop.permute.xlu0 %3661  ;;  %v9996_v12 = vpop.permute.xlu1 %3436 }
 0x4d6   : > { %3634 = vrot.lane.b32.xlu0 %v9998_v60, %s7298_s16  ;;  %3782 = vrot.lane.b32.xlu1 %v9970_v40, %s7303_s9 }
 0x4d8   : > { %v3692_v24 = vpop.permute.xlu0 %3691  ;;  %v3617_v20 = vpop.permute.xlu1 %3616 }
 0x4da   : > { %3784 = vrot.lane.b32.xlu0 %v9998_v60, %s7303_s9  ;;  %4042 = vrot.lane.b32.xlu1 %v9970_v40, %s7300_s18 }
 0x4dc   : > { %v10021_v50 = vpop.permute.xlu0 %3622  ;;  %v10023_v44 = vpop.permute.xlu1 %3736 }
 0x4de   : > { %4044 = vrot.lane.b32.xlu0 %v9998_v60, %s7300_s18  ;;  %3713 = vrot.lane.b32.xlu1 %v9985_v42, %s7301_s19 }
 0x4e0   : > { %v10037_v51 = vpop.permute.xlu0 %3657  ;;  %v3767_v30 = vpop.permute.xlu1 %3766 }
 0x4e1   : > { %v3975_v11 = vsel %vm1683_vm0, %v3943_v28, %v3767_v30 }
 0x4e2   : > { %v4003_v34 = vsel %vm1716_vm1, %v3975_v11, %v3767_v30  ;;  %4060 = vrot.lane.b32.xlu0 %v9670_v8, %s7304_s12  ;;  %3709 = vrot.lane.b32.xlu1 %v9998_v60, %s7301_s19  ;;  %v3844_v11 = vsel %vm1550_vm11, %v3806_v35, %v9845_v43 }
 0x4e3   : > { %v6848_v4 = vcombine.low %v4002_v46, %v4003_v34  ;;  %v3865_v46 = vsel %vm1567_vm12, %v3844_v11, %v9854_v58 }
 0x4e4   : > { %v10047_v59 = vpop.permute.xlu0 %3772  ;;  %v10049_v62 = vpop.permute.xlu1 %4026  ;;  %v3897_v37 = vsel %vm1600_vm13, %v3865_v46, %v3692_v24 }
 0x4e5   : > { %12632 = vst [vmem:[#allocation60_spill] sm:$0xff] %v10049_v62  ;;  %7082 = vmatmul.mubr.msk.bf16.vlgmr.msra.gmra.mxu1 %vm2483_vm2, %v6848_v4  ;;  %v3809_v4 = vsel %vm544_vm8, %v9872_v16, %v3617_v20  ;;  %v3924_v35 = vsel %vm1633_vm14, %v3897_v37, %v3692_v24 }
 0x4e6   : > { %4064 = vrot.lane.b32.xlu0 %v9808_v13, %s7304_s12  ;;  %4062 = vrot.lane.b32.xlu1 %v9712_v32, %s7304_s12  ;;  %v3845_v43 = vsel %vm1550_vm11, %v3809_v4, %v3617_v20  ;;  %v3945_v46 = vsel %vm1650_vm15, %v3924_v35, %v9981_v41 }
 0x4e7   : > { %v3867_v16 = vsel %vm1567_vm12, %v3845_v43, %v9948_v63 }
 0x4e8   : > { %v10056_v15 = vpop.permute.xlu0 %4032  ;;  %v10058_v22 = vpop.permute.xlu1 %3432 }
 0x4e9   : > { %12633 = vst [vmem:[#allocation14_spill] sm:$0xff] %v10056_v15 }
 0x4ea   : > { %4068 = vrot.lane.b32.xlu0 %v9765_v9, %s7304_s12  ;;  %4066 = vrot.lane.b32.xlu1 %v9852_v26, %s7304_s12 }
 0x4ec   : > { %v10064_v34 = vpop.permute.xlu0 %3438  ;;  %v10066_v1 = vpop.permute.xlu1 %3697 }
 0x4ed   : > { %12634 = vst [vmem:[#allocation61_spill] sm:$0xff] %v10064_v34 }
 0x4ee   : > { %4072 = vrot.lane.b32.xlu0 %v9925_v29, %s7304_s12  ;;  %4070 = vrot.lane.b32.xlu1 %v9818_v45, %s7304_s12 }
 0x4f0   : > { %v3619_v28 = vpop.permute.xlu0 %3618  ;;  %v10075_v30 = vpop.permute.xlu1 %3732 }
 0x4f2   : > { %4076 = vrot.lane.b32.xlu0 %v9888_v57, %s7304_s12  ;;  %4074 = vrot.lane.b32.xlu1 %v9955_v19, %s7304_s12 }
 0x4f4   : > { %v10088_v15 = vpop.permute.xlu0 %3738  ;;  %v10090_v62 = vpop.permute.xlu1 %3663 }
 0x4f6   : > { %4080 = vrot.lane.b32.xlu0 %v9642_v33, %s7302_s20  ;;  %4078 = vrot.lane.b32.xlu1 %v9944_v25, %s7304_s12 }
 0x4f8   : > { %v3769_v58 = vpop.permute.xlu0 %3768  ;;  %v3694_v11 = vpop.permute.xlu1 %3693 }
 0x4f9   : > { %v3899_v34 = vsel %vm1600_vm13, %v3867_v16, %v3694_v11  ;;  %v3977_v20 = vsel %vm1683_vm0, %v3945_v46, %v3769_v58  ;;  %v3812_v16 = vsel %vm544_vm8, %v9957_v17, %v3619_v28 }
 0x4fa   : > { %v3925_v24 = vsel %vm1633_vm14, %v3899_v34, %v3694_v11  ;;  %4084 = vrot.lane.b32.xlu0 %v9612_v0, %s7302_s20  ;;  %4082 = vrot.lane.b32.xlu1 %v9675_v3, %s7302_s20  ;;  %v4004_v37 = vsel %vm1716_vm1, %v3977_v20, %v3769_v58  ;;  %v3846_v11 = vsel %vm1550_vm11, %v3812_v16, %v3619_v28 }
 0x4fb   : > { %v3947_v33 = vsel %vm1650_vm15, %v3925_v24, %v9856_v49  ;;  %v3869_v17 = vsel %vm1567_vm12, %v3846_v11, %v9828_v21  ;;  %v3815_v28 = vsel %vm544_vm8, %v9836_v14, %v9931_v18 }
 0x4fc   : > { %v3979_v63 = vsel %vm1683_vm0, %v3947_v33, %v9959_v7  ;;  %v10113_v4 = vpop.permute.xlu0 %4028  ;;  %v10115_v41 = vpop.permute.xlu1 %3628  ;;  %v3847_v21 = vsel %vm1550_vm11, %v3815_v28, %v9931_v18 }
 0x4fd   : > { %v4005_v34 = vsel %vm1716_vm1, %v3979_v63, %v9959_v7  ;;  %v3901_v63 = vsel %vm1600_vm13, %v3869_v17, %v9966_v2  ;;  %v3871_v14 = vsel %vm1567_vm12, %v3847_v21, %v9903_v5 }
 0x4fe   : > { %4088 = vrot.lane.b32.xlu0 %v9730_v55, %s7302_s20  ;;  %4086 = vrot.lane.b32.xlu1 %v9648_v52, %s7302_s20  ;;  %v6849_v43 = vcombine.low %v4004_v37, %v4005_v34  ;;  %v3903_v16 = vsel %vm1600_vm13, %v3871_v14, %v10066_v1 }
 0x500   : > { %v10124_v49 = vpop.permute.xlu0 %3434  ;;  %7085 = vmatprep.mubr.msk.bf16.mxu1 %vm2483_vm2, %v6849_v43  ;;  %v10127_v35 = vpop.permute.xlu1 %3659  ;;  %v3926_v43 = vsel %vm1633_vm14, %v3901_v63, %v9966_v2  ;;  %v3927_v2 = vsel %vm1633_vm14, %v3903_v16, %v10066_v1 }
 0x501   : > { %v3949_v17 = vsel %vm1650_vm15, %v3926_v43, %v9913_v56  ;;  %v3951_v28 = vsel %vm1650_vm15, %v3927_v2, %v10075_v30 }
 0x502   : > { %4092 = vrot.lane.b32.xlu0 %v9685_v61, %s7302_s20  ;;  %4090 = vrot.lane.b32.xlu1 %v9771_v6, %s7302_s20  ;;  %v3981_v5 = vsel %vm1683_vm0, %v3949_v17, %v10047_v59 }
 0x503   : > { %v4006_v43 = vsel %vm1716_vm1, %v3981_v5, %v10047_v59  ;;  %v12637_v59 = vld [vmem:[#allocation51_spill] sm:$0xff] }
 0x504   : > { %v10133_v7 = vpop.permute.xlu0 %3703  ;;  %v10135_v58 = vpop.permute.xlu1 %3778 }
 0x506   : > { %4096 = vrot.lane.b32.xlu0 %v9838_v48, %s7302_s20  ;;  %4094 = vrot.lane.b32.xlu1 %v9737_v27, %s7302_s20 }
 0x508   : > { %v10144_v46 = vpop.permute.xlu0 %3734  ;;  %v10146_v20 = vpop.permute.xlu1 %4038 }
 0x509   : > { %12635 = vst [vmem:[#allocation16_spill] sm:$0xff] %v10146_v20 }
 0x50a   : > { %4100 = vrot.lane.b32.xlu0 %v9796_v53, %s7302_s20  ;;  %4098 = vrot.lane.b32.xlu1 %v9882_v23, %s7302_s20 }
 0x50c   : > { %v10154_v24 = vpop.permute.xlu0 %3669  ;;  %v10156_v33 = vpop.permute.xlu1 %3444 }
 0x50e   : > { %4104 = vrot.lane.b32.xlu0 %v9970_v40, %s7302_s20  ;;  %4102 = vrot.lane.b32.xlu1 %v9847_v39, %s7302_s20 }
 0x510   : > { %v3700_v37 = vpop.permute.xlu0 %3699  ;;  %v3625_v34 = vpop.permute.xlu1 %3624 }
 0x512   : > { %4108 = vrot.lane.b32.xlu0 %v9933_v36, %s7302_s20  ;;  %4106 = vrot.lane.b32.xlu1 %v9998_v60, %s7302_s20 }
 0x514   : > { %v10179_v11 = vpop.permute.xlu0 %3630  ;;  %v10181_v18 = vpop.permute.xlu1 %3744 }
 0x516   : > { %4112 = vrot.lane.b32.xlu0 %v9635_v54, %s7305_s13  ;;  %4110 = vrot.lane.b32.xlu1 %v9985_v42, %s7302_s20 }
 0x518   : > { %v10195_v63 = vpop.permute.xlu0 %3665  ;;  %v3775_v21 = vpop.permute.xlu1 %3774 }
 0x519   : > { %v3983_v56 = vsel %vm1683_vm0, %v3951_v28, %v3775_v21 }
 0x51a   : > { %v4007_v14 = vsel %vm1716_vm1, %v3983_v56, %v3775_v21  ;;  %4116 = vrot.lane.b32.xlu0 %v9606_v10, %s7305_s13  ;;  %4114 = vrot.lane.b32.xlu1 %v9531_v31, %s7305_s13  ;;  %v12639_v21 = vld [vmem:[#allocation50_spill] sm:$0xff] }
 0x51b   : > { %v6850_v1 = vcombine.low %v4006_v43, %v4007_v14  ;;  %v3818_v56 = vsel %vm544_vm8, %v12639_v21, %v10021_v50 }
 0x51c   : > { %v10205_v16 = vpop.permute.xlu0 %3780  ;;  %v10207_v30 = vpop.permute.xlu1 %4034 }
 0x51d   : > { %12636 = vst [vmem:[#allocation18_spill] sm:$0xff] %v10207_v30  ;;  %7086 = vmatmul.mubr.msk.bf16.gmra.mxu1 %vm2483_vm2, %v6850_v1  ;;  %v3848_v1 = vsel %vm1550_vm11, %v3818_v56, %v10021_v50  ;;  %v3821_v30 = vsel %vm544_vm8, %v10058_v22, %v3625_v34 }
 0x51e   : > { %4120 = vrot.lane.b32.xlu0 %v9714_v38, %s7305_s13  ;;  %4118 = vrot.lane.b32.xlu1 %v12637_v59, %s7305_s13  ;;  %v3849_v20 = vsel %vm1550_vm11, %v3821_v30, %v3625_v34 }
 0x51f   : > { %v3875_v22 = vsel %vm1567_vm12, %v3849_v20, %v10127_v35 }
 0x520   : > { %v10214_v17 = vpop.permute.xlu0 %4040  ;;  %v10216_v2 = vpop.permute.xlu1 %3440 }
 0x521   : > { %12638 = vst [vmem:[#allocation19_spill] sm:$0xff] %v10214_v17  ;;  %v3873_v17 = vsel %vm1567_vm12, %v3848_v1, %v10037_v51 }
 0x522   : > { %4124 = vrot.lane.b32.xlu0 %v9712_v32, %s7305_s13  ;;  %4122 = vrot.lane.b32.xlu1 %v9670_v8, %s7305_s13  ;;  %v3905_v21 = vsel %vm1600_vm13, %v3873_v17, %v3700_v37 }
 0x523   : > { %v3928_v50 = vsel %vm1633_vm14, %v3905_v21, %v3700_v37 }
 0x524   : > { %v3627_v5 = vpop.permute.xlu0 %3626  ;;  %v10222_v28 = vpop.permute.xlu1 %3705  ;;  %v3953_v17 = vsel %vm1650_vm15, %v3928_v50, %v10144_v46 }
 0x525   : > { %v3824_v35 = vsel %vm544_vm8, %v10124_v49, %v3627_v5 }
 0x526   : > { %4128 = vrot.lane.b32.xlu0 %v9852_v26, %s7305_s13  ;;  %4126 = vrot.lane.b32.xlu1 %v9808_v13, %s7305_s13 }
 0x528   : > { %v10231_v43 = vpop.permute.xlu0 %3746  ;;  %v3741_v14 = vpop.permute.xlu1 %3740 }
 0x52a   : > { %4132 = vrot.lane.b32.xlu0 %v9818_v45, %s7305_s13  ;;  %4130 = vrot.lane.b32.xlu1 %v9765_v9, %s7305_s13 }
 0x52c   : > { %v3777_v26 = vpop.permute.xlu0 %3776  ;;  %v10244_v13 = vpop.permute.xlu1 %3671 }
 0x52d   : > { %v3985_v34 = vsel %vm1683_vm0, %v3953_v17, %v3777_v26 }
 0x52e   : > { %4136 = vrot.lane.b32.xlu0 %v9955_v19, %s7305_s13  ;;  %4134 = vrot.lane.b32.xlu1 %v9925_v29, %s7305_s13  ;;  %v4008_v50 = vsel %vm1716_vm1, %v3985_v34, %v3777_v26 }
 0x530   : > { %v10252_v51 = vpop.permute.xlu0 %4036  ;;  %v3702_v56 = vpop.permute.xlu1 %3701 }
 0x531   : > { %v3907_v1 = vsel %vm1600_vm13, %v3875_v22, %v3702_v56 }
 0x532   : > { %v3929_v37 = vsel %vm1633_vm14, %v3907_v1, %v3702_v56  ;;  %4140 = vrot.lane.b32.xlu0 %v9944_v25, %s7305_s13  ;;  %4138 = vrot.lane.b32.xlu1 %v9888_v57, %s7305_s13  ;;  %v12640_v25 = vld [vmem:[#allocation49_spill] sm:$0xff]  ;;  %v3850_v56 = vsel %vm1550_vm11, %v3824_v35, %v3627_v5  ;;  %v3827_v5 = vsel %vm544_vm8, %v9996_v12, %v10115_v41 }
 0x533   : > { %v3955_v30 = vsel %vm1650_vm15, %v3929_v37, %v10023_v44  ;;  %v3877_v26 = vsel %vm1567_vm12, %v3850_v56, %v9994_v47 }
 0x534   : > { %v3987_v46 = vsel %vm1683_vm0, %v3955_v30, %v10135_v58  ;;  %v3443_v20 = vpop.permute.xlu0 %3442  ;;  %v3637_v21 = vpop.permute.xlu1 %3636  ;;  %v3909_v1 = vsel %vm1600_vm13, %v3877_v26, %v10133_v7  ;;  %v12641_v30 = vld [vmem:[#allocation61_spill] sm:$0xff] }
 0x535   : > { %v4009_v22 = vsel %vm1716_vm1, %v3987_v46, %v10135_v58  ;;  %v3830_v35 = vsel %vm544_vm8, %v12641_v30, %v10179_v11 }
 0x536   : > { %4144 = vrot.lane.b32.xlu0 %v9675_v3, %s7306_s14  ;;  %4142 = vrot.lane.b32.xlu1 %v12640_v25, %s7305_s13  ;;  %v6851_v44 = vcombine.low %v4008_v50, %v4009_v22  ;;  %v3839_v50 = vsel %vm544_vm8, %v10156_v33, %v3637_v21  ;;  %v3852_v33 = vsel %vm1550_vm11, %v3830_v35, %v10179_v11 }
 0x538   : > { %v3712_v49 = vpop.permute.xlu0 %3711  ;;  %7089 = vmatprep.mubr.msk.bf16.mxu1 %vm2483_vm2, %v6851_v44  ;;  %v10280_v17 = vpop.permute.xlu1 %3667  ;;  %v3855_v44 = vsel %vm1550_vm11, %v3839_v50, %v3637_v21 }
 0x539   : > { %v3887_v21 = vsel %vm1567_vm12, %v3855_v44, %v10244_v13 }
 0x53a   : > { %4148 = vrot.lane.b32.xlu0 %v9648_v52, %s7306_s14  ;;  %4146 = vrot.lane.b32.xlu1 %v9612_v0, %s7306_s14  ;;  %v3851_v52 = vsel %vm1550_vm11, %v3827_v5, %v10115_v41  ;;  %v3930_v0 = vsel %vm1633_vm14, %v3909_v1, %v10133_v7 }
 0x53c   : > { %v3743_v3 = vpop.permute.xlu0 %3742  ;;  %v10288_v58 = vpop.permute.xlu1 %3786 }
 0x53e   : > { %4152 = vrot.lane.b32.xlu0 %v9771_v6, %s7306_s14  ;;  %4150 = vrot.lane.b32.xlu1 %v9730_v55, %s7306_s14  ;;  %v3879_v6 = vsel %vm1567_vm12, %v3851_v52, %v10090_v62  ;;  %v3957_v55 = vsel %vm1650_vm15, %v3930_v0, %v10088_v15 }
 0x53f   : > { %v3911_v12 = vsel %vm1600_vm13, %v3879_v6, %v10222_v28 }
 0x540   : > { %v3708_v47 = vpop.permute.xlu0 %3707  ;;  %v10303_v34 = vpop.permute.xlu1 %4046 }
 0x542   : > { %4156 = vrot.lane.b32.xlu0 %v9737_v27, %s7306_s14  ;;  %4154 = vrot.lane.b32.xlu1 %v9685_v61, %s7306_s14  ;;  %v3989_v61 = vsel %vm1683_vm0, %v3957_v55, %v10205_v16  ;;  %v3931_v27 = vsel %vm1633_vm14, %v3911_v12, %v10222_v28  ;;  %v12643_v55 = vld [vmem:[#allocation46_spill] sm:$0xff] }
 0x543   : > { %v3959_v62 = vsel %vm1650_vm15, %v3931_v27, %v3741_v14 }
 0x544   : > { %v3789_v41 = vpop.permute.xlu0 %3788  ;;  %v3633_v7 = vpop.permute.xlu1 %3632 }
 0x546   : > { %4160 = vrot.lane.b32.xlu0 %v9882_v23, %s7306_s14  ;;  %4158 = vrot.lane.b32.xlu1 %v9838_v48, %s7306_s14  ;;  %v4010_v23 = vsel %vm1716_vm1, %v3989_v61, %v10205_v16  ;;  %v12644_v61 = vld [vmem:[#allocation42_spill] sm:$0xff] }
 0x548   : > { %v3635_v15 = vpop.permute.xlu0 %3634  ;;  %v3783_v37 = vpop.permute.xlu1 %3782 }
 0x549   : > { %v3836_v46 = vsel %vm544_vm8, %v3443_v20, %v3635_v15  ;;  %v3991_v48 = vsel %vm1683_vm0, %v3959_v62, %v3783_v37 }
 0x54a   : > { %v3854_v28 = vsel %vm1550_vm11, %v3836_v46, %v3635_v15  ;;  %v4011_v14 = vsel %vm1716_vm1, %v3991_v48, %v3783_v37  ;;  %4164 = vrot.lane.b32.xlu0 %v9847_v39, %s7306_s14  ;;  %4162 = vrot.lane.b32.xlu1 %v9796_v53, %s7306_s14  ;;  %v3881_v39 = vsel %vm1567_vm12, %v3852_v33, %v10195_v63 }
 0x54b   : > { %v3885_v20 = vsel %vm1567_vm12, %v3854_v28, %v10154_v24  ;;  %v6852_v22 = vcombine.low %v4010_v23, %v4011_v14  ;;  %v3833_v53 = vsel %vm544_vm8, %v10216_v2, %v3633_v7  ;;  %v3913_v24 = vsel %vm1600_vm13, %v3881_v39, %v3708_v47 }
 0x54c   : > { %v3785_v16 = vpop.permute.xlu0 %3784  ;;  %v10341_v25 = vpop.permute.xlu1 %4042  ;;  %v3917_v56 = vsel %vm1600_vm13, %v3885_v20, %v3712_v49  ;;  %v3853_v63 = vsel %vm1550_vm11, %v3833_v53, %v3633_v7  ;;  %v3932_v1 = vsel %vm1633_vm14, %v3913_v24, %v3708_v47 }
 0x54d   : > { %7090 = vmatmul.mubr.msk.bf16.gmra.mxu1 %vm2483_vm2, %v6852_v22  ;;  %v3934_v2 = vsel %vm1633_vm14, %v3917_v56, %v3712_v49  ;;  %v3883_v49 = vsel %vm1567_vm12, %v3853_v63, %v10280_v17  ;;  %v3961_v6 = vsel %vm1650_vm15, %v3932_v1, %v3743_v3 }
 0x54e   : > { %4168 = vrot.lane.b32.xlu0 %v9998_v60, %s7306_s14  ;;  %4166 = vrot.lane.b32.xlu1 %v9970_v40, %s7306_s14  ;;  %v12642_v40 = vld [vmem:[#allocation33_spill] sm:$0xff]  ;;  %v3965_v52 = vsel %vm1650_vm15, %v3934_v2, %v10231_v43 }
 0x54f   : > { %v3997_v17 = vsel %vm1683_vm0, %v3965_v52, %v3789_v41 }
 0x550   : > { %v10357_v11 = vpop.permute.xlu0 %4044  ;;  %v3714_v26 = vpop.permute.xlu1 %3713 }
 0x551   : > { %v3919_v5 = vsel %vm1600_vm13, %v3887_v21, %v3714_v26 }
 0x552   : > { %v3935_v60 = vsel %vm1633_vm14, %v3919_v5, %v3714_v26  ;;  %4172 = vrot.lane.b32.xlu0 %v9985_v42, %s7306_s14  ;;  %4170 = vrot.lane.b32.xlu1 %v9933_v36, %s7306_s14  ;;  %v3993_v36 = vsel %vm1683_vm0, %v3961_v6, %v3785_v16  ;;  %v12647_v6 = vld [vmem:[#allocation11_spill] sm:$0xff] }
 0x553   : > { %v3967_v13 = vsel %vm1650_vm15, %v3935_v60, %v12642_v40  ;;  %v4012_v37 = vsel %vm1716_vm1, %v3993_v36, %v3785_v16 }
 0x554   : > { %v10374_v0 = vpop.permute.xlu0 %4060  ;;  %v3710_v47 = vpop.permute.xlu1 %3709  ;;  %v3999_v42 = vsel %vm1683_vm0, %v3967_v13, %v12643_v55 }
 0x555   : > { %v3915_v12 = vsel %vm1600_vm13, %v3883_v49, %v3710_v47  ;;  %v4015_v15 = vsel %vm1716_vm1, %v3999_v42, %v12643_v55  ;;  %v12646_v49 = vld [vmem:[#allocation34_spill] sm:$0xff]  ;;  %v12648_v55 = vld [vmem:[#allocation9_spill] sm:$0xff] }
 0x556   : > { %v3933_v7 = vsel %vm1633_vm14, %v3915_v12, %v3710_v47  ;;  %4174 = vrot.lane.b32.xlu1 %v12644_v61, %s7306_s14  ;;  %v4183_v47 = vsel %vm1550_vm11, %v9531_v31, %v12646_v49  ;;  %v4179_v42 = vsel %vm1550_vm11, %v12648_v55, %v12647_v6  ;;  %v12649_v12 = vld [vmem:[#allocation57_spill] sm:$0xff]  ;;  %v12653_v31 = vld [vmem:[#allocation52_spill] sm:$0xff]  ;;  %v12656_v49 = vld [vmem:[#allocation59_spill] sm:$0xff] }
 0x557   : > { %v3963_v43 = vsel %vm1650_vm15, %v3933_v7, %v10181_v18  ;;  %v4014_v18 = vsel %vm1716_vm1, %v3997_v17, %v3789_v41  ;;  %v4181_v36 = vsel %vm1550_vm11, %v9635_v54, %v12649_v12  ;;  %v12651_v17 = vld [vmem:[#allocation27_spill] sm:$0xff]  ;;  %v12657_v55 = vld [vmem:[#allocation40_spill] sm:$0xff] }
 0x558   : > { %v3995_v3 = vsel %vm1683_vm0, %v3963_v43, %v10288_v58  ;;  %v10391_v27 = vpop.permute.xlu0 %4064  ;;  %v10393_v62 = vpop.permute.xlu1 %4062  ;;  %v6854_v46 = vcombine.low %v4014_v18, %v4015_v15  ;;  %v12650_v43 = vld [vmem:[#allocation55_spill] sm:$0xff]  ;;  %v12652_v15 = vld [vmem:[#allocation32_spill] sm:$0xff]  ;;  %v4213_v12 = vsel %vm1567_vm12, %v4181_v36, %v12657_v55 }
 0x559   : > { %v4013_v30 = vsel %vm1716_vm1, %v3995_v3, %v10288_v58  ;;  %v4177_v3 = vsel %vm1550_vm11, %v12651_v17, %v12650_v43  ;;  %v12658_v43 = vld [vmem:[#allocation60_spill] sm:$0xff] }
 0x55a   : > { %v6853_v35 = vcombine.low %v4012_v37, %v4013_v30  ;;  %v4209_v37 = vsel %vm1567_vm12, %v4177_v3, %v12652_v15  ;;  %v4185_v30 = vsel %vm1550_vm11, %v9606_v10, %v12653_v31  ;;  %v4187_v17 = vsel %vm1550_vm11, %v12637_v59, %v12658_v43  ;;  %v12660_v59 = vld [vmem:[#allocation13_spill] sm:$0xff] }
 0x55b   : > { %v4217_v6 = vsel %vm1567_vm12, %v4185_v30, %v12656_v49  ;;  %v4240_v10 = vsel %vm1600_vm13, %v4209_v37, %v12652_v15  ;;  %v4191_v30 = vsel %vm1550_vm11, %v9670_v8, %v12660_v59  ;;  %v12661_v43 = vld [vmem:[#allocation53_spill] sm:$0xff]  ;;  %v12662_v15 = vld [vmem:[#allocation14_spill] sm:$0xff]  ;;  %v12666_v8 = vld [vmem:[#allocation19_spill] sm:$0xff] }
 0x55c   : > { %v10401_v23 = vpop.permute.xlu0 %4068  ;;  %7093 = vmatprep.mubr.msk.bf16.mxu1 %vm2483_vm2, %v6853_v35  ;;  %v10404_v48 = vpop.permute.xlu1 %4066  ;;  %v12654_v35 = vld [vmem:[#allocation58_spill] sm:$0xff]  ;;  %v4193_v37 = vsel %vm1550_vm11, %v9712_v32, %v12662_v15 }
 0x55d   : > { %7094 = vmatmul.mubr.msk.bf16.gmra.mxu1 %vm2483_vm2, %v6854_v46  ;;  %v4215_v18 = vsel %vm1567_vm12, %v4183_v47, %v12654_v35  ;;  %v12655_v46 = vld [vmem:[#allocation48_spill] sm:$0xff]  ;;  %v4244_v47 = vsel %vm1600_vm13, %v4217_v6, %v12656_v49  ;;  %v4189_v49 = vsel %vm1550_vm11, %v9714_v38, %v10113_v4  ;;  %v4203_v38 = vsel %vm1550_vm11, %v9925_v29, %v10341_v25 }
 0x55e   : > { %v4211_v54 = vsel %vm1567_vm12, %v4179_v42, %v12655_v46  ;;  %v4242_v42 = vsel %vm1600_vm13, %v4213_v12, %v12657_v55  ;;  %v4243_v31 = vsel %vm1600_vm13, %v4215_v18, %v12654_v35  ;;  %v12663_v6 = vld [vmem:[#allocation16_spill] sm:$0xff]  ;;  %v12664_v35 = vld [vmem:[#allocation18_spill] sm:$0xff]  ;;  %v12665_v18 = vld [vmem:[#allocation45_spill] sm:$0xff]  ;;  %v4201_v55 = vsel %vm1550_vm11, %v9818_v45, %v12666_v8 }
 0x55f   : > { %v4241_v36 = vsel %vm1600_vm13, %v4211_v54, %v12655_v46  ;;  %v4199_v46 = vsel %vm1550_vm11, %v9765_v9, %v12663_v6  ;;  %v4195_v54 = vsel %vm1550_vm11, %v12665_v18, %v12664_v35  ;;  %v12667_v12 = vld [vmem:[#allocation56_spill] sm:$0xff]  ;;  %v4205_v9 = vsel %vm1550_vm11, %v9955_v19, %v10357_v11 }
 0x560   : > { %v10407_v50 = vpop.permute.xlu0 %4072  ;;  %v10409_v28 = vpop.permute.xlu1 %4070  ;;  %v4197_v32 = vsel %vm1550_vm11, %v12667_v12, %v10252_v51  ;;  %v4221_v4 = vsel %vm1567_vm12, %v4189_v49, %v10374_v0  ;;  %v4225_v45 = vsel %vm1567_vm12, %v4193_v37, %v10391_v27  ;;  %v4223_v51 = vsel %vm1567_vm12, %v4191_v30, %v10393_v62 }
 0x561   : > { %v4229_v15 = vsel %vm1567_vm12, %v4197_v32, %v10401_v23  ;;  %v4227_v6 = vsel %vm1567_vm12, %v4195_v54, %v10404_v48  ;;  %v4233_v29 = vsel %vm1567_vm12, %v4201_v55, %v10407_v50  ;;  %v4207_v19 = vsel %vm1550_vm11, %v9888_v57, %v10303_v34 }
 0x562   : > { %v4231_v25 = vsel %vm1567_vm12, %v4199_v46, %v10409_v28  ;;  %v4246_v37 = vsel %vm1600_vm13, %v4221_v4, %v10374_v0  ;;  %v4248_v49 = vsel %vm1600_vm13, %v4225_v45, %v10391_v27  ;;  %v4247_v18 = vsel %vm1600_vm13, %v4223_v51, %v10393_v62 }
 0x563   : > { %v4250_v54 = vsel %vm1600_vm13, %v4229_v15, %v10401_v23  ;;  %v4249_v0 = vsel %vm1600_vm13, %v4227_v6, %v10404_v48  ;;  %v4252_v27 = vsel %vm1600_vm13, %v4233_v29, %v10407_v50  ;;  %v4251_v8 = vsel %vm1600_vm13, %v4231_v25, %v10409_v28 }
 0x564   : > { %v10411_v14 = vpop.permute.xlu0 %4076  ;;  %v10413_v20 = vpop.permute.xlu1 %4074 }
 0x565   : > { %v4237_v11 = vsel %vm1567_vm12, %v4205_v9, %v10411_v14  ;;  %v4235_v30 = vsel %vm1567_vm12, %v4203_v38, %v10413_v20 }
 0x568   : > { %v10415_v58 = vpop.permute.xlu0 %4080  ;;  %v10417_v41 = vpop.permute.xlu1 %4078 }
 0x569   : > { %v4239_v35 = vsel %vm1567_vm12, %v4207_v19, %v10417_v41  ;;  %v4257_v62 = vsel %vm1633_vm14, %v4240_v10, %v10415_v58 }
 0x56a   : > { %v4255_v23 = vsel %vm1600_vm13, %v4239_v35, %v10417_v41 }
 0x56c   : > { %v10419_v22 = vpop.permute.xlu0 %4084  ;;  %v10421_v16 = vpop.permute.xlu1 %4082 }
 0x56d   : > { %v4261_v48 = vsel %vm1633_vm14, %v4242_v42, %v10419_v22  ;;  %v4259_v50 = vsel %vm1633_vm14, %v4241_v36, %v10421_v16 }
 0x570   : > { %v10423_v33 = vpop.permute.xlu0 %4088  ;;  %v10425_v44 = vpop.permute.xlu1 %4086 }
 0x571   : > { %v4265_v28 = vsel %vm1633_vm14, %v4244_v47, %v10423_v33 }
 0x574   : > { %v10427_v39 = vpop.permute.xlu0 %4092  ;;  %v10429_v53 = vpop.permute.xlu1 %4090 }
 0x578   : > { %v10431_v56 = vpop.permute.xlu0 %4096  ;;  %v10433_v24 = vpop.permute.xlu1 %4094 }
 0x579   : > { %v4273_v41 = vsel %vm1633_vm14, %v4248_v49, %v10431_v56  ;;  %v4271_v16 = vsel %vm1633_vm14, %v4247_v18, %v10433_v24 }
 0x57c   : > { %v10435_v21 = vpop.permute.xlu0 %4100  ;;  %v10437_v26 = vpop.permute.xlu1 %4098 }
 0x57d   : > { %v4277_v33 = vsel %vm1633_vm14, %v4250_v54, %v10435_v21 }
 0x580   : > { %v10439_v63 = vpop.permute.xlu0 %4104  ;;  %v10441_v2 = vpop.permute.xlu1 %4102 }
 0x581   : > { %v4279_v56 = vsel %vm1633_vm14, %v4251_v8, %v10441_v2  ;;  %v10624_v2 = vld [vmem:[%s12346_s6] ss:$0 sm:$0xff] }
 0x584   : > { %v10443_v5 = vpop.permute.xlu0 %4108  ;;  %v10445_v1 = vpop.permute.xlu1 %4106 }
 0x588   : > { %v10447_v60 = vpop.permute.xlu0 %4112  ;;  %v10449_v40 = vpop.permute.xlu1 %4110 }
 0x589   : > { %12645 = vst [vmem:[#allocation26_spill] sm:$0xff] %v10449_v40 }
 0x58c   : > { %v10451_v13 = vpop.permute.xlu0 %4116  ;;  %v10453_v52 = vpop.permute.xlu1 %4114 }
 0x58d   : > { %v4293_v47 = vsel %vm1650_vm15, %v4261_v48, %v10451_v13  ;;  %v4291_v24 = vsel %vm1650_vm15, %v4259_v50, %v10453_v52 }
 0x58e   : > { %v4322_v9 = vsel %vm1683_vm0, %v4293_v47, %v10451_v13  ;;  %v4321_v4 = vsel %vm1683_vm0, %v4291_v24, %v10453_v52  ;;  %v10654_v52 = vld [vmem:[%s12347_s7] ss:$0 sm:$0xff] }
 0x590   : > { %v10464_v7 = vpop.permute.xlu0 %4120  ;;  %v10466_v61 = vpop.permute.xlu1 %4118 }
 0x591   : > { %v4297_v42 = vsel %vm1650_vm15, %v4265_v28, %v10464_v7 }
 0x592   : > { %v10644_v15 = vsel %vm1683_vm0, %v4297_v42, %v10464_v7 }
 0x594   : > { %v10487_v3 = vpop.permute.xlu0 %4124  ;;  %v10489_v40 = vpop.permute.xlu1 %4122 }
 0x595   : > { %12659 = vst [vmem:[#allocation21_spill] sm:$0xff] %v10489_v40  ;;  %v4219_v40 = vsel %vm1567_vm12, %v4187_v17, %v12661_v43 }
 0x596   : > { %v4245_v57 = vsel %vm1600_vm13, %v4219_v40, %v12661_v43  ;;  %v4254_v40 = vsel %vm1600_vm13, %v4237_v11, %v10411_v14  ;;  %v4253_v43 = vsel %vm1600_vm13, %v4235_v30, %v10413_v20  ;;  %v4263_v14 = vsel %vm1633_vm14, %v4243_v31, %v10425_v44  ;;  %v12668_v31 = vld [vmem:[#allocation26_spill] sm:$0xff] }
 0x597   : > { %v4269_v20 = vsel %vm1633_vm14, %v4246_v37, %v10427_v39  ;;  %v4267_v58 = vsel %vm1633_vm14, %v4245_v57, %v10429_v53  ;;  %v4275_v44 = vsel %vm1633_vm14, %v4249_v0, %v10437_v26  ;;  %v4289_v39 = vsel %vm1650_vm15, %v4257_v62, %v10447_v60 }
 0x598   : > { %v10524_v17 = vpop.permute.xlu0 %4128  ;;  %v10526_v59 = vpop.permute.xlu1 %4126  ;;  %v4281_v53 = vsel %vm1633_vm14, %v4252_v27, %v10439_v63  ;;  %v4285_v21 = vsel %vm1633_vm14, %v4254_v40, %v10443_v5  ;;  %v4283_v26 = vsel %vm1633_vm14, %v4253_v43, %v10445_v1  ;;  %v4295_v63 = vsel %vm1650_vm15, %v4263_v14, %v10466_v61 }
 0x599   : > { %v4320_v36 = vsel %vm1683_vm0, %v4289_v39, %v10447_v60  ;;  %v4287_v5 = vsel %vm1633_vm14, %v4255_v23, %v12668_v31  ;;  %v4301_v1 = vsel %vm1650_vm15, %v4269_v20, %v10487_v3  ;;  %v4305_v60 = vsel %vm1650_vm15, %v4273_v41, %v10524_v17 }
 0x59a   : > { %v4303_v45 = vsel %vm1650_vm15, %v4271_v16, %v10526_v59  ;;  %v10648_v6 = vsel %vm1683_vm0, %v4295_v63, %v10466_v61  ;;  %v10659_v19 = vsel %vm1683_vm0, %v4301_v1, %v10487_v3  ;;  %v10670_v30 = vsel %vm1683_vm0, %v4305_v60, %v10524_v17 }
 0x59b   : > { %v10674_v37 = vsel %vm1683_vm0, %v4303_v45, %v10526_v59 }
 0x59c   : > { %v4133_v34 = vpop.permute.xlu0 %4132  ;;  %v10563_v46 = vpop.permute.xlu1 %4130  ;;  %v12669_v55 = vld [vmem:[#allocation21_spill] sm:$0xff] }
 0x59d   : > { %v4299_v12 = vsel %vm1650_vm15, %v4267_v58, %v12669_v55  ;;  %v4309_v13 = vsel %vm1650_vm15, %v4277_v33, %v4133_v34  ;;  %v4307_v61 = vsel %vm1650_vm15, %v4275_v44, %v10563_v46 }
 0x59e   : > { %v10663_v7 = vsel %vm1683_vm0, %v4299_v12, %v12669_v55  ;;  %v10679_v18 = vsel %vm1683_vm0, %v4309_v13, %v4133_v34  ;;  %v10686_v59 = vsel %vm1683_vm0, %v4307_v61, %v10563_v46 }
 0x5a0   : > { %v4137_v10 = vpop.permute.xlu0 %4136  ;;  %v4135_v22 = vpop.permute.xlu1 %4134 }
 0x5a1   : > { %v4313_v25 = vsel %vm1650_vm15, %v4281_v53, %v4137_v10  ;;  %v4311_v3 = vsel %vm1650_vm15, %v4279_v56, %v4135_v22 }
 0x5a2   : > { %v10689_v8 = vsel %vm1683_vm0, %v4313_v25, %v4137_v10  ;;  %v10693_v34 = vsel %vm1683_vm0, %v4311_v3, %v4135_v22 }
 0x5a4   : > { %v4141_v32 = vpop.permute.xlu0 %4140  ;;  %v4139_v38 = vpop.permute.xlu1 %4138 }
 0x5a5   : > { %v7083_v51 = vpop.f32.mrf.mxu1  ;;  %v4317_v54 = vsel %vm1650_vm15, %v4285_v21, %v4141_v32  ;;  %v4315_v62 = vsel %vm1650_vm15, %v4283_v26, %v4139_v38 }
 0x5a6   : > { %v4983_v29 = vmul.f32 %v7083_v51, %v10624_v2  ;;  %v10698_v28 = vsel %vm1683_vm0, %v4317_v54, %v4141_v32  ;;  %v10705_v47 = vsel %vm1683_vm0, %v4315_v62, %v4139_v38 }
 0x5a7   : > { %v4848_v11 = vpop.f32.mrf.mxu1 }
 0x5a8   : > { %v4981_v49 = vmul.f32 %v10624_v2, %v4848_v11  ;;  %v4145_v35 = vpop.permute.xlu0 %4144  ;;  %v4143_v57 = vpop.permute.xlu1 %4142  ;;  %v5021_v0 = vadd.f32 %v10654_v52, %v4983_v29 }
 0x5a9   : > { %v4337_v17 = vsel %vm1716_vm1, %v4320_v36, %v4145_v35  ;;  %v7084_v27 = vpop.f32.mrf.mxu1  ;;  %v4319_v20 = vsel %vm1650_vm15, %v4287_v5, %v4143_v57 }
 0x5aa   : > { %v5019_v40 = vadd.f32 %v10654_v52, %v4981_v49  ;;  %v6815_v43 = vcombine.low %v4337_v17, %v4337_v17  ;;  %v6816_v23 = vcombine.high %v4337_v17, %v4337_v17  ;;  %v4984_v48 = vmul.f32 %v7084_v27, %v10624_v2 }
 0x5ab   : > { %v4851_v50 = vpop.f32.mrf.mxu1  ;;  %v5053_v41 = vmax.f32 %v5021_v0, 0.0  ;;  %v10714_v12 = vsel %vm1683_vm0, %v4319_v20, %v4143_v57 }
 0x5ac   : > { %v4449_v46 = vshrl.u32 %v6815_v43, 16  ;;  %v4452_v14 = vshll.u32 %v6815_v43, 16  ;;  %v4149_v58 = vpop.permute.xlu0 %4148  ;;  %v5051_v10 = vmax.f32 %v5019_v40, 0.0  ;;  %v4982_v16 = vmul.f32 %v10624_v2, %v4851_v50  ;;  %v4147_v33 = vpop.permute.xlu1 %4146 }
 0x5ad   : > { %v4341_v22 = vsel %vm1716_vm1, %v4322_v9, %v4149_v58  ;;  %v5022_v53 = vadd.f32 %v10654_v52, %v4984_v48  ;;  %v4458_v24 = vshll.u32 %v6816_v23, 16  ;;  %v4339_v31 = vsel %vm1716_vm1, %v4321_v4, %v4147_v33 }
 0x5ae   : > { %v4451_v44 = vrot.slane %v4449_v46, 4  ;;  %v4454_v39 = vrot.slane %v4452_v14, 5  ;;  %v6819_v56 = vcombine.low %v4341_v22, %v4341_v22  ;;  %v5020_v21 = vadd.f32 %v10654_v52, %v4982_v16 }
 0x5af   : > { %v6820_v26 = vcombine.high %v4341_v22, %v4341_v22  ;;  %v10709_v1 = vpack.c.bf16 %v5053_v41, %v5053_v41  ;;  %v10711_v55 = vpack.c.bf16 %v5051_v10, %v5051_v10  ;;  %v6817_v32 = vcombine.low %v4339_v31, %v4339_v31 }
 0x5b0   : > { %v4455_v42 = vor.u32 %v4454_v39, %v4451_v44  ;;  %v4477_v63 = vshrl.u32 %v6819_v56, 16  ;;  %v4480_v36 = vshll.u32 %v6819_v56, 16  ;;  %v4153_v5 = vpop.permute.xlu0 %4152  ;;  %v5054_v38 = vmax.f32 %v5022_v53, 0.0  ;;  %v4151_v25 = vpop.permute.xlu1 %4150 }
 0x5b1   : > { %v6818_v45 = vcombine.high %v4339_v31, %v4339_v31  ;;  %v4460_v51 = vrot.slane %v4458_v24, 5  ;;  %v5052_v13 = vmax.f32 %v5020_v21, 0.0  ;;  %v4463_v29 = vshrl.u32 %v6817_v32, 16 }
 0x5b2   : > { %v4479_v9 = vrot.slane %v4477_v63, 4  ;;  %v4482_v60 = vrot.slane %v4480_v36, 5  ;;  %v4466_v61 = vshll.u32 %v6817_v32, 16  ;;  %v4456_v11 = vrot.slane %v4455_v42, 4 }
 0x5b3   : > { %v4486_v3 = vshll.u32 %v6820_v26, 16  ;;  %v4345_v49 = vsel %vm1716_vm1, %v10644_v15, %v4153_v5  ;;  %v4465_v35 = vrot.slane %v4463_v29, 4  ;;  %v10718_v27 = vpack.c.bf16 %v5054_v38, %v5054_v38 }
 0x5b4   : > { %v4483_v4 = vor.u32 %v4482_v60, %v4479_v9  ;;  %v4468_v54 = vrot.slane %v4466_v61, 5  ;;  %v6823_v57 = vcombine.low %v4345_v49, %v4345_v49  ;;  %v6824_v0 = vcombine.high %v4345_v49, %v4345_v49  ;;  %v4157_v17 = vpop.permute.xlu0 %4156  ;;  %v4155_v56 = vpop.permute.xlu1 %4154 }
 0x5b5   : > { %12670 = vst [vmem:[#allocation10_spill] sm:$0xff] %v10718_v27  ;;  %v4472_v40 = vshll.u32 %v6818_v45, 16  ;;  %v10721_v43 = vshrl.u32 %v10709_v1, 16  ;;  %v4343_v62 = vsel %vm1716_vm1, %v10648_v6, %v4151_v25  ;;  %v10725_v23 = vpack.c.bf16 %v5052_v13, %v5052_v13 }
 0x5b6   : > { %v4484_v48 = vrot.slane %v4483_v4, 4  ;;  %v4505_v50 = vshrl.u32 %v6823_v57, 16  ;;  %v4508_v46 = vshll.u32 %v6823_v57, 16  ;;  %v10729_v14 = vsel %vm9148_vm9, %v4456_v11, %v4460_v51 }
 0x5b7   : > { %v4488_v20 = vrot.slane %v4486_v3, 5  ;;  %5263 = vrot.lane.b32.xlu0 %v10721_v43, %s7300_s18  ;;  %v6821_v58 = vcombine.low %v4343_v62, %v4343_v62  ;;  %v4349_v41 = vsel %vm1716_vm1, %v10659_v19, %v4157_v17  ;;  %v4469_v10 = vor.u32 %v4468_v54, %v4465_v35 }
 0x5b8   : > { %v4507_v16 = vrot.slane %v4505_v50, 4  ;;  %v4510_v6 = vrot.slane %v4508_v46, 5  ;;  %v4514_v22 = vshll.u32 %v6824_v0, 16  ;;  %v4474_v33 = vrot.slane %v4472_v40, 5  ;;  %v4161_v63 = vpop.permute.xlu0 %4160  ;;  %v4159_v57 = vpop.permute.xlu1 %4158 }
 0x5b9   : > { %v4491_v44 = vshrl.u32 %v6821_v58, 16  ;;  %v4494_v39 = vshll.u32 %v6821_v58, 16  ;;  %v6827_v53 = vcombine.low %v4349_v41, %v4349_v41  ;;  %v10737_v24 = vsel %vm9148_vm9, %v4484_v48, %v4488_v20 }
 0x5ba   : > { %v4511_v21 = vor.u32 %v4510_v6, %v4507_v16  ;;  %v6822_v26 = vcombine.high %v4343_v62, %v4343_v62  ;;  %v5373_v42 = vrot.slane %v10709_v1, 1  ;;  %v6828_v31 = vcombine.high %v4349_v41, %v4349_v41 }
 0x5bb   : > { %v4493_v36 = vrot.slane %v4491_v44, 4  ;;  %v4496_v19 = vrot.slane %v4494_v39, 5  ;;  %v4533_v5 = vshrl.u32 %v6827_v53, 16  ;;  %v4470_v32 = vrot.slane %v4469_v10, 4 }
 0x5bc   : > { %v4516_v38 = vrot.slane %v4514_v22, 5  ;;  %v4536_v9 = vshll.u32 %v6827_v53, 16  ;;  %5391 = vrot.lane.b32.xlu0 %v5373_v42, %s7301_s19  ;;  %v10742_v60 = vshrl.u32 %v10718_v27, 16  ;;  %v4347_v13 = vsel %vm1716_vm1, %v10663_v7, %v4155_v56  ;;  %v4165_v10 = vpop.permute.xlu0 %4164 }
 0x5bd   : > { %v4497_v45 = vor.u32 %v4496_v19, %v4493_v36  ;;  %v4535_v51 = vrot.slane %v4533_v5, 4  ;;  %v4353_v29 = vsel %vm1716_vm1, %v10670_v30, %v4161_v63  ;;  %v4512_v61 = vrot.slane %v4511_v21, 4  ;;  %v4163_v36 = vpop.permute.xlu1 %4162 }
 0x5be   : > { %v4500_v25 = vshll.u32 %v6822_v26, 16  ;;  %v4538_v11 = vrot.slane %v4536_v9, 5  ;;  %5265 = vrot.lane.b32.xlu1 %v10742_v60, %s7300_s18  ;;  %v6825_v4 = vcombine.low %v4347_v13, %v4347_v13  ;;  %v4542_v49 = vshll.u32 %v6828_v31, 16 }
 0x5bf   : > { %v4498_v3 = vrot.slane %v4497_v45, 4  ;;  %v6826_v35 = vcombine.high %v4347_v13, %v4347_v13  ;;  %v6831_v54 = vcombine.low %v4353_v29, %v4353_v29  ;;  %v5565_v7 = vrot.slane %v10709_v1, 2 }
 0x5c0   : > { %v4539_v0 = vor.u32 %v4538_v11, %v4535_v51  ;;  %v4519_v17 = vshrl.u32 %v6825_v4, 16  ;;  %v4522_v40 = vshll.u32 %v6825_v4, 16  ;;  %v4475_v30 = vsel %vm9148_vm9, %v4470_v32, %v4474_v33 }
 0x5c1   : > { %v6832_v62 = vcombine.high %v4353_v29, %v4353_v29  ;;  %v4561_v48 = vshrl.u32 %v6831_v54, 16  ;;  %v4564_v50 = vshll.u32 %v6831_v54, 16  ;;  %v4502_v46 = vrot.slane %v4500_v25, 5  ;;  %5583 = vrot.lane.b32.xlu0 %v5565_v7, %s7306_s14  ;;  %v4169_v29 = vpop.permute.xlu0 %4168 }
 0x5c2   : > { %v4521_v20 = vrot.slane %v4519_v17, 4  ;;  %v4524_v58 = vrot.slane %v4522_v40, 5  ;;  %v4528_v41 = vshll.u32 %v6826_v35, 16  ;;  %v10756_v16 = vsel %vm9148_vm9, %v4512_v61, %v4516_v38 }
 0x5c3   : > { %v4563_v6 = vrot.slane %v4561_v48, 4  ;;  %v4566_v22 = vrot.slane %v4564_v50, 5  ;;  %v5374_v44 = vrot.slane %v10718_v27, 1  ;;  %v4503_v33 = vsel %vm9148_vm9, %v4498_v3, %v4502_v46  ;;  %v4167_v48 = vpop.permute.xlu1 %4166 }
 0x5c4   : > { %v4540_v39 = vrot.slane %v4539_v0, 4  ;;  %v4544_v53 = vrot.slane %v4542_v49, 5  ;;  %v4351_v56 = vsel %vm1716_vm1, %v10674_v37, %v4159_v57  ;;  %v4525_v21 = vor.u32 %v4524_v58, %v4521_v20 }
 0x5c5   : > { %v4570_v26 = vshll.u32 %v6832_v62, 16  ;;  %5393 = vrot.lane.b32.xlu1 %v5374_v44, %s7301_s19  ;;  %v6829_v42 = vcombine.low %v4351_v56, %v4351_v56  ;;  %v6855_v63 = vcombine.low %v10729_v14, %v4475_v30  ;;  %v4530_v19 = vrot.slane %v4528_v41, 5 }
 0x5c6   : > { %v4567_v31 = vor.u32 %v4566_v22, %v4563_v6  ;;  %v4357_v5 = vsel %vm1716_vm1, %v10679_v18, %v4165_v10  ;;  %v10768_v32 = vshrl.u32 %v10711_v55, 16  ;;  %v6830_v38 = vcombine.high %v4351_v56, %v4351_v56 }
 0x5c7   : > { %v4547_v9 = vshrl.u32 %v6829_v42, 16  ;;  %v4550_v45 = vshll.u32 %v6829_v42, 16  ;;  %7097 = vmatprep.mubr.msk.bf16.mxu1 %vm2483_vm2, %v6855_v63  ;;  %v5566_v37 = vrot.slane %v10718_v27, 2  ;;  %v10774_v51 = vsel %vm9148_vm9, %v4540_v39, %v4544_v53 }
 0x5c8   : > { %v6835_v14 = vcombine.low %v4357_v5, %v4357_v5  ;;  %v6836_v13 = vcombine.high %v4357_v5, %v4357_v5  ;;  %5259 = vrot.lane.b32.xlu0 %v10768_v32, %s7300_s18  ;;  %v4355_v18 = vsel %vm1716_vm1, %v10686_v59, %v4163_v36  ;;  %v4526_v61 = vrot.slane %v4525_v21, 4 }
 0x5c9   : > { %v4572_v25 = vrot.slane %v4570_v26, 5  ;;  %v4549_v11 = vrot.slane %v4547_v9, 4  ;;  %v4552_v4 = vrot.slane %v4550_v45, 5  ;;  %5585 = vrot.lane.b32.xlu1 %v5566_v37, %s7306_s14  ;;  %v4568_v3 = vrot.slane %v4567_v31, 4  ;;  %v4173_v26 = vpop.permute.xlu0 %4172  ;;  %v4171_v45 = vpop.permute.xlu1 %4170 }
 0x5ca   : > { %v4589_v49 = vshrl.u32 %v6835_v14, 16  ;;  %v4592_v35 = vshll.u32 %v6835_v14, 16  ;;  %v6833_v54 = vcombine.low %v4355_v18, %v4355_v18  ;;  %v4556_v57 = vshll.u32 %v6830_v38, 16 }
 0x5cb   : > { %v4598_v0 = vshll.u32 %v6836_v13, 16  ;;  %v6856_v17 = vcombine.low %v10737_v24, %v4503_v33  ;;  %v4361_v40 = vsel %vm1716_vm1, %v10689_v8, %v4169_v29  ;;  %v4553_v7 = vor.u32 %v4552_v4, %v4549_v11 }
 0x5cc   : > { %v4591_v59 = vrot.slane %v4589_v49, 4  ;;  %v4594_v30 = vrot.slane %v4592_v35, 5  ;;  %v4575_v62 = vshrl.u32 %v6833_v54, 16  ;;  %v4531_v50 = vsel %vm9148_vm9, %v4526_v61, %v4530_v19 }
 0x5cd   : > { %v6834_v46 = vcombine.high %v4355_v18, %v4355_v18  ;;  %v4578_v20 = vshll.u32 %v6833_v54, 16  ;;  %7098 = vmatmul.mubr.msk.bf16.gmra.mxu1 %vm2483_vm2, %v6856_v17  ;;  %v6839_v58 = vcombine.low %v4361_v40, %v4361_v40  ;;  %v6840_v6 = vcombine.high %v4361_v40, %v4361_v40 }
 0x5ce   : > { %v4595_v41 = vor.u32 %v4594_v30, %v4591_v59  ;;  %v4577_v10 = vrot.slane %v4575_v62, 4  ;;  %v5371_v24 = vrot.slane %v10711_v55, 1  ;;  %v10790_v8 = vsel %vm9148_vm9, %v4568_v3, %v4572_v25 }
 0x5cf   : > { %v4558_v22 = vrot.slane %v4556_v57, 5  ;;  %v4580_v44 = vrot.slane %v4578_v20, 5  ;;  %v4617_v33 = vshrl.u32 %v6839_v58, 16  ;;  %v4554_v39 = vrot.slane %v4553_v7, 4 }
 0x5d0   : > { %v4600_v53 = vrot.slane %v4598_v0, 5  ;;  %v4620_v56 = vshll.u32 %v6839_v58, 16  ;;  %5387 = vrot.lane.b32.xlu0 %v5371_v24, %s7301_s19  ;;  %v10794_v21 = vshrl.u32 %v10725_v23, 16  ;;  %v4584_v63 = vshll.u32 %v6834_v46, 16 }
 0x5d1   : > { %v4581_v42 = vor.u32 %v4580_v44, %v4577_v10  ;;  %v4359_v36 = vsel %vm1716_vm1, %v10693_v34, %v4167_v48  ;;  %v6857_v19 = vcombine.low %v10756_v16, %v4531_v50  ;;  %v4596_v31 = vrot.slane %v4595_v41, 4  ;;  %v4175_v48 = vpop.permute.xlu1 %4174 }
 0x5d2   : > { %v4619_v5 = vrot.slane %v4617_v33, 4  ;;  %v10799_v38 = vshll.u32 %v6840_v6, 16  ;;  %5261 = vrot.lane.b32.xlu1 %v10794_v21, %s7300_s18  ;;  %v6837_v9 = vcombine.low %v4359_v36, %v4359_v36  ;;  %v4622_v37 = vrot.slane %v4620_v56, 5 }
 0x5d3   : > { %v6838_v14 = vcombine.high %v4359_v36, %v4359_v36  ;;  %7101 = vmatprep.mubr.msk.bf16.mxu1 %vm2483_vm2, %v6857_v19  ;;  %v4365_v13 = vsel %vm1716_vm1, %v10698_v28, %v4173_v26  ;;  %v5469_v34 = vrot.slane %v10721_v43, 1  ;;  %v4582_v18 = vrot.slane %v4581_v42, 4 }
 0x5d4   : > { %v4603_v16 = vshrl.u32 %v6837_v9, 16  ;;  %v4606_v29 = vshll.u32 %v6837_v9, 16  ;;  %v6843_v61 = vcombine.low %v4365_v13, %v4365_v13  ;;  %v4559_v25 = vsel %vm9148_vm9, %v4554_v39, %v4558_v22 }
 0x5d5   : > { %v4586_v11 = vrot.slane %v4584_v63, 5  ;;  %v4612_v4 = vshll.u32 %v6838_v14, 16  ;;  %5487 = vrot.lane.b32.xlu0 %v5469_v34, %s7305_s13  ;;  %v5372_v3 = vrot.slane %v10725_v23, 1  ;;  %v4601_v49 = vsel %vm9148_vm9, %v4596_v31, %v4600_v53 }
 0x5d6   : > { %v4605_v35 = vrot.slane %v4603_v16, 4  ;;  %v4608_v28 = vrot.slane %v4606_v29, 5  ;;  %v4645_v54 = vshrl.u32 %v6843_v61, 16  ;;  %v4623_v57 = vor.u32 %v4622_v37, %v4619_v5 }
 0x5d7   : > { %v4628_v0 = vrot.slane %v10799_v38, 5  ;;  %v4648_v17 = vshll.u32 %v6843_v61, 16  ;;  %5389 = vrot.lane.b32.xlu1 %v5372_v3, %s7301_s19  ;;  %v4363_v40 = vsel %vm1716_vm1, %v10705_v47, %v4171_v45  ;;  %v4587_v7 = vsel %vm9148_vm9, %v4582_v18, %v4586_v11 }
 0x5d8   : > { %v4609_v59 = vor.u32 %v4608_v28, %v4605_v35  ;;  %v4614_v30 = vrot.slane %v4612_v4, 5  ;;  %v6841_v62 = vcombine.low %v4363_v40, %v4363_v40  ;;  %v4647_v50 = vrot.slane %v4645_v54, 4 }
 0x5d9   : > { %v4650_v46 = vrot.slane %v4648_v17, 5  ;;  %v6842_v20 = vcombine.high %v4363_v40, %v4363_v40  ;;  %v6858_v58 = vcombine.low %v10774_v51, %v4559_v25  ;;  %v5563_v24 = vrot.slane %v10711_v55, 2 }
 0x5da   : > { %v4610_v41 = vrot.slane %v4609_v59, 4  ;;  %v4631_v10 = vshrl.u32 %v6841_v62, 16  ;;  %v4634_v6 = vshll.u32 %v6841_v62, 16  ;;  %v6844_v22 = vcombine.high %v4365_v13, %v4365_v13 }
 0x5db   : > { %v4640_v44 = vshll.u32 %v6842_v20, 16  ;;  %7102 = vmatmul.mubr.msk.bf16.gmra.mxu1 %vm2483_vm2, %v6858_v58  ;;  %v5470_v47 = vrot.slane %v10742_v60, 1  ;;  %v4367_v33 = vsel %vm1716_vm1, %v10714_v12, %v4175_v48  ;;  %5579 = vrot.lane.b32.xlu0 %v5563_v24, %s7306_s14  ;;  %v4624_v42 = vrot.slane %v4623_v57, 4 }
 0x5dc   : > { %v4615_v39 = vsel %vm9148_vm9, %v4610_v41, %v4614_v30  ;;  %v4633_v53 = vrot.slane %v4631_v10, 4  ;;  %v4636_v56 = vrot.slane %v4634_v6, 5  ;;  %v6845_v51 = vcombine.low %v4367_v33, %v4367_v33 }
 0x5dd   : > { %v7087_v26 = vpop.f32.mrf.mxu1  ;;  %v4651_v63 = vor.u32 %v4650_v46, %v4647_v50  ;;  %5489 = vrot.lane.b32.xlu1 %v5470_v47, %s7305_s13  ;;  %v6846_v36 = vcombine.high %v4367_v33, %v4367_v33  ;;  %v6859_v19 = vcombine.low %v10790_v8, %v4587_v7  ;;  %v5467_v12 = vrot.slane %v10768_v32, 1 }
 0x5de   : > { %v4637_v31 = vor.u32 %v4636_v56, %v4633_v53  ;;  %v4659_v5 = vshrl.u32 %v6845_v51, 16  ;;  %v4662_v38 = vshll.u32 %v6845_v51, 16  ;;  %v4654_v45 = vshll.u32 %v6844_v22, 16 }
 0x5df   : > { %v4864_v9 = vpop.f32.mrf.mxu1  ;;  %v4642_v37 = vrot.slane %v4640_v44, 5  ;;  %7105 = vmatprep.mubr.msk.bf16.mxu1 %vm2483_vm2, %v6859_v19  ;;  %v5564_v14 = vrot.slane %v10725_v23, 2  ;;  %v6860_v13 = vcombine.low %v4601_v49, %v4615_v39  ;;  %v4668_v29 = vshll.u32 %v6846_v36, 16  ;;  %5483 = vrot.lane.b32.xlu0 %v5467_v12, %s7305_s13 }
 0x5e0   : > { %v4638_v34 = vrot.slane %v4637_v31, 4  ;;  %v4661_v18 = vrot.slane %v4659_v5, 4  ;;  %v4664_v16 = vrot.slane %v4662_v38, 5  ;;  %v4987_v61 = vmul.f32 %v7087_v26, %v10624_v2 }
 0x5e1   : > { %v7088_v8 = vpop.f32.mrf.mxu1  ;;  %5581 = vrot.lane.b32.xlu1 %v5564_v14, %s7306_s14  ;;  %v4629_v11 = vsel %vm9148_vm9, %v4624_v42, %v4628_v0  ;;  %v4652_v4 = vrot.slane %v4651_v63, 4  ;;  %v5468_v35 = vrot.slane %v10794_v21, 1  ;;  %v4656_v40 = vrot.slane %v4654_v45, 5 }
 0x5e2   : > { %v4988_v25 = vmul.f32 %v7088_v8, %v10624_v2  ;;  %v4643_v3 = vsel %vm9148_vm9, %v4638_v34, %v4642_v37  ;;  %v4665_v49 = vor.u32 %v4664_v16, %v4661_v18  ;;  %v5025_v54 = vadd.f32 %v10654_v52, %v4987_v61 }
 0x5e3   : > { %7106 = vmatmul.mubr.msk.bf16.gmra.mxu1 %vm2483_vm2, %v6860_v13  ;;  %v6861_v28 = vcombine.low %v4629_v11, %v4643_v3  ;;  %v4867_v17 = vpop.f32.mrf.mxu1  ;;  %v4670_v59 = vrot.slane %v4668_v29, 5  ;;  %v4985_v30 = vmul.f32 %v10624_v2, %v4864_v9  ;;  %v4657_v48 = vsel %vm9148_vm9, %v4652_v4, %v4656_v40 }
 0x5e4   : > { %v5026_v57 = vadd.f32 %v10654_v52, %v4988_v25  ;;  %v4666_v7 = vrot.slane %v4665_v49, 4  ;;  %v5057_v0 = vmax.f32 %v5025_v54, 0.0  ;;  %v4986_v46 = vmul.f32 %v10624_v2, %v4867_v17 }
 0x5e5   : > { %5485 = vrot.lane.b32.xlu1 %v5468_v35, %s7305_s13  ;;  %7109 = vmatprep.mubr.msk.bf16.mxu1 %vm2483_vm2, %v6861_v28  ;;  %v5023_v10 = vadd.f32 %v10654_v52, %v4985_v30 }
 0x5e6   : > { %v5058_v62 = vmax.f32 %v5026_v57, 0.0  ;;  %v4671_v50 = vsel %vm9148_vm9, %v4666_v7, %v4670_v59  ;;  %v10853_v58 = vpack.c.bf16 %v5057_v0, %v5057_v0  ;;  %v5024_v22 = vadd.f32 %v10654_v52, %v4986_v46 }
 0x5e7   : > { %v6862_v20 = vcombine.low %v4657_v48, %v4671_v50  ;;  %v5055_v15 = vmax.f32 %v5023_v10, 0.0 }
 0x5e8   : > { %12672 = vst [vmem:[#allocation23_spill] sm:$0xff] %v10853_v58  ;;  %v10855_v41 = vpack.c.bf16 %v5058_v62, %v5058_v62  ;;  %v10859_v6 = vshrl.u32 %v10853_v58, 16  ;;  %v5377_v44 = vrot.slane %v10853_v58, 1  ;;  %v5056_v47 = vmax.f32 %v5024_v22, 0.0 }
 0x5e9   : > { %v10874_v39 = vpack.c.bf16 %v5055_v15, %v5055_v15  ;;  %v5569_v53 = vrot.slane %v10853_v58, 2 }
 0x5ea   : > { %12673 = vst [vmem:[#allocation12_spill] sm:$0xff] %v10855_v41  ;;  %12674 = vst [vmem:[#allocation37_spill] sm:$0xff] %v10859_v6  ;;  %v10862_v24 = vshrl.u32 %v10855_v41, 16  ;;  %5271 = vrot.lane.b32.xlu0 %v10859_v6, %s7300_s18  ;;  %v5378_v33 = vrot.slane %v10855_v41, 1  ;;  %v10877_v56 = vpack.c.bf16 %v5056_v47, %v5056_v47  ;;  %v5570_v51 = vrot.slane %v10855_v41, 2 }
 0x5eb   : > { %7110 = vmatmul.mubr.msk.bf16.gmra.mxu1 %vm2483_vm2, %v6862_v20  ;;  %v10883_v26 = vshrl.u32 %v10874_v39, 16  ;;  %v5375_v63 = vrot.slane %v10874_v39, 1  ;;  %v5473_v19 = vrot.slane %v10859_v6, 1  ;;  %v5567_v5 = vrot.slane %v10874_v39, 2 }
 0x5ec   : > { %12675 = vst [vmem:[#allocation15_spill] sm:$0xff] %v10862_v24  ;;  %5273 = vrot.lane.b32.xlu1 %v10862_v24, %s7300_s18  ;;  %12676 = vst [vmem:[#allocation17_spill] sm:$0xff] %v10877_v56  ;;  %v10886_v42 = vshrl.u32 %v10877_v56, 16  ;;  %v5376_v36 = vrot.slane %v10877_v56, 1  ;;  %v5474_v31 = vrot.slane %v10862_v24, 1  ;;  %v5568_v38 = vrot.slane %v10877_v56, 2 }
 0x5ed   : > { %v5471_v12 = vrot.slane %v10883_v26, 1 }
 0x5ee   : > { %5399 = vrot.lane.b32.xlu0 %v5377_v44, %s7301_s19  ;;  %12677 = vst [vmem:[#allocation20_spill] sm:$0xff] %v10886_v42  ;;  %v5472_v9 = vrot.slane %v10886_v42, 1 }
 0x5f0   : > { %5401 = vrot.lane.b32.xlu1 %v5378_v33, %s7301_s19 }
 0x5f2   : > { %5591 = vrot.lane.b32.xlu0 %v5569_v53, %s7306_s14 }
 0x5f4   : > { %5593 = vrot.lane.b32.xlu1 %v5570_v51, %s7306_s14 }
 0x5f6   : > { %5267 = vrot.lane.b32.xlu0 %v10883_v26, %s7300_s18 }
 0x5f8   : > { %5269 = vrot.lane.b32.xlu1 %v10886_v42, %s7300_s18 }
 0x5fa   : > { %5395 = vrot.lane.b32.xlu0 %v5375_v63, %s7301_s19 }
 0x5fc   : > { %5397 = vrot.lane.b32.xlu1 %v5376_v36, %s7301_s19 }
 0x5fe   : > { %5495 = vrot.lane.b32.xlu0 %v5473_v19, %s7305_s13 }
 0x600   : > { %5497 = vrot.lane.b32.xlu1 %v5474_v31, %s7305_s13 }
 0x602   : > { %5587 = vrot.lane.b32.xlu0 %v5567_v5, %s7306_s14 }
 0x604   : > { %5589 = vrot.lane.b32.xlu1 %v5568_v38, %s7306_s14 }
 0x606   : > { %5491 = vrot.lane.b32.xlu0 %v5471_v12, %s7305_s13 }
 0x608   : > { %5493 = vrot.lane.b32.xlu1 %v5472_v9, %s7305_s13 }
 0x60d   : > { %v7091_v45 = vpop.f32.mrf.mxu1 }
 0x60e   : > { %v4991_v37 = vmul.f32 %v7091_v45, %v10624_v2 }
 0x60f   : > { %v4880_v14 = vpop.f32.mrf.mxu1 }
 0x610   : > { %v5029_v13 = vadd.f32 %v10654_v52, %v4991_v37  ;;  %v4989_v16 = vmul.f32 %v10624_v2, %v4880_v14 }
 0x611   : > { %v7092_v34 = vpop.f32.mrf.mxu1 }
 0x612   : > { %v5061_v18 = vmax.f32 %v5029_v13, 0.0  ;;  %v4992_v29 = vmul.f32 %v7092_v34, %v10624_v2  ;;  %v5027_v11 = vadd.f32 %v10654_v52, %v4989_v16 }
 0x613   : > { %v4883_v8 = vpop.f32.mrf.mxu1 }
 0x614   : > { %v10912_v61 = vpack.c.bf16 %v5061_v18, %v5061_v18  ;;  %v5030_v25 = vadd.f32 %v10654_v52, %v4992_v29  ;;  %v4990_v3 = vmul.f32 %v10624_v2, %v4883_v8  ;;  %v5059_v28 = vmax.f32 %v5027_v11, 0.0 }
 0x616   : > { %12678 = vst [vmem:[#allocation22_spill] sm:$0xff] %v10912_v61  ;;  %v5062_v4 = vmax.f32 %v5030_v25, 0.0  ;;  %v10918_v49 = vshrl.u32 %v10912_v61, 16  ;;  %v5028_v54 = vadd.f32 %v10654_v52, %v4990_v3  ;;  %v5381_v57 = vrot.slane %v10912_v61, 1 }
 0x617   : > { %v10932_v40 = vpack.c.bf16 %v5059_v28, %v5059_v28  ;;  %v5573_v59 = vrot.slane %v10912_v61, 2 }
 0x618   : > { %v10920_v35 = vpack.c.bf16 %v5062_v4, %v5062_v4  ;;  %5279 = vrot.lane.b32.xlu0 %v10918_v49, %s7300_s18  ;;  %v5060_v7 = vmax.f32 %v5028_v54, 0.0  ;;  %v5477_v33 = vrot.slane %v10918_v49, 1 }
 0x619   : > { %12680 = vst [vmem:[#allocation44_spill] sm:$0xff] %v10932_v40  ;;  %v10941_v48 = vshrl.u32 %v10932_v40, 16  ;;  %v5379_v10 = vrot.slane %v10932_v40, 1  ;;  %v5571_v51 = vrot.slane %v10932_v40, 2 }
 0x61a   : > { %12679 = vst [vmem:[#allocation24_spill] sm:$0xff] %v10920_v35  ;;  %v10927_v17 = vshrl.u32 %v10920_v35, 16  ;;  %v5382_v0 = vrot.slane %v10920_v35, 1  ;;  %v10938_v62 = vpack.c.bf16 %v5060_v7, %v5060_v7  ;;  %v5574_v50 = vrot.slane %v10920_v35, 2 }
 0x61b   : > { %v5475_v38 = vrot.slane %v10941_v48, 1 }
 0x61c   : > { %5407 = vrot.lane.b32.xlu0 %v5381_v57, %s7301_s19  ;;  %5281 = vrot.lane.b32.xlu1 %v10927_v17, %s7300_s18  ;;  %12681 = vst [vmem:[#allocation7_spill] sm:$0xff] %v10938_v62  ;;  %v10950_v22 = vshrl.u32 %v10938_v62, 16  ;;  %v5380_v53 = vrot.slane %v10938_v62, 1  ;;  %v5478_v31 = vrot.slane %v10927_v17, 1  ;;  %v5572_v12 = vrot.slane %v10938_v62, 2 }
 0x61d   : > { %v7095_v30 = vpop.f32.mrf.mxu1 }
 0x61e   : > { %v4995_v20 = vmul.f32 %v7095_v30, %v10624_v2  ;;  %v5476_v13 = vrot.slane %v10950_v22, 1 }
 0x61f   : > { %v4896_v46 = vpop.f32.mrf.mxu1 }
 0x620   : > { %5599 = vrot.lane.b32.xlu0 %v5573_v59, %s7306_s14  ;;  %5409 = vrot.lane.b32.xlu1 %v5382_v0, %s7301_s19  ;;  %v5033_v44 = vadd.f32 %v10654_v52, %v4995_v20  ;;  %v4993_v36 = vmul.f32 %v10624_v2, %v4896_v46 }
 0x621   : > { %v7096_v15 = vpop.f32.mrf.mxu1 }
 0x622   : > { %v4996_v47 = vmul.f32 %v7096_v15, %v10624_v2  ;;  %v5065_v63 = vmax.f32 %v5033_v44, 0.0  ;;  %v5031_v45 = vadd.f32 %v10654_v52, %v4993_v36 }
 0x623   : > { %v4899_v5 = vpop.f32.mrf.mxu1 }
 0x624   : > { %5275 = vrot.lane.b32.xlu0 %v10941_v48, %s7300_s18  ;;  %5601 = vrot.lane.b32.xlu1 %v5574_v50, %s7306_s14  ;;  %v5034_v19 = vadd.f32 %v10654_v52, %v4996_v47  ;;  %v10969_v9 = vpack.c.bf16 %v5065_v63, %v5065_v63  ;;  %v4994_v14 = vmul.f32 %v10624_v2, %v4899_v5  ;;  %v5063_v34 = vmax.f32 %v5031_v45, 0.0 }
 0x626   : > { %v5066_v37 = vmax.f32 %v5034_v19, 0.0  ;;  %v5032_v16 = vadd.f32 %v10654_v52, %v4994_v14  ;;  %v10980_v29 = vshrl.u32 %v10969_v9, 16  ;;  %v10985_v8 = vpack.c.bf16 %v5063_v34, %v5063_v34 }
 0x627   : > { %v5385_v11 = vrot.slane %v10969_v9, 1 }
 0x628   : > { %5403 = vrot.lane.b32.xlu0 %v5379_v10, %s7301_s19  ;;  %5277 = vrot.lane.b32.xlu1 %v10950_v22, %s7300_s18  ;;  %v10976_v18 = vpack.c.bf16 %v5066_v37, %v5066_v37  ;;  %12682 = vst [vmem:[#allocation8_spill] sm:$0xff] %v10980_v29  ;;  %12683 = vst [vmem:[#allocation36_spill] sm:$0xff] %v10985_v8  ;;  %v5064_v25 = vmax.f32 %v5032_v16, 0.0  ;;  %v10997_v28 = vshrl.u32 %v10985_v8, 16  ;;  %v5383_v57 = vrot.slane %v10985_v8, 1 }
 0x629   : > { %v5481_v59 = vrot.slane %v10980_v29, 1  ;;  %v11020_v20 = vpop.permute.xlu0 %5263 }
 0x62a   : > { %v10989_v4 = vshrl.u32 %v10976_v18, 16  ;;  %v10994_v3 = vpack.c.bf16 %v5064_v25, %v5064_v25  ;;  %v5386_v54 = vrot.slane %v10976_v18, 1  ;;  %v5479_v30 = vrot.slane %v10997_v28, 1  ;;  %12687 = vst [vmem:[#allocation39_spill] sm:$0xff] %v11020_v20 }
 0x62c   : > { %5503 = vrot.lane.b32.xlu0 %v5477_v33, %s7305_s13  ;;  %5405 = vrot.lane.b32.xlu1 %v5380_v53, %s7301_s19  ;;  %12684 = vst [vmem:[#allocation35_spill] sm:$0xff] %v10989_v4  ;;  %12685 = vst [vmem:[#allocation28_spill] sm:$0xff] %v10994_v3  ;;  %v11005_v7 = vshrl.u32 %v10994_v3, 16  ;;  %v5384_v0 = vrot.slane %v10994_v3, 1  ;;  %v5482_v50 = vrot.slane %v10989_v4, 1 }
 0x62e   : > { %12686 = vst [vmem:[#allocation29_spill] sm:$0xff] %v11005_v7  ;;  %v5480_v46 = vrot.slane %v11005_v7, 1  ;;  %v11024_v15 = vpop.permute.xlu0 %5391 }
 0x62f   : > { %12689 = vst [vmem:[#allocation41_spill] sm:$0xff] %v11024_v15 }
 0x630   : > { %5595 = vrot.lane.b32.xlu0 %v5571_v51, %s7306_s14  ;;  %5505 = vrot.lane.b32.xlu1 %v5478_v31, %s7305_s13  ;;  %v11022_v10 = vpop.permute.xlu1 %5265 }
 0x631   : > { %12688 = vst [vmem:[#allocation25_spill] sm:$0xff] %v11022_v10 }
 0x633   : > { %v11028_v47 = vpop.permute.xlu0 %5583 }
 0x634   : > { %5499 = vrot.lane.b32.xlu0 %v5475_v38, %s7305_s13  ;;  %5597 = vrot.lane.b32.xlu1 %v5572_v12, %s7306_s14  ;;  %12691 = vst [vmem:[#allocation31_spill] sm:$0xff] %v11028_v47 }
 0x637   : > { %v11026_v44 = vpop.permute.xlu1 %5393 }
 0x638   : > { %5287 = vrot.lane.b32.xlu0 %v10980_v29, %s7300_s18  ;;  %5501 = vrot.lane.b32.xlu1 %v5476_v13, %s7305_s13  ;;  %12690 = vst [vmem:[#allocation47_spill] sm:$0xff] %v11026_v44 }
 0x63a   : > { %v11032_v53 = vpop.permute.xlu0 %5259 }
 0x63b   : > { %v11030_v33 = vpop.permute.xlu1 %5585  ;;  %12693 = vst [vmem:[#allocation30_spill] sm:$0xff] %v11032_v53 }
 0x63c   : > { %5415 = vrot.lane.b32.xlu0 %v5385_v11, %s7301_s19  ;;  %5289 = vrot.lane.b32.xlu1 %v10989_v4, %s7300_s18  ;;  %12692 = vst [vmem:[#allocation38_spill] sm:$0xff] %v11030_v33 }
 0x640   : > { %5283 = vrot.lane.b32.xlu0 %v10997_v28, %s7300_s18  ;;  %5417 = vrot.lane.b32.xlu1 %v5386_v54, %s7301_s19 }
 0x642   : > { %v11036_v63 = vpop.permute.xlu0 %5387 }
 0x643   : > { %12695 = vst [vmem:[#allocation4_spill] sm:$0xff] %v11036_v63 }
 0x644   : > { %5411 = vrot.lane.b32.xlu0 %v5383_v57, %s7301_s19  ;;  %5285 = vrot.lane.b32.xlu1 %v11005_v7, %s7300_s18  ;;  %v11034_v51 = vpop.permute.xlu1 %5261 }
 0x645   : > { %12694 = vst [vmem:[#allocation43_spill] sm:$0xff] %v11034_v51 }
 0x647   : > { %v11040_v19 = vpop.permute.xlu0 %5487 }
 0x648   : > { %5511 = vrot.lane.b32.xlu0 %v5481_v59, %s7305_s13  ;;  %5413 = vrot.lane.b32.xlu1 %v5384_v0, %s7301_s19  ;;  %12697 = vst [vmem:[#allocation6_spill] sm:$0xff] %v11040_v19 }
 0x649   : > { %v11038_v36 = vpop.permute.xlu1 %5389 }
 0x64a   : > { %12696 = vst [vmem:[#allocation5_spill] sm:$0xff] %v11038_v36 }
 0x64c   : > { %5507 = vrot.lane.b32.xlu0 %v5479_v30, %s7305_s13  ;;  %5513 = vrot.lane.b32.xlu1 %v5482_v50, %s7305_s13 }
 0x64d   : > { %v11044_v5 = vpop.permute.xlu0 %5579 }
 0x64e   : > { %12699 = vst [vmem:[#allocation50_spill] sm:$0xff] %v11044_v5 }
 0x64f   : > { %v11042_v31 = vpop.permute.xlu1 %5489 }
 0x650   : > { %5509 = vrot.lane.b32.xlu1 %v5480_v46, %s7305_s13  ;;  %12698 = vst [vmem:[#allocation51_spill] sm:$0xff] %v11042_v31 }
 0x651   : > { %v11048_v12 = vpop.permute.xlu0 %5483 }
 0x652   : > { %12701 = vst [vmem:[#allocation61_spill] sm:$0xff] %v11048_v12 }
 0x653   : > { %v11046_v38 = vpop.permute.xlu1 %5581 }
 0x654   : > { %12700 = vst [vmem:[#allocation49_spill] sm:$0xff] %v11046_v38 }
 0x657   : > { %v11050_v45 = vpop.permute.xlu1 %5485 }
 0x658   : > { %12702 = vst [vmem:[#allocation33_spill] sm:$0xff] %v11050_v45 }
 0x65c   : > { %v11052_v37 = vpop.permute.xlu0 %5271 }
 0x65d   : > { %12703 = vst [vmem:[#allocation46_spill] sm:$0xff] %v11052_v37 }
 0x65e   : > { %v11054_v14 = vpop.permute.xlu1 %5273 }
 0x65f   : > { %12704 = vst [vmem:[#allocation42_spill] sm:$0xff] %v11054_v14 }
 0x660   : > { %v11056_v34 = vpop.permute.xlu0 %5399 }
 0x661   : > { %12705 = vst [vmem:[#allocation34_spill] sm:$0xff] %v11056_v34 }
 0x662   : > { %v11061_v59 = vpop.permute.xlu1 %5401 }
 0x663   : > { %12706 = vst [vmem:[#allocation11_spill] sm:$0xff] %v11061_v59 }
 0x664   : > { %v11065_v38 = vpop.permute.xlu0 %5591 }
 0x665   : > { %12707 = vst [vmem:[#allocation9_spill] sm:$0xff] %v11065_v38 }
 0x68d   : > { %v7099_v13 = vpop.f32.mrf.mxu1 }
 0x68e   : > { %v4999_v16 = vmul.f32 %v7099_v13, %v10624_v2 }
 0x68f   : > { %v4912_v25 = vpop.f32.mrf.mxu1 }
 0x690   : > { %v5037_v11 = vadd.f32 %v10654_v52, %v4999_v16  ;;  %v4997_v54 = vmul.f32 %v10624_v2, %v4912_v25 }
 0x691   : > { %v7100_v57 = vpop.f32.mrf.mxu1 }
 0x692   : > { %v5069_v0 = vmax.f32 %v5037_v11, 0.0  ;;  %v5035_v30 = vadd.f32 %v10654_v52, %v4997_v54  ;;  %v5000_v50 = vmul.f32 %v7100_v57, %v10624_v2  ;;  %v11074_v11 = vpop.permute.xlu1 %5593 }
 0x693   : > { %v4915_v46 = vpop.f32.mrf.mxu1  ;;  %12708 = vst [vmem:[#allocation57_spill] sm:$0xff] %v11074_v11 }
 0x694   : > { %v11067_v33 = vpack.c.bf16 %v5069_v0, %v5069_v0  ;;  %v5067_v5 = vmax.f32 %v5035_v30, 0.0  ;;  %v5038_v13 = vadd.f32 %v10654_v52, %v5000_v50  ;;  %v4998_v16 = vmul.f32 %v10624_v2, %v4915_v46  ;;  %v11080_v0 = vpop.permute.xlu0 %5267 }
 0x695   : > { %12709 = vst [vmem:[#allocation55_spill] sm:$0xff] %v11080_v0 }
 0x696   : > { %v5070_v34 = vmax.f32 %v5038_v13, 0.0  ;;  %v5036_v25 = vadd.f32 %v10654_v52, %v4998_v16  ;;  %5183 = vrot.lane.b32.xlu0 %v11067_v33, %s7298_s16  ;;  %v11076_v54 = vpack.c.bf16 %v5067_v5, %v5067_v5  ;;  %v11089_v52 = vshrl.u32 %v11067_v33, 16  ;;  %v11091_v30 = vpop.permute.xlu1 %5269 }
 0x697   : > { %12710 = vst [vmem:[#allocation27_spill] sm:$0xff] %v11091_v30 }
 0x698   : > { %v11078_v57 = vpack.c.bf16 %v5070_v34, %v5070_v34  ;;  %v5068_v38 = vmax.f32 %v5036_v25, 0.0  ;;  %v11097_v5 = vpop.permute.xlu0 %5395  ;;  %v5421_v34 = vrot.slane %v11067_v33, 1  ;;  %v11109_v13 = vshrl.u32 %v11076_v54, 16 }
 0x699   : > { %12711 = vst [vmem:[#allocation32_spill] sm:$0xff] %v11097_v5  ;;  %v5419_v5 = vrot.slane %v11076_v54, 1 }
 0x69a   : > { %5179 = vrot.lane.b32.xlu0 %v11076_v54, %s7298_s16  ;;  %5185 = vrot.lane.b32.xlu1 %v11078_v57, %s7298_s16  ;;  %v11086_v2 = vpack.c.bf16 %v5068_v38, %v5068_v38  ;;  %v11101_v50 = vshrl.u32 %v11078_v57, 16  ;;  %v11106_v46 = vpop.permute.xlu1 %5397  ;;  %v5422_v16 = vrot.slane %v11078_v57, 1 }
 0x69b   : > { %v7103_v38 = vpop.f32.mrf.mxu1  ;;  %12712 = vst [vmem:[#allocation52_spill] sm:$0xff] %v11106_v46 }
 0x69c   : > { %v11112_v11 = vpop.permute.xlu0 %5495  ;;  %v11125_v59 = vshrl.u32 %v11086_v2, 16  ;;  %v5518_v45 = vrot.slane %v11101_v50, 1 }
 0x69d   : > { %v4928_v25 = vpop.f32.mrf.mxu1  ;;  %12713 = vst [vmem:[#allocation58_spill] sm:$0xff] %v11112_v11 }
 0x69e   : > { %5343 = vrot.lane.b32.xlu0 %v11089_v52, %s7304_s12  ;;  %5181 = vrot.lane.b32.xlu1 %v11086_v2, %s7298_s16  ;;  %v11127_v0 = vpop.permute.xlu1 %5497 }
 0x69f   : > { %v7104_v30 = vpop.f32.mrf.mxu1  ;;  %12714 = vst [vmem:[#allocation48_spill] sm:$0xff] %v11127_v0 }
 0x6a0   : > { %v11133_v11 = vpop.permute.xlu0 %5587 }
 0x6a1   : > { %12715 = vst [vmem:[#allocation59_spill] sm:$0xff] %v11133_v11  ;;  %v4931_v37 = vpop.f32.mrf.mxu1  ;;  %v5515_v11 = vrot.slane %v11109_v13, 1 }
 0x6a2   : > { %5439 = vrot.lane.b32.xlu0 %v5421_v34, %s7302_s20  ;;  %5345 = vrot.lane.b32.xlu1 %v11101_v50, %s7304_s12  ;;  %v11120_v34 = vld [vmem:[%s12346_s6] ss:$0 sm:$0xff]  ;;  %v11148_v12 = vpop.permute.xlu1 %5589 }
 0x6a3   : > { %v5003_v46 = vmul.f32 %v11120_v34, %v7103_v38  ;;  %v11138_v38 = vld [vmem:[%s12347_s7] ss:$0 sm:$0xff]  ;;  %v5001_v47 = vmul.f32 %v11120_v34, %v4928_v25  ;;  %v5004_v0 = vmul.f32 %v11120_v34, %v7104_v30  ;;  %12716 = vst [vmem:[#allocation40_spill] sm:$0xff] %v11148_v12  ;;  %v5002_v30 = vmul.f32 %v11120_v34, %v4931_v37 }
 0x6a4   : > { %v11153_v19 = vpop.permute.xlu0 %5491 }
 0x6a5   : > { %v5041_v14 = vadd.f32 %v11138_v38, %v5003_v46  ;;  %v5039_v46 = vadd.f32 %v11138_v38, %v5001_v47  ;;  %v5042_v25 = vadd.f32 %v11138_v38, %v5004_v0  ;;  %12717 = vst [vmem:[#allocation60_spill] sm:$0xff] %v11153_v19 }
 0x6a6   : > { %5339 = vrot.lane.b32.xlu0 %v11109_v13, %s7304_s12  ;;  %5441 = vrot.lane.b32.xlu1 %v5422_v16, %s7302_s20  ;;  %v5517_v16 = vrot.slane %v11089_v52, 1  ;;  %v11161_v12 = vpop.permute.xlu1 %5493 }
 0x6a7   : > { %v5073_v31 = vmax.f32 %v5041_v14, 0.0  ;;  %v5071_v36 = vmax.f32 %v5039_v46, 0.0  ;;  %v5074_v63 = vmax.f32 %v5042_v25, 0.0  ;;  %v5040_v14 = vadd.f32 %v11138_v38, %v5002_v30  ;;  %12718 = vst [vmem:[#allocation13_spill] sm:$0xff] %v11161_v12 }
 0x6a8   : > { %v11163_v47 = vpop.permute.xlu0 %5279 }
 0x6a9   : > { %12719 = vst [vmem:[#allocation53_spill] sm:$0xff] %v11163_v47  ;;  %v11168_v37 = vpack.c.bf16 %v5071_v36, %v5071_v36 }
 0x6aa   : > { %5435 = vrot.lane.b32.xlu0 %v5419_v5, %s7302_s20  ;;  %5341 = vrot.lane.b32.xlu1 %v11125_v59, %s7304_s12  ;;  %v5420_v5 = vrot.slane %v11086_v2, 1 }
 0x6ac   : > { %v11180_v46 = vpop.permute.xlu0 %5407 }
 0x6ad   : > { %12721 = vst [vmem:[#allocation16_spill] sm:$0xff] %v11180_v46 }
 0x6ae   : > { %5535 = vrot.lane.b32.xlu0 %v5517_v16, %s7303_s9  ;;  %5437 = vrot.lane.b32.xlu1 %v5420_v5, %s7302_s20  ;;  %v5516_v16 = vrot.slane %v11125_v59, 1  ;;  %v11158_v5 = vpack.c.bf16 %v5073_v31, %v5073_v31  ;;  %v11172_v31 = vpop.permute.xlu1 %5281 }
 0x6af   : > { %12720 = vst [vmem:[#allocation14_spill] sm:$0xff] %v11172_v31 }
 0x6b0   : > { %v11183_v25 = vshrl.u32 %v11158_v5, 16  ;;  %v5425_v36 = vrot.slane %v11158_v5, 1 }
 0x6b2   : > { %5531 = vrot.lane.b32.xlu0 %v5515_v11, %s7303_s9  ;;  %5537 = vrot.lane.b32.xlu1 %v5518_v45, %s7303_s9  ;;  %v11170_v45 = vpack.c.bf16 %v5074_v63, %v5074_v63  ;;  %v5072_v11 = vmax.f32 %v5040_v14, 0.0  ;;  %12722 = vst [vmem:[#allocation18_spill] sm:$0xff] %v11183_v25  ;;  %v11189_v63 = vpop.permute.xlu1 %5409  ;;  %v11195_v14 = vpop.permute.xlu0 %5599 }
 0x6b3   : > { %12723 = vst [vmem:[#allocation45_spill] sm:$0xff] %v11189_v63  ;;  %12725 = vst [vmem:[#allocation56_spill] sm:$0xff] %v11195_v14 }
 0x6b4   : > { %v11178_v0 = vpack.c.bf16 %v5072_v11, %v5072_v11  ;;  %v11193_v30 = vshrl.u32 %v11170_v45, 16  ;;  %v11201_v11 = vshrl.u32 %v11168_v37, 16  ;;  %v5426_v46 = vrot.slane %v11170_v45, 1 }
 0x6b6   : > { %5533 = vrot.lane.b32.xlu1 %v5516_v16, %s7303_s9  ;;  %5191 = vrot.lane.b32.xlu0 %v11158_v5, %s7298_s16  ;;  %12724 = vst [vmem:[#allocation19_spill] sm:$0xff] %v11193_v30  ;;  %v7107_v16 = vpop.f32.mrf.mxu1  ;;  %12726 = vst [vmem:[#allocation26_spill] sm:$0xff] %v11201_v11  ;;  %v11204_v63 = vpop.permute.xlu1 %5601  ;;  %v11214_v12 = vshrl.u32 %v11178_v0, 16  ;;  %v5424_v15 = vrot.slane %v11178_v0, 1  ;;  %v5522_v10 = vrot.slane %v11193_v30, 1 }
 0x6b7   : > { %12727 = vst [vmem:[#allocation21_spill] sm:$0xff] %v11204_v63  ;;  %v5007_v14 = vmul.f32 %v11120_v34, %v7107_v16  ;;  %v11210_v47 = vpop.permute.xlu0 %5275 }
 0x6b8   : > { %v4944_v31 = vpop.f32.mrf.mxu1  ;;  %12728 = vst [vmem:[#allocation54_spill] sm:$0xff] %v11210_v47  ;;  %12729 = vst [vmem:[#allocation62_spill] sm:$0xff] %v11214_v12  ;;  %v5521_v47 = vrot.slane %v11183_v25, 1 }
 0x6b9   : > { %v5045_v63 = vadd.f32 %v11138_v38, %v5007_v14  ;;  %v5005_v44 = vmul.f32 %v11120_v34, %v4944_v31 }
 0x6ba   : > { %5187 = vrot.lane.b32.xlu0 %v11168_v37, %s7298_s16  ;;  %5193 = vrot.lane.b32.xlu1 %v11170_v45, %s7298_s16  ;;  %v7108_v19 = vpop.f32.mrf.mxu1  ;;  %v11222_v16 = vpop.permute.xlu1 %5277 }
 0x6bb   : > { %12730 = vst [vmem:[#allocation63_spill] sm:$0xff] %v11222_v16  ;;  %v11226_v53 = vpop.permute.xlu0 %5403  ;;  %v5043_v14 = vadd.f32 %v11138_v38, %v5005_v44  ;;  %v5519_v16 = vrot.slane %v11201_v11, 1 }
 0x6bc   : > { %v4947_v51 = vpop.f32.mrf.mxu1  ;;  %12731 = vst [vmem:[#allocation64_spill] sm:$0xff] %v11226_v53 }
 0x6be   : > { %5351 = vrot.lane.b32.xlu0 %v11183_v25, %s7304_s12  ;;  %5189 = vrot.lane.b32.xlu1 %v11178_v0, %s7298_s16  ;;  %v11235_v20 = vpop.permute.xlu1 %5405 }
 0x6bf   : > { %12732 = vst [vmem:[#allocation65_spill] sm:$0xff] %v11235_v20  ;;  %v11242_v53 = vpop.permute.xlu0 %5503 }
 0x6c0   : > { %12733 = vst [vmem:[#allocation66_spill] sm:$0xff] %v11242_v53 }
 0x6c2   : > { %5447 = vrot.lane.b32.xlu0 %v5425_v36, %s7302_s20  ;;  %5353 = vrot.lane.b32.xlu1 %v11193_v30, %s7304_s12  ;;  %v5423_v36 = vrot.slane %v11168_v37, 1 }
 0x6c6   : > { %5347 = vrot.lane.b32.xlu0 %v11201_v11, %s7304_s12  ;;  %5449 = vrot.lane.b32.xlu1 %v5426_v46, %s7302_s20  ;;  %v5008_v46 = vmul.f32 %v11120_v34, %v7108_v19  ;;  %v5006_v19 = vmul.f32 %v11120_v34, %v4947_v51  ;;  %v5520_v51 = vrot.slane %v11214_v12, 1 }
 0x6c8   : > { %v5046_v31 = vadd.f32 %v11138_v38, %v5008_v46  ;;  %v5044_v44 = vadd.f32 %v11138_v38, %v5006_v19 }
 0x6ca   : > { %5443 = vrot.lane.b32.xlu0 %v5423_v36, %s7302_s20  ;;  %5349 = vrot.lane.b32.xlu1 %v11214_v12, %s7304_s12  ;;  %v5077_v36 = vmax.f32 %v5045_v63, 0.0  ;;  %v5078_v63 = vmax.f32 %v5046_v31, 0.0 }
 0x6ce   : > { %5543 = vrot.lane.b32.xlu0 %v5521_v47, %s7303_s9  ;;  %5445 = vrot.lane.b32.xlu1 %v5424_v15, %s7302_s20  ;;  %v11239_v47 = vpack.c.bf16 %v5077_v36, %v5077_v36  ;;  %v5075_v15 = vmax.f32 %v5043_v14, 0.0  ;;  %v11252_v36 = vpop.permute.xlu1 %5505  ;;  %v11254_v14 = vpop.permute.xlu0 %5595 }
 0x6cf   : > { %12734 = vst [vmem:[#allocation67_spill] sm:$0xff] %v11252_v36  ;;  %12735 = vst [vmem:[#allocation68_spill] sm:$0xff] %v11254_v14 }
 0x6d0   : > { %v11248_v46 = vpack.c.bf16 %v5075_v15, %v5075_v15  ;;  %v11263_v19 = vshrl.u32 %v11239_v47, 16 }
 0x6d2   : > { %5539 = vrot.lane.b32.xlu0 %v5519_v16, %s7303_s9  ;;  %5545 = vrot.lane.b32.xlu1 %v5522_v10, %s7303_s9  ;;  %v11250_v16 = vpack.c.bf16 %v5078_v63, %v5078_v63  ;;  %v5076_v10 = vmax.f32 %v5044_v44, 0.0  ;;  %v11265_v15 = vpop.permute.xlu1 %5597  ;;  %v11271_v63 = vpop.permute.xlu0 %5499  ;;  %v5429_v44 = vrot.slane %v11239_v47, 1  ;;  %v11283_v36 = vshrl.u32 %v11248_v46, 16 }
 0x6d3   : > { %12736 = vst [vmem:[#allocation69_spill] sm:$0xff] %v11265_v15  ;;  %12737 = vst [vmem:[#allocation70_spill] sm:$0xff] %v11271_v63  ;;  %v5427_v20 = vrot.slane %v11248_v46, 1  ;;  %v5525_v41 = vrot.slane %v11263_v19, 1 }
 0x6d4   : > { %v11260_v31 = vpack.c.bf16 %v5076_v10, %v5076_v10  ;;  %v7111_v10 = vpop.f32.mrf.mxu1  ;;  %12740 = vst [vmem:[#allocation73_spill] sm:$0xff] %v11283_v36  ;;  %v5430_v14 = vrot.slane %v11250_v16, 1 }
 0x6d6   : > { %5541 = vrot.lane.b32.xlu1 %v5520_v51, %s7303_s9  ;;  %5199 = vrot.lane.b32.xlu0 %v11239_v47, %s7298_s16  ;;  %v11275_v51 = vshrl.u32 %v11250_v16, 16  ;;  %v11280_v15 = vpop.permute.xlu1 %5501  ;;  %v4960_v53 = vpop.f32.mrf.mxu1  ;;  %v11294_v35 = vshrl.u32 %v11260_v31, 16  ;;  %v5428_v40 = vrot.slane %v11260_v31, 1 }
 0x6d7   : > { %12739 = vst [vmem:[#allocation72_spill] sm:$0xff] %v11280_v15  ;;  %v11286_v63 = vpop.permute.xlu0 %5287  ;;  %v5009_v61 = vmul.f32 %v11120_v34, %v4960_v53 }
 0x6d8   : > { %12738 = vst [vmem:[#allocation71_spill] sm:$0xff] %v11275_v51  ;;  %12741 = vst [vmem:[#allocation74_spill] sm:$0xff] %v11286_v63  ;;  %v7112_v15 = vpop.f32.mrf.mxu1 }
 0x6da   : > { %5195 = vrot.lane.b32.xlu0 %v11248_v46, %s7298_s16  ;;  %5201 = vrot.lane.b32.xlu1 %v11250_v16, %s7298_s16  ;;  %v11296_v62 = vpop.permute.xlu1 %5289  ;;  %v4963_v56 = vpop.f32.mrf.mxu1 }
 0x6db   : > { %12742 = vst [vmem:[#allocation75_spill] sm:$0xff] %v11296_v62  ;;  %v5047_v62 = vadd.f32 %v11138_v38, %v5009_v61  ;;  %v5010_v53 = vmul.f32 %v11120_v34, %v4963_v56  ;;  %v5524_v56 = vrot.slane %v11294_v35, 1 }
 0x6de   : > { %5359 = vrot.lane.b32.xlu0 %v11263_v19, %s7304_s12  ;;  %5197 = vrot.lane.b32.xlu1 %v11260_v31, %s7298_s16  ;;  %v11313_v58 = vpop.permute.xlu1 %5417 }
 0x6df   : > { %12744 = vst [vmem:[#allocation77_spill] sm:$0xff] %v11313_v58 }
 0x6e2   : > { %5455 = vrot.lane.b32.xlu0 %v5429_v44, %s7302_s20  ;;  %5361 = vrot.lane.b32.xlu1 %v11275_v51, %s7304_s12  ;;  %v5011_v44 = vmul.f32 %v11120_v34, %v7111_v10  ;;  %v11304_v10 = vpop.permute.xlu0 %5415 }
 0x6e3   : > { %12743 = vst [vmem:[#allocation76_spill] sm:$0xff] %v11304_v10  ;;  %v5526_v10 = vrot.slane %v11275_v51, 1 }
 0x6e4   : > { %v5049_v63 = vadd.f32 %v11138_v38, %v5011_v44 }
 0x6e6   : > { %5355 = vrot.lane.b32.xlu0 %v11283_v36, %s7304_s12  ;;  %5457 = vrot.lane.b32.xlu1 %v5430_v14, %s7302_s20  ;;  %v5012_v14 = vmul.f32 %v11120_v34, %v7112_v15  ;;  %v5523_v15 = vrot.slane %v11283_v36, 1  ;;  %v11317_v27 = vpop.permute.xlu0 %5283  ;;  %v11325_v34 = vpop.permute.xlu1 %5285 }
 0x6e7   : > { %12745 = vst [vmem:[#allocation78_spill] sm:$0xff] %v11317_v27  ;;  %12747 = vst [vmem:[#allocation80_spill] sm:$0xff] %v11325_v34  ;;  %v5576_v27 = vrot.slane %v10994_v3, 2 }
 0x6e8   : > { %v5050_v44 = vadd.f32 %v11138_v38, %v5012_v14 }
 0x6ea   : > { %5451 = vrot.lane.b32.xlu0 %v5427_v20, %s7302_s20  ;;  %5357 = vrot.lane.b32.xlu1 %v11294_v35, %s7304_s12  ;;  %v5081_v20 = vmax.f32 %v5049_v63, 0.0  ;;  %v5082_v61 = vmax.f32 %v5050_v44, 0.0  ;;  %v5048_v63 = vadd.f32 %v11138_v38, %v5010_v53  ;;  %v11342_v38 = vpop.permute.xlu1 %5413 }
 0x6eb   : > { %12751 = vst [vmem:[#allocation84_spill] sm:$0xff] %v11342_v38 }
 0x6ee   : > { %5551 = vrot.lane.b32.xlu0 %v5525_v41, %s7303_s9  ;;  %5453 = vrot.lane.b32.xlu1 %v5428_v40, %s7302_s20  ;;  %v11321_v41 = vpack.c.bf16 %v5081_v20, %v5081_v20  ;;  %v5079_v40 = vmax.f32 %v5047_v62, 0.0  ;;  %v11334_v20 = vpop.permute.xlu0 %5411 }
 0x6ef   : > { %12749 = vst [vmem:[#allocation82_spill] sm:$0xff] %v11334_v20 }
 0x6f0   : > { %12746 = vst [vmem:[#allocation79_spill] sm:$0xff] %v11321_v41  ;;  %v11330_v14 = vpack.c.bf16 %v5079_v40, %v5079_v40  ;;  %v11345_v44 = vshrl.u32 %v11321_v41, 16  ;;  %v5433_v40 = vrot.slane %v11321_v41, 1 }
 0x6f2   : > { %5547 = vrot.lane.b32.xlu0 %v5523_v15, %s7303_s9  ;;  %5553 = vrot.lane.b32.xlu1 %v5526_v10, %s7303_s9  ;;  %v11332_v15 = vpack.c.bf16 %v5082_v61, %v5082_v61  ;;  %v5080_v10 = vmax.f32 %v5048_v63, 0.0  ;;  %12752 = vst [vmem:[#allocation85_spill] sm:$0xff] %v11345_v44  ;;  %v11347_v53 = vpop.permute.xlu0 %5511  ;;  %v11357_v63 = vpop.permute.xlu1 %5513 }
 0x6f3   : > { %12753 = vst [vmem:[#allocation86_spill] sm:$0xff] %v11347_v53  ;;  %12755 = vst [vmem:[#allocation88_spill] sm:$0xff] %v11357_v63  ;;  %v5529_v53 = vrot.slane %v11345_v44, 1 }
 0x6f4   : > { %12748 = vst [vmem:[#allocation81_spill] sm:$0xff] %v11332_v15  ;;  %v11340_v62 = vpack.c.bf16 %v5080_v10, %v5080_v10  ;;  %v11355_v61 = vshrl.u32 %v11332_v15, 16  ;;  %v11365_v10 = vshrl.u32 %v11330_v14, 16  ;;  %v5434_v38 = vrot.slane %v11332_v15, 1 }
 0x6f6   : > { %5207 = vrot.lane.b32.xlu0 %v11321_v41, %s7298_s16  ;;  %5549 = vrot.lane.b32.xlu1 %v5524_v56, %s7303_s9  ;;  %12750 = vst [vmem:[#allocation83_spill] sm:$0xff] %v11340_v62  ;;  %12754 = vst [vmem:[#allocation87_spill] sm:$0xff] %v11355_v61  ;;  %v11362_v56 = vpop.permute.xlu0 %5507  ;;  %v11371_v20 = vpop.permute.xlu1 %5509 }
 0x6f7   : > { %12756 = vst [vmem:[#allocation89_spill] sm:$0xff] %v11362_v56  ;;  %12757 = vst [vmem:[#allocation90_spill] sm:$0xff] %v11365_v10 }
 0x6f8   : > { %12758 = vst [vmem:[#allocation91_spill] sm:$0xff] %v11371_v20 }
 0x6fa   : > { %5203 = vrot.lane.b32.xlu0 %v11330_v14, %s7298_s16  ;;  %5209 = vrot.lane.b32.xlu1 %v11332_v15, %s7298_s16 }
 0x6fe   : > { %5367 = vrot.lane.b32.xlu0 %v11345_v44, %s7304_s12  ;;  %5205 = vrot.lane.b32.xlu1 %v11340_v62, %s7298_s16  ;;  %s7307_s16 = smov 72  }
 0x702   : > { %5463 = vrot.lane.b32.xlu0 %v5433_v40, %s7302_s20  ;;  %5369 = vrot.lane.b32.xlu1 %v11355_v61, %s7304_s12  ;;  %v5431_v40 = vrot.slane %v11330_v14, 1 }
 0x706   : > { %5363 = vrot.lane.b32.xlu0 %v11365_v10, %s7304_s12  ;;  %5465 = vrot.lane.b32.xlu1 %v5434_v38, %s7302_s20  ;;  %v11385_v38 = vshrl.u32 %v11340_v62, 16 }
 0x708   : > { %v11373_v34 = vpop.permute.xlu0 %5183  ;;  %12762 = vst [vmem:[#allocation95_spill] sm:$0xff] %v11385_v38 }
 0x709   : > { %12759 = vst [vmem:[#allocation92_spill] sm:$0xff] %v11373_v34  ;;  %v5530_v34 = vrot.slane %v11355_v61, 1 }
 0x70a   : > { %5459 = vrot.lane.b32.xlu0 %v5431_v40, %s7302_s20  ;;  %5605 = vrot.lane.b32.xlu1 %v5576_v27, %s7306_s14  ;;  %v5527_v27 = vrot.slane %v11365_v10, 1  ;;  %v5432_v40 = vrot.slane %v11340_v62, 1 }
 0x70c   : > { %v11379_v56 = vpop.permute.xlu0 %5179  ;;  %v11381_v63 = vpop.permute.xlu1 %5185 }
 0x70d   : > { %12760 = vst [vmem:[#allocation93_spill] sm:$0xff] %v11379_v56  ;;  %12761 = vst [vmem:[#allocation94_spill] sm:$0xff] %v11381_v63 }
 0x70e   : > { %5559 = vrot.lane.b32.xlu0 %v5529_v53, %s7303_s9  ;;  %5365 = vrot.lane.b32.xlu1 %v11385_v38, %s7304_s12  ;;  %v5575_v53 = vrot.slane %v10985_v8, 2  ;;  %s7310_s12 = smov 96  }
 0x710   : > { %v11390_v20 = vpop.permute.xlu0 %5343  ;;  %v11392_v58 = vpop.permute.xlu1 %5181 }
 0x711   : > { %12763 = vst [vmem:[#allocation96_spill] sm:$0xff] %v11390_v20  ;;  %12764 = vst [vmem:[#allocation97_spill] sm:$0xff] %v11392_v58 }
 0x712   : > { %5555 = vrot.lane.b32.xlu0 %v5527_v27, %s7303_s9  ;;  %5461 = vrot.lane.b32.xlu1 %v5432_v40, %s7302_s20  ;;  %v5577_v27 = vrot.slane %v10969_v9, 2  ;;  %v5528_v40 = vrot.slane %v11385_v38, 1  ;;  %s7308_s20 = smov 80  }
 0x714   : > { %v11398_v56 = vpop.permute.xlu0 %5439  ;;  %v11400_v63 = vpop.permute.xlu1 %5345 }
 0x715   : > { %12765 = vst [vmem:[#allocation98_spill] sm:$0xff] %v11398_v56  ;;  %12766 = vst [vmem:[#allocation99_spill] sm:$0xff] %v11400_v63 }
 0x716   : > { %5603 = vrot.lane.b32.xlu0 %v5575_v53, %s7306_s14  ;;  %5561 = vrot.lane.b32.xlu1 %v5530_v34, %s7303_s9  ;;  %v5611_v53 = vrot.slane %v11076_v54, 2  ;;  %v5578_v34 = vrot.slane %v10976_v18, 2 }
 0x718   : > { %v11406_v20 = vpop.permute.xlu0 %5339  ;;  %v11408_v58 = vpop.permute.xlu1 %5441 }
 0x719   : > { %12767 = vst [vmem:[#allocation100_spill] sm:$0xff] %v11406_v20  ;;  %12768 = vst [vmem:[#allocation101_spill] sm:$0xff] %v11408_v58 }
 0x71a   : > { %5607 = vrot.lane.b32.xlu0 %v5577_v27, %s7306_s14  ;;  %5557 = vrot.lane.b32.xlu1 %v5528_v40, %s7303_s9  ;;  %v5613_v27 = vrot.slane %v11067_v33, 2  ;;  %v5612_v40 = vrot.slane %v11086_v2, 2  ;;  %s7309_s9 = smov 88  }
 0x71c   : > { %v11414_v56 = vpop.permute.xlu0 %5435  ;;  %v11416_v63 = vpop.permute.xlu1 %5341 }
 0x71d   : > { %12769 = vst [vmem:[#allocation102_spill] sm:$0xff] %v11414_v56  ;;  %12770 = vst [vmem:[#allocation103_spill] sm:$0xff] %v11416_v63 }
 0x71e   : > { %5627 = vrot.lane.b32.xlu0 %v5611_v53, %s7307_s16  ;;  %5609 = vrot.lane.b32.xlu1 %v5578_v34, %s7306_s14  ;;  %v5615_v53 = vrot.slane %v11168_v37, 2  ;;  %v5614_v34 = vrot.slane %v11078_v57, 2  ;;  %s7311_s14 = smov 104  }
 0x720   : > { %v11422_v58 = vpop.permute.xlu0 %5535  ;;  %v11424_v20 = vpop.permute.xlu1 %5437 }
 0x721   : > { %12771 = vst [vmem:[#allocation104_spill] sm:$0xff] %v11422_v58  ;;  %12772 = vst [vmem:[#allocation105_spill] sm:$0xff] %v11424_v20 }
 0x722   : > { %5631 = vrot.lane.b32.xlu0 %v5613_v27, %s7307_s16  ;;  %5629 = vrot.lane.b32.xlu1 %v5612_v40, %s7307_s16  ;;  %v5617_v27 = vrot.slane %v11158_v5, 2  ;;  %v5616_v40 = vrot.slane %v11178_v0, 2 }
 0x724   : > { %v11430_v56 = vpop.permute.xlu0 %5531  ;;  %v11432_v63 = vpop.permute.xlu1 %5537 }
 0x725   : > { %12773 = vst [vmem:[#allocation106_spill] sm:$0xff] %v11430_v56  ;;  %12774 = vst [vmem:[#allocation107_spill] sm:$0xff] %v11432_v63 }
 0x726   : > { %5635 = vrot.lane.b32.xlu0 %v5615_v53, %s7307_s16  ;;  %5633 = vrot.lane.b32.xlu1 %v5614_v34, %s7307_s16  ;;  %v5619_v53 = vrot.slane %v11248_v46, 2  ;;  %v5618_v34 = vrot.slane %v11170_v45, 2 }
 0x728   : > { %v11438_v58 = vpop.permute.xlu0 %5191  ;;  %v11440_v20 = vpop.permute.xlu1 %5533 }
 0x729   : > { %12775 = vst [vmem:[#allocation108_spill] sm:$0xff] %v11438_v58  ;;  %12776 = vst [vmem:[#allocation109_spill] sm:$0xff] %v11440_v20 }
 0x72a   : > { %5639 = vrot.lane.b32.xlu0 %v5617_v27, %s7307_s16  ;;  %5637 = vrot.lane.b32.xlu1 %v5616_v40, %s7307_s16  ;;  %v5621_v27 = vrot.slane %v11239_v47, 2  ;;  %v5620_v40 = vrot.slane %v11260_v31, 2 }
 0x72c   : > { %v11446_v63 = vpop.permute.xlu0 %5187  ;;  %v11448_v56 = vpop.permute.xlu1 %5193 }
 0x72d   : > { %12777 = vst [vmem:[#allocation110_spill] sm:$0xff] %v11446_v63  ;;  %12778 = vst [vmem:[#allocation111_spill] sm:$0xff] %v11448_v56 }
 0x72e   : > { %5643 = vrot.lane.b32.xlu0 %v5619_v53, %s7307_s16  ;;  %5641 = vrot.lane.b32.xlu1 %v5618_v34, %s7307_s16  ;;  %v5623_v53 = vrot.slane %v11330_v14, 2  ;;  %v5622_v34 = vrot.slane %v11250_v16, 2 }
 0x730   : > { %v11454_v20 = vpop.permute.xlu0 %5351  ;;  %v11456_v58 = vpop.permute.xlu1 %5189 }
 0x731   : > { %12779 = vst [vmem:[#allocation112_spill] sm:$0xff] %v11454_v20  ;;  %12780 = vst [vmem:[#allocation113_spill] sm:$0xff] %v11456_v58 }
 0x732   : > { %5647 = vrot.lane.b32.xlu0 %v5621_v27, %s7307_s16  ;;  %5645 = vrot.lane.b32.xlu1 %v5620_v40, %s7307_s16  ;;  %v5625_v27 = vrot.slane %v11321_v41, 2  ;;  %v5624_v40 = vrot.slane %v11340_v62, 2 }
 0x734   : > { %v11462_v56 = vpop.permute.xlu0 %5447  ;;  %v11464_v63 = vpop.permute.xlu1 %5353 }
 0x735   : > { %12781 = vst [vmem:[#allocation114_spill] sm:$0xff] %v11462_v56  ;;  %12782 = vst [vmem:[#allocation115_spill] sm:$0xff] %v11464_v63 }
 0x736   : > { %5651 = vrot.lane.b32.xlu0 %v5623_v53, %s7307_s16  ;;  %5649 = vrot.lane.b32.xlu1 %v5622_v34, %s7307_s16  ;;  %v5659_v53 = vrot.slane %v10768_v32, 2  ;;  %v5626_v34 = vrot.slane %v11332_v15, 2 }
 0x738   : > { %v11470_v20 = vpop.permute.xlu0 %5347  ;;  %v11472_v58 = vpop.permute.xlu1 %5449 }
 0x73a   : > { %5655 = vrot.lane.b32.xlu0 %v5625_v27, %s7307_s16  ;;  %5653 = vrot.lane.b32.xlu1 %v5624_v40, %s7307_s16  ;;  %v5661_v27 = vrot.slane %v10721_v43, 2  ;;  %v5660_v40 = vrot.slane %v10794_v21, 2 }
 0x73c   : > { %v11478_v56 = vpop.permute.xlu0 %5443  ;;  %v11480_v63 = vpop.permute.xlu1 %5349 }
 0x73d   : > { %12783 = vst [vmem:[#allocation116_spill] sm:$0xff] %v11478_v56 }
 0x73e   : > { %5675 = vrot.lane.b32.xlu0 %v5659_v53, %s7308_s20  ;;  %5657 = vrot.lane.b32.xlu1 %v5626_v34, %s7307_s16  ;;  %v5663_v53 = vrot.slane %v10883_v26, 2  ;;  %v5662_v34 = vrot.slane %v10742_v60, 2 }
 0x740   : > { %v11486_v41 = vpop.permute.xlu0 %5543  ;;  %v11488_v62 = vpop.permute.xlu1 %5445 }
 0x741   : > { %12784 = vst [vmem:[#allocation117_spill] sm:$0xff] %v11486_v41  ;;  %12785 = vst [vmem:[#allocation118_spill] sm:$0xff] %v11488_v62 }
 0x742   : > { %5679 = vrot.lane.b32.xlu0 %v5661_v27, %s7308_s20  ;;  %5677 = vrot.lane.b32.xlu1 %v5660_v40, %s7308_s20  ;;  %v5665_v27 = vrot.slane %v10859_v6, 2  ;;  %v5664_v40 = vrot.slane %v10886_v42, 2 }
 0x744   : > { %v11494_v56 = vpop.permute.xlu0 %5539  ;;  %v11496_v15 = vpop.permute.xlu1 %5545 }
 0x745   : > { %12786 = vst [vmem:[#allocation119_spill] sm:$0xff] %v11494_v56  ;;  %12787 = vst [vmem:[#allocation120_spill] sm:$0xff] %v11496_v15 }
 0x746   : > { %5683 = vrot.lane.b32.xlu0 %v5663_v53, %s7308_s20  ;;  %5681 = vrot.lane.b32.xlu1 %v5662_v34, %s7308_s20  ;;  %v5667_v53 = vrot.slane %v10941_v48, 2  ;;  %v5666_v34 = vrot.slane %v10862_v24, 2 }
 0x748   : > { %v11502_v41 = vpop.permute.xlu0 %5199  ;;  %v11504_v62 = vpop.permute.xlu1 %5541 }
 0x749   : > { %12788 = vst [vmem:[#allocation121_spill] sm:$0xff] %v11502_v41  ;;  %12789 = vst [vmem:[#allocation122_spill] sm:$0xff] %v11504_v62  ;;  %v12825_v41 = vld [vmem:[#allocation24_spill] sm:$0xff] }
 0x74a   : > { %5687 = vrot.lane.b32.xlu0 %v5665_v27, %s7308_s20  ;;  %5685 = vrot.lane.b32.xlu1 %v5664_v40, %s7308_s20  ;;  %v5669_v27 = vrot.slane %v10918_v49, 2  ;;  %v5668_v40 = vrot.slane %v10950_v22, 2 }
 0x74c   : > { %v11510_v15 = vpop.permute.xlu0 %5195  ;;  %v11512_v56 = vpop.permute.xlu1 %5201 }
 0x74d   : > { %12790 = vst [vmem:[#allocation123_spill] sm:$0xff] %v11510_v15  ;;  %12791 = vst [vmem:[#allocation124_spill] sm:$0xff] %v11512_v56  ;;  %v12823_v15 = vld [vmem:[#allocation7_spill] sm:$0xff] }
 0x74e   : > { %5691 = vrot.lane.b32.xlu0 %v5667_v53, %s7308_s20  ;;  %5689 = vrot.lane.b32.xlu1 %v5666_v34, %s7308_s20  ;;  %v5671_v53 = vrot.slane %v10997_v28, 2  ;;  %v5670_v34 = vrot.slane %v10927_v17, 2 }
 0x750   : > { %v11518_v62 = vpop.permute.xlu0 %5359  ;;  %v11520_v6 = vpop.permute.xlu1 %5197 }
 0x751   : > { %12792 = vst [vmem:[#allocation125_spill] sm:$0xff] %v11518_v62  ;;  %12793 = vst [vmem:[#allocation126_spill] sm:$0xff] %v11520_v6  ;;  %v12822_v6 = vld [vmem:[#allocation22_spill] sm:$0xff] }
 0x752   : > { %5695 = vrot.lane.b32.xlu0 %v5669_v27, %s7308_s20  ;;  %5693 = vrot.lane.b32.xlu1 %v5668_v40, %s7308_s20  ;;  %v5673_v27 = vrot.slane %v10980_v29, 2  ;;  %v5672_v40 = vrot.slane %v11005_v7, 2 }
 0x754   : > { %v11526_v42 = vpop.permute.xlu0 %5455  ;;  %v11528_v56 = vpop.permute.xlu1 %5361 }
 0x755   : > { %12794 = vst [vmem:[#allocation127_spill] sm:$0xff] %v11526_v42  ;;  %12795 = vst [vmem:[#allocation128_spill] sm:$0xff] %v11528_v56 }
 0x756   : > { %5699 = vrot.lane.b32.xlu0 %v5671_v53, %s7308_s20  ;;  %5697 = vrot.lane.b32.xlu1 %v5670_v34, %s7308_s20  ;;  %v5707_v53 = vrot.slane %v11109_v13, 2  ;;  %v5674_v34 = vrot.slane %v10989_v4, 2 }
 0x758   : > { %v11534_v24 = vpop.permute.xlu0 %5355  ;;  %v11536_v62 = vpop.permute.xlu1 %5457 }
 0x759   : > { %12796 = vst [vmem:[#allocation129_spill] sm:$0xff] %v11534_v24  ;;  %12797 = vst [vmem:[#allocation130_spill] sm:$0xff] %v11536_v62  ;;  %v12819_v24 = vld [vmem:[#allocation12_spill] sm:$0xff] }
 0x75a   : > { %5703 = vrot.lane.b32.xlu0 %v5673_v27, %s7308_s20  ;;  %5701 = vrot.lane.b32.xlu1 %v5672_v40, %s7308_s20  ;;  %v5709_v27 = vrot.slane %v11089_v52, 2  ;;  %v5708_v40 = vrot.slane %v11125_v59, 2 }
 0x75c   : > { %v11542_v42 = vpop.permute.xlu0 %5451  ;;  %v11544_v56 = vpop.permute.xlu1 %5357 }
 0x75d   : > { %12798 = vst [vmem:[#allocation131_spill] sm:$0xff] %v11542_v42  ;;  %12799 = vst [vmem:[#allocation132_spill] sm:$0xff] %v11544_v56  ;;  %v12816_v42 = vld [vmem:[#allocation17_spill] sm:$0xff]  ;;  %v12818_v56 = vld [vmem:[#allocation44_spill] sm:$0xff] }
 0x75e   : > { %5723 = vrot.lane.b32.xlu0 %v5707_v53, %s7309_s9  ;;  %5705 = vrot.lane.b32.xlu1 %v5674_v34, %s7308_s20  ;;  %v5711_v53 = vrot.slane %v11201_v11, 2  ;;  %v5710_v34 = vrot.slane %v11101_v50, 2 }
 0x760   : > { %v11550_v29 = vpop.permute.xlu0 %5551  ;;  %v11552_v7 = vpop.permute.xlu1 %5453 }
 0x761   : > { %12800 = vst [vmem:[#allocation133_spill] sm:$0xff] %v11550_v29  ;;  %12801 = vst [vmem:[#allocation134_spill] sm:$0xff] %v11552_v7 }
 0x762   : > { %5727 = vrot.lane.b32.xlu0 %v5709_v27, %s7309_s9  ;;  %5725 = vrot.lane.b32.xlu1 %v5708_v40, %s7309_s9  ;;  %v5713_v27 = vrot.slane %v11183_v25, 2  ;;  %v5712_v40 = vrot.slane %v11214_v12, 2 }
 0x764   : > { %v11558_v62 = vpop.permute.xlu0 %5547  ;;  %v11560_v4 = vpop.permute.xlu1 %5553 }
 0x765   : > { %12802 = vst [vmem:[#allocation135_spill] sm:$0xff] %v11558_v62  ;;  %12803 = vst [vmem:[#allocation136_spill] sm:$0xff] %v11560_v4 }
 0x766   : > { %5731 = vrot.lane.b32.xlu0 %v5711_v53, %s7309_s9  ;;  %5729 = vrot.lane.b32.xlu1 %v5710_v34, %s7309_s9  ;;  %v5715_v53 = vrot.slane %v11283_v36, 2  ;;  %v5714_v34 = vrot.slane %v11193_v30, 2 }
 0x768   : > { %v11566_v29 = vpop.permute.xlu0 %5207  ;;  %v11568_v7 = vpop.permute.xlu1 %5549 }
 0x769   : > { %12804 = vst [vmem:[#allocation137_spill] sm:$0xff] %v11568_v7 }
 0x76a   : > { %5735 = vrot.lane.b32.xlu0 %v5713_v27, %s7309_s9  ;;  %5733 = vrot.lane.b32.xlu1 %v5712_v40, %s7309_s9  ;;  %v5717_v27 = vrot.slane %v11263_v19, 2  ;;  %v5716_v40 = vrot.slane %v11294_v35, 2 }
 0x76c   : > { %v11574_v4 = vpop.permute.xlu0 %5203  ;;  %v11576_v11 = vpop.permute.xlu1 %5209 }
 0x76d   : > { %12805 = vst [vmem:[#allocation138_spill] sm:$0xff] %v11574_v4 }
 0x76e   : > { %5739 = vrot.lane.b32.xlu0 %v5715_v53, %s7309_s9  ;;  %5737 = vrot.lane.b32.xlu1 %v5714_v34, %s7309_s9  ;;  %v5719_v53 = vrot.slane %v11365_v10, 2  ;;  %v5718_v34 = vrot.slane %v11275_v51, 2  ;;  %v12815_v51 = vld [vmem:[#allocation23_spill] sm:$0xff] }
 0x770   : > { %v11582_v7 = vpop.permute.xlu0 %5367  ;;  %v11584_v25 = vpop.permute.xlu1 %5205 }
 0x771   : > { %12806 = vst [vmem:[#allocation139_spill] sm:$0xff] %v11584_v25 }
 0x772   : > { %5743 = vrot.lane.b32.xlu0 %v5717_v27, %s7309_s9  ;;  %5741 = vrot.lane.b32.xlu1 %v5716_v40, %s7309_s9  ;;  %v5721_v27 = vrot.slane %v11345_v44, 2  ;;  %v5720_v40 = vrot.slane %v11385_v38, 2 }
 0x774   : > { %v11590_v12 = vpop.permute.xlu0 %5463  ;;  %v11592_v62 = vpop.permute.xlu1 %5369 }
 0x776   : > { %5747 = vrot.lane.b32.xlu0 %v5719_v53, %s7309_s9  ;;  %5745 = vrot.lane.b32.xlu1 %v5718_v34, %s7309_s9  ;;  %v5755_v53 = vrot.slane %v10711_v55, 3  ;;  %v5722_v34 = vrot.slane %v11355_v61, 2 }
 0x778   : > { %v11598_v30 = vpop.permute.xlu0 %5363  ;;  %v11600_v25 = vpop.permute.xlu1 %5465 }
 0x779   : > { %12807 = vst [vmem:[#allocation140_spill] sm:$0xff] %v11598_v30 }
 0x77a   : > { %5751 = vrot.lane.b32.xlu0 %v5721_v27, %s7309_s9  ;;  %5749 = vrot.lane.b32.xlu1 %v5720_v40, %s7309_s9  ;;  %v5757_v27 = vrot.slane %v10709_v1, 3  ;;  %v5756_v40 = vrot.slane %v10725_v23, 3 }
 0x77c   : > { %v11606_v4 = vpop.permute.xlu0 %5459  ;;  %v11608_v10 = vpop.permute.xlu1 %5605 }
 0x77d   : > { %12808 = vst [vmem:[#allocation141_spill] sm:$0xff] %v11606_v4  ;;  %12809 = vst [vmem:[#allocation142_spill] sm:$0xff] %v11608_v10  ;;  %v12813_v4 = vld [vmem:[#allocation10_spill] sm:$0xff] }
 0x77e   : > { %5771 = vrot.lane.b32.xlu0 %v5755_v53, %s7310_s12  ;;  %5753 = vrot.lane.b32.xlu1 %v5722_v34, %s7309_s9  ;;  %v5759_v53 = vrot.slane %v10874_v39, 3  ;;  %v5758_v34 = vrot.slane %v12813_v4, 3 }
 0x780   : > { %v11614_v44 = vpop.permute.xlu0 %5559  ;;  %v11616_v38 = vpop.permute.xlu1 %5365 }
 0x781   : > { %12810 = vst [vmem:[#allocation143_spill] sm:$0xff] %v11616_v38 }
 0x782   : > { %5775 = vrot.lane.b32.xlu0 %v5757_v27, %s7310_s12  ;;  %5773 = vrot.lane.b32.xlu1 %v5756_v40, %s7310_s12  ;;  %v5761_v27 = vrot.slane %v12815_v51, 3  ;;  %v5760_v40 = vrot.slane %v12816_v42, 3 }
 0x784   : > { %v11622_v10 = vpop.permute.xlu0 %5555  ;;  %v11624_v61 = vpop.permute.xlu1 %5461 }
 0x785   : > { %12811 = vst [vmem:[#allocation144_spill] sm:$0xff] %v11622_v10  ;;  %12812 = vst [vmem:[#allocation145_spill] sm:$0xff] %v11624_v61 }
 0x786   : > { %5779 = vrot.lane.b32.xlu0 %v5759_v53, %s7310_s12  ;;  %5777 = vrot.lane.b32.xlu1 %v5758_v34, %s7310_s12  ;;  %v5763_v53 = vrot.slane %v12818_v56, 3  ;;  %v5762_v34 = vrot.slane %v12819_v24, 3 }
 0x788   : > { %v11630_v38 = vpop.permute.xlu0 %5603  ;;  %v11632_v30 = vpop.permute.xlu1 %5561 }
 0x789   : > { %12814 = vst [vmem:[#allocation10_spill] sm:$0xff] %v11630_v38 }
 0x78a   : > { %5783 = vrot.lane.b32.xlu0 %v5761_v27, %s7310_s12  ;;  %5781 = vrot.lane.b32.xlu1 %v5760_v40, %s7310_s12  ;;  %v5765_v27 = vrot.slane %v12822_v6, 3  ;;  %v5764_v40 = vrot.slane %v12823_v15, 3 }
 0x78c   : > { %v11638_v10 = vpop.permute.xlu0 %5607  ;;  %v11640_v61 = vpop.permute.xlu1 %5557 }
 0x78d   : > { %12817 = vst [vmem:[#allocation23_spill] sm:$0xff] %v11640_v61 }
 0x78e   : > { %5787 = vrot.lane.b32.xlu0 %v5763_v53, %s7310_s12  ;;  %5785 = vrot.lane.b32.xlu1 %v5762_v34, %s7310_s12  ;;  %v5767_v53 = vrot.slane %v10985_v8, 3  ;;  %v5766_v34 = vrot.slane %v12825_v41, 3 }
 0x790   : > { %v11646_v38 = vpop.permute.xlu0 %5627  ;;  %v11648_v36 = vpop.permute.xlu1 %5609 }
 0x791   : > { %12820 = vst [vmem:[#allocation17_spill] sm:$0xff] %v11646_v38  ;;  %12821 = vst [vmem:[#allocation12_spill] sm:$0xff] %v11648_v36 }
 0x792   : > { %5791 = vrot.lane.b32.xlu0 %v5765_v27, %s7310_s12  ;;  %5789 = vrot.lane.b32.xlu1 %v5764_v40, %s7310_s12  ;;  %v5769_v27 = vrot.slane %v10969_v9, 3  ;;  %v5768_v40 = vrot.slane %v10994_v3, 3 }
 0x794   : > { %v11654_v61 = vpop.permute.xlu0 %5631  ;;  %v11656_v56 = vpop.permute.xlu1 %5629 }
 0x795   : > { %12824 = vst [vmem:[#allocation22_spill] sm:$0xff] %v11656_v56 }
 0x796   : > { %5795 = vrot.lane.b32.xlu0 %v5767_v53, %s7310_s12  ;;  %5793 = vrot.lane.b32.xlu1 %v5766_v34, %s7310_s12  ;;  %v5803_v53 = vrot.slane %v11076_v54, 3  ;;  %v5770_v34 = vrot.slane %v10976_v18, 3 }
 0x798   : > { %v11662_v36 = vpop.permute.xlu0 %5635  ;;  %v11664_v38 = vpop.permute.xlu1 %5633 }
 0x799   : > { %12826 = vst [vmem:[#allocation7_spill] sm:$0xff] %v11664_v38 }
 0x79a   : > { %5799 = vrot.lane.b32.xlu0 %v5769_v27, %s7310_s12  ;;  %5797 = vrot.lane.b32.xlu1 %v5768_v40, %s7310_s12  ;;  %v5805_v27 = vrot.slane %v11067_v33, 3  ;;  %v5804_v40 = vrot.slane %v11086_v2, 3  ;;  %v5809_v2 = vrot.slane %v11158_v5, 3 }
 0x79c   : > { %v11670_v56 = vpop.permute.xlu0 %5639  ;;  %v11672_v8 = vpop.permute.xlu1 %5637 }
 0x79d   : > { %12827 = vst [vmem:[#allocation24_spill] sm:$0xff] %v11672_v8 }
 0x79e   : > { %5819 = vrot.lane.b32.xlu0 %v5803_v53, %s7311_s14  ;;  %5801 = vrot.lane.b32.xlu1 %v5770_v34, %s7310_s12  ;;  %v5807_v53 = vrot.slane %v11168_v37, 3  ;;  %v5806_v34 = vrot.slane %v11078_v57, 3  ;;  %v5811_v57 = vrot.slane %v11248_v46, 3 }
 0x7a0   : > { %v11678_v38 = vpop.permute.xlu0 %5643  ;;  %v11680_v3 = vpop.permute.xlu1 %5641 }
 0x7a1   : > { %12828 = vst [vmem:[#allocation146_spill] sm:$0xff] %v11680_v3 }
 0x7a2   : > { %5823 = vrot.lane.b32.xlu0 %v5805_v27, %s7311_s14  ;;  %5821 = vrot.lane.b32.xlu1 %v5804_v40, %s7311_s14  ;;  %v5808_v27 = vrot.slane %v11178_v0, 3  ;;  %v5813_v0 = vrot.slane %v11239_v47, 3 }
 0x7a4   : > { %v11686_v54 = vpop.permute.xlu0 %5647  ;;  %v11688_v8 = vpop.permute.xlu1 %5645 }
 0x7a5   : > { %12829 = vst [vmem:[#allocation147_spill] sm:$0xff] %v11686_v54  ;;  %12830 = vst [vmem:[#allocation148_spill] sm:$0xff] %v11688_v8 }
 0x7a6   : > { %5827 = vrot.lane.b32.xlu0 %v5807_v53, %s7311_s14  ;;  %5825 = vrot.lane.b32.xlu1 %v5806_v34, %s7311_s14  ;;  %v5810_v53 = vrot.slane %v11170_v45, 3 }
 0x7a8   : > { %v11694_v3 = vpop.permute.xlu0 %5651  ;;  %v11696_v33 = vpop.permute.xlu1 %5649 }
 0x7a9   : > { %12831 = vst [vmem:[#allocation149_spill] sm:$0xff] %v11694_v3  ;;  %12832 = vst [vmem:[#allocation150_spill] sm:$0xff] %v11696_v33  ;;  %v12835_v33 = vld [vmem:[#allocation94_spill] sm:$0xff] }
 0x7aa   : > { %5831 = vrot.lane.b32.xlu0 %v5809_v2, %s7311_s14  ;;  %5829 = vrot.lane.b32.xlu1 %v5808_v27, %s7311_s14  ;;  %v5812_v2 = vrot.slane %v11260_v31, 3  ;;  %v12834_v27 = vld [vmem:[#allocation92_spill] sm:$0xff]  ;;  %v5954_v47 = vsel %vm544_vm8, %v12813_v4, %v12835_v33  ;;  %v12836_v31 = vld [vmem:[#allocation93_spill] sm:$0xff] }
 0x7ab   : > { %v5952_v45 = vsel %vm544_vm8, %v10709_v1, %v12834_v27  ;;  %v12837_v1 = vld [vmem:[#allocation39_spill] sm:$0xff]  ;;  %v12838_v27 = vld [vmem:[#allocation97_spill] sm:$0xff] }
 0x7ac   : > { %v11702_v40 = vpop.permute.xlu0 %5655  ;;  %v11704_v37 = vpop.permute.xlu1 %5653  ;;  %v12840_v4 = vld [vmem:[#allocation25_spill] sm:$0xff] }
 0x7ad   : > { %12833 = vst [vmem:[#allocation151_spill] sm:$0xff] %v11704_v37  ;;  %v5852_v37 = vrot.slane %v10794_v21, 3  ;;  %v5950_v21 = vsel %vm544_vm8, %v10725_v23, %v12838_v27  ;;  %v5986_v33 = vsel %vm1550_vm11, %v5954_v47, %v12840_v4  ;;  %v12843_v27 = vld [vmem:[#allocation100_spill] sm:$0xff]  ;;  %v12845_v4 = vld [vmem:[#allocation41_spill] sm:$0xff] }
 0x7ae   : > { %5835 = vrot.lane.b32.xlu0 %v5811_v57, %s7311_s14  ;;  %5833 = vrot.lane.b32.xlu1 %v5810_v53, %s7311_s14  ;;  %v5860_v53 = vrot.slane %v10950_v22, 3  ;;  %v12839_v22 = vld [vmem:[#allocation96_spill] sm:$0xff] }
 0x7b0   : > { %v11710_v34 = vpop.permute.xlu0 %5675  ;;  %v11712_v5 = vpop.permute.xlu1 %5657 }
 0x7b2   : > { %5839 = vrot.lane.b32.xlu0 %v5813_v0, %s7311_s14  ;;  %5837 = vrot.lane.b32.xlu1 %v5812_v2, %s7311_s14  ;;  %v5948_v0 = vsel %vm544_vm8, %v10711_v55, %v12836_v31  ;;  %v5984_v2 = vsel %vm1550_vm11, %v5952_v45, %v12837_v1  ;;  %v12841_v31 = vld [vmem:[#allocation99_spill] sm:$0xff]  ;;  %v12842_v1 = vld [vmem:[#allocation30_spill] sm:$0xff] }
 0x7b3   : > { %v6016_v3 = vsel %vm1567_vm12, %v5984_v2, %v12839_v22  ;;  %v6018_v45 = vsel %vm1567_vm12, %v5986_v33, %v12841_v31  ;;  %v5980_v23 = vsel %vm1550_vm11, %v5948_v0, %v12842_v1  ;;  %v12844_v22 = vld [vmem:[#allocation43_spill] sm:$0xff]  ;;  %v5861_v1 = vrot.slane %v10918_v49, 3  ;;  %v12850_v49 = vld [vmem:[#allocation4_spill] sm:$0xff] }
 0x7b4   : > { %v11721_v46 = vpop.permute.xlu0 %5679  ;;  %v11723_v57 = vpop.permute.xlu1 %5677  ;;  %v6012_v2 = vsel %vm1567_vm12, %v5980_v23, %v12843_v27  ;;  %v5982_v47 = vsel %vm1550_vm11, %v5950_v21, %v12844_v22  ;;  %v6048_v33 = vsel %vm1600_vm13, %v6016_v3, %v12845_v4  ;;  %v12846_v31 = vld [vmem:[#allocation103_spill] sm:$0xff]  ;;  %v12847_v27 = vld [vmem:[#allocation98_spill] sm:$0xff]  ;;  %v5862_v3 = vrot.slane %v10927_v17, 3  ;;  %v12849_v4 = vld [vmem:[#allocation101_spill] sm:$0xff] }
 0x7b5   : > { %v6014_v0 = vsel %vm1567_vm12, %v5982_v47, %v12846_v31  ;;  %v6080_v21 = vsel %vm1633_vm14, %v6048_v33, %v12847_v27  ;;  %v6044_v31 = vsel %vm1600_vm13, %v6012_v2, %v12850_v49  ;;  %v5859_v23 = vrot.slane %v10941_v48, 3  ;;  %v12851_v27 = vld [vmem:[#allocation102_spill] sm:$0xff]  ;;  %v12854_v49 = vld [vmem:[#allocation105_spill] sm:$0xff]  ;;  %v12891_v48 = vld [vmem:[#allocation48_spill] sm:$0xff] }
 0x7b6   : > { %5885 = vrot.lane.b32.xlu0 %v5860_v53, %s7312_s30  ;;  %5869 = vrot.lane.b32.xlu1 %v5852_v37, %s7312_s30  ;;  %v5853_v53 = vrot.slane %v10721_v43, 3  ;;  %v5814_v37 = vrot.slane %v11250_v16, 3  ;;  %v5854_v43 = vrot.slane %v10742_v60, 3  ;;  %v5851_v16 = vrot.slane %v10768_v32, 3 }
 0x7b7   : > { %v5900_v32 = vrot.slane %v11125_v59, 3  ;;  %v5976_v59 = vsel %vm544_vm8, %v10969_v9, %v11566_v29  ;;  %v12856_v9 = vld [vmem:[#allocation51_spill] sm:$0xff] }
 0x7b8   : > { %v11744_v8 = vpop.permute.xlu0 %5683  ;;  %v11746_v55 = vpop.permute.xlu1 %5681 }
 0x7ba   : > { %5871 = vrot.lane.b32.xlu0 %v5853_v53, %s7312_s30  ;;  %5841 = vrot.lane.b32.xlu1 %v5814_v37, %s7311_s14  ;;  %v12848_v53 = vld [vmem:[#allocation47_spill] sm:$0xff] }
 0x7bb   : > { %v6050_v37 = vsel %vm1600_vm13, %v6018_v45, %v12848_v53  ;;  %v6076_v45 = vsel %vm1633_vm14, %v6044_v31, %v12851_v27  ;;  %v12852_v53 = vld [vmem:[#allocation5_spill] sm:$0xff]  ;;  %v5815_v31 = vrot.slane %v11330_v14, 3  ;;  %v12855_v27 = vld [vmem:[#allocation104_spill] sm:$0xff] }
 0x7bc   : > { %v11772_v22 = vpop.permute.xlu0 %5687  ;;  %v11774_v60 = vpop.permute.xlu1 %5685  ;;  %v6082_v47 = vsel %vm1633_vm14, %v6050_v37, %v12849_v4  ;;  %v6046_v54 = vsel %vm1600_vm13, %v6014_v0, %v12852_v53  ;;  %v12853_v37 = vld [vmem:[#allocation6_spill] sm:$0xff] }
 0x7bd   : > { %v6112_v4 = vsel %vm1650_vm15, %v6080_v21, %v12853_v37  ;;  %v6078_v33 = vsel %vm1633_vm14, %v6046_v54, %v12854_v49  ;;  %v6114_v29 = vsel %vm1650_vm15, %v6082_v47, %v12856_v9  ;;  %v5908_v54 = vrot.slane %v11294_v35, 3  ;;  %v12858_v37 = vld [vmem:[#allocation61_spill] sm:$0xff]  ;;  %v12859_v49 = vld [vmem:[#allocation110_spill] sm:$0xff] }
 0x7be   : > { %5917 = vrot.lane.b32.xlu0 %v5900_v32, %s7299_s17  ;;  %5887 = vrot.lane.b32.xlu1 %v5861_v1, %s7312_s30  ;;  %v6144_v53 = vsel %vm1683_vm0, %v6112_v4, %v12855_v27  ;;  %v12857_v32 = vld [vmem:[#allocation108_spill] sm:$0xff]  ;;  %v6108_v14 = vsel %vm1650_vm15, %v6076_v45, %v12858_v37  ;;  %v5956_v4 = vsel %vm544_vm8, %v10874_v39, %v12859_v49  ;;  %v12860_v27 = vld [vmem:[#allocation111_spill] sm:$0xff]  ;;  %v12861_v9 = vld [vmem:[#allocation74_spill] sm:$0xff]  ;;  %v5902_v39 = vrot.slane %v11101_v50, 3 }
 0x7bf   : > { %v5960_v1 = vsel %vm544_vm8, %v12815_v51, %v12857_v32  ;;  %v5962_v47 = vsel %vm544_vm8, %v12819_v24, %v12860_v27  ;;  %v6008_v51 = vsel %vm1550_vm11, %v5976_v59, %v12861_v9  ;;  %v12862_v32 = vld [vmem:[#allocation33_spill] sm:$0xff]  ;;  %v5978_v35 = vsel %vm544_vm8, %v10976_v18, %v11576_v11  ;;  %v12863_v24 = vld [vmem:[#allocation106_spill] sm:$0xff]  ;;  %v12866_v18 = vld [vmem:[#allocation31_spill] sm:$0xff] }
 0x7c0   : > { %v11807_v2 = vpop.permute.xlu0 %5691  ;;  %v11809_v21 = vpop.permute.xlu1 %5689  ;;  %v6110_v0 = vsel %vm1650_vm15, %v6078_v33, %v12862_v32  ;;  %v6040_v45 = vsel %vm1567_vm12, %v6008_v51, %v11582_v7  ;;  %v6140_v37 = vsel %vm1683_vm0, %v6108_v14, %v12863_v24  ;;  %v12864_v59 = vld [vmem:[#allocation46_spill] sm:$0xff]  ;;  %v12865_v33 = vld [vmem:[#allocation113_spill] sm:$0xff]  ;;  %v11841_v11 = vsel %vm1716_vm1, %v6144_v53, %v12866_v18  ;;  %v12867_v7 = vld [vmem:[#allocation107_spill] sm:$0xff] }
 0x7c1   : > { %v5992_v49 = vsel %vm1550_vm11, %v5960_v1, %v12864_v59  ;;  %v5958_v27 = vsel %vm544_vm8, %v12816_v42, %v12865_v33  ;;  %v12869_v51 = vld [vmem:[#allocation42_spill] sm:$0xff]  ;;  %v12870_v32 = vld [vmem:[#allocation55_spill] sm:$0xff] }
 0x7c2   : > { %5843 = vrot.lane.b32.xlu0 %v5815_v31, %s7311_s14  ;;  %5933 = vrot.lane.b32.xlu1 %v5908_v54, %s7299_s17  ;;  %v6146_v31 = vsel %vm1683_vm0, %v6114_v29, %v12867_v7  ;;  %v12868_v54 = vld [vmem:[#allocation112_spill] sm:$0xff]  ;;  %v5994_v14 = vsel %vm1550_vm11, %v5962_v47, %v12869_v51  ;;  %v5988_v1 = vsel %vm1550_vm11, %v5956_v4, %v12870_v32  ;;  %v12871_v42 = vld [vmem:[#allocation115_spill] sm:$0xff]  ;;  %v12876_v32 = vld [vmem:[#allocation50_spill] sm:$0xff] }
 0x7c3   : > { %v6024_v9 = vsel %vm1567_vm12, %v5992_v49, %v12868_v54  ;;  %v6026_v53 = vsel %vm1567_vm12, %v5994_v14, %v12871_v42  ;;  %v6020_v33 = vsel %vm1567_vm12, %v5988_v1, %v11470_v20  ;;  %v12872_v29 = vld [vmem:[#allocation76_spill] sm:$0xff]  ;;  %v12873_v49 = vld [vmem:[#allocation75_spill] sm:$0xff]  ;;  %v5909_v20 = vrot.slane %v11263_v19, 3  ;;  %v12875_v14 = vld [vmem:[#allocation34_spill] sm:$0xff] }
 0x7c4   : > { %v11851_v24 = vpop.permute.xlu0 %5695  ;;  %v11853_v59 = vpop.permute.xlu1 %5693  ;;  %v6072_v18 = vsel %vm1600_vm13, %v6040_v45, %v12872_v29  ;;  %v6010_v7 = vsel %vm1550_vm11, %v5978_v35, %v12873_v49  ;;  %v12874_v47 = vld [vmem:[#allocation27_spill] sm:$0xff]  ;;  %v6056_v45 = vsel %vm1600_vm13, %v6024_v9, %v12875_v14  ;;  %v12877_v1 = vld [vmem:[#allocation38_spill] sm:$0xff]  ;;  %v12881_v9 = vld [vmem:[#allocation32_spill] sm:$0xff] }
 0x7c5   : > { %v5990_v54 = vsel %vm1550_vm11, %v5958_v27, %v12874_v47  ;;  %v6104_v4 = vsel %vm1633_vm14, %v6072_v18, %v11590_v12  ;;  %v6042_v51 = vsel %vm1567_vm12, %v6010_v7, %v11592_v62  ;;  %v6172_v27 = vsel %vm1716_vm1, %v6140_v37, %v12876_v32  ;;  %v12878_v62 = vld [vmem:[#allocation109_spill] sm:$0xff]  ;;  %v12879_v42 = vld [vmem:[#allocation114_spill] sm:$0xff]  ;;  %v12880_v19 = vld [vmem:[#allocation11_spill] sm:$0xff] }
 0x7c6   : > { %5873 = vrot.lane.b32.xlu0 %v5854_v43, %s7312_s30  ;;  %5867 = vrot.lane.b32.xlu1 %v5851_v16, %s7312_s30  ;;  %v6022_v35 = vsel %vm1567_vm12, %v5990_v54, %v11480_v63  ;;  %v11880_v12 = vsel %vm1716_vm1, %v6146_v31, %v12877_v1  ;;  %v6142_v43 = vsel %vm1683_vm0, %v6110_v0, %v12878_v62  ;;  %v12882_v31 = vld [vmem:[#allocation116_spill] sm:$0xff]  ;;  %v12883_v0 = vld [vmem:[#allocation77_spill] sm:$0xff]  ;;  %v12884_v54 = vld [vmem:[#allocation86_spill] sm:$0xff] }
 0x7c7   : > { %v6088_v16 = vsel %vm1633_vm14, %v6056_v45, %v12879_v42  ;;  %v6058_v29 = vsel %vm1600_vm13, %v6026_v53, %v12880_v19  ;;  %v6052_v18 = vsel %vm1600_vm13, %v6020_v33, %v12881_v9  ;;  %v6074_v47 = vsel %vm1600_vm13, %v6042_v51, %v12883_v0  ;;  %v12885_v53 = vld [vmem:[#allocation52_spill] sm:$0xff]  ;;  %v12942_v50 = vld [vmem:[#allocation78_spill] sm:$0xff] }
 0x7c8   : > { %v11890_v63 = vpop.permute.xlu0 %5699  ;;  %v11892_v49 = vpop.permute.xlu1 %5697  ;;  %v6090_v37 = vsel %vm1633_vm14, %v6058_v29, %v11472_v58  ;;  %v6084_v7 = vsel %vm1633_vm14, %v6052_v18, %v12882_v31  ;;  %v6136_v14 = vsel %vm1650_vm15, %v6104_v4, %v12884_v54  ;;  %v6054_v45 = vsel %vm1600_vm13, %v6022_v35, %v12885_v53  ;;  %v12886_v58 = vld [vmem:[#allocation83_spill] sm:$0xff]  ;;  %v12887_v4 = vld [vmem:[#allocation118_spill] sm:$0xff]  ;;  %v12894_v0 = vld [vmem:[#allocation88_spill] sm:$0xff] }
 0x7c9   : > { %v6106_v33 = vsel %vm1633_vm14, %v6074_v47, %v11600_v25  ;;  %v6168_v32 = vsel %vm1683_vm0, %v6136_v14, %v11614_v44  ;;  %v5816_v51 = vrot.slane %v12886_v58, 3  ;;  %v6086_v1 = vsel %vm1633_vm14, %v6054_v45, %v12887_v4  ;;  %v12888_v25 = vld [vmem:[#allocation49_spill] sm:$0xff]  ;;  %v12889_v44 = vld [vmem:[#allocation58_spill] sm:$0xff]  ;;  %v12895_v47 = vld [vmem:[#allocation120_spill] sm:$0xff] }
 0x7ca   : > { %5889 = vrot.lane.b32.xlu0 %v5862_v3, %s7312_s30  ;;  %5883 = vrot.lane.b32.xlu1 %v5859_v23, %s7312_s30  ;;  %v6200_v35 = vsel %vm1716_vm1, %v6168_v32, %v11638_v10  ;;  %v6174_v62 = vsel %vm1716_vm1, %v6142_v43, %v12888_v25  ;;  %v6120_v17 = vsel %vm1650_vm15, %v6088_v16, %v12889_v44  ;;  %v12890_v3 = vld [vmem:[#allocation60_spill] sm:$0xff]  ;;  %v12892_v10 = vld [vmem:[#allocation117_spill] sm:$0xff]  ;;  %v12893_v43 = vld [vmem:[#allocation119_spill] sm:$0xff]  ;;  %v12897_v53 = vrot.slane %v11089_v52, 3 }
 0x7cb   : > { %v6116_v42 = vsel %vm1650_vm15, %v6084_v7, %v12890_v3  ;;  %v6122_v23 = vsel %vm1650_vm15, %v6090_v37, %v12891_v48  ;;  %v6232_v19 = vsel %vm2483_vm2, %v6200_v35, %v11702_v40  ;;  %v6152_v18 = vsel %vm1683_vm0, %v6120_v17, %v12892_v10  ;;  %v12896_v54 = vld [vmem:[#allocation13_spill] sm:$0xff]  ;;  %v12899_v32 = vld [vmem:[#allocation123_spill] sm:$0xff]  ;;  %v12900_v58 = vld [vmem:[#allocation44_spill] sm:$0xff] }
 0x7cc   : > { %v5704_v29 = vpop.permute.xlu0 %5703  ;;  %v11929_v9 = vpop.permute.xlu1 %5701  ;;  %v6148_v31 = vsel %vm1683_vm0, %v6116_v42, %v12893_v43  ;;  %v6138_v16 = vsel %vm1650_vm15, %v6106_v33, %v12894_v0  ;;  %v6154_v37 = vsel %vm1683_vm0, %v6122_v23, %v12895_v47  ;;  %v6118_v40 = vsel %vm1650_vm15, %v6086_v1, %v12896_v54  ;;  %v12898_v45 = vld [vmem:[#allocation121_spill] sm:$0xff]  ;;  %v12902_v25 = vld [vmem:[#allocation12_spill] sm:$0xff]  ;;  %v12909_v0 = vld [vmem:[#allocation54_spill] sm:$0xff] }
 0x7cd   : > { %v11938_v7 = vsel %vm6235_vm3, %v6232_v19, %v5704_v29  ;;  %v6170_v14 = vsel %vm1683_vm0, %v6138_v16, %v11632_v30  ;;  %v5968_v33 = vsel %vm544_vm8, %v12822_v6, %v12898_v45  ;;  %v5964_v4 = vsel %vm544_vm8, %v12900_v58, %v12899_v32  ;;  %v12901_v35 = vld [vmem:[#allocation17_spill] sm:$0xff]  ;;  %v12905_v23 = vld [vmem:[#allocation124_spill] sm:$0xff]  ;;  %v12915_v58 = vld [vmem:[#allocation122_spill] sm:$0xff] }
 0x7ce   : > { %5935 = vrot.lane.b32.xlu0 %v5909_v20, %s7299_s17  ;;  %5919 = vrot.lane.b32.xlu1 %v12897_v53, %s7299_s17  ;;  %v6204_v1 = vsel %vm2483_vm2, %v6172_v27, %v12901_v35  ;;  %v6202_v30 = vsel %vm1716_vm1, %v6170_v14, %v12902_v25  ;;  %v12903_v20 = vld [vmem:[#allocation59_spill] sm:$0xff]  ;;  %v12904_v52 = vld [vmem:[#allocation9_spill] sm:$0xff]  ;;  %v5970_v27 = vsel %vm544_vm8, %v12825_v41, %v12905_v23  ;;  %v12910_v16 = vrot.slane %v10883_v26, 3 }
 0x7cf   : > { %v6180_v44 = vsel %vm1716_vm1, %v6148_v31, %v12903_v20  ;;  %v6184_v17 = vsel %vm1716_vm1, %v6152_v18, %v12904_v52  ;;  %v6237_v3 = vsel %vm6235_vm3, %v6204_v1, %v11710_v34  ;;  %v6234_v6 = vsel %vm2483_vm2, %v6202_v30, %v11712_v5  ;;  %v12906_v19 = vld [vmem:[#allocation57_spill] sm:$0xff]  ;;  %v12908_v5 = vld [vmem:[#allocation126_spill] sm:$0xff]  ;;  %v12917_v20 = vld [vmem:[#allocation128_spill] sm:$0xff] }
 0x7d0   : > { %v5724_v42 = vpop.permute.xlu0 %5723  ;;  %v5706_v48 = vpop.permute.xlu1 %5705  ;;  %v11973_v29 = vsel %vm1716_vm1, %v6154_v37, %v12906_v19  ;;  %v12907_v34 = vld [vmem:[#allocation53_spill] sm:$0xff]  ;;  %v5966_v31 = vsel %vm544_vm8, %v12823_v15, %v12908_v5  ;;  %v5996_v41 = vsel %vm1550_vm11, %v5964_v4, %v12909_v0  ;;  %v6208_v15 = vsel %vm2483_vm2, %v11841_v11, %v11654_v61  ;;  %v12916_v4 = vld [vmem:[#allocation14_spill] sm:$0xff]  ;;  %v12918_v11 = vld [vmem:[#allocation63_spill] sm:$0xff] }
 0x7d1   : > { %v11976_v10 = vsel %vm6268_vm5, %v6237_v3, %v5724_v42  ;;  %v11979_v18 = vsel %vm6235_vm3, %v6234_v6, %v5706_v48  ;;  %v6000_v43 = vsel %vm1550_vm11, %v5968_v33, %v12907_v34  ;;  %v12911_v47 = vld [vmem:[#allocation73_spill] sm:$0xff]  ;;  %v12914_v33 = vld [vmem:[#allocation22_spill] sm:$0xff]  ;;  %v6150_v26 = vsel %vm1683_vm0, %v6118_v40, %v12915_v58  ;;  %v12919_v3 = vld [vmem:[#allocation16_spill] sm:$0xff] }
 0x7d2   : > { %5875 = vrot.lane.b32.xlu0 %v12910_v16, %s7312_s30  ;;  %5845 = vrot.lane.b32.xlu1 %v5816_v51, %s7311_s14  ;;  %v5907_v37 = vrot.slane %v12911_v47, 3  ;;  %v12912_v54 = vld [vmem:[#allocation125_spill] sm:$0xff]  ;;  %v6206_v32 = vsel %vm2483_vm2, %v6174_v62, %v12914_v33  ;;  %v6002_v51 = vsel %vm1550_vm11, %v5970_v27, %v12916_v4  ;;  %v6241_v35 = vsel %vm6235_vm3, %v6208_v15, %v11721_v46  ;;  %v12920_v6 = vld [vmem:[#allocation64_spill] sm:$0xff]  ;;  %v12924_v19 = vld [vmem:[#allocation79_spill] sm:$0xff] }
 0x7d3   : > { %v6032_v14 = vsel %vm1567_vm12, %v6000_v43, %v12912_v54  ;;  %v12913_v53 = vld [vmem:[#allocation129_spill] sm:$0xff]  ;;  %v6239_v1 = vsel %vm6235_vm3, %v6206_v32, %v11723_v57  ;;  %v6034_v61 = vsel %vm1567_vm12, %v6002_v51, %v12917_v20  ;;  %v5998_v62 = vsel %vm1550_vm11, %v5966_v31, %v12918_v11  ;;  %v12921_v42 = vld [vmem:[#allocation132_spill] sm:$0xff]  ;;  %v12925_v43 = vld [vmem:[#allocation127_spill] sm:$0xff] }
 0x7d4   : > { %v6028_v45 = vsel %vm1567_vm12, %v5996_v41, %v12913_v53  ;;  %v5728_v25 = vpop.permute.xlu0 %5727  ;;  %v5726_v30 = vpop.permute.xlu1 %5725  ;;  %v6064_v46 = vsel %vm1600_vm13, %v6032_v14, %v12919_v3  ;;  %v6030_v48 = vsel %vm1567_vm12, %v5998_v62, %v12921_v42  ;;  %v12922_v23 = vrot.slane %v11109_v13, 3  ;;  %v12926_v31 = vld [vmem:[#allocation131_spill] sm:$0xff]  ;;  %v12928_v47 = vld [vmem:[#allocation45_spill] sm:$0xff]  ;;  %v12932_v58 = vld [vmem:[#allocation36_spill] sm:$0xff] }
 0x7d5   : > { %v12015_v52 = vsel %vm6268_vm5, %v6241_v35, %v5728_v25  ;;  %v12018_v40 = vsel %vm6268_vm5, %v6239_v1, %v5726_v30  ;;  %v6060_v57 = vsel %vm1600_vm13, %v6028_v45, %v12920_v6  ;;  %v12923_v27 = vrot.slane %v10997_v28, 3  ;;  %v12927_v16 = vld [vmem:[#allocation7_spill] sm:$0xff]  ;;  %v12929_v28 = vld [vmem:[#allocation40_spill] sm:$0xff]  ;;  %v12930_v32 = vld [vmem:[#allocation65_spill] sm:$0xff] }
 0x7d6   : > { %5915 = vrot.lane.b32.xlu0 %v12922_v23, %s7299_s17  ;;  %v5817_v34 = vrot.slane %v12924_v19, 3  ;;  %v6096_v5 = vsel %vm1633_vm14, %v6064_v46, %v12925_v43  ;;  %v6092_v0 = vsel %vm1633_vm14, %v6060_v57, %v12926_v31  ;;  %v6212_v41 = vsel %vm2483_vm2, %v6180_v44, %v11662_v36  ;;  %v12931_v44 = vld [vmem:[#allocation138_spill] sm:$0xff]  ;;  %v12936_v30 = vld [vmem:[#allocation71_spill] sm:$0xff]  ;;  %v12939_v3 = vld [vmem:[#allocation28_spill] sm:$0xff] }
 0x7d7   : > { %5891 = vrot.lane.b32.xlu1 %v12923_v27, %s7312_s30  ;;  %v6210_v13 = vsel %vm2483_vm2, %v11880_v12, %v12927_v16  ;;  %v6066_v54 = vsel %vm1600_vm13, %v6034_v61, %v12928_v47  ;;  %v6182_v14 = vsel %vm1716_vm1, %v6150_v26, %v12929_v28  ;;  %v6245_v53 = vsel %vm6235_vm3, %v6212_v41, %v11744_v8  ;;  %v12933_v51 = vld [vmem:[#allocation66_spill] sm:$0xff]  ;;  %v12937_v61 = vld [vmem:[#allocation135_spill] sm:$0xff]  ;;  %v12940_v57 = vld [vmem:[#allocation24_spill] sm:$0xff] }
 0x7d8   : > { %v6243_v45 = vsel %vm6235_vm3, %v6210_v13, %v11746_v55  ;;  %v5732_v15 = vpop.permute.xlu0 %5731  ;;  %v5730_v33 = vpop.permute.xlu1 %5729  ;;  %v6062_v36 = vsel %vm1600_vm13, %v6030_v48, %v12930_v32  ;;  %v5972_v12 = vsel %vm544_vm8, %v12932_v58, %v12931_v44  ;;  %v6128_v8 = vsel %vm1650_vm15, %v6096_v5, %v12933_v51  ;;  %v12934_v35 = vld [vmem:[#allocation134_spill] sm:$0xff]  ;;  %v12938_v62 = vld [vmem:[#allocation139_spill] sm:$0xff]  ;;  %v12943_v5 = vld [vmem:[#allocation133_spill] sm:$0xff] }
 0x7d9   : > { %v12056_v4 = vsel %vm6268_vm5, %v6245_v53, %v5732_v15  ;;  %v12059_v26 = vsel %vm6268_vm5, %v6243_v45, %v5730_v33  ;;  %v6094_v55 = vsel %vm1633_vm14, %v6062_v36, %v12934_v35  ;;  %v12935_v1 = vld [vmem:[#allocation70_spill] sm:$0xff]  ;;  %v5910_v20 = vrot.slane %v12936_v30, 3  ;;  %v12945_v16 = vld [vmem:[#allocation72_spill] sm:$0xff]  ;;  %v12949_v53 = vld [vmem:[#allocation137_spill] sm:$0xff] }
 0x7da   : > { %v6124_v25 = vsel %vm1650_vm15, %v6092_v0, %v12935_v1  ;;  %5931 = vrot.lane.b32.xlu0 %v5907_v37, %s7299_s17  ;;  %v5974_v46 = vsel %vm544_vm8, %v12939_v3, %v12938_v62  ;;  %v6216_v6 = vsel %vm2483_vm2, %v6184_v17, %v11670_v56  ;;  %v6214_v42 = vsel %vm2483_vm2, %v6182_v14, %v12940_v57  ;;  %v12941_v37 = vld [vmem:[#allocation130_spill] sm:$0xff]  ;;  %v12944_v17 = vld [vmem:[#allocation140_spill] sm:$0xff]  ;;  %v12950_v15 = vld [vmem:[#allocation143_spill] sm:$0xff] }
 0x7db   : > { %5921 = vrot.lane.b32.xlu1 %v5902_v39, %s7299_s17  ;;  %v6156_v11 = vsel %vm1683_vm0, %v6124_v25, %v12937_v61  ;;  %v6098_v48 = vsel %vm1633_vm14, %v6066_v54, %v12941_v37  ;;  %v6004_v39 = vsel %vm1550_vm11, %v5972_v12, %v12942_v50  ;;  %v6249_v23 = vsel %vm6235_vm3, %v6216_v6, %v11772_v22  ;;  %v12946_v13 = vld [vmem:[#allocation80_spill] sm:$0xff]  ;;  %v12951_v36 = vld [vmem:[#allocation146_spill] sm:$0xff]  ;;  %v12954_v25 = vld [vmem:[#allocation67_spill] sm:$0xff] }
 0x7dc   : > { %v6247_v27 = vsel %vm6235_vm3, %v6214_v42, %v11774_v60  ;;  %v5736_v19 = vpop.permute.xlu0 %5735  ;;  %v5734_v43 = vpop.permute.xlu1 %5733  ;;  %v6160_v56 = vsel %vm1683_vm0, %v6128_v8, %v12943_v5  ;;  %v6036_v31 = vsel %vm1567_vm12, %v6004_v39, %v12944_v17  ;;  %v6126_v22 = vsel %vm1650_vm15, %v6094_v55, %v12945_v16  ;;  %v12947_v47 = vld [vmem:[#allocation68_spill] sm:$0xff]  ;;  %v12952_v58 = vld [vmem:[#allocation82_spill] sm:$0xff]  ;;  %v12953_v55 = vld [vmem:[#allocation29_spill] sm:$0xff] }
 0x7dd   : > { %v12094_v0 = vsel %vm6268_vm5, %v6249_v23, %v5736_v19  ;;  %v12097_v41 = vsel %vm6268_vm5, %v6247_v27, %v5734_v43  ;;  %v6006_v60 = vsel %vm1550_vm11, %v5974_v46, %v12946_v13  ;;  %v6188_v54 = vsel %vm1716_vm1, %v6156_v11, %v12947_v47  ;;  %v12948_v28 = vld [vmem:[#allocation20_spill] sm:$0xff]  ;;  %v12955_v30 = vld [vmem:[#allocation141_spill] sm:$0xff]  ;;  %v12959_v6 = vld [vmem:[#allocation90_spill] sm:$0xff] }
 0x7de   : > { %5847 = vrot.lane.b32.xlu0 %v5817_v34, %s7311_s14  ;;  %v5856_v14 = vrot.slane %v12948_v28, 3  ;;  %v6158_v45 = vsel %vm1683_vm0, %v6126_v22, %v12949_v53  ;;  %v6038_v33 = vsel %vm1567_vm12, %v6006_v60, %v12950_v15  ;;  %v6220_v32 = vsel %vm2483_vm2, %v6188_v54, %v11678_v38  ;;  %v12958_v3 = vld [vmem:[#allocation69_spill] sm:$0xff]  ;;  %v12960_v42 = vld [vmem:[#allocation136_spill] sm:$0xff]  ;;  %v12962_v39 = vld [vmem:[#allocation147_spill] sm:$0xff] }
 0x7df   : > { %5937 = vrot.lane.b32.xlu1 %v5910_v20, %s7299_s17  ;;  %v6218_v44 = vsel %vm2483_vm2, %v11973_v29, %v12951_v36  ;;  %v6068_v34 = vsel %vm1600_vm13, %v6036_v31, %v12952_v58  ;;  %v6253_v12 = vsel %vm6235_vm3, %v6220_v32, %v11807_v2  ;;  %v5864_v1 = vrot.slane %v12953_v55, 3  ;;  %v12956_v2 = vld [vmem:[#allocation84_spill] sm:$0xff]  ;;  %v12964_v43 = vld [vmem:[#allocation89_spill] sm:$0xff]  ;;  %v12965_v22 = vld [vmem:[#allocation26_spill] sm:$0xff] }
 0x7e0   : > { %v6251_v51 = vsel %vm6235_vm3, %v6218_v44, %v11809_v21  ;;  %v5740_v8 = vpop.permute.xlu0 %5739  ;;  %v5738_v35 = vpop.permute.xlu1 %5737  ;;  %v6130_v38 = vsel %vm1650_vm15, %v6098_v48, %v12954_v25  ;;  %v6100_v20 = vsel %vm1633_vm14, %v6068_v34, %v12955_v30  ;;  %v6070_v11 = vsel %vm1600_vm13, %v6038_v33, %v12956_v2  ;;  %v12957_v21 = vld [vmem:[#allocation56_spill] sm:$0xff]  ;;  %v12961_v48 = vld [vmem:[#allocation145_spill] sm:$0xff]  ;;  %v12970_v33 = vld [vmem:[#allocation23_spill] sm:$0xff] }
 0x7e1   : > { %v12129_v29 = vsel %vm6268_vm5, %v6253_v12, %v5740_v8  ;;  %v12132_v61 = vsel %vm6268_vm5, %v6251_v51, %v5738_v35  ;;  %v6192_v62 = vsel %vm1716_vm1, %v6160_v56, %v12957_v21  ;;  %v6190_v46 = vsel %vm1716_vm1, %v6158_v45, %v12958_v3  ;;  %v12963_v27 = vld [vmem:[#allocation148_spill] sm:$0xff]  ;;  %v12971_v36 = vld [vmem:[#allocation149_spill] sm:$0xff]  ;;  %v12972_v58 = vld [vmem:[#allocation150_spill] sm:$0xff] }
 0x7e2   : > { %5893 = vrot.lane.b32.xlu0 %v5864_v1, %s7312_s30  ;;  %v5911_v57 = vrot.slane %v12959_v6, 3  ;;  %v6162_v37 = vsel %vm1683_vm0, %v6130_v38, %v12960_v42  ;;  %v6102_v50 = vsel %vm1633_vm14, %v6070_v11, %v12961_v48  ;;  %v6224_v23 = vsel %vm2483_vm2, %v6192_v62, %v12962_v39  ;;  %v12966_v60 = vld [vmem:[#allocation144_spill] sm:$0xff]  ;;  %v12973_v55 = vld [vmem:[#allocation37_spill] sm:$0xff]  ;;  %v12975_v2 = vld [vmem:[#allocation142_spill] sm:$0xff] }
 0x7e3   : > { %5877 = vrot.lane.b32.xlu1 %v5856_v14, %s7312_s30  ;;  %v6222_v19 = vsel %vm2483_vm2, %v6190_v46, %v12963_v27  ;;  %v6132_v5 = vsel %vm1650_vm15, %v6100_v20, %v12964_v43  ;;  %v6257_v56 = vsel %vm6235_vm3, %v6224_v23, %v11851_v24  ;;  %v5903_v13 = vrot.slane %v12965_v22, 3  ;;  %v12967_v14 = vld [vmem:[#allocation10_spill] sm:$0xff]  ;;  %v12968_v24 = vld [vmem:[#allocation91_spill] sm:$0xff]  ;;  %v12974_v25 = vld [vmem:[#allocation81_spill] sm:$0xff] }
 0x7e4   : > { %v6255_v17 = vsel %vm6235_vm3, %v6222_v19, %v11853_v59  ;;  %v5744_v31 = vpop.permute.xlu0 %5743  ;;  %v5742_v16 = vpop.permute.xlu1 %5741  ;;  %v6164_v47 = vsel %vm1683_vm0, %v6132_v5, %v12966_v60  ;;  %v6134_v45 = vsel %vm1650_vm15, %v6102_v50, %v12968_v24  ;;  %v12969_v59 = vld [vmem:[#allocation21_spill] sm:$0xff]  ;;  %v5857_v1 = vrot.slane %v12973_v55, 3  ;;  %v12977_v46 = vld [vmem:[#allocation62_spill] sm:$0xff]  ;;  %v12979_v23 = vld [vmem:[#allocation15_spill] sm:$0xff] }
 0x7e5   : > { %v12161_v54 = vsel %vm6268_vm5, %v6257_v56, %v5744_v31  ;;  %v12164_v28 = vsel %vm6268_vm5, %v6255_v17, %v5742_v16  ;;  %v6196_v53 = vsel %vm1716_vm1, %v6164_v47, %v12967_v14  ;;  %v6194_v15 = vsel %vm1716_vm1, %v6162_v37, %v12969_v59  ;;  %v12980_v27 = vld [vmem:[#allocation95_spill] sm:$0xff]  ;;  %v12981_v17 = vld [vmem:[#allocation18_spill] sm:$0xff] }
 0x7e6   : > { %5939 = vrot.lane.b32.xlu0 %v5911_v57, %s7299_s17  ;;  %v6166_v32 = vsel %vm1683_vm0, %v6134_v45, %v12970_v33  ;;  %v6228_v44 = vsel %vm2483_vm2, %v6196_v53, %v12971_v36  ;;  %v6226_v34 = vsel %vm2483_vm2, %v6194_v15, %v12972_v58  ;;  %v5818_v38 = vrot.slane %v12974_v25, 3  ;;  %v12978_v57 = vld [vmem:[#allocation8_spill] sm:$0xff]  ;;  %v12982_v16 = vld [vmem:[#allocation35_spill] sm:$0xff]  ;;  %v12984_v53 = vld [vmem:[#allocation85_spill] sm:$0xff] }
 0x7e7   : > { %5923 = vrot.lane.b32.xlu1 %v5903_v13, %s7299_s17  ;;  %v6261_v12 = vsel %vm6235_vm3, %v6228_v44, %v11890_v63  ;;  %v6259_v51 = vsel %vm6235_vm3, %v6226_v34, %v11892_v49  ;;  %v6198_v11 = vsel %vm1716_vm1, %v6166_v32, %v12975_v2  ;;  %v12976_v63 = vld [vmem:[#allocation151_spill] sm:$0xff]  ;;  %v5904_v6 = vrot.slane %v12977_v46, 3 }
 0x7e8   : > { %v5748_v8 = vpop.permute.xlu0 %5747  ;;  %v5746_v35 = vpop.permute.xlu1 %5745  ;;  %v6230_v49 = vsel %vm2483_vm2, %v6198_v11, %v12976_v63  ;;  %v5865_v42 = vrot.slane %v12978_v57, 3  ;;  %v5912_v19 = vrot.slane %v12980_v27, 3  ;;  %v5905_v31 = vrot.slane %v12981_v17, 3  ;;  %v12983_v47 = vld [vmem:[#allocation19_spill] sm:$0xff] }
 0x7e9   : > { %v6294_v30 = vsel %vm6268_vm5, %v6261_v12, %v5748_v8  ;;  %v6292_v20 = vsel %vm6268_vm5, %v6259_v51, %v5746_v35  ;;  %v6263_v21 = vsel %vm6235_vm3, %v6230_v49, %v11929_v9  ;;  %v5858_v9 = vrot.slane %v12979_v23, 3  ;;  %v12985_v15 = vld [vmem:[#allocation87_spill] sm:$0xff] }
 0x7ea   : > { %5879 = vrot.lane.b32.xlu0 %v5857_v1, %s7312_s30  ;;  %v5866_v22 = vrot.slane %v12982_v16, 3  ;;  %v5906_v14 = vrot.slane %v12983_v47, 3  ;;  %v5913_v24 = vrot.slane %v12984_v53, 3  ;;  %v5914_v33 = vrot.slane %v12985_v15, 3 }
 0x7eb   : > { %5849 = vrot.lane.b32.xlu1 %v5818_v38, %s7311_s14  ;;  %vm6334_vm8 = vcmask 850944   ;;  %vm6400_vm11 = vcmask 982016   ;;  %vm6498_vm12 = vcmask 1041409   ;;  %vm6501_vm13 = vcmask 1042434  }
 0x7ec   : > { %v5752_v62 = vpop.permute.xlu0 %5751  ;;  %v5750_v3 = vpop.permute.xlu1 %5749  ;;  %vm6504_vm14 = vcmask 1043459   ;;  %vm6507_vm15 = vcmask 1044484   ;;  %vm6510_vm0 = vcmask 1045509   ;;  %vm6513_vm1 = vcmask 1046534  }
 0x7ed   : > { %v6298_v37 = vsel %vm6268_vm5, %v11938_v7, %v5752_v62  ;;  %v6296_v48 = vsel %vm6268_vm5, %v6263_v21, %v5750_v3  ;;  %vm6516_vm2 = vcmask 1047559  }
 0x7ee   : > { %5925 = vrot.lane.b32.xlu0 %v5904_v6, %s7299_s17 }
 0x7ef   : > { %5895 = vrot.lane.b32.xlu1 %v5865_v42, %s7312_s30 }
 0x7f0   : > { %v5772_v50 = vpop.permute.xlu0 %5771  ;;  %v5754_v39 = vpop.permute.xlu1 %5753 }
 0x7f1   : > { %v6303_v43 = vsel %vm6301_vm6, %v11976_v10, %v5772_v50  ;;  %v6300_v5 = vsel %vm6268_vm5, %v11979_v18, %v5754_v39 }
 0x7f2   : > { %5881 = vrot.lane.b32.xlu0 %v5858_v9, %s7312_s30 }
 0x7f3   : > { %5941 = vrot.lane.b32.xlu1 %v5912_v19, %s7299_s17 }
 0x7f4   : > { %v5776_v7 = vpop.permute.xlu0 %5775  ;;  %v5774_v56 = vpop.permute.xlu1 %5773 }
 0x7f5   : > { %v6307_v13 = vsel %vm6301_vm6, %v12015_v52, %v5776_v7  ;;  %v6305_v60 = vsel %vm6301_vm6, %v12018_v40, %v5774_v56 }
 0x7f6   : > { %5927 = vrot.lane.b32.xlu0 %v5905_v31, %s7299_s17 }
 0x7f7   : > { %5897 = vrot.lane.b32.xlu1 %v5866_v22, %s7312_s30 }
 0x7f8   : > { %v5780_v10 = vpop.permute.xlu0 %5779  ;;  %v5778_v18 = vpop.permute.xlu1 %5777 }
 0x7f9   : > { %v6311_v45 = vsel %vm6301_vm6, %v12056_v4, %v5780_v10  ;;  %v6309_v59 = vsel %vm6301_vm6, %v12059_v26, %v5778_v18 }
 0x7fa   : > { %5929 = vrot.lane.b32.xlu0 %v5906_v14, %s7299_s17 }
 0x7fb   : > { %5943 = vrot.lane.b32.xlu1 %v5913_v24, %s7299_s17 }
 0x7fc   : > { %v5784_v52 = vpop.permute.xlu0 %5783  ;;  %v5782_v40 = vpop.permute.xlu1 %5781 }
 0x7fd   : > { %v6315_v32 = vsel %vm6301_vm6, %v12094_v0, %v5784_v52  ;;  %v6313_v36 = vsel %vm6301_vm6, %v12097_v41, %v5782_v40 }
 0x7ff   : > { %5945 = vrot.lane.b32.xlu1 %v5914_v33, %s7299_s17  ;;  %s6938_s17 = sshll.u32 %s12987_s28, 3 }
 0x800   : > { %v5788_v4 = vpop.permute.xlu0 %5787  ;;  %v5786_v44 = vpop.permute.xlu1 %5785  ;;  %s325_s15 = scalar_lea.vmem %s12348_s8, %s6938_s17 }
 0x801   : > { %v6319_v26 = vsel %vm6301_vm6, %v12129_v29, %v5788_v4  ;;  %v6317_v58 = vsel %vm6301_vm6, %v12132_v61, %v5786_v44 }
 0x804   : > { %v5792_v34 = vpop.permute.xlu0 %5791  ;;  %v5790_v12 = vpop.permute.xlu1 %5789 }
 0x805   : > { %v6323_v51 = vsel %vm6301_vm6, %v12161_v54, %v5792_v34  ;;  %v6321_v0 = vsel %vm6301_vm6, %v12164_v28, %v5790_v12 }
 0x808   : > { %v5796_v8 = vpop.permute.xlu0 %5795  ;;  %v5794_v41 = vpop.permute.xlu1 %5793 }
 0x809   : > { %v12242_v35 = vsel %vm6301_vm6, %v6294_v30, %v5796_v8  ;;  %v12245_v55 = vsel %vm6301_vm6, %v6292_v20, %v5794_v41 }
 0x80c   : > { %v5800_v29 = vpop.permute.xlu0 %5799  ;;  %v5798_v1 = vpop.permute.xlu1 %5797 }
 0x80d   : > { %v12248_v61 = vsel %vm6301_vm6, %v6298_v37, %v5800_v29  ;;  %v12251_v25 = vsel %vm6301_vm6, %v6296_v48, %v5798_v1 }
 0x810   : > { %v5820_v54 = vpop.permute.xlu0 %5819  ;;  %v5802_v38 = vpop.permute.xlu1 %5801 }
 0x811   : > { %v6336_v28 = vsel %vm6334_vm8, %v6303_v43, %v5820_v54  ;;  %v12255_v2 = vsel %vm6301_vm6, %v6300_v5, %v5802_v38 }
 0x814   : > { %v5824_v30 = vpop.permute.xlu0 %5823  ;;  %v5822_v11 = vpop.permute.xlu1 %5821 }
 0x815   : > { %v6340_v20 = vsel %vm6334_vm8, %v6307_v13, %v5824_v30  ;;  %v6338_v63 = vsel %vm6334_vm8, %v6305_v60, %v5822_v11 }
 0x818   : > { %v5828_v49 = vpop.permute.xlu0 %5827  ;;  %v5826_v21 = vpop.permute.xlu1 %5825 }
 0x819   : > { %v12260_v62 = vsel %vm6334_vm8, %v6311_v45, %v5828_v49  ;;  %v6342_v3 = vsel %vm6334_vm8, %v6309_v59, %v5826_v21 }
 0x81c   : > { %v5832_v46 = vpop.permute.xlu0 %5831  ;;  %v5830_v6 = vpop.permute.xlu1 %5829 }
 0x81d   : > { %v12264_v57 = vsel %vm6334_vm8, %v6315_v32, %v5832_v46  ;;  %v12267_v42 = vsel %vm6334_vm8, %v6313_v36, %v5830_v6 }
 0x820   : > { %v5836_v37 = vpop.permute.xlu0 %5835  ;;  %v5834_v48 = vpop.permute.xlu1 %5833 }
 0x821   : > { %v6352_v50 = vsel %vm6334_vm8, %v6319_v26, %v5836_v37  ;;  %v12271_v39 = vsel %vm6334_vm8, %v6317_v58, %v5834_v48 }
 0x824   : > { %v5840_v23 = vpop.permute.xlu0 %5839  ;;  %v5838_v9 = vpop.permute.xlu1 %5837 }
 0x825   : > { %v6356_v27 = vsel %vm6334_vm8, %v6323_v51, %v5840_v23  ;;  %v6354_v19 = vsel %vm6334_vm8, %v6321_v0, %v5838_v9 }
 0x828   : > { %v5886_v43 = vpop.permute.xlu0 %5885  ;;  %v5870_v5 = vpop.permute.xlu1 %5869 }
 0x829   : > { %v6387_v7 = vsel %vm6367_vm10, %v6354_v19, %v5886_v43  ;;  %v6371_v14 = vsel %vm6367_vm10, %v6338_v63, %v5870_v5 }
 0x82c   : > { %v5872_v56 = vpop.permute.xlu0 %5871  ;;  %v5842_v17 = vpop.permute.xlu1 %5841 }
 0x82d   : > { %v6373_v59 = vsel %vm6367_vm10, %v6340_v20, %v5872_v56  ;;  %v6358_v23 = vsel %vm6334_vm8, %v12245_v55, %v5842_v17 }
 0x830   : > { %v5918_v31 = vpop.permute.xlu0 %5917  ;;  %v5888_v16 = vpop.permute.xlu1 %5887 }
 0x831   : > { %v6404_v53 = vsel %vm6400_vm11, %v6371_v14, %v5918_v31  ;;  %v6389_v32 = vsel %vm6367_vm10, %v6356_v27, %v5888_v16 }
 0x832   : > { %v6919_v40 = vcombine.low %v6404_v53, %v6404_v53 }
 0x834   : > { %v12276_v22 = vpop.permute.xlu0 %5843  ;;  %v5934_v13 = vpop.permute.xlu1 %5933  ;;  %v6482_v26 = vunpack.c.l.b16 %v6919_v40 }
 0x835   : > { %v6420_v36 = vsel %vm6400_vm11, %v6387_v7, %v5934_v13 }
 0x836   : > { %v6927_v58 = vcombine.low %v6420_v36, %v6420_v36  ;;  %v6497_v1 = vrot.slane %v6482_v26, 7 }
 0x838   : > { %v5874_v60 = vpop.permute.xlu0 %5873  ;;  %v5868_v10 = vpop.permute.xlu1 %5867  ;;  %v6490_v54 = vunpack.c.l.b16 %v6927_v58 }
 0x839   : > { %v6369_v34 = vsel %vm6367_vm10, %v6336_v28, %v5868_v10  ;;  %v6375_v38 = vsel %vm6367_vm10, %v6342_v3, %v5874_v60 }
 0x83a   : > { %v6518_v9 = vrot.slane %v6490_v54, 7 }
 0x83c   : > { %v5890_v18 = vpop.permute.xlu0 %5889  ;;  %v5884_v47 = vpop.permute.xlu1 %5883 }
 0x83d   : > { %v6385_v30 = vsel %vm6367_vm10, %v6352_v50, %v5884_v47  ;;  %v6391_v50 = vsel %vm6367_vm10, %v6358_v23, %v5890_v18  ;;  %v6360_v18 = vsel %vm6334_vm8, %v12242_v35, %v12276_v22 }
 0x840   : > { %v5936_v24 = vpop.permute.xlu0 %5935  ;;  %v5920_v45 = vpop.permute.xlu1 %5919 }
 0x841   : > { %v6406_v52 = vsel %vm6400_vm11, %v6373_v59, %v5920_v45  ;;  %v6422_v44 = vsel %vm6400_vm11, %v6389_v32, %v5936_v24 }
 0x842   : > { %v6920_v4 = vcombine.low %v6406_v52, %v6406_v52  ;;  %v6928_v0 = vcombine.low %v6422_v44, %v6422_v44 }
 0x844   : > { %v5876_v15 = vpop.permute.xlu0 %5875  ;;  %v12282_v33 = vpop.permute.xlu1 %5845  ;;  %v6483_v8 = vunpack.c.l.b16 %v6920_v4  ;;  %v6491_v49 = vunpack.c.l.b16 %v6928_v0 }
 0x845   : > { %v6377_v53 = vsel %vm6367_vm10, %v12260_v62, %v5876_v15 }
 0x846   : > { %v6500_v28 = vrot.slane %v6483_v8, 6  ;;  %v6520_v7 = vrot.slane %v6491_v49, 6 }
 0x848   : > { %v5916_v12 = vpop.permute.xlu0 %5915 }
 0x849   : > { %v5892_v51 = vpop.permute.xlu1 %5891  ;;  %v6402_v41 = vsel %vm6400_vm11, %v6369_v34, %v5916_v12 }
 0x84a   : > { %v6918_v29 = vcombine.low %v6402_v41, %v6402_v41  ;;  %v6393_v24 = vsel %vm6367_vm10, %v6360_v18, %v5892_v51 }
 0x84c   : > { %v6481_v11 = vunpack.c.l.b16 %v6918_v29  ;;  %v5932_v20 = vpop.permute.xlu0 %5931  ;;  %v6362_v29 = vsel %vm6334_vm8, %v12251_v25, %v12282_v33 }
 0x84d   : > { %v5922_v63 = vpop.permute.xlu1 %5921  ;;  %v6418_v21 = vsel %vm6400_vm11, %v6385_v30, %v5932_v20 }
 0x84e   : > { %v6408_v46 = vsel %vm6400_vm11, %v6375_v38, %v5922_v63  ;;  %v6499_v6 = vsel %vm6498_vm12, %v6497_v1, %v6481_v11  ;;  %v6926_v37 = vcombine.low %v6418_v21, %v6418_v21 }
 0x84f   : > { %v6921_v48 = vcombine.low %v6408_v46, %v6408_v46  ;;  %v6502_v3 = vsel %vm6501_vm13, %v6500_v28, %v6499_v6 }
 0x850   : > { %v6489_v27 = vunpack.c.l.b16 %v6926_v37  ;;  %v5848_v43 = vpop.permute.xlu0 %5847 }
 0x851   : > { %v6484_v19 = vunpack.c.l.b16 %v6921_v48  ;;  %v5938_v5 = vpop.permute.xlu1 %5937  ;;  %v6364_v37 = vsel %vm6334_vm8, %v12248_v61, %v5848_v43 }
 0x852   : > { %v6424_v56 = vsel %vm6400_vm11, %v6391_v50, %v5938_v5  ;;  %v6519_v31 = vsel %vm6498_vm12, %v6518_v9, %v6489_v27 }
 0x853   : > { %v6503_v16 = vrot.slane %v6484_v19, 5  ;;  %v6929_v13 = vcombine.low %v6424_v56, %v6424_v56  ;;  %v6521_v60 = vsel %vm6501_vm13, %v6520_v7, %v6519_v31 }
 0x854   : > { %v5894_v10 = vpop.permute.xlu0 %5893 }
 0x855   : > { %v6505_v55 = vsel %vm6504_vm14, %v6503_v16, %v6502_v3  ;;  %v6492_v17 = vunpack.c.l.b16 %v6929_v13  ;;  %v5878_v47 = vpop.permute.xlu1 %5877  ;;  %v6395_v1 = vsel %vm6367_vm10, %v6362_v29, %v5894_v10 }
 0x856   : > { %v6379_v62 = vsel %vm6367_vm10, %v12267_v42, %v5878_v47 }
 0x857   : > { %v6522_v14 = vrot.slane %v6492_v17, 5 }
 0x858   : > { %v5940_v59 = vpop.permute.xlu0 %5939 }
 0x859   : > { %v6523_v45 = vsel %vm6504_vm14, %v6522_v14, %v6521_v60  ;;  %v5924_v52 = vpop.permute.xlu1 %5923  ;;  %v6426_v40 = vsel %vm6400_vm11, %v6393_v24, %v5940_v59 }
 0x85a   : > { %v6410_v32 = vsel %vm6400_vm11, %v6377_v53, %v5924_v52  ;;  %v6930_v36 = vcombine.low %v6426_v40, %v6426_v40 }
 0x85b   : > { %v6922_v4 = vcombine.low %v6410_v32, %v6410_v32 }
 0x85c   : > { %v6493_v44 = vunpack.c.l.b16 %v6930_v36  ;;  %v5880_v58 = vpop.permute.xlu0 %5879 }
 0x85d   : > { %v6485_v26 = vunpack.c.l.b16 %v6922_v4  ;;  %v5850_v34 = vpop.permute.xlu1 %5849  ;;  %v6381_v63 = vsel %vm6367_vm10, %v12264_v57, %v5880_v58 }
 0x85e   : > { %v6524_v35 = vrot.slane %v6493_v44, 4  ;;  %v6366_v61 = vsel %vm6334_vm8, %v12255_v2, %v5850_v34 }
 0x85f   : > { %v6506_v22 = vrot.slane %v6485_v26, 4 }
 0x860   : > { %v6525_v15 = vsel %vm6507_vm15, %v6524_v35, %v6523_v45  ;;  %v5926_v51 = vpop.permute.xlu0 %5925 }
 0x861   : > { %v6508_v12 = vsel %vm6507_vm15, %v6506_v22, %v6505_v55  ;;  %v5896_v0 = vpop.permute.xlu1 %5895  ;;  %v6412_v8 = vsel %vm6400_vm11, %v6379_v62, %v5926_v51 }
 0x862   : > { %v6923_v41 = vcombine.low %v6412_v8, %v6412_v8  ;;  %v6397_v48 = vsel %vm6367_vm10, %v6364_v37, %v5896_v0 }
 0x864   : > { %v6486_v54 = vunpack.c.l.b16 %v6923_v41  ;;  %v5882_v38 = vpop.permute.xlu0 %5881 }
 0x865   : > { %v5942_v30 = vpop.permute.xlu1 %5941  ;;  %v6383_v23 = vsel %vm6367_vm10, %v12271_v39, %v5882_v38 }
 0x866   : > { %v6428_v11 = vsel %vm6400_vm11, %v6395_v1, %v5942_v30  ;;  %v6509_v42 = vrot.slane %v6486_v54, 3 }
 0x867   : > { %v6931_v20 = vcombine.low %v6428_v11, %v6428_v11 }
 0x868   : > { %v6511_v49 = vsel %vm6510_vm0, %v6509_v42, %v6508_v12  ;;  %v5928_v21 = vpop.permute.xlu0 %5927 }
 0x869   : > { %v6494_v28 = vunpack.c.l.b16 %v6931_v20  ;;  %v5898_v46 = vpop.permute.xlu1 %5897  ;;  %v6414_v6 = vsel %vm6400_vm11, %v6381_v63, %v5928_v21 }
 0x86a   : > { %v6924_v33 = vcombine.low %v6414_v6, %v6414_v6  ;;  %v6399_v39 = vsel %vm6367_vm10, %v6366_v61, %v5898_v46 }
 0x86b   : > { %v6526_v25 = vrot.slane %v6494_v28, 3 }
 0x86c   : > { %v6487_v9 = vunpack.c.l.b16 %v6924_v33  ;;  %v5930_v57 = vpop.permute.xlu0 %5929 }
 0x86d   : > { %v6527_v3 = vsel %vm6510_vm0, %v6526_v25, %v6525_v15  ;;  %v5944_v50 = vpop.permute.xlu1 %5943  ;;  %v6416_v27 = vsel %vm6400_vm11, %v6383_v23, %v5930_v57 }
 0x86e   : > { %v6430_v19 = vsel %vm6400_vm11, %v6397_v48, %v5944_v50  ;;  %v6512_v5 = vrot.slane %v6487_v9, 2  ;;  %v6925_v7 = vcombine.low %v6416_v27, %v6416_v27 }
 0x86f   : > { %v6932_v56 = vcombine.low %v6430_v19, %v6430_v19 }
 0x870   : > { %v6514_v43 = vsel %vm6513_vm1, %v6512_v5, %v6511_v49  ;;  %v6488_v31 = vunpack.c.l.b16 %v6925_v7 }
 0x871   : > { %v6495_v16 = vunpack.c.l.b16 %v6932_v56  ;;  %v5946_v13 = vpop.permute.xlu1 %5945 }
 0x872   : > { %v6432_v60 = vsel %vm6400_vm11, %v6399_v39, %v5946_v13  ;;  %v6515_v55 = vrot.slane %v6488_v31, 1 }
 0x873   : > { %v6528_v17 = vrot.slane %v6495_v16, 2  ;;  %v6933_v10 = vcombine.low %v6432_v60, %v6432_v60 }
 0x874   : > { %v6517_v47 = vsel %vm6516_vm2, %v6515_v55, %v6514_v43 }
 0x875   : > { %v6529_v2 = vsel %vm6513_vm1, %v6528_v17, %v6527_v3  ;;  %v6496_v14 = vunpack.c.l.b16 %v6933_v10  ;;  %v6532_v18 = vpack.c.b16 %v6517_v47, %v6517_v47 }
 0x877   : > { %v6530_v53 = vrot.slane %v6496_v14, 1  ;;  %6536 = vst [vmem:[%s325_s15] sm:$0xf] %v6532_v18 }
 0x879   : > { %v6531_v24 = vsel %vm6516_vm2, %v6530_v53, %v6529_v2 }
 0x87a   : > { %v6533_v45 = vpack.c.b16 %v6531_v24, %v6531_v24 }
 0x87c   : > { %6537 = vst [vmem:[%s325_s15 + $0x4] sm:$0xf] %v6533_v45 }
 0x87d PF: > { %s18_s27 = sadd.s32 1, %s7294_s27  }
 0x87e   : > { %p15_p4 = scmp.ge.s32.totalorder %s18_s27, 4  }
 0x880   :  { %17 = sbr.rel (!%p15_p4) target bundleno = 1 (0x1), region = 89 }

</bundles_post_ra>
